<compile_context>
chip_gen: v7x
topology: tpu7x:2x2x1
jax: 0.10.0
libtpu: 0.0.40
codegen_flags: <defaults>
</compile_context>

<pallas_src>
import jax
import jax.numpy as jnp
from jax.experimental import pallas as pl
from jax.experimental.pallas import tpu as pltpu

EPS = 1e-5
NEG_SLOPE = 0.2
LANE = 128
VMEM_LIMIT = 48 * 1024 * 1024       # explicit, with headroom for v7x (64 MiB physical)
TILE_BUDGET = 6 * 1024 * 1024       # per-grid-step live-tile budget (acc + temps + out)
MIN_PAR_STEPS = 4                   # feed both TensorCores on v7x + allow pipelining


def _round_up(v, m):
    return ((v + m - 1) // m) * m


def _pick_tile_rows(oh, ow, ocp, n, budget_bytes=TILE_BUDGET):
    """Largest divisor of OH whose live tiles fit the budget and which (if possible)
    yields at least MIN_PAR_STEPS total grid steps across (batch, row-tiles)."""
    # per output row: f32 acc + f32 acc^2 temp + bf16 y tile + double-buffered bf16 out
    per_row = ow * ocp * (4 + 4 + 2 + 2 * 2)
    cap = max(1, budget_bytes // per_row)
    divs = [d for d in range(1, oh + 1) if oh % d == 0 and d <= cap]
    if not divs:
        divs = [1]
    par = [d for d in divs if n * (oh // d) >= MIN_PAR_STEPS]
    return max(par) if par else max(divs)


# --------------------------------------------------------------------------
# Pass A: conv (as 2-tap space-to-depth matmul) + per-tile f32 BN partial sums
# --------------------------------------------------------------------------
def _conv_stats_kernel(sw_ref, w_ref, y_ref, sum_ref, sq_ref):
    toh = y_ref.shape[1]
    ow = y_ref.shape[2]
    ocp = y_ref.shape[3]
    c8 = w_ref.shape[1]
    r0 = pl.program_id(1) * toh

    acc = jnp.zeros((toh * ow, ocp), dtype=jnp.float32)
    for dh in range(2):  # kh-parity taps; kw-parity is folded into channels
        x = sw_ref[0, pl.ds(r0 + dh, toh), :, :]            # (toh, ow, c8) bf16
        acc = acc + jnp.dot(x.reshape(toh * ow, c8), w_ref[dh],
                            preferred_element_type=jnp.float32)

    # bf16 writeback of the pre-BN activation; stats stay in f32 from the accumulator.
    y_ref[0] = acc.reshape(toh, ow, ocp).astype(y_ref.dtype)
    sum_ref[0, 0] = jnp.sum(acc, axis=0, keepdims=True)
    sq_ref[0, 0] = jnp.sum(acc * acc, axis=0, keepdims=True)


def _conv_stats_call(sw, w4, n, oh, ow, ocp, toh):
    t = oh // toh
    hs = sw.shape[1]
    c8p = sw.shape[3]
    flops = 2 * n * oh * ow * c8p * ocp * 2
    bytes_accessed = (sw.size * 2 + w4.size * 2
                      + n * oh * ow * ocp * 2 + 2 * n * t * ocp * 4)
    return pl.pallas_call(
        _conv_stats_kernel,
        out_shape=(
            jax.ShapeDtypeStruct((n, oh, ow, ocp), jnp.bfloat16),
            jax.ShapeDtypeStruct((n, t, 1, ocp), jnp.float32),
            jax.ShapeDtypeStruct((n, t, 1, ocp), jnp.float32),
        ),
        grid=(n, t),
        in_specs=[
            # TODO(synk): full-height sw slab per batch (tiny at these shapes); for very
            #             large spectrograms on v7x, re-tile along rows (duplicating the
            #             single boundary row per tile) so input VMEM scales with toh.
            pl.BlockSpec((1, hs, ow, c8p), lambda i, j: (i, 0, 0, 0)),
            pl.BlockSpec((2, c8p, ocp), lambda i, j: (0, 0, 0)),
        ],
        out_specs=(
            pl.BlockSpec((1, toh, ow, ocp), lambda i, j: (i, j, 0, 0)),
            pl.BlockSpec((1, 1, 1, ocp), lambda i, j: (i, j, 0, 0)),
            pl.BlockSpec((1, 1, 1, ocp), lambda i, j: (i, j, 0, 0)),
        ),
        compiler_params=pltpu.CompilerParams(
            dimension_semantics=("parallel", "parallel"),
            vmem_limit_bytes=VMEM_LIMIT),
        cost_estimate=pl.CostEstimate(flops=flops, transcendentals=0,
                                      bytes_accessed=bytes_accessed),
    )(sw, w4)


# --------------------------------------------------------------------------
# Pass B: apply BatchNorm (scale/shift from batch stats) + LeakyReLU(0.2)
# --------------------------------------------------------------------------
def _bn_lrelu_kernel(y_ref, scale_ref, shift_ref, a_ref):
    z = y_ref[0].astype(jnp.float32) * scale_ref[...] + shift_ref[...]
    a_ref[0] = jnp.where(z > 0, z, NEG_SLOPE * z).astype(a_ref.dtype)


def _bn_lrelu_call(y, scale, shift, toh):
    n, oh, ow, ocp = y.shape
    t = oh // toh
    return pl.pallas_call(
        _bn_lrelu_kernel,
        out_shape=jax.ShapeDtypeStruct((n, oh, ow, ocp), jnp.bfloat16),
        grid=(n, t),
        in_specs=[
            pl.BlockSpec((1, toh, ow, ocp), lambda i, j: (i, j, 0, 0)),
            pl.BlockSpec((1, ocp), lambda i, j: (0, 0)),
            pl.BlockSpec((1, ocp), lambda i, j: (0, 0)),
        ],
        out_specs=pl.BlockSpec((1, toh, ow, ocp), lambda i, j: (i, j, 0, 0)),
        compiler_params=pltpu.CompilerParams(
            dimension_semantics=("parallel", "parallel"),
            vmem_limit_bytes=VMEM_LIMIT),
    )(y, scale, shift)


# --------------------------------------------------------------------------
# Output heads: one K-tiled matmul producing [bin | mul] logits; sigmoid on col 0
# --------------------------------------------------------------------------
def _head_kernel(f_ref, w_ref, o_ref, acc_ref):
    k = pl.program_id(0)

    @pl.when(k == 0)
    def _():
        acc_ref[...] = jnp.zeros_like(acc_ref)

    acc_ref[...] += jnp.dot(f_ref[...], w_ref[...],
                            preferred_element_type=jnp.float32)

    @pl.when(k == pl.num_programs(0) - 1)
    def _():
        logits = acc_ref[...]
        sig = 1.0 / (1.0 + jnp.exp(-logits))
        lane = jax.lax.broadcasted_iota(jnp.int32, logits.shape, 1)
        o_ref[...] = jnp.where(lane == 0, sig, logits)


def _head_call(f, wh):
    n, k = f.shape
    outp = wh.shape[1]
    if k % LANE == 0:
        tk = min(k, 2048)
        while k % tk:
            tk -= LANE
    else:
        tk = k                     # guard: fall back to a single K tile
    return pl.pallas_call(
        _head_kernel,
        out_shape=jax.ShapeDtypeStruct((n, outp), jnp.float32),
        grid=(k // tk,),
        in_specs=[
            pl.BlockSpec((n, tk), lambda i: (0, i)),
            pl.BlockSpec((tk, outp), lambda i: (i, 0)),
        ],
        out_specs=pl.BlockSpec((n, outp), lambda i: (0, 0)),
        scratch_shapes=[pltpu.VMEM((n, outp), jnp.float32)],
        compiler_params=pltpu.CompilerParams(
            dimension_semantics=("arbitrary",),
            vmem_limit_bytes=VMEM_LIMIT),
    )(f, wh)


# --------------------------------------------------------------------------
# Layer wrappers
# --------------------------------------------------------------------------
def conv_bn_lrelu_layer(a, w, gamma, beta):
    """One [Conv2d(4,2,1,bias=False) -> BatchNorm2d(train stats) -> LeakyReLU(0.2)] block.

    a: (N, H, W, C) bf16 channels-last; only the first w.shape[1] channels are real
       (any extra lane padding carried from the previous layer is sliced off here).
    w: (OC, Cin, 4, 4) PyTorch conv weight.  Returns (N, H/2, W/2, OCp) bf16 with
       OCp = round_up(OC, 128); padded output channels are exactly 0.
    """
    n, h, wd = a.shape[0], a.shape[1], a.shape[2]
    cin = w.shape[1]
    oc = w.shape[0]
    assert w.shape[2:] == (4, 4) and h % 2 == 0 and wd % 2 == 0
    a = a[..., :cin]                         # de-pad: only real channels feed the conv
    oh, ow = h // 2, wd // 2
    ocp = _round_up(oc, LANE)
    c8p = _round_up(8 * cin, LANE)

    # Weight regroup for the space-to-depth formulation:
    #   W4[dh, dw*(4*Cin) + (ph*2+pw)*Cin + c, oc] = w[oc, c, 2*dh+ph, 2*dw+pw]
    w4 = (w.astype(jnp.float32)
           .reshape(oc, cin, 2, 2, 2, 2)
           .transpose(2, 4, 3, 5, 1, 0)
           .reshape(2, 8 * cin, oc))
    w4 = jnp.pad(w4, ((0, 0), (0, c8p - 8 * cin), (0, ocp - oc))).astype(jnp.bfloat16)

    # Factor-2 space-to-depth of the zero-padded input; kw-parity neighbour folded into
    # channels.  Lane pad + cast are fused into the same concatenate (no extra passes).
    xp = jnp.pad(a, ((0, 0), (1, 1), (1, 1), (0, 0)))
    s = xp.reshape(n, oh + 1, 2, ow + 1, 2, cin)
    s = s.transpose(0, 1, 3, 2, 4, 5).reshape(n, oh + 1, ow + 1, 4 * cin)
    parts = [s[:, :, :-1, :], s[:, :, 1:, :]]
    if c8p > 8 * cin:
        parts.append(jnp.zeros((n, oh + 1, ow, c8p - 8 * cin), s.dtype))
    sw = jnp.concatenate(parts, axis=-1).astype(jnp.bfloat16)   # (N, OH+1, OW, c8p)

    toh = _pick_tile_rows(oh, ow, ocp, n)
    y, ysum, ysq = _conv_stats_call(sw, w4, n, oh, ow, ocp, toh)

    # Train-mode BatchNorm statistics (biased variance) from the f32 partial sums.
    # TODO(synk): E[x^2]-E[x]^2 in f32 can cancel if |mean| >> std; fine at these scales.
    m_count = float(n * oh * ow)
    mean = jnp.sum(ysum, axis=(0, 1, 2)) / m_count
    var = jnp.maximum(jnp.sum(ysq, axis=(0, 1, 2)) / m_count - mean * mean, 0.0)
    gamma_p = jnp.pad(gamma.astype(jnp.float32), (0, ocp - oc))
    beta_p = jnp.pad(beta.astype(jnp.float32), (0, ocp - oc))
    scale = gamma_p * jax.lax.rsqrt(var + EPS)
    shift = beta_p - mean * scale

    return _bn_lrelu_call(y, scale.reshape(1, ocp), shift.reshape(1, ocp), toh)


def discriminator_forward(x_nchw, shared_params, w_bin, w_mul):
    """Full Discriminator forward.  Returns (output_bin (N,), output_mul (N, num_gens))."""
    a = jnp.transpose(x_nchw, (0, 2, 3, 1)).astype(jnp.bfloat16)   # NCHW -> NHWC
    for (w, g, b) in shared_params:
        a = conv_bn_lrelu_layer(a, w, g, b)

    n = a.shape[0]
    c3 = w_bin.shape[1]                       # real feature channels (ndf*4)
    hh, ww = a.shape[1], a.shape[2]
    assert (hh, ww) == (w_bin.shape[2], w_bin.shape[3])
    a = a[..., :c3]                           # de-pad before the head contraction
    k3 = hh * ww * c3                         # e.g. 8*16*32 = 4096 (multiple of 128)
    f = a.reshape(n, k3)

    def _head_w(wc):
        occ = wc.shape[0]
        return wc.astype(jnp.float32).transpose(2, 3, 1, 0).reshape(k3, occ)

    num_gens = w_mul.shape[0]
    wh = jnp.concatenate([_head_w(w_bin), _head_w(w_mul)], axis=1)   # (K3, 1+num_gens)
    outp = _round_up(1 + num_gens, LANE)
    wh = jnp.pad(wh, ((0, 0), (0, outp - (1 + num_gens)))).astype(jnp.bfloat16)

    out = _head_call(f, wh)                 # (N, outp) f32; col 0 already sigmoid'ed
    out_bin = out[:, 0]                     # == output_bin.view(-1)
    out_mul = out[:, 1:1 + num_gens]        # == output_mul.view(-1, num_gens)
    return out_bin, out_mul


# --------------------------------------------------------------------------
# Deterministic synthetic parameters
# --------------------------------------------------------------------------
def init_params(key, ndf, nc, num_gens):
    shapes = [(ndf, nc, 4, 4), (ndf * 2, ndf, 4, 4), (ndf * 4, ndf * 2, 4, 4)]
    shared = []
    for i, s in enumerate(shapes):
        kw_, kg, kb = jax.random.split(jax.random.fold_in(key, i), 3)
        w = 0.05 * jax.random.normal(kw_, s, dtype=jnp.float32)
        gamma = 1.0 + 0.1 * jax.random.normal(kg, (s[0],), dtype=jnp.float32)
        beta = 0.1 * jax.random.normal(kb, (s[0],), dtype=jnp.float32)
        shared.append((w, gamma, beta))
    kb_, km_ = jax.random.split(jax.random.fold_in(key, 100))
    w_bin = 0.05 * jax.random.normal(kb_, (1, ndf * 4, 8, 16), dtype=jnp.float32)
    w_mul = 0.05 * jax.random.normal(km_, (num_gens, ndf * 4, 8, 16), dtype=jnp.float32)
    return shared, w_bin, w_mul


if __name__ == "__main__":
    batch, nc, ndf, num_gens = 2, 4, 8, 3
    mel_bins, time_frames = 64, 128        # -> 8x16 feature map, matching the (8,16) head conv

    key = jax.random.PRNGKey(0)
    kx, kp = jax.random.split(key)
    x = jax.random.normal(kx, (batch, nc, mel_bins, time_frames), dtype=jnp.float32)
    shared, w_bin, w_mul = init_params(kp, ndf, nc, num_gens)

    fwd = jax.jit(discriminator_forward)
    out_bin, out_mul = fwd(x, shared, w_bin, w_mul)
    out_bin, out_mul = jax.block_until_ready((out_bin, out_mul))

    assert out_bin.shape == (batch,), out_bin.shape
    assert out_mul.shape == (batch, num_gens), out_mul.shape
    assert bool(jnp.all(jnp.isfinite(out_bin))) and bool(jnp.all(jnp.isfinite(out_mul)))
    assert bool(jnp.all((out_bin >= 0.0) & (out_bin <= 1.0)))
    print("KERNEL_OK")
</pallas_src>

<mosaic_0001>
module attributes {stable_mosaic.version = 11 : i64} {
  func.func @_conv_stats_kernel(%arg0: i32, %arg1: i32, %arg2: memref<1x33x64x128xbf16, #tpu.memory_space<vmem>>, %arg3: memref<2x128x128xbf16, #tpu.memory_space<vmem>>, %arg4: memref<1x16x64x128xbf16, #tpu.memory_space<vmem>>, %arg5: memref<1x1x1x128xf32, #tpu.memory_space<vmem>>, %arg6: memref<1x1x1x128xf32, #tpu.memory_space<vmem>>) attributes {dimension_semantics = [#tpu.dimension_semantics<parallel>, #tpu.dimension_semantics<parallel>], iteration_bounds = array<i64: 2, 2>, scalar_prefetch = 0 : i64, scratch_operands = 0 : i64, tpu.core_type = #tpu.core_type<tc>, window_params = [{transform_indices = @transform_0, window_bounds = array<i64: 1, 33, 64, 128>}, {pipeline_mode = #tpu.pipeline_mode<synchronous>, transform_indices = @transform_1, window_bounds = array<i64: 2, 128, 128>}, {transform_indices = @transform_2, window_bounds = array<i64: 1, 16, 64, 128>}, {transform_indices = @transform_3, window_bounds = array<i64: 1, 1, 1, 128>}, {transform_indices = @transform_4, window_bounds = array<i64: 1, 1, 1, 128>}]} {
    %c16_i32 = arith.constant 16 : i32
    %0 = arith.muli %arg1, %c16_i32 : i32
    %cst = arith.constant 0.000000e+00 : f32
    %1 = vector.broadcast %cst : f32 to vector<1024x128xf32>
    %c0_i32 = arith.constant 0 : i32
    %2 = arith.addi %0, %c0_i32 : i32
    %c0 = arith.constant 0 : index
    %3 = arith.index_cast %2 : i32 to index
    %c0_0 = arith.constant 0 : index
    %c0_1 = arith.constant 0 : index
    %4 = vector.load %arg2[%c0, %3, %c0_0, %c0_1] : memref<1x33x64x128xbf16, #tpu.memory_space<vmem>>, vector<1x16x64x128xbf16>
    %5 = vector.shape_cast %4 : vector<1x16x64x128xbf16> to vector<16x64x128xbf16>
    %6 = vector.shape_cast %5 : vector<16x64x128xbf16> to vector<1024x128xbf16>
    %c0_2 = arith.constant 0 : index
    %c0_3 = arith.constant 0 : index
    %c0_4 = arith.constant 0 : index
    %7 = vector.load %arg3[%c0_2, %c0_3, %c0_4] : memref<2x128x128xbf16, #tpu.memory_space<vmem>>, vector<1x128x128xbf16>
    %8 = vector.shape_cast %7 : vector<1x128x128xbf16> to vector<128x128xbf16>
    %cst_5 = arith.constant dense<0.000000e+00> : vector<1024x128xf32>
    %9 = tpu.matmul %6, %8, %cst_5 {dimension_numbers = #tpu.dot_dimension_numbers<[1], [0], [0], [1], [0, 0, 1, 1], [], []>} : vector<1024x128xbf16>, vector<128x128xbf16>, vector<1024x128xf32> -> vector<1024x128xf32>
    %10 = arith.addf %1, %9 : vector<1024x128xf32>
    %c1_i32 = arith.constant 1 : i32
    %11 = arith.addi %0, %c1_i32 : i32
    %c0_6 = arith.constant 0 : index
    %12 = arith.index_cast %11 : i32 to index
    %c0_7 = arith.constant 0 : index
    %c0_8 = arith.constant 0 : index
    %13 = vector.load %arg2[%c0_6, %12, %c0_7, %c0_8] : memref<1x33x64x128xbf16, #tpu.memory_space<vmem>>, vector<1x16x64x128xbf16>
    %14 = vector.shape_cast %13 : vector<1x16x64x128xbf16> to vector<16x64x128xbf16>
    %15 = vector.shape_cast %14 : vector<16x64x128xbf16> to vector<1024x128xbf16>
    %c1 = arith.constant 1 : index
    %c0_9 = arith.constant 0 : index
    %c0_10 = arith.constant 0 : index
    %16 = vector.load %arg3[%c1, %c0_9, %c0_10] : memref<2x128x128xbf16, #tpu.memory_space<vmem>>, vector<1x128x128xbf16>
    %17 = vector.shape_cast %16 : vector<1x128x128xbf16> to vector<128x128xbf16>
    %cst_11 = arith.constant dense<0.000000e+00> : vector<1024x128xf32>
    %18 = tpu.matmul %15, %17, %cst_11 {dimension_numbers = #tpu.dot_dimension_numbers<[1], [0], [0], [1], [0, 0, 1, 1], [], []>} : vector<1024x128xbf16>, vector<128x128xbf16>, vector<1024x128xf32> -> vector<1024x128xf32>
    %19 = arith.addf %10, %18 : vector<1024x128xf32>
    %20 = vector.shape_cast %19 : vector<1024x128xf32> to vector<16x64x128xf32>
    %21 = arith.truncf %20 : vector<16x64x128xf32> to vector<16x64x128xbf16>
    %c0_12 = arith.constant 0 : index
    %c0_13 = arith.constant 0 : index
    %c0_14 = arith.constant 0 : index
    %c0_15 = arith.constant 0 : index
    %22 = vector.load %arg4[%c0_12, %c0_13, %c0_14, %c0_15] : memref<1x16x64x128xbf16, #tpu.memory_space<vmem>>, vector<1x16x64x128xbf16>
    %23 = vector.shape_cast %22 : vector<1x16x64x128xbf16> to vector<16x64x128xbf16>
    %24 = vector.shape_cast %21 : vector<16x64x128xbf16> to vector<1x16x64x128xbf16>
    tpu.vector_store %arg4[%c0_12, %c0_13, %c0_14, %c0_15], %24 {strides = array<i32>} : memref<1x16x64x128xbf16, #tpu.memory_space<vmem>>, vector<1x16x64x128xbf16>,
    %cst_16 = arith.constant dense<0.000000e+00> : vector<128xf32>
    %25 = vector.multi_reduction <add>, %19, %cst_16 [0] : vector<1024x128xf32> to vector<128xf32>
    %26 = vector.shape_cast %25 : vector<128xf32> to vector<1x128xf32>
    %c0_17 = arith.constant 0 : index
    %c0_18 = arith.constant 0 : index
    %c0_19 = arith.constant 0 : index
    %c0_20 = arith.constant 0 : index
    %27 = vector.load %arg5[%c0_17, %c0_18, %c0_19, %c0_20] : memref<1x1x1x128xf32, #tpu.memory_space<vmem>>, vector<1x1x1x128xf32>
    %28 = vector.shape_cast %27 : vector<1x1x1x128xf32> to vector<1x128xf32>
    %29 = vector.shape_cast %26 : vector<1x128xf32> to vector<1x1x1x128xf32>
    tpu.vector_store %arg5[%c0_17, %c0_18, %c0_19, %c0_20], %29 {strides = array<i32>} : memref<1x1x1x128xf32, #tpu.memory_space<vmem>>, vector<1x1x1x128xf32>,
    %30 = arith.mulf %19, %19 : vector<1024x128xf32>
    %cst_21 = arith.constant dense<0.000000e+00> : vector<128xf32>
    %31 = vector.multi_reduction <add>, %30, %cst_21 [0] : vector<1024x128xf32> to vector<128xf32>
    %32 = vector.shape_cast %31 : vector<128xf32> to vector<1x128xf32>
    %c0_22 = arith.constant 0 : index
    %c0_23 = arith.constant 0 : index
    %c0_24 = arith.constant 0 : index
    %c0_25 = arith.constant 0 : index
    %33 = vector.load %arg6[%c0_22, %c0_23, %c0_24, %c0_25] : memref<1x1x1x128xf32, #tpu.memory_space<vmem>>, vector<1x1x1x128xf32>
    %34 = vector.shape_cast %33 : vector<1x1x1x128xf32> to vector<1x128xf32>
    %35 = vector.shape_cast %32 : vector<1x128xf32> to vector<1x1x1x128xf32>
    tpu.vector_store %arg6[%c0_22, %c0_23, %c0_24, %c0_25], %35 {strides = array<i32>} : memref<1x1x1x128xf32, #tpu.memory_space<vmem>>, vector<1x1x1x128xf32>,
    return
  }
  func.func @transform_0(%arg0: i32, %arg1: i32) -> (i32, i32, i32, i32) {
    %c0_i32 = arith.constant 0 : i32
    %c0_i32_0 = arith.constant 0 : i32
    %c0_i32_1 = arith.constant 0 : i32
    %c0_i32_2 = arith.constant 0 : i32
    return %arg0, %c0_i32, %c0_i32_0, %c0_i32_1 : i32, i32, i32, i32
  }
  func.func @transform_1(%arg0: i32, %arg1: i32) -> (i32, i32, i32) {
    %c0_i32 = arith.constant 0 : i32
    %c0_i32_0 = arith.constant 0 : i32
    %c0_i32_1 = arith.constant 0 : i32
    %c0_i32_2 = arith.constant 0 : i32
    return %c0_i32, %c0_i32_0, %c0_i32_1 : i32, i32, i32
  }
  func.func @transform_2(%arg0: i32, %arg1: i32) -> (i32, i32, i32, i32) {
    %c0_i32 = arith.constant 0 : i32
    %c0_i32_0 = arith.constant 0 : i32
    %c0_i32_1 = arith.constant 0 : i32
    return %arg0, %arg1, %c0_i32, %c0_i32_0 : i32, i32, i32, i32
  }
  func.func @transform_3(%arg0: i32, %arg1: i32) -> (i32, i32, i32, i32) {
    %c0_i32 = arith.constant 0 : i32
    %c0_i32_0 = arith.constant 0 : i32
    %c0_i32_1 = arith.constant 0 : i32
    return %arg0, %arg1, %c0_i32, %c0_i32_0 : i32, i32, i32, i32
  }
  func.func @transform_4(%arg0: i32, %arg1: i32) -> (i32, i32, i32, i32) {
    %c0_i32 = arith.constant 0 : i32
    %c0_i32_0 = arith.constant 0 : i32
    %c0_i32_1 = arith.constant 0 : i32
    return %arg0, %arg1, %c0_i32, %c0_i32_0 : i32, i32, i32, i32
  }
}

module attributes {stable_mosaic.version = 11 : i64} {
  func.func @_bn_lrelu_kernel(%arg0: i32, %arg1: i32, %arg2: memref<1x16x64x128xbf16, #tpu.memory_space<vmem>>, %arg3: memref<1x128xf32, #tpu.memory_space<vmem>>, %arg4: memref<1x128xf32, #tpu.memory_space<vmem>>, %arg5: memref<1x16x64x128xbf16, #tpu.memory_space<vmem>>) attributes {dimension_semantics = [#tpu.dimension_semantics<parallel>, #tpu.dimension_semantics<parallel>], iteration_bounds = array<i64: 2, 2>, scalar_prefetch = 0 : i64, scratch_operands = 0 : i64, tpu.core_type = #tpu.core_type<tc>, window_params = [{transform_indices = @transform_0, window_bounds = array<i64: 1, 16, 64, 128>}, {pipeline_mode = #tpu.pipeline_mode<synchronous>, transform_indices = @transform_1, window_bounds = array<i64: 1, 128>}, {pipeline_mode = #tpu.pipeline_mode<synchronous>, transform_indices = @transform_2, window_bounds = array<i64: 1, 128>}, {transform_indices = @transform_3, window_bounds = array<i64: 1, 16, 64, 128>}]} {
    %c0 = arith.constant 0 : index
    %c0_0 = arith.constant 0 : index
    %c0_1 = arith.constant 0 : index
    %c0_2 = arith.constant 0 : index
    %0 = vector.load %arg2[%c0, %c0_0, %c0_1, %c0_2] : memref<1x16x64x128xbf16, #tpu.memory_space<vmem>>, vector<1x16x64x128xbf16>
    %1 = vector.shape_cast %0 : vector<1x16x64x128xbf16> to vector<16x64x128xbf16>
    %2 = arith.extf %1 : vector<16x64x128xbf16> to vector<16x64x128xf32>
    %c0_3 = arith.constant 0 : index
    %c0_4 = arith.constant 0 : index
    %3 = vector.load %arg3[%c0_3, %c0_4] : memref<1x128xf32, #tpu.memory_space<vmem>>, vector<1x128xf32>
    %4 = vector.shape_cast %3 : vector<1x128xf32> to vector<1x1x128xf32>
    %5 = vector.broadcast %4 : vector<1x1x128xf32> to vector<16x64x128xf32>
    %6 = arith.mulf %2, %5 : vector<16x64x128xf32>
    %c0_5 = arith.constant 0 : index
    %c0_6 = arith.constant 0 : index
    %7 = vector.load %arg4[%c0_5, %c0_6] : memref<1x128xf32, #tpu.memory_space<vmem>>, vector<1x128xf32>
    %8 = vector.shape_cast %7 : vector<1x128xf32> to vector<1x1x128xf32>
    %9 = vector.broadcast %8 : vector<1x1x128xf32> to vector<16x64x128xf32>
    %10 = arith.addf %6, %9 : vector<16x64x128xf32>
    %cst = arith.constant 0.000000e+00 : f32
    %11 = vector.broadcast %cst : f32 to vector<16x64x128xf32>
    %12 = arith.cmpf ogt, %10, %11 : vector<16x64x128xf32>
    %cst_7 = arith.constant 2.000000e-01 : f32
    %13 = vector.broadcast %cst_7 : f32 to vector<16x64x128xf32>
    %14 = arith.mulf %13, %10 : vector<16x64x128xf32>
    %15 = arith.select %12, %10, %14 : vector<16x64x128xi1>, vector<16x64x128xf32>
    %16 = arith.truncf %15 : vector<16x64x128xf32> to vector<16x64x128xbf16>
    %c0_8 = arith.constant 0 : index
    %c0_9 = arith.constant 0 : index
    %c0_10 = arith.constant 0 : index
    %c0_11 = arith.constant 0 : index
    %17 = vector.load %arg5[%c0_8, %c0_9, %c0_10, %c0_11] : memref<1x16x64x128xbf16, #tpu.memory_space<vmem>>, vector<1x16x64x128xbf16>
    %18 = vector.shape_cast %17 : vector<1x16x64x128xbf16> to vector<16x64x128xbf16>
    %19 = vector.shape_cast %16 : vector<16x64x128xbf16> to vector<1x16x64x128xbf16>
    tpu.vector_store %arg5[%c0_8, %c0_9, %c0_10, %c0_11], %19 {strides = array<i32>} : memref<1x16x64x128xbf16, #tpu.memory_space<vmem>>, vector<1x16x64x128xbf16>,
    return
  }
  func.func @transform_0(%arg0: i32, %arg1: i32) -> (i32, i32, i32, i32) {
    %c0_i32 = arith.constant 0 : i32
    %c0_i32_0 = arith.constant 0 : i32
    %c0_i32_1 = arith.constant 0 : i32
    return %arg0, %arg1, %c0_i32, %c0_i32_0 : i32, i32, i32, i32
  }
  func.func @transform_1(%arg0: i32, %arg1: i32) -> (i32, i32) {
    %c0_i32 = arith.constant 0 : i32
    %c0_i32_0 = arith.constant 0 : i32
    %c0_i32_1 = arith.constant 0 : i32
    return %c0_i32, %c0_i32_0 : i32, i32
  }
  func.func @transform_2(%arg0: i32, %arg1: i32) -> (i32, i32) {
    %c0_i32 = arith.constant 0 : i32
    %c0_i32_0 = arith.constant 0 : i32
    %c0_i32_1 = arith.constant 0 : i32
    return %c0_i32, %c0_i32_0 : i32, i32
  }
  func.func @transform_3(%arg0: i32, %arg1: i32) -> (i32, i32, i32, i32) {
    %c0_i32 = arith.constant 0 : i32
    %c0_i32_0 = arith.constant 0 : i32
    %c0_i32_1 = arith.constant 0 : i32
    return %arg0, %arg1, %c0_i32, %c0_i32_0 : i32, i32, i32, i32
  }
}

module attributes {stable_mosaic.version = 11 : i64} {
  func.func @_conv_stats_kernel(%arg0: i32, %arg1: i32, %arg2: memref<1x17x32x128xbf16, #tpu.memory_space<vmem>>, %arg3: memref<2x128x128xbf16, #tpu.memory_space<vmem>>, %arg4: memref<1x8x32x128xbf16, #tpu.memory_space<vmem>>, %arg5: memref<1x1x1x128xf32, #tpu.memory_space<vmem>>, %arg6: memref<1x1x1x128xf32, #tpu.memory_space<vmem>>) attributes {dimension_semantics = [#tpu.dimension_semantics<parallel>, #tpu.dimension_semantics<parallel>], iteration_bounds = array<i64: 2, 2>, scalar_prefetch = 0 : i64, scratch_operands = 0 : i64, tpu.core_type = #tpu.core_type<tc>, window_params = [{transform_indices = @transform_0, window_bounds = array<i64: 1, 17, 32, 128>}, {pipeline_mode = #tpu.pipeline_mode<synchronous>, transform_indices = @transform_1, window_bounds = array<i64: 2, 128, 128>}, {transform_indices = @transform_2, window_bounds = array<i64: 1, 8, 32, 128>}, {transform_indices = @transform_3, window_bounds = array<i64: 1, 1, 1, 128>}, {transform_indices = @transform_4, window_bounds = array<i64: 1, 1, 1, 128>}]} {
    %c8_i32 = arith.constant 8 : i32
    %0 = arith.muli %arg1, %c8_i32 : i32
    %cst = arith.constant 0.000000e+00 : f32
    %1 = vector.broadcast %cst : f32 to vector<256x128xf32>
    %c0_i32 = arith.constant 0 : i32
    %2 = arith.addi %0, %c0_i32 : i32
    %c0 = arith.constant 0 : index
    %3 = arith.index_cast %2 : i32 to index
    %c0_0 = arith.constant 0 : index
    %c0_1 = arith.constant 0 : index
    %4 = vector.load %arg2[%c0, %3, %c0_0, %c0_1] : memref<1x17x32x128xbf16, #tpu.memory_space<vmem>>, vector<1x8x32x128xbf16>
    %5 = vector.shape_cast %4 : vector<1x8x32x128xbf16> to vector<8x32x128xbf16>
    %6 = vector.shape_cast %5 : vector<8x32x128xbf16> to vector<256x128xbf16>
    %c0_2 = arith.constant 0 : index
    %c0_3 = arith.constant 0 : index
    %c0_4 = arith.constant 0 : index
    %7 = vector.load %arg3[%c0_2, %c0_3, %c0_4] : memref<2x128x128xbf16, #tpu.memory_space<vmem>>, vector<1x128x128xbf16>
    %8 = vector.shape_cast %7 : vector<1x128x128xbf16> to vector<128x128xbf16>
    %cst_5 = arith.constant dense<0.000000e+00> : vector<256x128xf32>
    %9 = tpu.matmul %6, %8, %cst_5 {dimension_numbers = #tpu.dot_dimension_numbers<[1], [0], [0], [1], [0, 0, 1, 1], [], []>} : vector<256x128xbf16>, vector<128x128xbf16>, vector<256x128xf32> -> vector<256x128xf32>
    %10 = arith.addf %1, %9 : vector<256x128xf32>
    %c1_i32 = arith.constant 1 : i32
    %11 = arith.addi %0, %c1_i32 : i32
    %c0_6 = arith.constant 0 : index
    %12 = arith.index_cast %11 : i32 to index
    %c0_7 = arith.constant 0 : index
    %c0_8 = arith.constant 0 : index
    %13 = vector.load %arg2[%c0_6, %12, %c0_7, %c0_8] : memref<1x17x32x128xbf16, #tpu.memory_space<vmem>>, vector<1x8x32x128xbf16>
    %14 = vector.shape_cast %13 : vector<1x8x32x128xbf16> to vector<8x32x128xbf16>
    %15 = vector.shape_cast %14 : vector<8x32x128xbf16> to vector<256x128xbf16>
    %c1 = arith.constant 1 : index
    %c0_9 = arith.constant 0 : index
    %c0_10 = arith.constant 0 : index
    %16 = vector.load %arg3[%c1, %c0_9, %c0_10] : memref<2x128x128xbf16, #tpu.memory_space<vmem>>, vector<1x128x128xbf16>
    %17 = vector.shape_cast %16 : vector<1x128x128xbf16> to vector<128x128xbf16>
    %cst_11 = arith.constant dense<0.000000e+00> : vector<256x128xf32>
    %18 = tpu.matmul %15, %17, %cst_11 {dimension_numbers = #tpu.dot_dimension_numbers<[1], [0], [0], [1], [0, 0, 1, 1], [], []>} : vector<256x128xbf16>, vector<128x128xbf16>, vector<256x128xf32> -> vector<256x128xf32>
    %19 = arith.addf %10, %18 : vector<256x128xf32>
    %20 = vector.shape_cast %19 : vector<256x128xf32> to vector<8x32x128xf32>
    %21 = arith.truncf %20 : vector<8x32x128xf32> to vector<8x32x128xbf16>
    %c0_12 = arith.constant 0 : index
    %c0_13 = arith.constant 0 : index
    %c0_14 = arith.constant 0 : index
    %c0_15 = arith.constant 0 : index
    %22 = vector.load %arg4[%c0_12, %c0_13, %c0_14, %c0_15] : memref<1x8x32x128xbf16, #tpu.memory_space<vmem>>, vector<1x8x32x128xbf16>
    %23 = vector.shape_cast %22 : vector<1x8x32x128xbf16> to vector<8x32x128xbf16>
    %24 = vector.shape_cast %21 : vector<8x32x128xbf16> to vector<1x8x32x128xbf16>
    tpu.vector_store %arg4[%c0_12, %c0_13, %c0_14, %c0_15], %24 {strides = array<i32>} : memref<1x8x32x128xbf16, #tpu.memory_space<vmem>>, vector<1x8x32x128xbf16>,
    %cst_16 = arith.constant dense<0.000000e+00> : vector<128xf32>
    %25 = vector.multi_reduction <add>, %19, %cst_16 [0] : vector<256x128xf32> to vector<128xf32>
    %26 = vector.shape_cast %25 : vector<128xf32> to vector<1x128xf32>
    %c0_17 = arith.constant 0 : index
    %c0_18 = arith.constant 0 : index
    %c0_19 = arith.constant 0 : index
    %c0_20 = arith.constant 0 : index
    %27 = vector.load %arg5[%c0_17, %c0_18, %c0_19, %c0_20] : memref<1x1x1x128xf32, #tpu.memory_space<vmem>>, vector<1x1x1x128xf32>
    %28 = vector.shape_cast %27 : vector<1x1x1x128xf32> to vector<1x128xf32>
    %29 = vector.shape_cast %26 : vector<1x128xf32> to vector<1x1x1x128xf32>
    tpu.vector_store %arg5[%c0_17, %c0_18, %c0_19, %c0_20], %29 {strides = array<i32>} : memref<1x1x1x128xf32, #tpu.memory_space<vmem>>, vector<1x1x1x128xf32>,
    %30 = arith.mulf %19, %19 : vector<256x128xf32>
    %cst_21 = arith.constant dense<0.000000e+00> : vector<128xf32>
    %31 = vector.multi_reduction <add>, %30, %cst_21 [0] : vector<256x128xf32> to vector<128xf32>
    %32 = vector.shape_cast %31 : vector<128xf32> to vector<1x128xf32>
    %c0_22 = arith.constant 0 : index
    %c0_23 = arith.constant 0 : index
    %c0_24 = arith.constant 0 : index
    %c0_25 = arith.constant 0 : index
    %33 = vector.load %arg6[%c0_22, %c0_23, %c0_24, %c0_25] : memref<1x1x1x128xf32, #tpu.memory_space<vmem>>, vector<1x1x1x128xf32>
    %34 = vector.shape_cast %33 : vector<1x1x1x128xf32> to vector<1x128xf32>
    %35 = vector.shape_cast %32 : vector<1x128xf32> to vector<1x1x1x128xf32>
    tpu.vector_store %arg6[%c0_22, %c0_23, %c0_24, %c0_25], %35 {strides = array<i32>} : memref<1x1x1x128xf32, #tpu.memory_space<vmem>>, vector<1x1x1x128xf32>,
    return
  }
  func.func @transform_0(%arg0: i32, %arg1: i32) -> (i32, i32, i32, i32) {
    %c0_i32 = arith.constant 0 : i32
    %c0_i32_0 = arith.constant 0 : i32
    %c0_i32_1 = arith.constant 0 : i32
    %c0_i32_2 = arith.constant 0 : i32
    return %arg0, %c0_i32, %c0_i32_0, %c0_i32_1 : i32, i32, i32, i32
  }
  func.func @transform_1(%arg0: i32, %arg1: i32) -> (i32, i32, i32) {
    %c0_i32 = arith.constant 0 : i32
    %c0_i32_0 = arith.constant 0 : i32
    %c0_i32_1 = arith.constant 0 : i32
    %c0_i32_2 = arith.constant 0 : i32
    return %c0_i32, %c0_i32_0, %c0_i32_1 : i32, i32, i32
  }
  func.func @transform_2(%arg0: i32, %arg1: i32) -> (i32, i32, i32, i32) {
    %c0_i32 = arith.constant 0 : i32
    %c0_i32_0 = arith.constant 0 : i32
    %c0_i32_1 = arith.constant 0 : i32
    return %arg0, %arg1, %c0_i32, %c0_i32_0 : i32, i32, i32, i32
  }
  func.func @transform_3(%arg0: i32, %arg1: i32) -> (i32, i32, i32, i32) {
    %c0_i32 = arith.constant 0 : i32
    %c0_i32_0 = arith.constant 0 : i32
    %c0_i32_1 = arith.constant 0 : i32
    return %arg0, %arg1, %c0_i32, %c0_i32_0 : i32, i32, i32, i32
  }
  func.func @transform_4(%arg0: i32, %arg1: i32) -> (i32, i32, i32, i32) {
    %c0_i32 = arith.constant 0 : i32
    %c0_i32_0 = arith.constant 0 : i32
    %c0_i32_1 = arith.constant 0 : i32
    return %arg0, %arg1, %c0_i32, %c0_i32_0 : i32, i32, i32, i32
  }
}

module attributes {stable_mosaic.version = 11 : i64} {
  func.func @_bn_lrelu_kernel(%arg0: i32, %arg1: i32, %arg2: memref<1x8x32x128xbf16, #tpu.memory_space<vmem>>, %arg3: memref<1x128xf32, #tpu.memory_space<vmem>>, %arg4: memref<1x128xf32, #tpu.memory_space<vmem>>, %arg5: memref<1x8x32x128xbf16, #tpu.memory_space<vmem>>) attributes {dimension_semantics = [#tpu.dimension_semantics<parallel>, #tpu.dimension_semantics<parallel>], iteration_bounds = array<i64: 2, 2>, scalar_prefetch = 0 : i64, scratch_operands = 0 : i64, tpu.core_type = #tpu.core_type<tc>, window_params = [{transform_indices = @transform_0, window_bounds = array<i64: 1, 8, 32, 128>}, {pipeline_mode = #tpu.pipeline_mode<synchronous>, transform_indices = @transform_1, window_bounds = array<i64: 1, 128>}, {pipeline_mode = #tpu.pipeline_mode<synchronous>, transform_indices = @transform_2, window_bounds = array<i64: 1, 128>}, {transform_indices = @transform_3, window_bounds = array<i64: 1, 8, 32, 128>}]} {
    %c0 = arith.constant 0 : index
    %c0_0 = arith.constant 0 : index
    %c0_1 = arith.constant 0 : index
    %c0_2 = arith.constant 0 : index
    %0 = vector.load %arg2[%c0, %c0_0, %c0_1, %c0_2] : memref<1x8x32x128xbf16, #tpu.memory_space<vmem>>, vector<1x8x32x128xbf16>
    %1 = vector.shape_cast %0 : vector<1x8x32x128xbf16> to vector<8x32x128xbf16>
    %2 = arith.extf %1 : vector<8x32x128xbf16> to vector<8x32x128xf32>
    %c0_3 = arith.constant 0 : index
    %c0_4 = arith.constant 0 : index
    %3 = vector.load %arg3[%c0_3, %c0_4] : memref<1x128xf32, #tpu.memory_space<vmem>>, vector<1x128xf32>
    %4 = vector.shape_cast %3 : vector<1x128xf32> to vector<1x1x128xf32>
    %5 = vector.broadcast %4 : vector<1x1x128xf32> to vector<8x32x128xf32>
    %6 = arith.mulf %2, %5 : vector<8x32x128xf32>
    %c0_5 = arith.constant 0 : index
    %c0_6 = arith.constant 0 : index
    %7 = vector.load %arg4[%c0_5, %c0_6] : memref<1x128xf32, #tpu.memory_space<vmem>>, vector<1x128xf32>
    %8 = vector.shape_cast %7 : vector<1x128xf32> to vector<1x1x128xf32>
    %9 = vector.broadcast %8 : vector<1x1x128xf32> to vector<8x32x128xf32>
    %10 = arith.addf %6, %9 : vector<8x32x128xf32>
    %cst = arith.constant 0.000000e+00 : f32
    %11 = vector.broadcast %cst : f32 to vector<8x32x128xf32>
    %12 = arith.cmpf ogt, %10, %11 : vector<8x32x128xf32>
    %cst_7 = arith.constant 2.000000e-01 : f32
    %13 = vector.broadcast %cst_7 : f32 to vector<8x32x128xf32>
    %14 = arith.mulf %13, %10 : vector<8x32x128xf32>
    %15 = arith.select %12, %10, %14 : vector<8x32x128xi1>, vector<8x32x128xf32>
    %16 = arith.truncf %15 : vector<8x32x128xf32> to vector<8x32x128xbf16>
    %c0_8 = arith.constant 0 : index
    %c0_9 = arith.constant 0 : index
    %c0_10 = arith.constant 0 : index
    %c0_11 = arith.constant 0 : index
    %17 = vector.load %arg5[%c0_8, %c0_9, %c0_10, %c0_11] : memref<1x8x32x128xbf16, #tpu.memory_space<vmem>>, vector<1x8x32x128xbf16>
    %18 = vector.shape_cast %17 : vector<1x8x32x128xbf16> to vector<8x32x128xbf16>
    %19 = vector.shape_cast %16 : vector<8x32x128xbf16> to vector<1x8x32x128xbf16>
    tpu.vector_store %arg5[%c0_8, %c0_9, %c0_10, %c0_11], %19 {strides = array<i32>} : memref<1x8x32x128xbf16, #tpu.memory_space<vmem>>, vector<1x8x32x128xbf16>,
    return
  }
  func.func @transform_0(%arg0: i32, %arg1: i32) -> (i32, i32, i32, i32) {
    %c0_i32 = arith.constant 0 : i32
    %c0_i32_0 = arith.constant 0 : i32
    %c0_i32_1 = arith.constant 0 : i32
    return %arg0, %arg1, %c0_i32, %c0_i32_0 : i32, i32, i32, i32
  }
  func.func @transform_1(%arg0: i32, %arg1: i32) -> (i32, i32) {
    %c0_i32 = arith.constant 0 : i32
    %c0_i32_0 = arith.constant 0 : i32
    %c0_i32_1 = arith.constant 0 : i32
    return %c0_i32, %c0_i32_0 : i32, i32
  }
  func.func @transform_2(%arg0: i32, %arg1: i32) -> (i32, i32) {
    %c0_i32 = arith.constant 0 : i32
    %c0_i32_0 = arith.constant 0 : i32
    %c0_i32_1 = arith.constant 0 : i32
    return %c0_i32, %c0_i32_0 : i32, i32
  }
  func.func @transform_3(%arg0: i32, %arg1: i32) -> (i32, i32, i32, i32) {
    %c0_i32 = arith.constant 0 : i32
    %c0_i32_0 = arith.constant 0 : i32
    %c0_i32_1 = arith.constant 0 : i32
    return %arg0, %arg1, %c0_i32, %c0_i32_0 : i32, i32, i32, i32
  }
}

module attributes {stable_mosaic.version = 11 : i64} {
  func.func @_conv_stats_kernel(%arg0: i32, %arg1: i32, %arg2: memref<1x9x16x128xbf16, #tpu.memory_space<vmem>>, %arg3: memref<2x128x128xbf16, #tpu.memory_space<vmem>>, %arg4: memref<1x4x16x128xbf16, #tpu.memory_space<vmem>>, %arg5: memref<1x1x1x128xf32, #tpu.memory_space<vmem>>, %arg6: memref<1x1x1x128xf32, #tpu.memory_space<vmem>>) attributes {dimension_semantics = [#tpu.dimension_semantics<parallel>, #tpu.dimension_semantics<parallel>], iteration_bounds = array<i64: 2, 2>, scalar_prefetch = 0 : i64, scratch_operands = 0 : i64, tpu.core_type = #tpu.core_type<tc>, window_params = [{transform_indices = @transform_0, window_bounds = array<i64: 1, 9, 16, 128>}, {pipeline_mode = #tpu.pipeline_mode<synchronous>, transform_indices = @transform_1, window_bounds = array<i64: 2, 128, 128>}, {transform_indices = @transform_2, window_bounds = array<i64: 1, 4, 16, 128>}, {transform_indices = @transform_3, window_bounds = array<i64: 1, 1, 1, 128>}, {transform_indices = @transform_4, window_bounds = array<i64: 1, 1, 1, 128>}]} {
    %c4_i32 = arith.constant 4 : i32
    %0 = arith.muli %arg1, %c4_i32 : i32
    %cst = arith.constant 0.000000e+00 : f32
    %1 = vector.broadcast %cst : f32 to vector<64x128xf32>
    %c0_i32 = arith.constant 0 : i32
    %2 = arith.addi %0, %c0_i32 : i32
    %c0 = arith.constant 0 : index
    %3 = arith.index_cast %2 : i32 to index
    %c0_0 = arith.constant 0 : index
    %c0_1 = arith.constant 0 : index
    %4 = vector.load %arg2[%c0, %3, %c0_0, %c0_1] : memref<1x9x16x128xbf16, #tpu.memory_space<vmem>>, vector<1x4x16x128xbf16>
    %5 = vector.shape_cast %4 : vector<1x4x16x128xbf16> to vector<4x16x128xbf16>
    %6 = vector.shape_cast %5 : vector<4x16x128xbf16> to vector<64x128xbf16>
    %c0_2 = arith.constant 0 : index
    %c0_3 = arith.constant 0 : index
    %c0_4 = arith.constant 0 : index
    %7 = vector.load %arg3[%c0_2, %c0_3, %c0_4] : memref<2x128x128xbf16, #tpu.memory_space<vmem>>, vector<1x128x128xbf16>
    %8 = vector.shape_cast %7 : vector<1x128x128xbf16> to vector<128x128xbf16>
    %cst_5 = arith.constant dense<0.000000e+00> : vector<64x128xf32>
    %9 = tpu.matmul %6, %8, %cst_5 {dimension_numbers = #tpu.dot_dimension_numbers<[1], [0], [0], [1], [0, 0, 1, 1], [], []>} : vector<64x128xbf16>, vector<128x128xbf16>, vector<64x128xf32> -> vector<64x128xf32>
    %10 = arith.addf %1, %9 : vector<64x128xf32>
    %c1_i32 = arith.constant 1 : i32
    %11 = arith.addi %0, %c1_i32 : i32
    %c0_6 = arith.constant 0 : index
    %12 = arith.index_cast %11 : i32 to index
    %c0_7 = arith.constant 0 : index
    %c0_8 = arith.constant 0 : index
    %13 = vector.load %arg2[%c0_6, %12, %c0_7, %c0_8] : memref<1x9x16x128xbf16, #tpu.memory_space<vmem>>, vector<1x4x16x128xbf16>
    %14 = vector.shape_cast %13 : vector<1x4x16x128xbf16> to vector<4x16x128xbf16>
    %15 = vector.shape_cast %14 : vector<4x16x128xbf16> to vector<64x128xbf16>
    %c1 = arith.constant 1 : index
    %c0_9 = arith.constant 0 : index
    %c0_10 = arith.constant 0 : index
    %16 = vector.load %arg3[%c1, %c0_9, %c0_10] : memref<2x128x128xbf16, #tpu.memory_space<vmem>>, vector<1x128x128xbf16>
    %17 = vector.shape_cast %16 : vector<1x128x128xbf16> to vector<128x128xbf16>
    %cst_11 = arith.constant dense<0.000000e+00> : vector<64x128xf32>
    %18 = tpu.matmul %15, %17, %cst_11 {dimension_numbers = #tpu.dot_dimension_numbers<[1], [0], [0], [1], [0, 0, 1, 1], [], []>} : vector<64x128xbf16>, vector<128x128xbf16>, vector<64x128xf32> -> vector<64x128xf32>
    %19 = arith.addf %10, %18 : vector<64x128xf32>
    %20 = vector.shape_cast %19 : vector<64x128xf32> to vector<4x16x128xf32>
    %21 = arith.truncf %20 : vector<4x16x128xf32> to vector<4x16x128xbf16>
    %c0_12 = arith.constant 0 : index
    %c0_13 = arith.constant 0 : index
    %c0_14 = arith.constant 0 : index
    %c0_15 = arith.constant 0 : index
    %22 = vector.load %arg4[%c0_12, %c0_13, %c0_14, %c0_15] : memref<1x4x16x128xbf16, #tpu.memory_space<vmem>>, vector<1x4x16x128xbf16>
    %23 = vector.shape_cast %22 : vector<1x4x16x128xbf16> to vector<4x16x128xbf16>
    %24 = vector.shape_cast %21 : vector<4x16x128xbf16> to vector<1x4x16x128xbf16>
    tpu.vector_store %arg4[%c0_12, %c0_13, %c0_14, %c0_15], %24 {strides = array<i32>} : memref<1x4x16x128xbf16, #tpu.memory_space<vmem>>, vector<1x4x16x128xbf16>,
    %cst_16 = arith.constant dense<0.000000e+00> : vector<128xf32>
    %25 = vector.multi_reduction <add>, %19, %cst_16 [0] : vector<64x128xf32> to vector<128xf32>
    %26 = vector.shape_cast %25 : vector<128xf32> to vector<1x128xf32>
    %c0_17 = arith.constant 0 : index
    %c0_18 = arith.constant 0 : index
    %c0_19 = arith.constant 0 : index
    %c0_20 = arith.constant 0 : index
    %27 = vector.load %arg5[%c0_17, %c0_18, %c0_19, %c0_20] : memref<1x1x1x128xf32, #tpu.memory_space<vmem>>, vector<1x1x1x128xf32>
    %28 = vector.shape_cast %27 : vector<1x1x1x128xf32> to vector<1x128xf32>
    %29 = vector.shape_cast %26 : vector<1x128xf32> to vector<1x1x1x128xf32>
    tpu.vector_store %arg5[%c0_17, %c0_18, %c0_19, %c0_20], %29 {strides = array<i32>} : memref<1x1x1x128xf32, #tpu.memory_space<vmem>>, vector<1x1x1x128xf32>,
    %30 = arith.mulf %19, %19 : vector<64x128xf32>
    %cst_21 = arith.constant dense<0.000000e+00> : vector<128xf32>
    %31 = vector.multi_reduction <add>, %30, %cst_21 [0] : vector<64x128xf32> to vector<128xf32>
    %32 = vector.shape_cast %31 : vector<128xf32> to vector<1x128xf32>
    %c0_22 = arith.constant 0 : index
    %c0_23 = arith.constant 0 : index
    %c0_24 = arith.constant 0 : index
    %c0_25 = arith.constant 0 : index
    %33 = vector.load %arg6[%c0_22, %c0_23, %c0_24, %c0_25] : memref<1x1x1x128xf32, #tpu.memory_space<vmem>>, vector<1x1x1x128xf32>
    %34 = vector.shape_cast %33 : vector<1x1x1x128xf32> to vector<1x128xf32>
    %35 = vector.shape_cast %32 : vector<1x128xf32> to vector<1x1x1x128xf32>
    tpu.vector_store %arg6[%c0_22, %c0_23, %c0_24, %c0_25], %35 {strides = array<i32>} : memref<1x1x1x128xf32, #tpu.memory_space<vmem>>, vector<1x1x1x128xf32>,
    return
  }
  func.func @transform_0(%arg0: i32, %arg1: i32) -> (i32, i32, i32, i32) {
    %c0_i32 = arith.constant 0 : i32
    %c0_i32_0 = arith.constant 0 : i32
    %c0_i32_1 = arith.constant 0 : i32
    %c0_i32_2 = arith.constant 0 : i32
    return %arg0, %c0_i32, %c0_i32_0, %c0_i32_1 : i32, i32, i32, i32
  }
  func.func @transform_1(%arg0: i32, %arg1: i32) -> (i32, i32, i32) {
    %c0_i32 = arith.constant 0 : i32
    %c0_i32_0 = arith.constant 0 : i32
    %c0_i32_1 = arith.constant 0 : i32
    %c0_i32_2 = arith.constant 0 : i32
    return %c0_i32, %c0_i32_0, %c0_i32_1 : i32, i32, i32
  }
  func.func @transform_2(%arg0: i32, %arg1: i32) -> (i32, i32, i32, i32) {
    %c0_i32 = arith.constant 0 : i32
    %c0_i32_0 = arith.constant 0 : i32
    %c0_i32_1 = arith.constant 0 : i32
    return %arg0, %arg1, %c0_i32, %c0_i32_0 : i32, i32, i32, i32
  }
  func.func @transform_3(%arg0: i32, %arg1: i32) -> (i32, i32, i32, i32) {
    %c0_i32 = arith.constant 0 : i32
    %c0_i32_0 = arith.constant 0 : i32
    %c0_i32_1 = arith.constant 0 : i32
    return %arg0, %arg1, %c0_i32, %c0_i32_0 : i32, i32, i32, i32
  }
  func.func @transform_4(%arg0: i32, %arg1: i32) -> (i32, i32, i32, i32) {
    %c0_i32 = arith.constant 0 : i32
    %c0_i32_0 = arith.constant 0 : i32
    %c0_i32_1 = arith.constant 0 : i32
    return %arg0, %arg1, %c0_i32, %c0_i32_0 : i32, i32, i32, i32
  }
}

module attributes {stable_mosaic.version = 11 : i64} {
  func.func @_bn_lrelu_kernel(%arg0: i32, %arg1: i32, %arg2: memref<1x4x16x128xbf16, #tpu.memory_space<vmem>>, %arg3: memref<1x128xf32, #tpu.memory_space<vmem>>, %arg4: memref<1x128xf32, #tpu.memory_space<vmem>>, %arg5: memref<1x4x16x128xbf16, #tpu.memory_space<vmem>>) attributes {dimension_semantics = [#tpu.dimension_semantics<parallel>, #tpu.dimension_semantics<parallel>], iteration_bounds = array<i64: 2, 2>, scalar_prefetch = 0 : i64, scratch_operands = 0 : i64, tpu.core_type = #tpu.core_type<tc>, window_params = [{transform_indices = @transform_0, window_bounds = array<i64: 1, 4, 16, 128>}, {pipeline_mode = #tpu.pipeline_mode<synchronous>, transform_indices = @transform_1, window_bounds = array<i64: 1, 128>}, {pipeline_mode = #tpu.pipeline_mode<synchronous>, transform_indices = @transform_2, window_bounds = array<i64: 1, 128>}, {transform_indices = @transform_3, window_bounds = array<i64: 1, 4, 16, 128>}]} {
    %c0 = arith.constant 0 : index
    %c0_0 = arith.constant 0 : index
    %c0_1 = arith.constant 0 : index
    %c0_2 = arith.constant 0 : index
    %0 = vector.load %arg2[%c0, %c0_0, %c0_1, %c0_2] : memref<1x4x16x128xbf16, #tpu.memory_space<vmem>>, vector<1x4x16x128xbf16>
    %1 = vector.shape_cast %0 : vector<1x4x16x128xbf16> to vector<4x16x128xbf16>
    %2 = arith.extf %1 : vector<4x16x128xbf16> to vector<4x16x128xf32>
    %c0_3 = arith.constant 0 : index
    %c0_4 = arith.constant 0 : index
    %3 = vector.load %arg3[%c0_3, %c0_4] : memref<1x128xf32, #tpu.memory_space<vmem>>, vector<1x128xf32>
    %4 = vector.shape_cast %3 : vector<1x128xf32> to vector<1x1x128xf32>
    %5 = vector.broadcast %4 : vector<1x1x128xf32> to vector<4x16x128xf32>
    %6 = arith.mulf %2, %5 : vector<4x16x128xf32>
    %c0_5 = arith.constant 0 : index
    %c0_6 = arith.constant 0 : index
    %7 = vector.load %arg4[%c0_5, %c0_6] : memref<1x128xf32, #tpu.memory_space<vmem>>, vector<1x128xf32>
    %8 = vector.shape_cast %7 : vector<1x128xf32> to vector<1x1x128xf32>
    %9 = vector.broadcast %8 : vector<1x1x128xf32> to vector<4x16x128xf32>
    %10 = arith.addf %6, %9 : vector<4x16x128xf32>
    %cst = arith.constant 0.000000e+00 : f32
    %11 = vector.broadcast %cst : f32 to vector<4x16x128xf32>
    %12 = arith.cmpf ogt, %10, %11 : vector<4x16x128xf32>
    %cst_7 = arith.constant 2.000000e-01 : f32
    %13 = vector.broadcast %cst_7 : f32 to vector<4x16x128xf32>
    %14 = arith.mulf %13, %10 : vector<4x16x128xf32>
    %15 = arith.select %12, %10, %14 : vector<4x16x128xi1>, vector<4x16x128xf32>
    %16 = arith.truncf %15 : vector<4x16x128xf32> to vector<4x16x128xbf16>
    %c0_8 = arith.constant 0 : index
    %c0_9 = arith.constant 0 : index
    %c0_10 = arith.constant 0 : index
    %c0_11 = arith.constant 0 : index
    %17 = vector.load %arg5[%c0_8, %c0_9, %c0_10, %c0_11] : memref<1x4x16x128xbf16, #tpu.memory_space<vmem>>, vector<1x4x16x128xbf16>
    %18 = vector.shape_cast %17 : vector<1x4x16x128xbf16> to vector<4x16x128xbf16>
    %19 = vector.shape_cast %16 : vector<4x16x128xbf16> to vector<1x4x16x128xbf16>
    tpu.vector_store %arg5[%c0_8, %c0_9, %c0_10, %c0_11], %19 {strides = array<i32>} : memref<1x4x16x128xbf16, #tpu.memory_space<vmem>>, vector<1x4x16x128xbf16>,
    return
  }
  func.func @transform_0(%arg0: i32, %arg1: i32) -> (i32, i32, i32, i32) {
    %c0_i32 = arith.constant 0 : i32
    %c0_i32_0 = arith.constant 0 : i32
    %c0_i32_1 = arith.constant 0 : i32
    return %arg0, %arg1, %c0_i32, %c0_i32_0 : i32, i32, i32, i32
  }
  func.func @transform_1(%arg0: i32, %arg1: i32) -> (i32, i32) {
    %c0_i32 = arith.constant 0 : i32
    %c0_i32_0 = arith.constant 0 : i32
    %c0_i32_1 = arith.constant 0 : i32
    return %c0_i32, %c0_i32_0 : i32, i32
  }
  func.func @transform_2(%arg0: i32, %arg1: i32) -> (i32, i32) {
    %c0_i32 = arith.constant 0 : i32
    %c0_i32_0 = arith.constant 0 : i32
    %c0_i32_1 = arith.constant 0 : i32
    return %c0_i32, %c0_i32_0 : i32, i32
  }
  func.func @transform_3(%arg0: i32, %arg1: i32) -> (i32, i32, i32, i32) {
    %c0_i32 = arith.constant 0 : i32
    %c0_i32_0 = arith.constant 0 : i32
    %c0_i32_1 = arith.constant 0 : i32
    return %arg0, %arg1, %c0_i32, %c0_i32_0 : i32, i32, i32, i32
  }
}

module attributes {stable_mosaic.version = 11 : i64} {
  func.func @_head_kernel(%arg0: i32, %arg1: memref<2x2048xbf16, #tpu.memory_space<vmem>>, %arg2: memref<2048x128xbf16, #tpu.memory_space<vmem>>, %arg3: memref<2x128xf32, #tpu.memory_space<vmem>>, %arg4: memref<2x128xf32, #tpu.memory_space<vmem>>) attributes {dimension_semantics = [#tpu.dimension_semantics<arbitrary>], iteration_bounds = array<i64: 2>, scalar_prefetch = 0 : i64, scratch_operands = 1 : i64, tpu.core_type = #tpu.core_type<tc>, window_params = [{transform_indices = @transform_0, window_bounds = array<i64: 2, 2048>}, {transform_indices = @transform_1, window_bounds = array<i64: 2048, 128>}, {pipeline_mode = #tpu.pipeline_mode<synchronous>, transform_indices = @transform_2, window_bounds = array<i64: 2, 128>}]} {
    %c0_i32 = arith.constant 0 : i32
    %0 = arith.cmpi eq, %arg0, %c0_i32 : i32
    %1 = arith.extui %0 : i1 to i32
    %c0_i32_0 = arith.constant 0 : i32
    %2 = arith.cmpi ne, %1, %c0_i32_0 : i32
    scf.if %2 {
      %cst_9 = arith.constant 0.000000e+00 : f32
      %12 = vector.broadcast %cst_9 : f32 to vector<2x128xf32>
      %c0_10 = arith.constant 0 : index
      %c0_11 = arith.constant 0 : index
      %13 = vector.load %arg4[%c0_10, %c0_11] : memref<2x128xf32, #tpu.memory_space<vmem>>, vector<2x128xf32>
      tpu.vector_store %arg4[%c0_10, %c0_11], %12 {strides = array<i32>} : memref<2x128xf32, #tpu.memory_space<vmem>>, vector<2x128xf32>,
    } else {
    }
    %c0 = arith.constant 0 : index
    %c0_1 = arith.constant 0 : index
    %3 = vector.load %arg4[%c0, %c0_1] : memref<2x128xf32, #tpu.memory_space<vmem>>, vector<2x128xf32>
    %c0_2 = arith.constant 0 : index
    %c0_3 = arith.constant 0 : index
    %4 = vector.load %arg1[%c0_2, %c0_3] : memref<2x2048xbf16, #tpu.memory_space<vmem>>, vector<2x2048xbf16>
    %c0_4 = arith.constant 0 : index
    %c0_5 = arith.constant 0 : index
    %5 = vector.load %arg2[%c0_4, %c0_5] : memref<2048x128xbf16, #tpu.memory_space<vmem>>, vector<2048x128xbf16>
    %cst = arith.constant dense<0.000000e+00> : vector<2x128xf32>
    %6 = tpu.matmul %4, %5, %cst {dimension_numbers = #tpu.dot_dimension_numbers<[1], [0], [0], [1], [0, 0, 1, 1], [], []>} : vector<2x2048xbf16>, vector<2048x128xbf16>, vector<2x128xf32> -> vector<2x128xf32>
    %7 = arith.addf %3, %6 : vector<2x128xf32>
    %c0_6 = arith.constant 0 : index
    %c0_7 = arith.constant 0 : index
    %8 = vector.load %arg4[%c0_6, %c0_7] : memref<2x128xf32, #tpu.memory_space<vmem>>, vector<2x128xf32>
    tpu.vector_store %arg4[%c0_6, %c0_7], %7 {strides = array<i32>} : memref<2x128xf32, #tpu.memory_space<vmem>>, vector<2x128xf32>,
    %c1_i32 = arith.constant 1 : i32
    %9 = arith.cmpi eq, %arg0, %c1_i32 : i32
    %10 = arith.extui %9 : i1 to i32
    %c0_i32_8 = arith.constant 0 : i32
    %11 = arith.cmpi ne, %10, %c0_i32_8 : i32
    scf.if %11 {
      %c0_9 = arith.constant 0 : index
      %c0_10 = arith.constant 0 : index
      %12 = vector.load %arg4[%c0_9, %c0_10] : memref<2x128xf32, #tpu.memory_space<vmem>>, vector<2x128xf32>
      %cst_11 = arith.constant 0.000000e+00 : f32
      %13 = vector.broadcast %cst_11 : f32 to vector<2x128xf32>
      %14 = arith.subf %13, %12 : vector<2x128xf32>
      %15 = math.exp %14 : vector<2x128xf32>
      %cst_12 = arith.constant 1.000000e+00 : f32
      %16 = vector.broadcast %cst_12 : f32 to vector<2x128xf32>
      %17 = arith.addf %16, %15 : vector<2x128xf32>
      %cst_13 = arith.constant 1.000000e+00 : f32
      %18 = vector.broadcast %cst_13 : f32 to vector<2x128xf32>
      %19 = arith.divf %18, %17 : vector<2x128xf32>
      %20 = tpu.iota {dimensions = array<i32: 1>} : vector<2x128xi32>
      %c0_i32_14 = arith.constant 0 : i32
      %21 = vector.broadcast %c0_i32_14 : i32 to vector<2x128xi32>
      %22 = arith.cmpi eq, %20, %21 : vector<2x128xi32>
      %23 = arith.select %22, %19, %12 : vector<2x128xi1>, vector<2x128xf32>
      %c0_15 = arith.constant 0 : index
      %c0_16 = arith.constant 0 : index
      %24 = vector.load %arg3[%c0_15, %c0_16] : memref<2x128xf32, #tpu.memory_space<vmem>>, vector<2x128xf32>
      tpu.vector_store %arg3[%c0_15, %c0_16], %23 {strides = array<i32>} : memref<2x128xf32, #tpu.memory_space<vmem>>, vector<2x128xf32>,
    } else {
    }
    return
  }
  func.func @transform_0(%arg0: i32) -> (i32, i32) {
    %c0_i32 = arith.constant 0 : i32
    %c0_i32_0 = arith.constant 0 : i32
    return %c0_i32, %arg0 : i32, i32
  }
  func.func @transform_1(%arg0: i32) -> (i32, i32) {
    %c0_i32 = arith.constant 0 : i32
    %c0_i32_0 = arith.constant 0 : i32
    return %arg0, %c0_i32 : i32, i32
  }
  func.func @transform_2(%arg0: i32) -> (i32, i32) {
    %c0_i32 = arith.constant 0 : i32
    %c0_i32_0 = arith.constant 0 : i32
    %c0_i32_1 = arith.constant 0 : i32
    return %c0_i32, %c0_i32_0 : i32, i32
  }
}

</mosaic_0001>

<bundles_post_ra>
// kernel: discriminator_forward.7
= control target key start
LH: loop header
LB: loop body
LE: loop exit
PB: predicated region body
PF: predicated region fallthrough
CT: control target
= control target key end

     0   :  { %s5485_s15 = smov 0   ;;  %s5487_s16 = smov 0   ;;  %s5797_s0 = inlined_call_operand.vmem [shape: bf16[2,33,64,128], index: 0, kind: input, shape index: {}]   ;;  %s5798_s1 = inlined_call_operand.vmem [shape: bf16[2,128,128], index: 1, kind: input, shape index: {}]   ;;  %s5799_s2 = inlined_call_operand.vmem [shape: bf16[2,32,64,128], index: 2, kind: output, shape index: {0}]   ;;  %s5800_s3 = inlined_call_operand.vmem [shape: f32[2,2,1,128], index: 3, kind: output, shape index: {1}]   ;;  %s5801_s4 = inlined_call_operand.vmem [shape: f32[2,2,1,128], index: 4, kind: output, shape index: {2}]  }
   0x1   :  { %s5489_s17 = smov 0   ;;  %s5491_s18 = smov 0  }
   0x2   :  { %s5493_s19 = smov 0  }
   0x3 LB: > { %s24_s20 = sadd.s32 1, %s5450_s17  ;;  %s27_s21 = sadd.s32 1, %s5454_s18  ;;  %s5458_s19 = sphi %s5493_s19, %s15_s19   ;;  %s5454_s18 = sphi %s5491_s18, %s5805_s18   ;;  %s5450_s17 = sphi %s5489_s17, %s5804_s17   ;;  %s5446_s16 = sphi %s5487_s16, %s5803_s16   ;;  %s5442_s15 = sphi %s5485_s15, %s5802_s15  }
   0x4   : > { %p25_p0 = scmp.ge.s32.totalorder %s24_s20, 2  ;;  %p3730_p1 = scmp.ge.s32.totalorder %s5458_s19, 1 }
   0x5   : > { %p185_p2 = scmp.lt.s32.totalorder %s5458_s19, 5 }
   0x6   : > { %s5807_s20 = smov (%p25_p0, %s24_s20), 0  ;;  %s5809_s21 = smov (!%p25_p0, %s27_s21), %s5454_s18 }
   0x7   : > { %p186_p3 = pnand %p3730_p1, %p185_p2  ;;  %p29_p4 = scmp.ge.s32.totalorder %s5809_s21, 2 }
   0x8   : > { %v5276_v0 = vld [vmem:[%s5798_s1 + $0x40] sm:$0xff] (!%p186_p3)   ;;  %p230_p5 = scmp.lt.s32.totalorder (!%p186_p3), %s5446_s16, 1  ;;  %v5278_v2 = vld [vmem:[%s5798_s1 + $0x48] sm:$0xff] (!%p186_p3)   ;;  %v5280_v4 = vld [vmem:[%s5798_s1 + $0x50] sm:$0xff] (!%p186_p3)   ;;  %s4162_s23 = sshll.u32 (!%p186_p3), %s5442_s15, 9 }
   0x9   : > { %s5811_s21 = smov (%p29_p4, %s5809_s21), 0  ;;  %189 = sbr.rel (%p186_p3) target bundleno = 529 (0x211), region = 28 }
   0xa   : > { %v5277_v1 = vld [vmem:[%s5798_s1] sm:$0xff] (!%p186_p3)   ;;  %4819 = vmatprep.subr.bf16.mxu1 (!%p186_p3), %v5276_v0  ;;  %v5279_v3 = vld [vmem:[%s5798_s1 + $0x8] sm:$0xff] (!%p186_p3)   ;;  %v5281_v5 = vld [vmem:[%s5798_s1 + $0x10] sm:$0xff] (!%p186_p3)   ;;  %p248_p7 = scmp.lt.s32.totalorder (!%p186_p3), %s5442_s15, 1 }
   0xb   : > { %4963 = vmatprep.subr.bf16.mxu0 (!%p186_p3), %v5277_v1  ;;  %4820 = vmatpush3.bf16.msra.mxu1 (!%p186_p3), %v5276_v0  ;;  %v5282_v6 = vld [vmem:[%s5798_s1 + $0x58] sm:$0xff] (!%p186_p3)   ;;  %v5284_v8 = vld [vmem:[%s5798_s1 + $0x60] sm:$0xff] (!%p186_p3)   ;;  %v5286_v10 = vld [vmem:[%s5798_s1 + $0x68] sm:$0xff] (!%p186_p3)  }
   0xc   : > { %4964 = vmatpush3.bf16.msra.mxu0 (!%p186_p3), %v5277_v1  ;;  %4821 = vmatprep.subr.bf16.mxu1 (!%p186_p3), %v5278_v2  ;;  %v5283_v7 = vld [vmem:[%s5798_s1 + $0x18] sm:$0xff] (!%p186_p3)   ;;  %v5285_v9 = vld [vmem:[%s5798_s1 + $0x20] sm:$0xff] (!%p186_p3)   ;;  %v5287_v11 = vld [vmem:[%s5798_s1 + $0x28] sm:$0xff] (!%p186_p3)  }
   0xd   : > { %4965 = vmatprep.subr.bf16.mxu0 (!%p186_p3), %v5279_v3  ;;  %v5288_v14 = vld [vmem:[%s5798_s1 + $0x70] sm:$0xff] (!%p186_p3)   ;;  %v5290_v16 = vld [vmem:[%s5798_s1 + $0x78] sm:$0xff] (!%p186_p3)  }
   0xe   : > { %v5289_v15 = vld [vmem:[%s5798_s1 + $0x30] sm:$0xff] (!%p186_p3)   ;;  %v5291_v17 = vld [vmem:[%s5798_s1 + $0x38] sm:$0xff] (!%p186_p3)  }
   0xf   : > { %4822 = vmatpush3.bf16.msra.mxu1 (!%p186_p3), %v5278_v2 }
  0x10   : > { %s5813_s16 = smov (!%p230_p5, %s5446_s16), 1  ;;  %4966 = vmatpush3.bf16.msra.mxu0 %v5279_v3  ;;  %4823 = vmatprep.subr.bf16.mxu1 %v5280_v4 }
  0x11   : > { %s5235_s8 = smul.u32 1056, %s5813_s16  ;;  %4967 = vmatprep.subr.bf16.mxu0 %v5281_v5  ;;  %s3734_s24 = sshll.u32 %s5813_s16, 8 }
  0x13   : > { %s234_s22 = scalar_lea.vmem %s5797_s0, %s5235_s8  ;;  %4824 = vmatpush3.bf16.msra.mxu1 %v5280_v4 }
  0x14   : > { %4968 = vmatpush3.bf16.msra.mxu0 %v5281_v5  ;;  %4825 = vmatprep.subr.bf16.mxu1 %v5282_v6  ;;  %s5554_s28 = scalar_lea.vmem %s234_s22, %s4162_s23  ;;  %s3732_s22 = sshll.u32 %s5442_s15, 4 }
  0x15   : > { %4969 = vmatprep.subr.bf16.mxu0 %v5283_v7  ;;  %v5292_v12 = vld [vmem:[%s5554_s28 + $0x20] sm:$0xff]   ;;  %v5294_v18 = vld [vmem:[%s5554_s28 + $0x28] sm:$0xff]   ;;  %v5296_v20 = vld [vmem:[%s5554_s28 + $0x30] sm:$0xff]   ;;  %p238_p6 = scmp.lt.s32.totalorder %s3732_s22, 31  ;;  %s5817_s15 = smov (!%p248_p7, %s5442_s15), 1 }
  0x16   : > { %v5293_v13 = vld [vmem:[%s5554_s28] sm:$0xff]   ;;  %4835 = vmatprep.mubr.bf16.mxu1 %v5292_v12  ;;  %v5295_v19 = vld [vmem:[%s5554_s28 + $0x8] sm:$0xff]   ;;  %v5297_v21 = vld [vmem:[%s5554_s28 + $0x10] sm:$0xff]  }
  0x17   : > { %4826 = vmatpush3.bf16.msra.mxu1 %v5282_v6  ;;  %4979 = vmatprep.mubr.bf16.mxu0 %v5293_v13  ;;  %v5298_v22 = vld [vmem:[%s5554_s28 + $0x38] sm:$0xff]   ;;  %v5300_v24 = vld [vmem:[%s5554_s28 + $0x40] sm:$0xff]   ;;  %v5302_v26 = vld [vmem:[%s5554_s28 + $0x48] sm:$0xff]   ;;  %s5815_s22 = smov (!%p238_p6, %s3732_s22), 31 }
  0x18   : > { %4970 = vmatpush3.bf16.msra.mxu0 %v5283_v7  ;;  %4827 = vmatprep.subr.bf16.mxu1 %v5284_v8  ;;  %v5299_v23 = vld [vmem:[%s5554_s28 + $0x18] sm:$0xff]   ;;  %v5301_v25 = vld [vmem:[%s5554_s28 + $0x20] sm:$0xff]   ;;  %v5303_v27 = vld [vmem:[%s5554_s28 + $0x28] sm:$0xff]   ;;  %s3733_s23 = sshll.u32 %s5815_s22, 3 }
  0x19   : > { %4971 = vmatprep.subr.bf16.mxu0 %v5285_v9  ;;  %v5304_v28 = vld [vmem:[%s5554_s28 + $0x50] sm:$0xff]   ;;  %v5306_v30 = vld [vmem:[%s5554_s28 + $0x58] sm:$0xff]   ;;  %v5308_v32 = vld [vmem:[%s5554_s28 + $0x60] sm:$0xff]   ;;  %s242_s25 = sadd.s32 %s3734_s24, %s3733_s23 }
  0x1a   : > { %v5305_v29 = vld [vmem:[%s5554_s28 + $0x30] sm:$0xff]   ;;  %v5307_v31 = vld [vmem:[%s5554_s28 + $0x38] sm:$0xff]   ;;  %v5309_v33 = vld [vmem:[%s5554_s28 + $0x40] sm:$0xff]   ;;  %s3735_s26 = sshll.u32 %s242_s25, 2 }
  0x1b   : > { %4828 = vmatpush3.bf16.msra.mxu1 %v5284_v8  ;;  %v5310_v34 = vld [vmem:[%s5554_s28 + $0x68] sm:$0xff]   ;;  %v5312_v36 = vld [vmem:[%s5554_s28 + $0x70] sm:$0xff]   ;;  %v5314_v38 = vld [vmem:[%s5554_s28 + $0x78] sm:$0xff]   ;;  %s5693_s30 = scalar_lea.vmem %s5799_s2, %s3735_s26 }
  0x1c   : > { %4972 = vmatpush3.bf16.msra.mxu0 %v5285_v9  ;;  %4829 = vmatprep.subr.bf16.mxu1 %v5286_v10  ;;  %v5311_v35 = vld [vmem:[%s5554_s28 + $0x48] sm:$0xff]   ;;  %v5313_v37 = vld [vmem:[%s5554_s28 + $0x50] sm:$0xff]   ;;  %v5315_v39 = vld [vmem:[%s5554_s28 + $0x58] sm:$0xff]  }
  0x1d   : > { %4973 = vmatprep.subr.bf16.mxu0 %v5287_v11  ;;  %v5316_v40 = vld [vmem:[%s5554_s28 + $0x80] sm:$0xff]   ;;  %v5318_v42 = vld [vmem:[%s5554_s28 + $0x88] sm:$0xff]   ;;  %v5320_v44 = vld [vmem:[%s5554_s28 + $0x90] sm:$0xff]  }
  0x1e   : > { %v5317_v41 = vld [vmem:[%s5554_s28 + $0x60] sm:$0xff]   ;;  %v5319_v43 = vld [vmem:[%s5554_s28 + $0x68] sm:$0xff]   ;;  %v5321_v45 = vld [vmem:[%s5554_s28 + $0x70] sm:$0xff]  }
  0x1f   : > { %4830 = vmatpush3.bf16.msra.mxu1 %v5286_v10  ;;  %v5322_v46 = vld [vmem:[%s5554_s28 + $0x98] sm:$0xff]   ;;  %v5324_v48 = vld [vmem:[%s5554_s28 + $0xa0] sm:$0xff]   ;;  %v5326_v50 = vld [vmem:[%s5554_s28 + $0xa8] sm:$0xff]  }
  0x20   : > { %4974 = vmatpush3.bf16.msra.mxu0 %v5287_v11  ;;  %4831 = vmatprep.subr.bf16.mxu1 %v5288_v14  ;;  %v5323_v47 = vld [vmem:[%s5554_s28 + $0x78] sm:$0xff]   ;;  %v5325_v49 = vld [vmem:[%s5554_s28 + $0x80] sm:$0xff]   ;;  %v5327_v51 = vld [vmem:[%s5554_s28 + $0x88] sm:$0xff]  }
  0x21   : > { %4975 = vmatprep.subr.bf16.mxu0 %v5289_v15  ;;  %v5328_v52 = vld [vmem:[%s5554_s28 + $0xb0] sm:$0xff]   ;;  %v5330_v54 = vld [vmem:[%s5554_s28 + $0xb8] sm:$0xff]   ;;  %v5332_v56 = vld [vmem:[%s5554_s28 + $0xc0] sm:$0xff]  }
  0x22   : > { %v5329_v53 = vld [vmem:[%s5554_s28 + $0x90] sm:$0xff]   ;;  %v5331_v55 = vld [vmem:[%s5554_s28 + $0x98] sm:$0xff]   ;;  %v5333_v57 = vld [vmem:[%s5554_s28 + $0xa0] sm:$0xff]  }
  0x23   : > { %4832 = vmatpush3.bf16.msra.mxu1 %v5288_v14  ;;  %v5334_v58 = vld [vmem:[%s5554_s28 + $0xc8] sm:$0xff]   ;;  %v5336_v60 = vld [vmem:[%s5554_s28 + $0xd0] sm:$0xff]   ;;  %v5338_v62 = vld [vmem:[%s5554_s28 + $0xd8] sm:$0xff]  }
  0x24   : > { %4976 = vmatpush3.bf16.msra.mxu0 %v5289_v15  ;;  %4833 = vmatprep.subr.bf16.mxu1 %v5290_v16  ;;  %v5335_v59 = vld [vmem:[%s5554_s28 + $0xa8] sm:$0xff]   ;;  %v5337_v61 = vld [vmem:[%s5554_s28 + $0xb0] sm:$0xff]   ;;  %v5339_v63 = vld [vmem:[%s5554_s28 + $0xb8] sm:$0xff]  }
  0x25   : > { %4977 = vmatprep.subr.bf16.mxu0 %v5291_v17  ;;  %v5340_v0 = vld [vmem:[%s5554_s28 + $0xe0] sm:$0xff]   ;;  %v5342_v2 = vld [vmem:[%s5554_s28 + $0xe8] sm:$0xff]   ;;  %v5344_v4 = vld [vmem:[%s5554_s28 + $0xf0] sm:$0xff]  }
  0x26   : > { %v5341_v1 = vld [vmem:[%s5554_s28 + $0xc0] sm:$0xff]   ;;  %v5343_v3 = vld [vmem:[%s5554_s28 + $0xc8] sm:$0xff]   ;;  %v5345_v5 = vld [vmem:[%s5554_s28 + $0xd0] sm:$0xff]  }
  0x27   : > { %4834 = vmatpush3.bf16.msra.mxu1 %v5290_v16  ;;  %v5346_v6 = vld [vmem:[%s5554_s28 + $0xf8] sm:$0xff]   ;;  %v5348_v8 = vld [vmem:[%s5554_s28 + $0x100] sm:$0xff]   ;;  %v5350_v10 = vld [vmem:[%s5554_s28 + $0x108] sm:$0xff]  }
  0x28   : > { %4978 = vmatpush3.bf16.msra.mxu0 %v5291_v17  ;;  %v5347_v7 = vld [vmem:[%s5554_s28 + $0xd8] sm:$0xff]   ;;  %v5349_v9 = vld [vmem:[%s5554_s28 + $0xe0] sm:$0xff]   ;;  %v5351_v11 = vld [vmem:[%s5554_s28 + $0xe8] sm:$0xff]  }
  0x29   : > { %v5352_v12 = vld [vmem:[%s5554_s28 + $0x110] sm:$0xff]   ;;  %v5354_v14 = vld [vmem:[%s5554_s28 + $0x118] sm:$0xff]   ;;  %v5356_v16 = vld [vmem:[%s5554_s28 + $0x120] sm:$0xff]  }
  0x2a   : > { %4836 = vmatmul.mubr.bf16.vlgmr.msra.gmra.mrb[0].mxu1 %v5294_v18  ;;  %v5353_v13 = vld [vmem:[%s5554_s28 + $0xf0] sm:$0xff]   ;;  %v5355_v15 = vld [vmem:[%s5554_s28 + $0xf8] sm:$0xff]   ;;  %v5357_v17 = vld [vmem:[%s5554_s28 + $0x100] sm:$0xff]  }
  0x2b   : > { %4980 = vmatmul.mubr.bf16.vlgmr.msra.gmra.mrb[0].mxu0 %v5295_v19  ;;  %4839 = vmatprep.mubr.bf16.mxu1 %v5296_v20  ;;  %v5358_v18 = vld [vmem:[%s5554_s28 + $0x128] sm:$0xff]   ;;  %v5360_v20 = vld [vmem:[%s5554_s28 + $0x130] sm:$0xff]  }
  0x2c   : > { %4983 = vmatprep.mubr.bf16.mxu0 %v5297_v21  ;;  %v5359_v19 = vld [vmem:[%s5554_s28 + $0x108] sm:$0xff]   ;;  %v5361_v21 = vld [vmem:[%s5554_s28 + $0x110] sm:$0xff]  }
  0x32   : > { %4840 = vmatmul.mubr.bf16.gmra.mrb[4].mxu1 %v5298_v22  ;;  %v5362_v22 = vld [vmem:[%s5554_s28 + $0x138] sm:$0xff]  }
  0x33   : > { %4984 = vmatmul.mubr.bf16.gmra.mrb[4].mxu0 %v5299_v23  ;;  %4843 = vmatprep.mubr.bf16.mxu1 %v5300_v24  ;;  %v5363_v23 = vld [vmem:[%s5554_s28 + $0x118] sm:$0xff]   ;;  %v5364_v24 = vld [vmem:[%s5554_s28 + $0x140] sm:$0xff]  }
  0x34   : > { %4987 = vmatprep.mubr.bf16.mxu0 %v5301_v25  ;;  %v5365_v25 = vld [vmem:[%s5554_s28 + $0x120] sm:$0xff]  }
  0x3a   : > { %4844 = vmatmul.mubr.bf16.gmra.mrb[8].mxu1 %v5302_v26  ;;  %v5366_v26 = vld [vmem:[%s5554_s28 + $0x148] sm:$0xff]  }
  0x3b   : > { %4988 = vmatmul.mubr.bf16.gmra.mrb[8].mxu0 %v5303_v27  ;;  %4847 = vmatprep.mubr.bf16.mxu1 %v5304_v28  ;;  %v5367_v27 = vld [vmem:[%s5554_s28 + $0x128] sm:$0xff]   ;;  %v5368_v28 = vld [vmem:[%s5554_s28 + $0x150] sm:$0xff]  }
  0x3c   : > { %4991 = vmatprep.mubr.bf16.mxu0 %v5305_v29  ;;  %v5369_v29 = vld [vmem:[%s5554_s28 + $0x130] sm:$0xff]  }
  0x42   : > { %4848 = vmatmul.mubr.bf16.gmra.mrb[12].mxu1 %v5306_v30  ;;  %v5370_v30 = vld [vmem:[%s5554_s28 + $0x158] sm:$0xff]  }
  0x43   : > { %4992 = vmatmul.mubr.bf16.gmra.mrb[12].mxu0 %v5307_v31  ;;  %4851 = vmatprep.mubr.bf16.mxu1 %v5308_v32  ;;  %v5371_v31 = vld [vmem:[%s5554_s28 + $0x138] sm:$0xff]   ;;  %v5372_v32 = vld [vmem:[%s5554_s28 + $0x160] sm:$0xff]  }
  0x44   : > { %4995 = vmatprep.mubr.bf16.mxu0 %v5309_v33  ;;  %v5373_v33 = vld [vmem:[%s5554_s28 + $0x140] sm:$0xff]  }
  0x4a   : > { %4852 = vmatmul.mubr.bf16.gmra.mrb[16].mxu1 %v5310_v34  ;;  %v5374_v34 = vld [vmem:[%s5554_s28 + $0x168] sm:$0xff]  }
  0x4b   : > { %4996 = vmatmul.mubr.bf16.gmra.mrb[16].mxu0 %v5311_v35  ;;  %4855 = vmatprep.mubr.bf16.mxu1 %v5312_v36  ;;  %v5375_v35 = vld [vmem:[%s5554_s28 + $0x148] sm:$0xff]   ;;  %v5376_v36 = vld [vmem:[%s5554_s28 + $0x170] sm:$0xff]  }
  0x4c   : > { %4999 = vmatprep.mubr.bf16.mxu0 %v5313_v37  ;;  %v5377_v37 = vld [vmem:[%s5554_s28 + $0x150] sm:$0xff]  }
  0x52   : > { %4856 = vmatmul.mubr.bf16.gmra.mrb[20].mxu1 %v5314_v38  ;;  %v5378_v38 = vld [vmem:[%s5554_s28 + $0x178] sm:$0xff]  }
  0x53   : > { %5000 = vmatmul.mubr.bf16.gmra.mrb[20].mxu0 %v5315_v39  ;;  %4859 = vmatprep.mubr.bf16.mxu1 %v5316_v40  ;;  %v5379_v39 = vld [vmem:[%s5554_s28 + $0x158] sm:$0xff]   ;;  %v5380_v40 = vld [vmem:[%s5554_s28 + $0x180] sm:$0xff]  }
  0x54   : > { %5003 = vmatprep.mubr.bf16.mxu0 %v5317_v41  ;;  %v5381_v41 = vld [vmem:[%s5554_s28 + $0x160] sm:$0xff]  }
  0x5a   : > { %4860 = vmatmul.mubr.bf16.gmra.mrb[24].mxu1 %v5318_v42  ;;  %v5382_v42 = vld [vmem:[%s5554_s28 + $0x188] sm:$0xff]  }
  0x5b   : > { %5004 = vmatmul.mubr.bf16.gmra.mrb[24].mxu0 %v5319_v43  ;;  %4863 = vmatprep.mubr.bf16.mxu1 %v5320_v44  ;;  %v5383_v43 = vld [vmem:[%s5554_s28 + $0x168] sm:$0xff]   ;;  %v5384_v44 = vld [vmem:[%s5554_s28 + $0x190] sm:$0xff]  }
  0x5c   : > { %5007 = vmatprep.mubr.bf16.mxu0 %v5321_v45  ;;  %v5385_v45 = vld [vmem:[%s5554_s28 + $0x170] sm:$0xff]  }
  0x62   : > { %4864 = vmatmul.mubr.bf16.gmra.mrb[28].mxu1 %v5322_v46  ;;  %v5386_v46 = vld [vmem:[%s5554_s28 + $0x198] sm:$0xff]  }
  0x63   : > { %5008 = vmatmul.mubr.bf16.gmra.mrb[28].mxu0 %v5323_v47  ;;  %4867 = vmatprep.mubr.bf16.mxu1 %v5324_v48  ;;  %v5387_v47 = vld [vmem:[%s5554_s28 + $0x178] sm:$0xff]   ;;  %v5388_v48 = vld [vmem:[%s5554_s28 + $0x1a0] sm:$0xff]  }
  0x64   : > { %5011 = vmatprep.mubr.bf16.mxu0 %v5325_v49  ;;  %v5389_v49 = vld [vmem:[%s5554_s28 + $0x180] sm:$0xff]  }
  0x6a   : > { %4868 = vmatmul.mubr.bf16.gmra.mrb[32].mxu1 %v5326_v50  ;;  %v5390_v50 = vld [vmem:[%s5554_s28 + $0x1a8] sm:$0xff]  }
  0x6b   : > { %5012 = vmatmul.mubr.bf16.gmra.mrb[32].mxu0 %v5327_v51  ;;  %4871 = vmatprep.mubr.bf16.mxu1 %v5328_v52  ;;  %v5391_v51 = vld [vmem:[%s5554_s28 + $0x188] sm:$0xff]   ;;  %v5392_v52 = vld [vmem:[%s5554_s28 + $0x1b0] sm:$0xff]  }
  0x6c   : > { %5015 = vmatprep.mubr.bf16.mxu0 %v5329_v53  ;;  %v5393_v53 = vld [vmem:[%s5554_s28 + $0x190] sm:$0xff]  }
  0x72   : > { %4872 = vmatmul.mubr.bf16.gmra.mrb[36].mxu1 %v5330_v54  ;;  %v5394_v54 = vld [vmem:[%s5554_s28 + $0x1b8] sm:$0xff]  }
  0x73   : > { %5016 = vmatmul.mubr.bf16.gmra.mrb[36].mxu0 %v5331_v55  ;;  %4875 = vmatprep.mubr.bf16.mxu1 %v5332_v56  ;;  %v5395_v55 = vld [vmem:[%s5554_s28 + $0x198] sm:$0xff]   ;;  %v5396_v56 = vld [vmem:[%s5554_s28 + $0x1c0] sm:$0xff]  }
  0x74   : > { %5019 = vmatprep.mubr.bf16.mxu0 %v5333_v57  ;;  %v5397_v57 = vld [vmem:[%s5554_s28 + $0x1a0] sm:$0xff]  }
  0x7a   : > { %4876 = vmatmul.mubr.bf16.gmra.mrb[40].mxu1 %v5334_v58  ;;  %v5398_v58 = vld [vmem:[%s5554_s28 + $0x1c8] sm:$0xff]  }
  0x7b   : > { %5020 = vmatmul.mubr.bf16.gmra.mrb[40].mxu0 %v5335_v59  ;;  %4879 = vmatprep.mubr.bf16.mxu1 %v5336_v60  ;;  %v5399_v59 = vld [vmem:[%s5554_s28 + $0x1a8] sm:$0xff]   ;;  %v5400_v60 = vld [vmem:[%s5554_s28 + $0x1d0] sm:$0xff]  }
  0x7c   : > { %5023 = vmatprep.mubr.bf16.mxu0 %v5337_v61  ;;  %v5401_v61 = vld [vmem:[%s5554_s28 + $0x1b0] sm:$0xff]  }
  0x82   : > { %4880 = vmatmul.mubr.bf16.gmra.mrb[44].mxu1 %v5338_v62 }
  0x83   : > { %5024 = vmatmul.mubr.bf16.gmra.mrb[44].mxu0 %v5339_v63  ;;  %4883 = vmatprep.mubr.bf16.mxu1 %v5340_v0 }
  0x84   : > { %5027 = vmatprep.mubr.bf16.mxu0 %v5341_v1  ;;  %v5402_v1 = vld [vmem:[%s5554_s28 + $0x1d8] sm:$0xff]  }
  0x8a   : > { %4884 = vmatmul.mubr.bf16.gmra.mrb[48].mxu1 %v5342_v2 }
  0x8b   : > { %5028 = vmatmul.mubr.bf16.gmra.mrb[48].mxu0 %v5343_v3  ;;  %4887 = vmatprep.mubr.bf16.mxu1 %v5344_v4 }
  0x8c   : > { %5031 = vmatprep.mubr.bf16.mxu0 %v5345_v5  ;;  %v5403_v5 = vld [vmem:[%s5554_s28 + $0x1b8] sm:$0xff]  }
  0x92   : > { %4888 = vmatmul.mubr.bf16.gmra.mrb[52].mxu1 %v5346_v6  ;;  %v5404_v6 = vld [vmem:[%s5554_s28 + $0x1e0] sm:$0xff]  }
  0x93   : > { %5032 = vmatmul.mubr.bf16.gmra.mrb[52].mxu0 %v5347_v7  ;;  %4891 = vmatprep.mubr.bf16.mxu1 %v5348_v8 }
  0x94   : > { %5035 = vmatprep.mubr.bf16.mxu0 %v5349_v9 }
  0x9a   : > { %4892 = vmatmul.mubr.bf16.gmra.mrb[56].mxu1 %v5350_v10  ;;  %v5405_v10 = vld [vmem:[%s5554_s28 + $0x1c0] sm:$0xff]  }
  0x9b   : > { %5036 = vmatmul.mubr.bf16.gmra.mrb[56].mxu0 %v5351_v11  ;;  %4895 = vmatprep.mubr.bf16.mxu1 %v5352_v12 }
  0x9c   : > { %5039 = vmatprep.mubr.bf16.mxu0 %v5353_v13 }
  0xa2   : > { %4896 = vmatmul.mubr.bf16.gmra.mrb[60].mxu1 %v5354_v14 }
  0xa3   : > { %5040 = vmatmul.mubr.bf16.gmra.mrb[60].mxu0 %v5355_v15  ;;  %4899 = vmatprep.mubr.bf16.mxu1 %v5356_v16 }
  0xa4   : > { %5043 = vmatprep.mubr.bf16.mxu0 %v5357_v17 }
  0xaa   : > { %4900 = vmatmul.mubr.bf16.gmra.mrb[64].mxu1 %v5358_v18 }
  0xab   : > { %5044 = vmatmul.mubr.bf16.gmra.mrb[64].mxu0 %v5359_v19  ;;  %4903 = vmatprep.mubr.bf16.mxu1 %v5360_v20 }
  0xac   : > { %5047 = vmatprep.mubr.bf16.mxu0 %v5361_v21 }
  0xb2   : > { %4904 = vmatmul.mubr.bf16.gmra.mrb[68].mxu1 %v5362_v22 }
  0xb3   : > { %5048 = vmatmul.mubr.bf16.gmra.mrb[68].mxu0 %v5363_v23  ;;  %4907 = vmatprep.mubr.bf16.mxu1 %v5364_v24 }
  0xb4   : > { %5051 = vmatprep.mubr.bf16.mxu0 %v5365_v25  ;;  %v5406_v25 = vld [vmem:[%s5554_s28 + $0x1e8] sm:$0xff]  }
  0xba   : > { %4908 = vmatmul.mubr.bf16.gmra.mrb[72].mxu1 %v5366_v26 }
  0xbb   : > { %5052 = vmatmul.mubr.bf16.gmra.mrb[72].mxu0 %v5367_v27  ;;  %4911 = vmatprep.mubr.bf16.mxu1 %v5368_v28 }
  0xbc   : > { %5055 = vmatprep.mubr.bf16.mxu0 %v5369_v29  ;;  %v5407_v29 = vld [vmem:[%s5554_s28 + $0x1c8] sm:$0xff]  }
  0xc2   : > { %4912 = vmatmul.mubr.bf16.gmra.mrb[76].mxu1 %v5370_v30  ;;  %v5408_v30 = vld [vmem:[%s5554_s28 + $0x1f0] sm:$0xff]  }
  0xc3   : > { %5056 = vmatmul.mubr.bf16.gmra.mrb[76].mxu0 %v5371_v31  ;;  %4915 = vmatprep.mubr.bf16.mxu1 %v5372_v32 }
  0xc4   : > { %5059 = vmatprep.mubr.bf16.mxu0 %v5373_v33 }
  0xca   : > { %4916 = vmatmul.mubr.bf16.gmra.mrb[80].mxu1 %v5374_v34 }
  0xcb   : > { %5060 = vmatmul.mubr.bf16.gmra.mrb[80].mxu0 %v5375_v35  ;;  %4919 = vmatprep.mubr.bf16.mxu1 %v5376_v36 }
  0xcc   : > { %5063 = vmatprep.mubr.bf16.mxu0 %v5377_v37  ;;  %v5409_v37 = vld [vmem:[%s5554_s28 + $0x1d0] sm:$0xff]  }
  0xd2   : > { %4920 = vmatmul.mubr.bf16.gmra.mrb[84].mxu1 %v5378_v38 }
  0xd3   : > { %5064 = vmatmul.mubr.bf16.gmra.mrb[84].mxu0 %v5379_v39  ;;  %4923 = vmatprep.mubr.bf16.mxu1 %v5380_v40 }
  0xd4   : > { %5067 = vmatprep.mubr.bf16.mxu0 %v5381_v41 }
  0xda   : > { %4924 = vmatmul.mubr.bf16.gmra.mrb[88].mxu1 %v5382_v42 }
  0xdb   : > { %5068 = vmatmul.mubr.bf16.gmra.mrb[88].mxu0 %v5383_v43  ;;  %4927 = vmatprep.mubr.bf16.mxu1 %v5384_v44 }
  0xdc   : > { %5071 = vmatprep.mubr.bf16.mxu0 %v5385_v45 }
  0xe2   : > { %4928 = vmatmul.mubr.bf16.gmra.mrb[92].mxu1 %v5386_v46 }
  0xe3   : > { %5072 = vmatmul.mubr.bf16.gmra.mrb[92].mxu0 %v5387_v47  ;;  %4931 = vmatprep.mubr.bf16.mxu1 %v5388_v48 }
  0xe4   : > { %5075 = vmatprep.mubr.bf16.mxu0 %v5389_v49 }
  0xea   : > { %4932 = vmatmul.mubr.bf16.gmra.mrb[96].mxu1 %v5390_v50 }
  0xeb   : > { %5076 = vmatmul.mubr.bf16.gmra.mrb[96].mxu0 %v5391_v51  ;;  %4935 = vmatprep.mubr.bf16.mxu1 %v5392_v52 }
  0xec   : > { %5079 = vmatprep.mubr.bf16.mxu0 %v5393_v53 }
  0xf2   : > { %4936 = vmatmul.mubr.bf16.gmra.mrb[100].mxu1 %v5394_v54 }
  0xf3   : > { %5080 = vmatmul.mubr.bf16.gmra.mrb[100].mxu0 %v5395_v55  ;;  %4939 = vmatprep.mubr.bf16.mxu1 %v5396_v56  ;;  %v5410_v55 = vld [vmem:[%s5554_s28 + $0x1f8] sm:$0xff]  }
  0xf4   : > { %5083 = vmatprep.mubr.bf16.mxu0 %v5397_v57 }
  0xfa   : > { %4940 = vmatmul.mubr.bf16.gmra.mrb[104].mxu1 %v5398_v58 }
  0xfb   : > { %5084 = vmatmul.mubr.bf16.gmra.mrb[104].mxu0 %v5399_v59  ;;  %4943 = vmatprep.mubr.bf16.mxu1 %v5400_v60  ;;  %v5411_v59 = vld [vmem:[%s5554_s28 + $0x1d8] sm:$0xff]   ;;  %v5412_v60 = vld [vmem:[%s5554_s28 + $0x200] sm:$0xff]  }
  0xfc   : > { %5087 = vmatprep.mubr.bf16.mxu0 %v5401_v61 }
  0xfd   : > { %v4837_v62 = vpop.f32.mrb[0].mxu1 }
  0xfe   : > { %v4981_v63 = vpop.f32.mrb[0].mxu0  ;;  %v1024_v0 = vpop.f32.mrb[1].mxu1 }
  0xff   : > { %v2010_v2 = vadd.f32 %v4981_v63, %v4837_v62  ;;  %v2001_v3 = vpop.f32.mrb[1].mxu0  ;;  %v4838_v4 = vpop.f32.mrb[2].mxu1 }
 0x100   : > { %v2002_v7 = vadd.f32 %v2001_v3, %v1024_v0  ;;  %v4982_v8 = vpop.f32.mrb[2].mxu0  ;;  %v1027_v9 = vpop.f32.mrb[3].mxu1  ;;  %v5413_v3 = vld [vmem:[%s5554_s28 + $0x1e0] sm:$0xff]  }
 0x101   : > { %v2013_v11 = vadd.f32 %v4982_v8, %v4838_v4  ;;  %v2004_v12 = vpop.f32.mrb[3].mxu0  ;;  %v3288_v20 = vmul.f32 %v2010_v2, %v2010_v2 }
 0x102   : > { %v2005_v13 = vadd.f32 %v2004_v12, %v1027_v9  ;;  %4944 = vmatmul.mubr.bf16.gmra.mrb[108].mxu1 %v5402_v1  ;;  %v3286_v15 = vmul.f32 %v2002_v7, %v2002_v7 }
 0x103   : > { %v4300_v14 = vpack.c.bf16 %v2013_v11, %v2010_v2  ;;  %5088 = vmatmul.mubr.bf16.gmra.mrb[108].mxu0 %v5403_v5  ;;  %4947 = vmatprep.mubr.bf16.mxu1 %v5404_v6  ;;  %v3289_v31 = vmul.f32 %v2013_v11, %v2013_v11 }
 0x104   : > { %v4295_v16 = vpack.c.bf16 %v2005_v13, %v2002_v7  ;;  %v3152_v17 = vadd.f32 %v2005_v13, %v2002_v7  ;;  %v3287_v18 = vmul.f32 %v2005_v13, %v2005_v13  ;;  %5091 = vmatprep.mubr.bf16.mxu0 %v5405_v10 }
 0x105   : > { %4612 = vst [vmem:[%s5693_s30 + $0x8] sm:$0xff] %v4300_v14   ;;  %v4841_v19 = vpop.f32.mrb[4].mxu1 }
 0x106   : > { %4296 = vst [vmem:[%s5693_s30] sm:$0xff] %v4295_v16   ;;  %v3153_v21 = vadd.f32 %v3152_v17, %v2010_v2  ;;  %v3414_v22 = vadd.f32 %v3287_v18, %v3286_v15  ;;  %v4985_v23 = vpop.f32.mrb[4].mxu0  ;;  %v1040_v24 = vpop.f32.mrb[5].mxu1 }
 0x107   : > { %v2026_v26 = vadd.f32 %v4985_v23, %v4841_v19  ;;  %v2017_v27 = vpop.f32.mrb[5].mxu0  ;;  %v4842_v28 = vpop.f32.mrb[6].mxu1 }
 0x108   : > { %v3154_v32 = vadd.f32 %v3153_v21, %v2013_v11  ;;  %v3415_v33 = vadd.f32 %v3414_v22, %v3288_v20  ;;  %v2018_v34 = vadd.f32 %v2017_v27, %v1040_v24  ;;  %v4986_v35 = vpop.f32.mrb[6].mxu0  ;;  %v1043_v36 = vpop.f32.mrb[7].mxu1  ;;  %v5414_v21 = vld [vmem:[%s5554_s28 + $0x208] sm:$0xff]  }
 0x109   : > { %v2029_v38 = vadd.f32 %v4986_v35, %v4842_v28  ;;  %v2020_v39 = vpop.f32.mrb[7].mxu0  ;;  %v3292_v50 = vmul.f32 %v2026_v26, %v2026_v26 }
 0x10a   : > { %v3416_v40 = vadd.f32 %v3415_v33, %v3289_v31  ;;  %v3155_v41 = vadd.f32 %v3154_v32, %v2018_v34  ;;  %v3290_v42 = vmul.f32 %v2018_v34, %v2018_v34  ;;  %v2021_v43 = vadd.f32 %v2020_v39, %v1043_v36  ;;  %4948 = vmatmul.mubr.bf16.gmra.mrb[112].mxu1 %v5406_v25  ;;  %v5415_v25 = vld [vmem:[%s5554_s28 + $0x1e8] sm:$0xff]   ;;  %v5417_v33 = vld [vmem:[%s5554_s28 + $0x1f0] sm:$0xff]  }
 0x10b   : > { %v4310_v44 = vpack.c.bf16 %v2029_v38, %v2026_v26  ;;  %5092 = vmatmul.mubr.bf16.gmra.mrb[112].mxu0 %v5407_v29  ;;  %4951 = vmatprep.mubr.bf16.mxu1 %v5408_v30  ;;  %v3293_v61 = vmul.f32 %v2029_v38, %v2029_v38 }
 0x10c   : > { %v3417_v45 = vadd.f32 %v3416_v40, %v3290_v42  ;;  %v4305_v46 = vpack.c.bf16 %v2021_v43, %v2018_v34  ;;  %v3156_v47 = vadd.f32 %v3155_v41, %v2021_v43  ;;  %v3291_v48 = vmul.f32 %v2021_v43, %v2021_v43  ;;  %5095 = vmatprep.mubr.bf16.mxu0 %v5409_v37 }
 0x10d   : > { %4614 = vst [vmem:[%s5693_s30 + $0x18] sm:$0xff] %v4310_v44   ;;  %v4845_v49 = vpop.f32.mrb[8].mxu1 }
 0x10e   : > { %4613 = vst [vmem:[%s5693_s30 + $0x10] sm:$0xff] %v4305_v46   ;;  %v3157_v51 = vadd.f32 %v3156_v47, %v2026_v26  ;;  %v3418_v52 = vadd.f32 %v3417_v45, %v3291_v48  ;;  %v4989_v53 = vpop.f32.mrb[8].mxu0  ;;  %v1056_v54 = vpop.f32.mrb[9].mxu1  ;;  %v5416_v26 = vld [vmem:[%s5554_s28 + $0x210] sm:$0xff]  }
 0x10f   : > { %v2042_v56 = vadd.f32 %v4989_v53, %v4845_v49  ;;  %v2033_v57 = vpop.f32.mrb[9].mxu0  ;;  %v4846_v58 = vpop.f32.mrb[10].mxu1 }
 0x110   : > { %v3158_v62 = vadd.f32 %v3157_v51, %v2029_v38  ;;  %v3419_v63 = vadd.f32 %v3418_v52, %v3292_v50  ;;  %v2034_v0 = vadd.f32 %v2033_v57, %v1056_v54  ;;  %v4990_v1 = vpop.f32.mrb[10].mxu0  ;;  %v1059_v2 = vpop.f32.mrb[11].mxu1  ;;  %v5418_v51 = vld [vmem:[%s5554_s28 + $0x218] sm:$0xff]  }
 0x111   : > { %v2045_v4 = vadd.f32 %v4990_v1, %v4846_v58  ;;  %v2036_v5 = vpop.f32.mrb[11].mxu0  ;;  %v3296_v16 = vmul.f32 %v2042_v56, %v2042_v56 }
 0x112   : > { %v3420_v6 = vadd.f32 %v3419_v63, %v3293_v61  ;;  %v3159_v7 = vadd.f32 %v3158_v62, %v2034_v0  ;;  %v3294_v8 = vmul.f32 %v2034_v0, %v2034_v0  ;;  %v2037_v9 = vadd.f32 %v2036_v5, %v1059_v2  ;;  %4952 = vmatmul.mubr.bf16.gmra.mrb[116].mxu1 %v5410_v55  ;;  %v5419_v55 = vld [vmem:[%s5554_s28 + $0x1f8] sm:$0xff]   ;;  %s3736_s28 = sshll.u32 %s5813_s16, 1 }
 0x113   : > { %v4320_v10 = vpack.c.bf16 %v2045_v4, %v2042_v56  ;;  %5096 = vmatmul.mubr.bf16.gmra.mrb[116].mxu0 %v5411_v59  ;;  %4955 = vmatprep.mubr.bf16.mxu1 %v5412_v60  ;;  %v3297_v27 = vmul.f32 %v2045_v4, %v2045_v4  ;;  %s251_s5 = sadd.s32 %s3736_s28, %s5817_s15 }
 0x114   : > { %v3421_v11 = vadd.f32 %v3420_v6, %v3294_v8  ;;  %v4315_v12 = vpack.c.bf16 %v2037_v9, %v2034_v0  ;;  %v3160_v13 = vadd.f32 %v3159_v7, %v2037_v9  ;;  %v3295_v14 = vmul.f32 %v2037_v9, %v2037_v9  ;;  %5099 = vmatprep.mubr.bf16.mxu0 %v5413_v3  ;;  %s252_s8 = scalar_lea.vmem %s5800_s3, %s251_s5  ;;  %s259_s11 = scalar_lea.vmem %s5801_s4, %s251_s5 }
 0x115   : > { %4616 = vst [vmem:[%s5693_s30 + $0x28] sm:$0xff] %v4320_v10   ;;  %v4849_v15 = vpop.f32.mrb[12].mxu1 }
 0x116   : > { %4615 = vst [vmem:[%s5693_s30 + $0x20] sm:$0xff] %v4315_v12   ;;  %v3161_v17 = vadd.f32 %v3160_v13, %v2042_v56  ;;  %v3422_v18 = vadd.f32 %v3421_v11, %v3295_v14  ;;  %v4993_v19 = vpop.f32.mrb[12].mxu0  ;;  %v1072_v20 = vpop.f32.mrb[13].mxu1 }
 0x117   : > { %v2058_v22 = vadd.f32 %v4993_v19, %v4849_v15  ;;  %v2049_v23 = vpop.f32.mrb[13].mxu0  ;;  %v4850_v24 = vpop.f32.mrb[14].mxu1 }
 0x118   : > { %v3162_v28 = vadd.f32 %v3161_v17, %v2045_v4  ;;  %v3423_v29 = vadd.f32 %v3422_v18, %v3296_v16  ;;  %v2050_v30 = vadd.f32 %v2049_v23, %v1072_v20  ;;  %v4994_v31 = vpop.f32.mrb[14].mxu0  ;;  %v1075_v32 = vpop.f32.mrb[15].mxu1 }
 0x119   : > { %v2061_v34 = vadd.f32 %v4994_v31, %v4850_v24  ;;  %v2052_v35 = vpop.f32.mrb[15].mxu0  ;;  %v3300_v46 = vmul.f32 %v2058_v22, %v2058_v22 }
 0x11a   : > { %v3424_v36 = vadd.f32 %v3423_v29, %v3297_v27  ;;  %v3163_v37 = vadd.f32 %v3162_v28, %v2050_v30  ;;  %v3298_v38 = vmul.f32 %v2050_v30, %v2050_v30  ;;  %v2053_v39 = vadd.f32 %v2052_v35, %v1075_v32  ;;  %4956 = vmatmul.mubr.bf16.gmra.mrb[120].mxu1 %v5414_v21 }
 0x11b   : > { %v4330_v40 = vpack.c.bf16 %v2061_v34, %v2058_v22  ;;  %5100 = vmatmul.mubr.bf16.gmra.mrb[120].mxu0 %v5415_v25  ;;  %4959 = vmatprep.mubr.bf16.mxu1 %v5416_v26  ;;  %v3301_v56 = vmul.f32 %v2061_v34, %v2061_v34 }
 0x11c   : > { %v3425_v41 = vadd.f32 %v3424_v36, %v3298_v38  ;;  %v4325_v42 = vpack.c.bf16 %v2053_v39, %v2050_v30  ;;  %v3164_v43 = vadd.f32 %v3163_v37, %v2053_v39  ;;  %v3299_v44 = vmul.f32 %v2053_v39, %v2053_v39  ;;  %5103 = vmatprep.mubr.bf16.mxu0 %v5417_v33 }
 0x11d   : > { %4618 = vst [vmem:[%s5693_s30 + $0x38] sm:$0xff] %v4330_v40   ;;  %v4853_v45 = vpop.f32.mrb[16].mxu1 }
 0x11e   : > { %4617 = vst [vmem:[%s5693_s30 + $0x30] sm:$0xff] %v4325_v42   ;;  %v3165_v47 = vadd.f32 %v3164_v43, %v2058_v22  ;;  %v3426_v48 = vadd.f32 %v3425_v41, %v3299_v44  ;;  %v4997_v49 = vpop.f32.mrb[16].mxu0  ;;  %v1088_v50 = vpop.f32.mrb[17].mxu1 }
 0x11f   : > { %v2074_v52 = vadd.f32 %v4997_v49, %v4853_v45  ;;  %v2065_v53 = vpop.f32.mrb[17].mxu0  ;;  %v4854_v54 = vpop.f32.mrb[18].mxu1 }
 0x120   : > { %v3166_v57 = vadd.f32 %v3165_v47, %v2061_v34  ;;  %v3427_v58 = vadd.f32 %v3426_v48, %v3300_v46  ;;  %v2066_v59 = vadd.f32 %v2065_v53, %v1088_v50  ;;  %v4998_v60 = vpop.f32.mrb[18].mxu0  ;;  %v1091_v61 = vpop.f32.mrb[19].mxu1 }
 0x121   : > { %v2077_v62 = vadd.f32 %v4998_v60, %v4854_v54  ;;  %v2068_v63 = vpop.f32.mrb[19].mxu0  ;;  %v3304_v10 = vmul.f32 %v2074_v52, %v2074_v52 }
 0x122   : > { %v3428_v0 = vadd.f32 %v3427_v58, %v3301_v56  ;;  %v3167_v1 = vadd.f32 %v3166_v57, %v2066_v59  ;;  %v3302_v2 = vmul.f32 %v2066_v59, %v2066_v59  ;;  %v2069_v3 = vadd.f32 %v2068_v63, %v1091_v61  ;;  %4960 = vmatmul.mubr.bf16.gmra.mrb[124].mxu1 %v5418_v51 }
 0x123   : > { %v4340_v4 = vpack.c.bf16 %v2077_v62, %v2074_v52  ;;  %5104 = vmatmul.mubr.bf16.gmra.mrb[124].mxu0 %v5419_v55  ;;  %v3305_v18 = vmul.f32 %v2077_v62, %v2077_v62 }
 0x124   : > { %v3429_v5 = vadd.f32 %v3428_v0, %v3302_v2  ;;  %v4335_v6 = vpack.c.bf16 %v2069_v3, %v2066_v59  ;;  %v3168_v7 = vadd.f32 %v3167_v1, %v2069_v3  ;;  %v3303_v8 = vmul.f32 %v2069_v3, %v2069_v3 }
 0x125   : > { %4620 = vst [vmem:[%s5693_s30 + $0x48] sm:$0xff] %v4340_v4   ;;  %v4857_v9 = vpop.f32.mrb[20].mxu1 }
 0x126   : > { %4619 = vst [vmem:[%s5693_s30 + $0x40] sm:$0xff] %v4335_v6   ;;  %v3169_v11 = vadd.f32 %v3168_v7, %v2074_v52  ;;  %v3430_v12 = vadd.f32 %v3429_v5, %v3303_v8  ;;  %v5001_v13 = vpop.f32.mrb[20].mxu0  ;;  %v1104_v14 = vpop.f32.mrb[21].mxu1 }
 0x127   : > { %v2090_v15 = vadd.f32 %v5001_v13, %v4857_v9  ;;  %v2081_v16 = vpop.f32.mrb[21].mxu0  ;;  %v4858_v17 = vpop.f32.mrb[22].mxu1 }
 0x128   : > { %v3170_v19 = vadd.f32 %v3169_v11, %v2077_v62  ;;  %v3431_v20 = vadd.f32 %v3430_v12, %v3304_v10  ;;  %v2082_v21 = vadd.f32 %v2081_v16, %v1104_v14  ;;  %v5002_v22 = vpop.f32.mrb[22].mxu0  ;;  %v1107_v23 = vpop.f32.mrb[23].mxu1 }
 0x129   : > { %v2093_v24 = vadd.f32 %v5002_v22, %v4858_v17  ;;  %v2084_v25 = vpop.f32.mrb[23].mxu0  ;;  %v3308_v36 = vmul.f32 %v2090_v15, %v2090_v15 }
 0x12a   : > { %v3432_v26 = vadd.f32 %v3431_v20, %v3305_v18  ;;  %v3171_v27 = vadd.f32 %v3170_v19, %v2082_v21  ;;  %v3306_v28 = vmul.f32 %v2082_v21, %v2082_v21  ;;  %v2085_v29 = vadd.f32 %v2084_v25, %v1107_v23 }
 0x12b   : > { %v4350_v30 = vpack.c.bf16 %v2093_v24, %v2090_v15  ;;  %v3309_v44 = vmul.f32 %v2093_v24, %v2093_v24 }
 0x12c   : > { %v3433_v31 = vadd.f32 %v3432_v26, %v3306_v28  ;;  %v4345_v32 = vpack.c.bf16 %v2085_v29, %v2082_v21  ;;  %v3172_v33 = vadd.f32 %v3171_v27, %v2085_v29  ;;  %v3307_v34 = vmul.f32 %v2085_v29, %v2085_v29 }
 0x12d   : > { %4622 = vst [vmem:[%s5693_s30 + $0x58] sm:$0xff] %v4350_v30   ;;  %v4861_v35 = vpop.f32.mrb[24].mxu1 }
 0x12e   : > { %4621 = vst [vmem:[%s5693_s30 + $0x50] sm:$0xff] %v4345_v32   ;;  %v3173_v37 = vadd.f32 %v3172_v33, %v2090_v15  ;;  %v3434_v38 = vadd.f32 %v3433_v31, %v3307_v34  ;;  %v5005_v39 = vpop.f32.mrb[24].mxu0  ;;  %v1120_v40 = vpop.f32.mrb[25].mxu1 }
 0x12f   : > { %v2106_v41 = vadd.f32 %v5005_v39, %v4861_v35  ;;  %v2097_v42 = vpop.f32.mrb[25].mxu0  ;;  %v4862_v43 = vpop.f32.mrb[26].mxu1 }
 0x130   : > { %v3174_v45 = vadd.f32 %v3173_v37, %v2093_v24  ;;  %v3435_v46 = vadd.f32 %v3434_v38, %v3308_v36  ;;  %v2098_v47 = vadd.f32 %v2097_v42, %v1120_v40  ;;  %v5006_v48 = vpop.f32.mrb[26].mxu0  ;;  %v1123_v49 = vpop.f32.mrb[27].mxu1 }
 0x131   : > { %v2109_v50 = vadd.f32 %v5006_v48, %v4862_v43  ;;  %v2100_v51 = vpop.f32.mrb[27].mxu0  ;;  %v3312_v62 = vmul.f32 %v2106_v41, %v2106_v41 }
 0x132   : > { %v3436_v52 = vadd.f32 %v3435_v46, %v3309_v44  ;;  %v3175_v53 = vadd.f32 %v3174_v45, %v2098_v47  ;;  %v3310_v54 = vmul.f32 %v2098_v47, %v2098_v47  ;;  %v2101_v55 = vadd.f32 %v2100_v51, %v1123_v49 }
 0x133   : > { %v4360_v56 = vpack.c.bf16 %v2109_v50, %v2106_v41  ;;  %v3313_v6 = vmul.f32 %v2109_v50, %v2109_v50 }
 0x134   : > { %v3437_v57 = vadd.f32 %v3436_v52, %v3310_v54  ;;  %v4355_v58 = vpack.c.bf16 %v2101_v55, %v2098_v47  ;;  %v3176_v59 = vadd.f32 %v3175_v53, %v2101_v55  ;;  %v3311_v60 = vmul.f32 %v2101_v55, %v2101_v55 }
 0x135   : > { %4624 = vst [vmem:[%s5693_s30 + $0x68] sm:$0xff] %v4360_v56   ;;  %v4865_v61 = vpop.f32.mrb[28].mxu1 }
 0x136   : > { %4623 = vst [vmem:[%s5693_s30 + $0x60] sm:$0xff] %v4355_v58   ;;  %v3177_v63 = vadd.f32 %v3176_v59, %v2106_v41  ;;  %v3438_v0 = vadd.f32 %v3437_v57, %v3311_v60  ;;  %v5009_v1 = vpop.f32.mrb[28].mxu0  ;;  %v1136_v2 = vpop.f32.mrb[29].mxu1 }
 0x137   : > { %v2122_v3 = vadd.f32 %v5009_v1, %v4865_v61  ;;  %v2113_v4 = vpop.f32.mrb[29].mxu0  ;;  %v4866_v5 = vpop.f32.mrb[30].mxu1 }
 0x138   : > { %v3178_v7 = vadd.f32 %v3177_v63, %v2109_v50  ;;  %v3439_v8 = vadd.f32 %v3438_v0, %v3312_v62  ;;  %v2114_v9 = vadd.f32 %v2113_v4, %v1136_v2  ;;  %v5010_v10 = vpop.f32.mrb[30].mxu0  ;;  %v1139_v11 = vpop.f32.mrb[31].mxu1 }
 0x139   : > { %v2125_v12 = vadd.f32 %v5010_v10, %v4866_v5  ;;  %v2116_v13 = vpop.f32.mrb[31].mxu0  ;;  %v3316_v24 = vmul.f32 %v2122_v3, %v2122_v3 }
 0x13a   : > { %v3440_v14 = vadd.f32 %v3439_v8, %v3313_v6  ;;  %v3179_v15 = vadd.f32 %v3178_v7, %v2114_v9  ;;  %v3314_v16 = vmul.f32 %v2114_v9, %v2114_v9  ;;  %v2117_v17 = vadd.f32 %v2116_v13, %v1139_v11 }
 0x13b   : > { %v4370_v18 = vpack.c.bf16 %v2125_v12, %v2122_v3  ;;  %v3317_v32 = vmul.f32 %v2125_v12, %v2125_v12 }
 0x13c   : > { %v3441_v19 = vadd.f32 %v3440_v14, %v3314_v16  ;;  %v4365_v20 = vpack.c.bf16 %v2117_v17, %v2114_v9  ;;  %v3180_v21 = vadd.f32 %v3179_v15, %v2117_v17  ;;  %v3315_v22 = vmul.f32 %v2117_v17, %v2117_v17 }
 0x13d   : > { %4626 = vst [vmem:[%s5693_s30 + $0x78] sm:$0xff] %v4370_v18   ;;  %v4869_v23 = vpop.f32.mrb[32].mxu1 }
 0x13e   : > { %4625 = vst [vmem:[%s5693_s30 + $0x70] sm:$0xff] %v4365_v20   ;;  %v3181_v25 = vadd.f32 %v3180_v21, %v2122_v3  ;;  %v3442_v26 = vadd.f32 %v3441_v19, %v3315_v22  ;;  %v5013_v27 = vpop.f32.mrb[32].mxu0  ;;  %v1152_v28 = vpop.f32.mrb[33].mxu1 }
 0x13f   : > { %v2138_v29 = vadd.f32 %v5013_v27, %v4869_v23  ;;  %v2129_v30 = vpop.f32.mrb[33].mxu0  ;;  %v4870_v31 = vpop.f32.mrb[34].mxu1 }
 0x140   : > { %v3182_v33 = vadd.f32 %v3181_v25, %v2125_v12  ;;  %v3443_v34 = vadd.f32 %v3442_v26, %v3316_v24  ;;  %v2130_v35 = vadd.f32 %v2129_v30, %v1152_v28  ;;  %v5014_v36 = vpop.f32.mrb[34].mxu0  ;;  %v1155_v37 = vpop.f32.mrb[35].mxu1 }
 0x141   : > { %v2141_v38 = vadd.f32 %v5014_v36, %v4870_v31  ;;  %v2132_v39 = vpop.f32.mrb[35].mxu0  ;;  %v3320_v50 = vmul.f32 %v2138_v29, %v2138_v29 }
 0x142   : > { %v3444_v40 = vadd.f32 %v3443_v34, %v3317_v32  ;;  %v3183_v41 = vadd.f32 %v3182_v33, %v2130_v35  ;;  %v3318_v42 = vmul.f32 %v2130_v35, %v2130_v35  ;;  %v2133_v43 = vadd.f32 %v2132_v39, %v1155_v37 }
 0x143   : > { %v4380_v44 = vpack.c.bf16 %v2141_v38, %v2138_v29  ;;  %v3321_v58 = vmul.f32 %v2141_v38, %v2141_v38 }
 0x144   : > { %v3445_v45 = vadd.f32 %v3444_v40, %v3318_v42  ;;  %v4375_v46 = vpack.c.bf16 %v2133_v43, %v2130_v35  ;;  %v3184_v47 = vadd.f32 %v3183_v41, %v2133_v43  ;;  %v3319_v48 = vmul.f32 %v2133_v43, %v2133_v43 }
 0x145   : > { %4628 = vst [vmem:[%s5693_s30 + $0x88] sm:$0xff] %v4380_v44   ;;  %v4873_v49 = vpop.f32.mrb[36].mxu1 }
 0x146   : > { %4627 = vst [vmem:[%s5693_s30 + $0x80] sm:$0xff] %v4375_v46   ;;  %v3185_v51 = vadd.f32 %v3184_v47, %v2138_v29  ;;  %v3446_v52 = vadd.f32 %v3445_v45, %v3319_v48  ;;  %v5017_v53 = vpop.f32.mrb[36].mxu0  ;;  %v1168_v54 = vpop.f32.mrb[37].mxu1 }
 0x147   : > { %v2154_v55 = vadd.f32 %v5017_v53, %v4873_v49  ;;  %v2145_v56 = vpop.f32.mrb[37].mxu0  ;;  %v4874_v57 = vpop.f32.mrb[38].mxu1 }
 0x148   : > { %v3186_v59 = vadd.f32 %v3185_v51, %v2141_v38  ;;  %v3447_v60 = vadd.f32 %v3446_v52, %v3320_v50  ;;  %v2146_v61 = vadd.f32 %v2145_v56, %v1168_v54  ;;  %v5018_v62 = vpop.f32.mrb[38].mxu0  ;;  %v1171_v63 = vpop.f32.mrb[39].mxu1 }
 0x149   : > { %v2157_v0 = vadd.f32 %v5018_v62, %v4874_v57  ;;  %v2148_v1 = vpop.f32.mrb[39].mxu0  ;;  %v3324_v12 = vmul.f32 %v2154_v55, %v2154_v55 }
 0x14a   : > { %v3448_v2 = vadd.f32 %v3447_v60, %v3321_v58  ;;  %v3187_v3 = vadd.f32 %v3186_v59, %v2146_v61  ;;  %v3322_v4 = vmul.f32 %v2146_v61, %v2146_v61  ;;  %v2149_v5 = vadd.f32 %v2148_v1, %v1171_v63 }
 0x14b   : > { %v4390_v6 = vpack.c.bf16 %v2157_v0, %v2154_v55  ;;  %v3325_v20 = vmul.f32 %v2157_v0, %v2157_v0 }
 0x14c   : > { %v3449_v7 = vadd.f32 %v3448_v2, %v3322_v4  ;;  %v4385_v8 = vpack.c.bf16 %v2149_v5, %v2146_v61  ;;  %v3188_v9 = vadd.f32 %v3187_v3, %v2149_v5  ;;  %v3323_v10 = vmul.f32 %v2149_v5, %v2149_v5 }
 0x14d   : > { %4630 = vst [vmem:[%s5693_s30 + $0x98] sm:$0xff] %v4390_v6   ;;  %v4877_v11 = vpop.f32.mrb[40].mxu1 }
 0x14e   : > { %4629 = vst [vmem:[%s5693_s30 + $0x90] sm:$0xff] %v4385_v8   ;;  %v3189_v13 = vadd.f32 %v3188_v9, %v2154_v55  ;;  %v3450_v14 = vadd.f32 %v3449_v7, %v3323_v10  ;;  %v5021_v15 = vpop.f32.mrb[40].mxu0  ;;  %v1184_v16 = vpop.f32.mrb[41].mxu1 }
 0x14f   : > { %v2170_v17 = vadd.f32 %v5021_v15, %v4877_v11  ;;  %v2161_v18 = vpop.f32.mrb[41].mxu0  ;;  %v4878_v19 = vpop.f32.mrb[42].mxu1 }
 0x150   : > { %v3190_v21 = vadd.f32 %v3189_v13, %v2157_v0  ;;  %v3451_v22 = vadd.f32 %v3450_v14, %v3324_v12  ;;  %v2162_v23 = vadd.f32 %v2161_v18, %v1184_v16  ;;  %v5022_v24 = vpop.f32.mrb[42].mxu0  ;;  %v1187_v25 = vpop.f32.mrb[43].mxu1 }
 0x151   : > { %v2173_v26 = vadd.f32 %v5022_v24, %v4878_v19  ;;  %v2164_v27 = vpop.f32.mrb[43].mxu0  ;;  %v3328_v38 = vmul.f32 %v2170_v17, %v2170_v17 }
 0x152   : > { %v3452_v28 = vadd.f32 %v3451_v22, %v3325_v20  ;;  %v3191_v29 = vadd.f32 %v3190_v21, %v2162_v23  ;;  %v3326_v30 = vmul.f32 %v2162_v23, %v2162_v23  ;;  %v2165_v31 = vadd.f32 %v2164_v27, %v1187_v25 }
 0x153   : > { %v4400_v32 = vpack.c.bf16 %v2173_v26, %v2170_v17  ;;  %v3329_v46 = vmul.f32 %v2173_v26, %v2173_v26 }
 0x154   : > { %v3453_v33 = vadd.f32 %v3452_v28, %v3326_v30  ;;  %v4395_v34 = vpack.c.bf16 %v2165_v31, %v2162_v23  ;;  %v3192_v35 = vadd.f32 %v3191_v29, %v2165_v31  ;;  %v3327_v36 = vmul.f32 %v2165_v31, %v2165_v31 }
 0x155   : > { %4632 = vst [vmem:[%s5693_s30 + $0xa8] sm:$0xff] %v4400_v32   ;;  %v4881_v37 = vpop.f32.mrb[44].mxu1 }
 0x156   : > { %4631 = vst [vmem:[%s5693_s30 + $0xa0] sm:$0xff] %v4395_v34   ;;  %v3193_v39 = vadd.f32 %v3192_v35, %v2170_v17  ;;  %v3454_v40 = vadd.f32 %v3453_v33, %v3327_v36  ;;  %v5025_v41 = vpop.f32.mrb[44].mxu0  ;;  %v1200_v42 = vpop.f32.mrb[45].mxu1 }
 0x157   : > { %v2186_v43 = vadd.f32 %v5025_v41, %v4881_v37  ;;  %v2177_v44 = vpop.f32.mrb[45].mxu0  ;;  %v4882_v45 = vpop.f32.mrb[46].mxu1 }
 0x158   : > { %v3194_v47 = vadd.f32 %v3193_v39, %v2173_v26  ;;  %v3455_v48 = vadd.f32 %v3454_v40, %v3328_v38  ;;  %v2178_v49 = vadd.f32 %v2177_v44, %v1200_v42  ;;  %v5026_v50 = vpop.f32.mrb[46].mxu0  ;;  %v1203_v51 = vpop.f32.mrb[47].mxu1 }
 0x159   : > { %v2189_v52 = vadd.f32 %v5026_v50, %v4882_v45  ;;  %v2180_v53 = vpop.f32.mrb[47].mxu0  ;;  %v3332_v0 = vmul.f32 %v2186_v43, %v2186_v43 }
 0x15a   : > { %v3456_v54 = vadd.f32 %v3455_v48, %v3329_v46  ;;  %v3195_v55 = vadd.f32 %v3194_v47, %v2178_v49  ;;  %v3330_v56 = vmul.f32 %v2178_v49, %v2178_v49  ;;  %v2181_v57 = vadd.f32 %v2180_v53, %v1203_v51 }
 0x15b   : > { %v4410_v58 = vpack.c.bf16 %v2189_v52, %v2186_v43  ;;  %v3333_v8 = vmul.f32 %v2189_v52, %v2189_v52 }
 0x15c   : > { %v3457_v59 = vadd.f32 %v3456_v54, %v3330_v56  ;;  %v4405_v60 = vpack.c.bf16 %v2181_v57, %v2178_v49  ;;  %v3196_v61 = vadd.f32 %v3195_v55, %v2181_v57  ;;  %v3331_v62 = vmul.f32 %v2181_v57, %v2181_v57 }
 0x15d   : > { %4634 = vst [vmem:[%s5693_s30 + $0xb8] sm:$0xff] %v4410_v58   ;;  %v4885_v63 = vpop.f32.mrb[48].mxu1 }
 0x15e   : > { %4633 = vst [vmem:[%s5693_s30 + $0xb0] sm:$0xff] %v4405_v60   ;;  %v3197_v1 = vadd.f32 %v3196_v61, %v2186_v43  ;;  %v3458_v2 = vadd.f32 %v3457_v59, %v3331_v62  ;;  %v5029_v3 = vpop.f32.mrb[48].mxu0  ;;  %v1216_v4 = vpop.f32.mrb[49].mxu1 }
 0x15f   : > { %v2202_v5 = vadd.f32 %v5029_v3, %v4885_v63  ;;  %v2193_v6 = vpop.f32.mrb[49].mxu0  ;;  %v4886_v7 = vpop.f32.mrb[50].mxu1 }
 0x160   : > { %v3198_v9 = vadd.f32 %v3197_v1, %v2189_v52  ;;  %v3459_v10 = vadd.f32 %v3458_v2, %v3332_v0  ;;  %v2194_v11 = vadd.f32 %v2193_v6, %v1216_v4  ;;  %v5030_v12 = vpop.f32.mrb[50].mxu0  ;;  %v1219_v13 = vpop.f32.mrb[51].mxu1 }
 0x161   : > { %v2205_v14 = vadd.f32 %v5030_v12, %v4886_v7  ;;  %v2196_v15 = vpop.f32.mrb[51].mxu0  ;;  %v3336_v26 = vmul.f32 %v2202_v5, %v2202_v5 }
 0x162   : > { %v3460_v16 = vadd.f32 %v3459_v10, %v3333_v8  ;;  %v3199_v17 = vadd.f32 %v3198_v9, %v2194_v11  ;;  %v3334_v18 = vmul.f32 %v2194_v11, %v2194_v11  ;;  %v2197_v19 = vadd.f32 %v2196_v15, %v1219_v13 }
 0x163   : > { %v4420_v20 = vpack.c.bf16 %v2205_v14, %v2202_v5  ;;  %v3337_v34 = vmul.f32 %v2205_v14, %v2205_v14 }
 0x164   : > { %v3461_v21 = vadd.f32 %v3460_v16, %v3334_v18  ;;  %v4415_v22 = vpack.c.bf16 %v2197_v19, %v2194_v11  ;;  %v3200_v23 = vadd.f32 %v3199_v17, %v2197_v19  ;;  %v3335_v24 = vmul.f32 %v2197_v19, %v2197_v19 }
 0x165   : > { %4636 = vst [vmem:[%s5693_s30 + $0xc8] sm:$0xff] %v4420_v20   ;;  %v4889_v25 = vpop.f32.mrb[52].mxu1 }
 0x166   : > { %4635 = vst [vmem:[%s5693_s30 + $0xc0] sm:$0xff] %v4415_v22   ;;  %v3201_v27 = vadd.f32 %v3200_v23, %v2202_v5  ;;  %v3462_v28 = vadd.f32 %v3461_v21, %v3335_v24  ;;  %v5033_v29 = vpop.f32.mrb[52].mxu0  ;;  %v1232_v30 = vpop.f32.mrb[53].mxu1 }
 0x167   : > { %v2218_v31 = vadd.f32 %v5033_v29, %v4889_v25  ;;  %v2209_v32 = vpop.f32.mrb[53].mxu0  ;;  %v4890_v33 = vpop.f32.mrb[54].mxu1 }
 0x168   : > { %v3202_v35 = vadd.f32 %v3201_v27, %v2205_v14  ;;  %v3463_v36 = vadd.f32 %v3462_v28, %v3336_v26  ;;  %v2210_v37 = vadd.f32 %v2209_v32, %v1232_v30  ;;  %v5034_v38 = vpop.f32.mrb[54].mxu0  ;;  %v1235_v39 = vpop.f32.mrb[55].mxu1 }
 0x169   : > { %v2221_v40 = vadd.f32 %v5034_v38, %v4890_v33  ;;  %v2212_v41 = vpop.f32.mrb[55].mxu0  ;;  %v3340_v52 = vmul.f32 %v2218_v31, %v2218_v31 }
 0x16a   : > { %v3464_v42 = vadd.f32 %v3463_v36, %v3337_v34  ;;  %v3203_v43 = vadd.f32 %v3202_v35, %v2210_v37  ;;  %v3338_v44 = vmul.f32 %v2210_v37, %v2210_v37  ;;  %v2213_v45 = vadd.f32 %v2212_v41, %v1235_v39 }
 0x16b   : > { %v4430_v46 = vpack.c.bf16 %v2221_v40, %v2218_v31  ;;  %v3341_v60 = vmul.f32 %v2221_v40, %v2221_v40 }
 0x16c   : > { %v3465_v47 = vadd.f32 %v3464_v42, %v3338_v44  ;;  %v4425_v48 = vpack.c.bf16 %v2213_v45, %v2210_v37  ;;  %v3204_v49 = vadd.f32 %v3203_v43, %v2213_v45  ;;  %v3339_v50 = vmul.f32 %v2213_v45, %v2213_v45 }
 0x16d   : > { %4638 = vst [vmem:[%s5693_s30 + $0xd8] sm:$0xff] %v4430_v46   ;;  %v4893_v51 = vpop.f32.mrb[56].mxu1 }
 0x16e   : > { %4637 = vst [vmem:[%s5693_s30 + $0xd0] sm:$0xff] %v4425_v48   ;;  %v3205_v53 = vadd.f32 %v3204_v49, %v2218_v31  ;;  %v3466_v54 = vadd.f32 %v3465_v47, %v3339_v50  ;;  %v5037_v55 = vpop.f32.mrb[56].mxu0  ;;  %v1248_v56 = vpop.f32.mrb[57].mxu1 }
 0x16f   : > { %v2234_v57 = vadd.f32 %v5037_v55, %v4893_v51  ;;  %v2225_v58 = vpop.f32.mrb[57].mxu0  ;;  %v4894_v59 = vpop.f32.mrb[58].mxu1 }
 0x170   : > { %v3206_v61 = vadd.f32 %v3205_v53, %v2221_v40  ;;  %v3467_v62 = vadd.f32 %v3466_v54, %v3340_v52  ;;  %v2226_v63 = vadd.f32 %v2225_v58, %v1248_v56  ;;  %v5038_v0 = vpop.f32.mrb[58].mxu0  ;;  %v1251_v1 = vpop.f32.mrb[59].mxu1 }
 0x171   : > { %v2237_v2 = vadd.f32 %v5038_v0, %v4894_v59  ;;  %v2228_v3 = vpop.f32.mrb[59].mxu0  ;;  %v3344_v14 = vmul.f32 %v2234_v57, %v2234_v57 }
 0x172   : > { %v3468_v4 = vadd.f32 %v3467_v62, %v3341_v60  ;;  %v3207_v5 = vadd.f32 %v3206_v61, %v2226_v63  ;;  %v3342_v6 = vmul.f32 %v2226_v63, %v2226_v63  ;;  %v2229_v7 = vadd.f32 %v2228_v3, %v1251_v1 }
 0x173   : > { %v4440_v8 = vpack.c.bf16 %v2237_v2, %v2234_v57  ;;  %v3345_v22 = vmul.f32 %v2237_v2, %v2237_v2 }
 0x174   : > { %v3469_v9 = vadd.f32 %v3468_v4, %v3342_v6  ;;  %v4435_v10 = vpack.c.bf16 %v2229_v7, %v2226_v63  ;;  %v3208_v11 = vadd.f32 %v3207_v5, %v2229_v7  ;;  %v3343_v12 = vmul.f32 %v2229_v7, %v2229_v7 }
 0x175   : > { %4640 = vst [vmem:[%s5693_s30 + $0xe8] sm:$0xff] %v4440_v8   ;;  %v4897_v13 = vpop.f32.mrb[60].mxu1 }
 0x176   : > { %4639 = vst [vmem:[%s5693_s30 + $0xe0] sm:$0xff] %v4435_v10   ;;  %v3209_v15 = vadd.f32 %v3208_v11, %v2234_v57  ;;  %v3470_v16 = vadd.f32 %v3469_v9, %v3343_v12  ;;  %v5041_v17 = vpop.f32.mrb[60].mxu0  ;;  %v1264_v18 = vpop.f32.mrb[61].mxu1 }
 0x177   : > { %v2250_v19 = vadd.f32 %v5041_v17, %v4897_v13  ;;  %v2241_v20 = vpop.f32.mrb[61].mxu0  ;;  %v4898_v21 = vpop.f32.mrb[62].mxu1 }
 0x178   : > { %v3210_v23 = vadd.f32 %v3209_v15, %v2237_v2  ;;  %v3471_v24 = vadd.f32 %v3470_v16, %v3344_v14  ;;  %v2242_v25 = vadd.f32 %v2241_v20, %v1264_v18  ;;  %v5042_v26 = vpop.f32.mrb[62].mxu0  ;;  %v1267_v27 = vpop.f32.mrb[63].mxu1 }
 0x179   : > { %v2253_v28 = vadd.f32 %v5042_v26, %v4898_v21  ;;  %v2244_v29 = vpop.f32.mrb[63].mxu0  ;;  %v3348_v40 = vmul.f32 %v2250_v19, %v2250_v19 }
 0x17a   : > { %v3472_v30 = vadd.f32 %v3471_v24, %v3345_v22  ;;  %v3211_v31 = vadd.f32 %v3210_v23, %v2242_v25  ;;  %v3346_v32 = vmul.f32 %v2242_v25, %v2242_v25  ;;  %v2245_v33 = vadd.f32 %v2244_v29, %v1267_v27 }
 0x17b   : > { %v4450_v34 = vpack.c.bf16 %v2253_v28, %v2250_v19  ;;  %v3349_v48 = vmul.f32 %v2253_v28, %v2253_v28 }
 0x17c   : > { %v3473_v35 = vadd.f32 %v3472_v30, %v3346_v32  ;;  %v4445_v36 = vpack.c.bf16 %v2245_v33, %v2242_v25  ;;  %v3212_v37 = vadd.f32 %v3211_v31, %v2245_v33  ;;  %v3347_v38 = vmul.f32 %v2245_v33, %v2245_v33 }
 0x17d   : > { %4642 = vst [vmem:[%s5693_s30 + $0xf8] sm:$0xff] %v4450_v34   ;;  %v4901_v39 = vpop.f32.mrb[64].mxu1 }
 0x17e   : > { %4641 = vst [vmem:[%s5693_s30 + $0xf0] sm:$0xff] %v4445_v36   ;;  %v3213_v41 = vadd.f32 %v3212_v37, %v2250_v19  ;;  %v3474_v42 = vadd.f32 %v3473_v35, %v3347_v38  ;;  %v5045_v43 = vpop.f32.mrb[64].mxu0  ;;  %v1280_v44 = vpop.f32.mrb[65].mxu1 }
 0x17f   : > { %v2266_v45 = vadd.f32 %v5045_v43, %v4901_v39  ;;  %v2257_v46 = vpop.f32.mrb[65].mxu0  ;;  %v4902_v47 = vpop.f32.mrb[66].mxu1 }
 0x180   : > { %v3214_v49 = vadd.f32 %v3213_v41, %v2253_v28  ;;  %v3475_v50 = vadd.f32 %v3474_v42, %v3348_v40  ;;  %v2258_v51 = vadd.f32 %v2257_v46, %v1280_v44  ;;  %v5046_v52 = vpop.f32.mrb[66].mxu0  ;;  %v1283_v53 = vpop.f32.mrb[67].mxu1 }
 0x181   : > { %v2269_v54 = vadd.f32 %v5046_v52, %v4902_v47  ;;  %v2260_v55 = vpop.f32.mrb[67].mxu0  ;;  %v3352_v2 = vmul.f32 %v2266_v45, %v2266_v45 }
 0x182   : > { %v3476_v56 = vadd.f32 %v3475_v50, %v3349_v48  ;;  %v3215_v57 = vadd.f32 %v3214_v49, %v2258_v51  ;;  %v3350_v58 = vmul.f32 %v2258_v51, %v2258_v51  ;;  %v2261_v59 = vadd.f32 %v2260_v55, %v1283_v53 }
 0x183   : > { %v4460_v60 = vpack.c.bf16 %v2269_v54, %v2266_v45  ;;  %v3353_v10 = vmul.f32 %v2269_v54, %v2269_v54 }
 0x184   : > { %v3477_v61 = vadd.f32 %v3476_v56, %v3350_v58  ;;  %v4455_v62 = vpack.c.bf16 %v2261_v59, %v2258_v51  ;;  %v3216_v63 = vadd.f32 %v3215_v57, %v2261_v59  ;;  %v3351_v0 = vmul.f32 %v2261_v59, %v2261_v59 }
 0x185   : > { %4644 = vst [vmem:[%s5693_s30 + $0x108] sm:$0xff] %v4460_v60   ;;  %v4905_v1 = vpop.f32.mrb[68].mxu1 }
 0x186   : > { %4643 = vst [vmem:[%s5693_s30 + $0x100] sm:$0xff] %v4455_v62   ;;  %v3217_v3 = vadd.f32 %v3216_v63, %v2266_v45  ;;  %v3478_v4 = vadd.f32 %v3477_v61, %v3351_v0  ;;  %v5049_v5 = vpop.f32.mrb[68].mxu0  ;;  %v1296_v6 = vpop.f32.mrb[69].mxu1 }
 0x187   : > { %v2282_v7 = vadd.f32 %v5049_v5, %v4905_v1  ;;  %v2273_v8 = vpop.f32.mrb[69].mxu0  ;;  %v4906_v9 = vpop.f32.mrb[70].mxu1 }
 0x188   : > { %v3479_v11 = vadd.f32 %v3478_v4, %v3352_v2  ;;  %v2274_v12 = vadd.f32 %v2273_v8, %v1296_v6  ;;  %v3218_v13 = vadd.f32 %v3217_v3, %v2269_v54  ;;  %v5050_v14 = vpop.f32.mrb[70].mxu0  ;;  %v1299_v15 = vpop.f32.mrb[71].mxu1 }
 0x189   : > { %v2285_v16 = vadd.f32 %v5050_v14, %v4906_v9  ;;  %v2276_v17 = vpop.f32.mrb[71].mxu0  ;;  %v3356_v28 = vmul.f32 %v2282_v7, %v2282_v7 }
 0x18a   : > { %v3219_v18 = vadd.f32 %v3218_v13, %v2274_v12  ;;  %v3354_v19 = vmul.f32 %v2274_v12, %v2274_v12  ;;  %v3480_v20 = vadd.f32 %v3479_v11, %v3353_v10  ;;  %v2277_v21 = vadd.f32 %v2276_v17, %v1299_v15 }
 0x18b   : > { %v4470_v22 = vpack.c.bf16 %v2285_v16, %v2282_v7  ;;  %v3357_v36 = vmul.f32 %v2285_v16, %v2285_v16 }
 0x18c   : > { %v3481_v23 = vadd.f32 %v3480_v20, %v3354_v19  ;;  %v4465_v24 = vpack.c.bf16 %v2277_v21, %v2274_v12  ;;  %v3220_v25 = vadd.f32 %v3219_v18, %v2277_v21  ;;  %v3355_v26 = vmul.f32 %v2277_v21, %v2277_v21 }
 0x18d   : > { %4646 = vst [vmem:[%s5693_s30 + $0x118] sm:$0xff] %v4470_v22   ;;  %v4909_v27 = vpop.f32.mrb[72].mxu1 }
 0x18e   : > { %4645 = vst [vmem:[%s5693_s30 + $0x110] sm:$0xff] %v4465_v24   ;;  %v3221_v29 = vadd.f32 %v3220_v25, %v2282_v7  ;;  %v3482_v30 = vadd.f32 %v3481_v23, %v3355_v26  ;;  %v5053_v31 = vpop.f32.mrb[72].mxu0  ;;  %v1312_v32 = vpop.f32.mrb[73].mxu1 }
 0x18f   : > { %v2298_v33 = vadd.f32 %v5053_v31, %v4909_v27  ;;  %v2289_v34 = vpop.f32.mrb[73].mxu0  ;;  %v4910_v35 = vpop.f32.mrb[74].mxu1 }
 0x190   : > { %v3483_v37 = vadd.f32 %v3482_v30, %v3356_v28  ;;  %v2290_v38 = vadd.f32 %v2289_v34, %v1312_v32  ;;  %v3222_v39 = vadd.f32 %v3221_v29, %v2285_v16  ;;  %v5054_v40 = vpop.f32.mrb[74].mxu0  ;;  %v1315_v41 = vpop.f32.mrb[75].mxu1 }
 0x191   : > { %v2301_v42 = vadd.f32 %v5054_v40, %v4910_v35  ;;  %v2292_v43 = vpop.f32.mrb[75].mxu0  ;;  %v3360_v54 = vmul.f32 %v2298_v33, %v2298_v33 }
 0x192   : > { %v3223_v44 = vadd.f32 %v3222_v39, %v2290_v38  ;;  %v3358_v45 = vmul.f32 %v2290_v38, %v2290_v38  ;;  %v3484_v46 = vadd.f32 %v3483_v37, %v3357_v36  ;;  %v2293_v47 = vadd.f32 %v2292_v43, %v1315_v41 }
 0x193   : > { %v4480_v48 = vpack.c.bf16 %v2301_v42, %v2298_v33  ;;  %v3361_v62 = vmul.f32 %v2301_v42, %v2301_v42 }
 0x194   : > { %v3485_v49 = vadd.f32 %v3484_v46, %v3358_v45  ;;  %v4475_v50 = vpack.c.bf16 %v2293_v47, %v2290_v38  ;;  %v3224_v51 = vadd.f32 %v3223_v44, %v2293_v47  ;;  %v3359_v52 = vmul.f32 %v2293_v47, %v2293_v47 }
 0x195   : > { %4648 = vst [vmem:[%s5693_s30 + $0x128] sm:$0xff] %v4480_v48   ;;  %v4913_v53 = vpop.f32.mrb[76].mxu1 }
 0x196   : > { %4647 = vst [vmem:[%s5693_s30 + $0x120] sm:$0xff] %v4475_v50   ;;  %v3225_v55 = vadd.f32 %v3224_v51, %v2298_v33  ;;  %v3486_v56 = vadd.f32 %v3485_v49, %v3359_v52  ;;  %v5057_v57 = vpop.f32.mrb[76].mxu0  ;;  %v1328_v58 = vpop.f32.mrb[77].mxu1 }
 0x197   : > { %v2314_v59 = vadd.f32 %v5057_v57, %v4913_v53  ;;  %v2305_v60 = vpop.f32.mrb[77].mxu0  ;;  %v4914_v61 = vpop.f32.mrb[78].mxu1 }
 0x198   : > { %v3487_v63 = vadd.f32 %v3486_v56, %v3360_v54  ;;  %v2306_v0 = vadd.f32 %v2305_v60, %v1328_v58  ;;  %v3226_v1 = vadd.f32 %v3225_v55, %v2301_v42  ;;  %v5058_v2 = vpop.f32.mrb[78].mxu0  ;;  %v1331_v3 = vpop.f32.mrb[79].mxu1 }
 0x199   : > { %v2317_v4 = vadd.f32 %v5058_v2, %v4914_v61  ;;  %v2308_v5 = vpop.f32.mrb[79].mxu0  ;;  %v3364_v16 = vmul.f32 %v2314_v59, %v2314_v59 }
 0x19a   : > { %v3227_v6 = vadd.f32 %v3226_v1, %v2306_v0  ;;  %v3362_v7 = vmul.f32 %v2306_v0, %v2306_v0  ;;  %v3488_v8 = vadd.f32 %v3487_v63, %v3361_v62  ;;  %v2309_v9 = vadd.f32 %v2308_v5, %v1331_v3 }
 0x19b   : > { %v4490_v10 = vpack.c.bf16 %v2317_v4, %v2314_v59  ;;  %v3365_v24 = vmul.f32 %v2317_v4, %v2317_v4 }
 0x19c   : > { %v3489_v11 = vadd.f32 %v3488_v8, %v3362_v7  ;;  %v4485_v12 = vpack.c.bf16 %v2309_v9, %v2306_v0  ;;  %v3228_v13 = vadd.f32 %v3227_v6, %v2309_v9  ;;  %v3363_v14 = vmul.f32 %v2309_v9, %v2309_v9 }
 0x19d   : > { %4650 = vst [vmem:[%s5693_s30 + $0x138] sm:$0xff] %v4490_v10   ;;  %v4917_v15 = vpop.f32.mrb[80].mxu1 }
 0x19e   : > { %4649 = vst [vmem:[%s5693_s30 + $0x130] sm:$0xff] %v4485_v12   ;;  %v3229_v17 = vadd.f32 %v3228_v13, %v2314_v59  ;;  %v3490_v18 = vadd.f32 %v3489_v11, %v3363_v14  ;;  %v5061_v19 = vpop.f32.mrb[80].mxu0  ;;  %v1344_v20 = vpop.f32.mrb[81].mxu1 }
 0x19f   : > { %v2330_v21 = vadd.f32 %v5061_v19, %v4917_v15  ;;  %v2321_v22 = vpop.f32.mrb[81].mxu0  ;;  %v4918_v23 = vpop.f32.mrb[82].mxu1 }
 0x1a0   : > { %v3491_v25 = vadd.f32 %v3490_v18, %v3364_v16  ;;  %v2322_v26 = vadd.f32 %v2321_v22, %v1344_v20  ;;  %v3230_v27 = vadd.f32 %v3229_v17, %v2317_v4  ;;  %v5062_v28 = vpop.f32.mrb[82].mxu0  ;;  %v1347_v29 = vpop.f32.mrb[83].mxu1 }
 0x1a1   : > { %v2333_v30 = vadd.f32 %v5062_v28, %v4918_v23  ;;  %v2324_v31 = vpop.f32.mrb[83].mxu0  ;;  %v3368_v42 = vmul.f32 %v2330_v21, %v2330_v21 }
 0x1a2   : > { %v3231_v32 = vadd.f32 %v3230_v27, %v2322_v26  ;;  %v3366_v33 = vmul.f32 %v2322_v26, %v2322_v26  ;;  %v3492_v34 = vadd.f32 %v3491_v25, %v3365_v24  ;;  %v2325_v35 = vadd.f32 %v2324_v31, %v1347_v29 }
 0x1a3   : > { %v4500_v36 = vpack.c.bf16 %v2333_v30, %v2330_v21  ;;  %v3369_v50 = vmul.f32 %v2333_v30, %v2333_v30 }
 0x1a4   : > { %v3493_v37 = vadd.f32 %v3492_v34, %v3366_v33  ;;  %v4495_v38 = vpack.c.bf16 %v2325_v35, %v2322_v26  ;;  %v3232_v39 = vadd.f32 %v3231_v32, %v2325_v35  ;;  %v3367_v40 = vmul.f32 %v2325_v35, %v2325_v35 }
 0x1a5   : > { %4652 = vst [vmem:[%s5693_s30 + $0x148] sm:$0xff] %v4500_v36   ;;  %v4921_v41 = vpop.f32.mrb[84].mxu1 }
 0x1a6   : > { %4651 = vst [vmem:[%s5693_s30 + $0x140] sm:$0xff] %v4495_v38   ;;  %v3233_v43 = vadd.f32 %v3232_v39, %v2330_v21  ;;  %v3494_v44 = vadd.f32 %v3493_v37, %v3367_v40  ;;  %v5065_v45 = vpop.f32.mrb[84].mxu0  ;;  %v1360_v46 = vpop.f32.mrb[85].mxu1 }
 0x1a7   : > { %v2346_v47 = vadd.f32 %v5065_v45, %v4921_v41  ;;  %v2337_v48 = vpop.f32.mrb[85].mxu0  ;;  %v4922_v49 = vpop.f32.mrb[86].mxu1 }
 0x1a8   : > { %v3495_v51 = vadd.f32 %v3494_v44, %v3368_v42  ;;  %v2338_v52 = vadd.f32 %v2337_v48, %v1360_v46  ;;  %v3234_v53 = vadd.f32 %v3233_v43, %v2333_v30  ;;  %v5066_v54 = vpop.f32.mrb[86].mxu0  ;;  %v1363_v55 = vpop.f32.mrb[87].mxu1 }
 0x1a9   : > { %v2349_v56 = vadd.f32 %v5066_v54, %v4922_v49  ;;  %v2340_v57 = vpop.f32.mrb[87].mxu0  ;;  %v3372_v4 = vmul.f32 %v2346_v47, %v2346_v47 }
 0x1aa   : > { %v3235_v58 = vadd.f32 %v3234_v53, %v2338_v52  ;;  %v3370_v59 = vmul.f32 %v2338_v52, %v2338_v52  ;;  %v3496_v60 = vadd.f32 %v3495_v51, %v3369_v50  ;;  %v2341_v61 = vadd.f32 %v2340_v57, %v1363_v55 }
 0x1ab   : > { %v4510_v62 = vpack.c.bf16 %v2349_v56, %v2346_v47  ;;  %v3373_v12 = vmul.f32 %v2349_v56, %v2349_v56 }
 0x1ac   : > { %v3497_v63 = vadd.f32 %v3496_v60, %v3370_v59  ;;  %v4505_v0 = vpack.c.bf16 %v2341_v61, %v2338_v52  ;;  %v3236_v1 = vadd.f32 %v3235_v58, %v2341_v61  ;;  %v3371_v2 = vmul.f32 %v2341_v61, %v2341_v61 }
 0x1ad   : > { %4654 = vst [vmem:[%s5693_s30 + $0x158] sm:$0xff] %v4510_v62   ;;  %v4925_v3 = vpop.f32.mrb[88].mxu1 }
 0x1ae   : > { %4653 = vst [vmem:[%s5693_s30 + $0x150] sm:$0xff] %v4505_v0   ;;  %v3237_v5 = vadd.f32 %v3236_v1, %v2346_v47  ;;  %v3498_v6 = vadd.f32 %v3497_v63, %v3371_v2  ;;  %v5069_v7 = vpop.f32.mrb[88].mxu0  ;;  %v1376_v8 = vpop.f32.mrb[89].mxu1 }
 0x1af   : > { %v2362_v9 = vadd.f32 %v5069_v7, %v4925_v3  ;;  %v2353_v10 = vpop.f32.mrb[89].mxu0  ;;  %v4926_v11 = vpop.f32.mrb[90].mxu1 }
 0x1b0   : > { %v3499_v13 = vadd.f32 %v3498_v6, %v3372_v4  ;;  %v2354_v14 = vadd.f32 %v2353_v10, %v1376_v8  ;;  %v3238_v15 = vadd.f32 %v3237_v5, %v2349_v56  ;;  %v5070_v16 = vpop.f32.mrb[90].mxu0  ;;  %v1379_v17 = vpop.f32.mrb[91].mxu1 }
 0x1b1   : > { %v2365_v18 = vadd.f32 %v5070_v16, %v4926_v11  ;;  %v2356_v19 = vpop.f32.mrb[91].mxu0  ;;  %v3376_v30 = vmul.f32 %v2362_v9, %v2362_v9 }
 0x1b2   : > { %v3239_v20 = vadd.f32 %v3238_v15, %v2354_v14  ;;  %v3374_v21 = vmul.f32 %v2354_v14, %v2354_v14  ;;  %v3500_v22 = vadd.f32 %v3499_v13, %v3373_v12  ;;  %v2357_v23 = vadd.f32 %v2356_v19, %v1379_v17 }
 0x1b3   : > { %v4520_v24 = vpack.c.bf16 %v2365_v18, %v2362_v9  ;;  %v3377_v38 = vmul.f32 %v2365_v18, %v2365_v18 }
 0x1b4   : > { %v3501_v25 = vadd.f32 %v3500_v22, %v3374_v21  ;;  %v4515_v26 = vpack.c.bf16 %v2357_v23, %v2354_v14  ;;  %v3240_v27 = vadd.f32 %v3239_v20, %v2357_v23  ;;  %v3375_v28 = vmul.f32 %v2357_v23, %v2357_v23 }
 0x1b5   : > { %4656 = vst [vmem:[%s5693_s30 + $0x168] sm:$0xff] %v4520_v24   ;;  %v4929_v29 = vpop.f32.mrb[92].mxu1 }
 0x1b6   : > { %4655 = vst [vmem:[%s5693_s30 + $0x160] sm:$0xff] %v4515_v26   ;;  %v3241_v31 = vadd.f32 %v3240_v27, %v2362_v9  ;;  %v3502_v32 = vadd.f32 %v3501_v25, %v3375_v28  ;;  %v5073_v33 = vpop.f32.mrb[92].mxu0  ;;  %v1392_v34 = vpop.f32.mrb[93].mxu1 }
 0x1b7   : > { %v2378_v35 = vadd.f32 %v5073_v33, %v4929_v29  ;;  %v2369_v36 = vpop.f32.mrb[93].mxu0  ;;  %v4930_v37 = vpop.f32.mrb[94].mxu1 }
 0x1b8   : > { %v3503_v39 = vadd.f32 %v3502_v32, %v3376_v30  ;;  %v2370_v40 = vadd.f32 %v2369_v36, %v1392_v34  ;;  %v3242_v41 = vadd.f32 %v3241_v31, %v2365_v18  ;;  %v5074_v42 = vpop.f32.mrb[94].mxu0  ;;  %v1395_v43 = vpop.f32.mrb[95].mxu1 }
 0x1b9   : > { %v2381_v44 = vadd.f32 %v5074_v42, %v4930_v37  ;;  %v2372_v45 = vpop.f32.mrb[95].mxu0  ;;  %v3380_v56 = vmul.f32 %v2378_v35, %v2378_v35 }
 0x1ba   : > { %v3243_v46 = vadd.f32 %v3242_v41, %v2370_v40  ;;  %v3378_v47 = vmul.f32 %v2370_v40, %v2370_v40  ;;  %v3504_v48 = vadd.f32 %v3503_v39, %v3377_v38  ;;  %v2373_v49 = vadd.f32 %v2372_v45, %v1395_v43 }
 0x1bb   : > { %v4530_v50 = vpack.c.bf16 %v2381_v44, %v2378_v35  ;;  %v3381_v0 = vmul.f32 %v2381_v44, %v2381_v44 }
 0x1bc   : > { %v3505_v51 = vadd.f32 %v3504_v48, %v3378_v47  ;;  %v4525_v52 = vpack.c.bf16 %v2373_v49, %v2370_v40  ;;  %v3244_v53 = vadd.f32 %v3243_v46, %v2373_v49  ;;  %v3379_v54 = vmul.f32 %v2373_v49, %v2373_v49 }
 0x1bd   : > { %4658 = vst [vmem:[%s5693_s30 + $0x178] sm:$0xff] %v4530_v50   ;;  %v4933_v55 = vpop.f32.mrb[96].mxu1 }
 0x1be   : > { %4657 = vst [vmem:[%s5693_s30 + $0x170] sm:$0xff] %v4525_v52   ;;  %v3245_v57 = vadd.f32 %v3244_v53, %v2378_v35  ;;  %v3506_v58 = vadd.f32 %v3505_v51, %v3379_v54  ;;  %v5077_v59 = vpop.f32.mrb[96].mxu0  ;;  %v1408_v60 = vpop.f32.mrb[97].mxu1 }
 0x1bf   : > { %v2394_v61 = vadd.f32 %v5077_v59, %v4933_v55  ;;  %v2385_v62 = vpop.f32.mrb[97].mxu0  ;;  %v4934_v63 = vpop.f32.mrb[98].mxu1 }
 0x1c0   : > { %v3507_v1 = vadd.f32 %v3506_v58, %v3380_v56  ;;  %v2386_v2 = vadd.f32 %v2385_v62, %v1408_v60  ;;  %v3246_v3 = vadd.f32 %v3245_v57, %v2381_v44  ;;  %v5078_v4 = vpop.f32.mrb[98].mxu0  ;;  %v1411_v5 = vpop.f32.mrb[99].mxu1 }
 0x1c1   : > { %v2397_v6 = vadd.f32 %v5078_v4, %v4934_v63  ;;  %v2388_v7 = vpop.f32.mrb[99].mxu0  ;;  %v3384_v18 = vmul.f32 %v2394_v61, %v2394_v61 }
 0x1c2   : > { %v3247_v8 = vadd.f32 %v3246_v3, %v2386_v2  ;;  %v3382_v9 = vmul.f32 %v2386_v2, %v2386_v2  ;;  %v3508_v10 = vadd.f32 %v3507_v1, %v3381_v0  ;;  %v2389_v11 = vadd.f32 %v2388_v7, %v1411_v5 }
 0x1c3   : > { %v4540_v12 = vpack.c.bf16 %v2397_v6, %v2394_v61  ;;  %v3385_v26 = vmul.f32 %v2397_v6, %v2397_v6 }
 0x1c4   : > { %v3509_v13 = vadd.f32 %v3508_v10, %v3382_v9  ;;  %v4535_v14 = vpack.c.bf16 %v2389_v11, %v2386_v2  ;;  %v3248_v15 = vadd.f32 %v3247_v8, %v2389_v11  ;;  %v3383_v16 = vmul.f32 %v2389_v11, %v2389_v11 }
 0x1c5   : > { %4660 = vst [vmem:[%s5693_s30 + $0x188] sm:$0xff] %v4540_v12   ;;  %v4937_v17 = vpop.f32.mrb[100].mxu1 }
 0x1c6   : > { %4659 = vst [vmem:[%s5693_s30 + $0x180] sm:$0xff] %v4535_v14   ;;  %v3249_v19 = vadd.f32 %v3248_v15, %v2394_v61  ;;  %v3510_v20 = vadd.f32 %v3509_v13, %v3383_v16  ;;  %v5081_v21 = vpop.f32.mrb[100].mxu0  ;;  %v1424_v22 = vpop.f32.mrb[101].mxu1 }
 0x1c7   : > { %v2410_v23 = vadd.f32 %v5081_v21, %v4937_v17  ;;  %v2401_v24 = vpop.f32.mrb[101].mxu0  ;;  %v4938_v25 = vpop.f32.mrb[102].mxu1 }
 0x1c8   : > { %v3511_v27 = vadd.f32 %v3510_v20, %v3384_v18  ;;  %v2402_v28 = vadd.f32 %v2401_v24, %v1424_v22  ;;  %v3250_v29 = vadd.f32 %v3249_v19, %v2397_v6  ;;  %v5082_v30 = vpop.f32.mrb[102].mxu0  ;;  %v1427_v31 = vpop.f32.mrb[103].mxu1 }
 0x1c9   : > { %v2413_v32 = vadd.f32 %v5082_v30, %v4938_v25  ;;  %v2404_v33 = vpop.f32.mrb[103].mxu0  ;;  %v3388_v44 = vmul.f32 %v2410_v23, %v2410_v23 }
 0x1ca   : > { %v3251_v34 = vadd.f32 %v3250_v29, %v2402_v28  ;;  %v3386_v35 = vmul.f32 %v2402_v28, %v2402_v28  ;;  %v3512_v36 = vadd.f32 %v3511_v27, %v3385_v26  ;;  %v2405_v37 = vadd.f32 %v2404_v33, %v1427_v31 }
 0x1cb   : > { %v4550_v38 = vpack.c.bf16 %v2413_v32, %v2410_v23  ;;  %v3389_v52 = vmul.f32 %v2413_v32, %v2413_v32 }
 0x1cc   : > { %v3513_v39 = vadd.f32 %v3512_v36, %v3386_v35  ;;  %v4545_v40 = vpack.c.bf16 %v2405_v37, %v2402_v28  ;;  %v3252_v41 = vadd.f32 %v3251_v34, %v2405_v37  ;;  %v3387_v42 = vmul.f32 %v2405_v37, %v2405_v37 }
 0x1cd   : > { %4662 = vst [vmem:[%s5693_s30 + $0x198] sm:$0xff] %v4550_v38   ;;  %v4941_v43 = vpop.f32.mrb[104].mxu1 }
 0x1ce   : > { %4661 = vst [vmem:[%s5693_s30 + $0x190] sm:$0xff] %v4545_v40   ;;  %v3253_v45 = vadd.f32 %v3252_v41, %v2410_v23  ;;  %v3514_v46 = vadd.f32 %v3513_v39, %v3387_v42  ;;  %v5085_v47 = vpop.f32.mrb[104].mxu0  ;;  %v1440_v48 = vpop.f32.mrb[105].mxu1 }
 0x1cf   : > { %v2426_v49 = vadd.f32 %v5085_v47, %v4941_v43  ;;  %v2417_v50 = vpop.f32.mrb[105].mxu0  ;;  %v4942_v51 = vpop.f32.mrb[106].mxu1 }
 0x1d0   : > { %v3515_v53 = vadd.f32 %v3514_v46, %v3388_v44  ;;  %v2418_v54 = vadd.f32 %v2417_v50, %v1440_v48  ;;  %v3254_v55 = vadd.f32 %v3253_v45, %v2413_v32  ;;  %v5086_v56 = vpop.f32.mrb[106].mxu0  ;;  %v1443_v57 = vpop.f32.mrb[107].mxu1 }
 0x1d1   : > { %v2429_v58 = vadd.f32 %v5086_v56, %v4942_v51  ;;  %v2420_v59 = vpop.f32.mrb[107].mxu0  ;;  %v3392_v6 = vmul.f32 %v2426_v49, %v2426_v49 }
 0x1d2   : > { %v3255_v60 = vadd.f32 %v3254_v55, %v2418_v54  ;;  %v3390_v61 = vmul.f32 %v2418_v54, %v2418_v54  ;;  %v3516_v62 = vadd.f32 %v3515_v53, %v3389_v52  ;;  %v2421_v63 = vadd.f32 %v2420_v59, %v1443_v57 }
 0x1d3   : > { %v4560_v0 = vpack.c.bf16 %v2429_v58, %v2426_v49  ;;  %v3393_v14 = vmul.f32 %v2429_v58, %v2429_v58 }
 0x1d4   : > { %v3517_v1 = vadd.f32 %v3516_v62, %v3390_v61  ;;  %v4555_v2 = vpack.c.bf16 %v2421_v63, %v2418_v54  ;;  %v3256_v3 = vadd.f32 %v3255_v60, %v2421_v63  ;;  %v3391_v4 = vmul.f32 %v2421_v63, %v2421_v63 }
 0x1d5   : > { %4664 = vst [vmem:[%s5693_s30 + $0x1a8] sm:$0xff] %v4560_v0   ;;  %v4945_v5 = vpop.f32.mrb[108].mxu1 }
 0x1d6   : > { %4663 = vst [vmem:[%s5693_s30 + $0x1a0] sm:$0xff] %v4555_v2   ;;  %v3257_v7 = vadd.f32 %v3256_v3, %v2426_v49  ;;  %v3518_v8 = vadd.f32 %v3517_v1, %v3391_v4  ;;  %v5089_v9 = vpop.f32.mrb[108].mxu0  ;;  %v1456_v10 = vpop.f32.mrb[109].mxu1 }
 0x1d7   : > { %v2442_v11 = vadd.f32 %v5089_v9, %v4945_v5  ;;  %v2433_v12 = vpop.f32.mrb[109].mxu0  ;;  %v4946_v13 = vpop.f32.mrb[110].mxu1 }
 0x1d8   : > { %v3519_v15 = vadd.f32 %v3518_v8, %v3392_v6  ;;  %v2434_v16 = vadd.f32 %v2433_v12, %v1456_v10  ;;  %v3258_v17 = vadd.f32 %v3257_v7, %v2429_v58  ;;  %v5090_v18 = vpop.f32.mrb[110].mxu0  ;;  %v1459_v19 = vpop.f32.mrb[111].mxu1 }
 0x1d9   : > { %v2445_v20 = vadd.f32 %v5090_v18, %v4946_v13  ;;  %v2436_v21 = vpop.f32.mrb[111].mxu0  ;;  %v3396_v32 = vmul.f32 %v2442_v11, %v2442_v11 }
 0x1da   : > { %v3259_v22 = vadd.f32 %v3258_v17, %v2434_v16  ;;  %v3394_v23 = vmul.f32 %v2434_v16, %v2434_v16  ;;  %v3520_v24 = vadd.f32 %v3519_v15, %v3393_v14  ;;  %v2437_v25 = vadd.f32 %v2436_v21, %v1459_v19 }
 0x1db   : > { %v4570_v26 = vpack.c.bf16 %v2445_v20, %v2442_v11  ;;  %v3397_v40 = vmul.f32 %v2445_v20, %v2445_v20 }
 0x1dc   : > { %v3521_v27 = vadd.f32 %v3520_v24, %v3394_v23  ;;  %v4565_v28 = vpack.c.bf16 %v2437_v25, %v2434_v16  ;;  %v3260_v29 = vadd.f32 %v3259_v22, %v2437_v25  ;;  %v3395_v30 = vmul.f32 %v2437_v25, %v2437_v25 }
 0x1dd   : > { %4666 = vst [vmem:[%s5693_s30 + $0x1b8] sm:$0xff] %v4570_v26   ;;  %v4949_v31 = vpop.f32.mrb[112].mxu1 }
 0x1de   : > { %4665 = vst [vmem:[%s5693_s30 + $0x1b0] sm:$0xff] %v4565_v28   ;;  %v3261_v33 = vadd.f32 %v3260_v29, %v2442_v11  ;;  %v3522_v34 = vadd.f32 %v3521_v27, %v3395_v30  ;;  %v5093_v35 = vpop.f32.mrb[112].mxu0  ;;  %v1472_v36 = vpop.f32.mrb[113].mxu1 }
 0x1df   : > { %v2458_v37 = vadd.f32 %v5093_v35, %v4949_v31  ;;  %v2449_v38 = vpop.f32.mrb[113].mxu0  ;;  %v4950_v39 = vpop.f32.mrb[114].mxu1 }
 0x1e0   : > { %v3523_v41 = vadd.f32 %v3522_v34, %v3396_v32  ;;  %v2450_v42 = vadd.f32 %v2449_v38, %v1472_v36  ;;  %v3262_v43 = vadd.f32 %v3261_v33, %v2445_v20  ;;  %v5094_v44 = vpop.f32.mrb[114].mxu0  ;;  %v1475_v45 = vpop.f32.mrb[115].mxu1 }
 0x1e1   : > { %v2461_v46 = vadd.f32 %v5094_v44, %v4950_v39  ;;  %v2452_v47 = vpop.f32.mrb[115].mxu0  ;;  %v3400_v58 = vmul.f32 %v2458_v37, %v2458_v37 }
 0x1e2   : > { %v3263_v48 = vadd.f32 %v3262_v43, %v2450_v42  ;;  %v3398_v49 = vmul.f32 %v2450_v42, %v2450_v42  ;;  %v3524_v50 = vadd.f32 %v3523_v41, %v3397_v40  ;;  %v2453_v51 = vadd.f32 %v2452_v47, %v1475_v45 }
 0x1e3   : > { %v4580_v52 = vpack.c.bf16 %v2461_v46, %v2458_v37  ;;  %v3401_v2 = vmul.f32 %v2461_v46, %v2461_v46 }
 0x1e4   : > { %v3525_v53 = vadd.f32 %v3524_v50, %v3398_v49  ;;  %v4575_v54 = vpack.c.bf16 %v2453_v51, %v2450_v42  ;;  %v3264_v55 = vadd.f32 %v3263_v48, %v2453_v51  ;;  %v3399_v56 = vmul.f32 %v2453_v51, %v2453_v51 }
 0x1e5   : > { %4668 = vst [vmem:[%s5693_s30 + $0x1c8] sm:$0xff] %v4580_v52   ;;  %v4953_v57 = vpop.f32.mrb[116].mxu1 }
 0x1e6   : > { %4667 = vst [vmem:[%s5693_s30 + $0x1c0] sm:$0xff] %v4575_v54   ;;  %v3265_v59 = vadd.f32 %v3264_v55, %v2458_v37  ;;  %v3526_v60 = vadd.f32 %v3525_v53, %v3399_v56  ;;  %v5097_v61 = vpop.f32.mrb[116].mxu0  ;;  %v1488_v62 = vpop.f32.mrb[117].mxu1 }
 0x1e7   : > { %v2474_v63 = vadd.f32 %v5097_v61, %v4953_v57  ;;  %v2465_v0 = vpop.f32.mrb[117].mxu0  ;;  %v4954_v1 = vpop.f32.mrb[118].mxu1 }
 0x1e8   : > { %v3527_v3 = vadd.f32 %v3526_v60, %v3400_v58  ;;  %v2466_v4 = vadd.f32 %v2465_v0, %v1488_v62  ;;  %v3266_v5 = vadd.f32 %v3265_v59, %v2461_v46  ;;  %v5098_v6 = vpop.f32.mrb[118].mxu0  ;;  %v1491_v7 = vpop.f32.mrb[119].mxu1 }
 0x1e9   : > { %v2477_v8 = vadd.f32 %v5098_v6, %v4954_v1  ;;  %v2468_v9 = vpop.f32.mrb[119].mxu0  ;;  %v3404_v20 = vmul.f32 %v2474_v63, %v2474_v63 }
 0x1ea   : > { %v3267_v10 = vadd.f32 %v3266_v5, %v2466_v4  ;;  %v3402_v11 = vmul.f32 %v2466_v4, %v2466_v4  ;;  %v3528_v12 = vadd.f32 %v3527_v3, %v3401_v2  ;;  %v2469_v13 = vadd.f32 %v2468_v9, %v1491_v7 }
 0x1eb   : > { %v4590_v14 = vpack.c.bf16 %v2477_v8, %v2474_v63  ;;  %v3405_v28 = vmul.f32 %v2477_v8, %v2477_v8 }
 0x1ec   : > { %v3529_v15 = vadd.f32 %v3528_v12, %v3402_v11  ;;  %v4585_v16 = vpack.c.bf16 %v2469_v13, %v2466_v4  ;;  %v3268_v17 = vadd.f32 %v3267_v10, %v2469_v13  ;;  %v3403_v18 = vmul.f32 %v2469_v13, %v2469_v13 }
 0x1ed   : > { %4670 = vst [vmem:[%s5693_s30 + $0x1d8] sm:$0xff] %v4590_v14   ;;  %v4957_v19 = vpop.f32.mrb[120].mxu1 }
 0x1ee   : > { %4669 = vst [vmem:[%s5693_s30 + $0x1d0] sm:$0xff] %v4585_v16   ;;  %v3269_v21 = vadd.f32 %v3268_v17, %v2474_v63  ;;  %v3530_v22 = vadd.f32 %v3529_v15, %v3403_v18  ;;  %v5101_v23 = vpop.f32.mrb[120].mxu0  ;;  %v1504_v24 = vpop.f32.mrb[121].mxu1 }
 0x1ef   : > { %v2490_v25 = vadd.f32 %v5101_v23, %v4957_v19  ;;  %v2481_v26 = vpop.f32.mrb[121].mxu0  ;;  %v4958_v27 = vpop.f32.mrb[122].mxu1 }
 0x1f0   : > { %v3531_v29 = vadd.f32 %v3530_v22, %v3404_v20  ;;  %v2482_v30 = vadd.f32 %v2481_v26, %v1504_v24  ;;  %v3270_v31 = vadd.f32 %v3269_v21, %v2477_v8  ;;  %v5102_v32 = vpop.f32.mrb[122].mxu0  ;;  %v1507_v33 = vpop.f32.mrb[123].mxu1 }
 0x1f1   : > { %v2493_v34 = vadd.f32 %v5102_v32, %v4958_v27  ;;  %v2484_v35 = vpop.f32.mrb[123].mxu0  ;;  %v3408_v46 = vmul.f32 %v2490_v25, %v2490_v25 }
 0x1f2   : > { %v3271_v36 = vadd.f32 %v3270_v31, %v2482_v30  ;;  %v3406_v37 = vmul.f32 %v2482_v30, %v2482_v30  ;;  %v3532_v38 = vadd.f32 %v3531_v29, %v3405_v28  ;;  %v2485_v39 = vadd.f32 %v2484_v35, %v1507_v33 }
 0x1f3   : > { %v4600_v40 = vpack.c.bf16 %v2493_v34, %v2490_v25  ;;  %v3409_v54 = vmul.f32 %v2493_v34, %v2493_v34 }
 0x1f4   : > { %v3533_v41 = vadd.f32 %v3532_v38, %v3406_v37  ;;  %v4595_v42 = vpack.c.bf16 %v2485_v39, %v2482_v30  ;;  %v3272_v43 = vadd.f32 %v3271_v36, %v2485_v39  ;;  %v3407_v44 = vmul.f32 %v2485_v39, %v2485_v39 }
 0x1f5   : > { %4672 = vst [vmem:[%s5693_s30 + $0x1e8] sm:$0xff] %v4600_v40   ;;  %v4961_v45 = vpop.f32.mrb[124].mxu1 }
 0x1f6   : > { %4671 = vst [vmem:[%s5693_s30 + $0x1e0] sm:$0xff] %v4595_v42   ;;  %v3273_v47 = vadd.f32 %v3272_v43, %v2490_v25  ;;  %v3534_v48 = vadd.f32 %v3533_v41, %v3407_v44  ;;  %v5105_v49 = vpop.f32.mrb[124].mxu0  ;;  %v1520_v50 = vpop.f32.mrb[125].mxu1 }
 0x1f7   : > { %v2506_v51 = vadd.f32 %v5105_v49, %v4961_v45  ;;  %v2497_v52 = vpop.f32.mrb[125].mxu0  ;;  %v4962_v53 = vpop.f32.mrb[126].mxu1 }
 0x1f8   : > { %v3535_v55 = vadd.f32 %v3534_v48, %v3408_v46  ;;  %v2498_v56 = vadd.f32 %v2497_v52, %v1520_v50  ;;  %v3274_v57 = vadd.f32 %v3273_v47, %v2493_v34  ;;  %v5106_v58 = vpop.f32.mrb[126].mxu0  ;;  %v1523_v59 = vpop.f32.mrb[127].mxu1 }
 0x1f9   : > { %v2509_v60 = vadd.f32 %v5106_v58, %v4962_v53  ;;  %v2500_v61 = vpop.f32.mrb[127].mxu0  ;;  %v3412_v7 = vmul.f32 %v2506_v51, %v2506_v51 }
 0x1fa   : > { %v3275_v62 = vadd.f32 %v3274_v57, %v2498_v56  ;;  %v3410_v63 = vmul.f32 %v2498_v56, %v2498_v56  ;;  %v3536_v0 = vadd.f32 %v3535_v55, %v3409_v54  ;;  %v2501_v1 = vadd.f32 %v2500_v61, %v1523_v59 }
 0x1fb   : > { %v4610_v2 = vpack.c.bf16 %v2509_v60, %v2506_v51  ;;  %v3413_v10 = vmul.f32 %v2509_v60, %v2509_v60 }
 0x1fc   : > { %v3537_v3 = vadd.f32 %v3536_v0, %v3410_v63  ;;  %v4605_v4 = vpack.c.bf16 %v2501_v1, %v2498_v56  ;;  %v3276_v5 = vadd.f32 %v3275_v62, %v2501_v1  ;;  %v3411_v6 = vmul.f32 %v2501_v1, %v2501_v1 }
 0x1fd   : > { %4674 = vst [vmem:[%s5693_s30 + $0x1f8] sm:$0xff] %v4610_v2  }
 0x1fe   : > { %4673 = vst [vmem:[%s5693_s30 + $0x1f0] sm:$0xff] %v4605_v4   ;;  %v3277_v8 = vadd.f32 %v3276_v5, %v2506_v51  ;;  %v3538_v9 = vadd.f32 %v3537_v3, %v3411_v6 }
 0x200   : > { %v3278_v11 = vadd.f32 %v3277_v8, %v2509_v60  ;;  %v3539_v12 = vadd.f32 %v3538_v9, %v3412_v7 }
 0x202   : > { %v3279_v13 = vrot.slane %v3278_v11, 4  ;;  %v3540_v14 = vadd.f32 %v3539_v12, %v3413_v10 }
 0x204   : > { %v3280_v15 = vadd.f32 %v3279_v13, %v3278_v11  ;;  %v3541_v16 = vrot.slane %v3540_v14, 4 }
 0x206   : > { %v3281_v17 = vrot.slane %v3280_v15, 2  ;;  %v3542_v18 = vadd.f32 %v3541_v16, %v3540_v14 }
 0x208   : > { %v3282_v19 = vadd.f32 %v3281_v17, %v3280_v15  ;;  %v3543_v20 = vrot.slane %v3542_v18, 2 }
 0x20a   : > { %v3283_v21 = vrot.slane %v3282_v19, 1  ;;  %v3544_v22 = vadd.f32 %v3543_v20, %v3542_v18 }
 0x20c   : > { %v3284_v23 = vadd.f32 %v3283_v21, %v3282_v19  ;;  %v3545_v24 = vrot.slane %v3544_v22, 1 }
 0x20e   : > { %3285 = vst [vmem:[%s252_s8] sm:$0x1] %v3284_v23  ;;  %v3546_v25 = vadd.f32 %v3545_v24, %v3544_v22 }
 0x210   : > { %3547 = vst [vmem:[%s259_s11] sm:$0x1] %v3546_v25 }
 0x211 PF: > { %s15_s19 = sadd.s32 1, %s5458_s19   ;;  %s5802_s15 = smov %s5450_s17 }
 0x212   : > { %p12_p8 = scmp.ge.s32.totalorder %s15_s19, 6   ;;  %s5803_s16 = smov %s5454_s18 }
 0x213   : > { %s5804_s17 = smov %s5807_s20  ;;  %s5805_s18 = smov %s5811_s21 }
 0x214   :  { %14 = sbr.rel (!%p12_p8) target bundleno = 3 (0x3), region = 85 }

// kernel: discriminator_forward.8
= control target key start
LH: loop header
LB: loop body
LE: loop exit
PB: predicated region body
PF: predicated region fallthrough
CT: control target
= control target key end

     0   :  { %s2941_s12 = smov 0   ;;  %s2943_s13 = smov 0   ;;  %s3408_s0 = inlined_call_operand.vmem [shape: bf16[2,32,64,128], index: 0, kind: input, shape index: {}]   ;;  %s3409_s1 = inlined_call_operand.vmem [shape: f32[1,128], index: 1, kind: input, shape index: {}]   ;;  %s3410_s2 = inlined_call_operand.vmem [shape: f32[1,128], index: 2, kind: input, shape index: {}]   ;;  %s3411_s3 = inlined_call_operand.vmem [shape: bf16[2,32,64,128], index: 3, kind: output, shape index: {}]  }
   0x1   :  { %s2945_s14 = smov 0   ;;  %s2947_s15 = smov 0  }
   0x2   :  { %s2949_s16 = smov 0  }
   0x3 LB: > { %s22_s17 = sadd.s32 1, %s2911_s14  ;;  %s25_s18 = sadd.s32 1, %s2915_s15  ;;  %s2919_s16 = sphi %s2949_s16, %s13_s16   ;;  %s2915_s15 = sphi %s2947_s15, %s3415_s15   ;;  %s2911_s14 = sphi %s2945_s14, %s3414_s14   ;;  %s2907_s13 = sphi %s2943_s13, %s3413_s13   ;;  %s2903_s12 = sphi %s2941_s12, %s3412_s12  }
   0x4   : > { %p23_p0 = scmp.ge.s32.totalorder %s22_s17, 2  ;;  %p1868_p1 = scmp.ge.s32.totalorder %s2919_s16, 1 }
   0x5   : > { %p159_p2 = scmp.lt.s32.totalorder %s2919_s16, 5 }
   0x6   : > { %s3417_s17 = smov (%p23_p0, %s22_s17), 0  ;;  %s3419_s18 = smov (!%p23_p0, %s25_s18), %s2915_s15 }
   0x7   : > { %p160_p3 = pnand %p1868_p1, %p159_p2  ;;  %p27_p4 = scmp.ge.s32.totalorder %s3419_s18, 2 }
   0x8   : > { %s1869_s19 = sshll.u32 (!%p160_p3), %s2903_s12, 4  ;;  %p194_p5 = scmp.lt.s32.totalorder (!%p160_p3), %s2907_s13, 1  ;;  %v2984_v0 = vld [vmem:[%s3409_s1] ss:$0 sm:$0xff] (!%p160_p3) }
   0x9   : > { %s3421_s18 = smov (%p27_p4, %s3419_s18), 0  ;;  %163 = sbr.rel (%p160_p3) target bundleno = 234 (0xea), region = 32 }
   0xa   : > { %p196_p6 = scmp.lt.s32.totalorder (!%p160_p3), %s1869_s19, 31  ;;  %v2993_v9 = vld [vmem:[%s3410_s2] ss:$0 sm:$0xff] (!%p160_p3) }
  0x10   : > { %s3423_s13 = smov (!%p194_p5, %s2907_s13), 1  ;;  %s3425_s19 = smov (!%p196_p6, %s1869_s19), 31 }
  0x11   : > { %s1871_s20 = sshll.u32 %s3423_s13, 8  ;;  %s1870_s21 = sshll.u32 %s3425_s19, 3 }
  0x12   : > { %s2971_s22 = sadd.s32 %s1871_s20, %s1870_s21 }
  0x13   : > { %s1872_s23 = sshll.u32 %s2971_s22, 2 }
  0x14   : > { %s2979_s26 = scalar_lea.vmem %s3408_s0, %s1872_s23  ;;  %s3016_s6 = scalar_lea.vmem %s3411_s3, %s1872_s23 }
  0x15   : > { %v2138_v1 = vld [vmem:[%s2979_s26] sm:$0xff]   ;;  %v2713_v2 = vld [vmem:[%s2979_s26 + $0x8] sm:$0xff]   ;;  %v2714_v3 = vld [vmem:[%s2979_s26 + $0x10] sm:$0xff]  }
  0x16   : > { %v2139_v4 = vunpack.c.l.bf16 %v2138_v1  ;;  %v2140_v5 = vunpack.c.h.bf16 %v2138_v1  ;;  %v2143_v6 = vunpack.c.l.bf16 %v2713_v2  ;;  %v2144_v7 = vunpack.c.h.bf16 %v2713_v2  ;;  %v2715_v8 = vld [vmem:[%s2979_s26 + $0x18] sm:$0xff]   ;;  %v2716_v36 = vld [vmem:[%s2979_s26 + $0x20] sm:$0xff]   ;;  %v2717_v41 = vld [vmem:[%s2979_s26 + $0x28] sm:$0xff]  }
  0x17   : > { %v2147_v10 = vunpack.c.l.bf16 %v2714_v3  ;;  %v2148_v11 = vunpack.c.h.bf16 %v2714_v3  ;;  %v2151_v12 = vunpack.c.l.bf16 %v2715_v8  ;;  %v2152_v13 = vunpack.c.h.bf16 %v2715_v8  ;;  %v2718_v52 = vld [vmem:[%s2979_s26 + $0x30] sm:$0xff]   ;;  %v2719_v53 = vld [vmem:[%s2979_s26 + $0x38] sm:$0xff]  }
  0x18   : > { %v478_v14 = vmul.f32 %v2139_v4, %v2984_v0  ;;  %v479_v15 = vmul.f32 %v2140_v5, %v2984_v0  ;;  %v480_v16 = vmul.f32 %v2143_v6, %v2984_v0  ;;  %v481_v17 = vmul.f32 %v2144_v7, %v2984_v0 }
  0x19   : > { %v482_v18 = vmul.f32 %v2147_v10, %v2984_v0  ;;  %v483_v19 = vmul.f32 %v2148_v11, %v2984_v0  ;;  %v484_v20 = vmul.f32 %v2151_v12, %v2984_v0  ;;  %v485_v21 = vmul.f32 %v2152_v13, %v2984_v0 }
  0x1a   : > { %v613_v22 = vadd.f32 %v2993_v9, %v478_v14  ;;  %v614_v23 = vadd.f32 %v2993_v9, %v479_v15  ;;  %v615_v24 = vadd.f32 %v2993_v9, %v480_v16  ;;  %v616_v25 = vadd.f32 %v2993_v9, %v481_v17 }
  0x1b   : > { %v617_v26 = vadd.f32 %v2993_v9, %v482_v18  ;;  %v618_v27 = vadd.f32 %v2993_v9, %v483_v19  ;;  %v619_v28 = vadd.f32 %v2993_v9, %v484_v20  ;;  %v620_v29 = vadd.f32 %v2993_v9, %v485_v21  ;;  %v2720_v20 = vld [vmem:[%s2979_s26 + $0x40] sm:$0xff]  }
  0x1c   : > { %vm741_vm0 = vcmp.gt.f32.partialorder %v613_v22, 0.0  ;;  %vm742_vm1 = vcmp.gt.f32.partialorder %v614_v23, 0.0  ;;  %v869_v30 = vmul.f32 0.2, %v613_v22  ;;  %v870_v31 = vmul.f32 0.2, %v614_v23 }
  0x1d   : > { %vm743_vm2 = vcmp.gt.f32.partialorder %v615_v24, 0.0  ;;  %vm744_vm3 = vcmp.gt.f32.partialorder %v616_v25, 0.0  ;;  %v871_v32 = vmul.f32 0.2, %v615_v24  ;;  %v872_v33 = vmul.f32 0.2, %v616_v25 }
  0x1e   : > { %v997_v34 = vsel %vm741_vm0, %v613_v22, %v869_v30  ;;  %v998_v35 = vsel %vm742_vm1, %v614_v23, %v870_v31  ;;  %vm745_vm4 = vcmp.gt.f32.partialorder %v617_v26, 0.0  ;;  %vm746_vm5 = vcmp.gt.f32.partialorder %v618_v27, 0.0 }
  0x1f   : > { %v2396_v37 = vpack.c.bf16 %v998_v35, %v997_v34  ;;  %v999_v38 = vsel %vm743_vm2, %v615_v24, %v871_v32  ;;  %v1000_v39 = vsel %vm744_vm3, %v616_v25, %v872_v33  ;;  %v873_v40 = vmul.f32 0.2, %v617_v26  ;;  %v2721_v24 = vld [vmem:[%s2979_s26 + $0x48] sm:$0xff]  }
  0x20   : > { %v2401_v42 = vpack.c.bf16 %v1000_v39, %v999_v38  ;;  %v874_v43 = vmul.f32 0.2, %v618_v27  ;;  %vm747_vm6 = vcmp.gt.f32.partialorder %v619_v28, 0.0  ;;  %vm748_vm7 = vcmp.gt.f32.partialorder %v620_v29, 0.0 }
  0x21   : > { %2397 = vst [vmem:[%s3016_s6] sm:$0xff] %v2396_v37   ;;  %v1001_v44 = vsel %vm745_vm4, %v617_v26, %v873_v40  ;;  %v875_v45 = vmul.f32 0.2, %v619_v28  ;;  %v876_v46 = vmul.f32 0.2, %v620_v29  ;;  %v2155_v47 = vunpack.c.l.bf16 %v2716_v36 }
  0x22   : > { %2776 = vst [vmem:[%s3016_s6 + $0x8] sm:$0xff] %v2401_v42   ;;  %v1002_v48 = vsel %vm746_vm5, %v618_v27, %v874_v43  ;;  %v2156_v49 = vunpack.c.h.bf16 %v2716_v36  ;;  %v2159_v50 = vunpack.c.l.bf16 %v2717_v41  ;;  %v2160_v51 = vunpack.c.h.bf16 %v2717_v41  ;;  %v2722_v36 = vld [vmem:[%s2979_s26 + $0x50] sm:$0xff]  }
  0x23   : > { %v2406_v54 = vpack.c.bf16 %v1002_v48, %v1001_v44  ;;  %v1003_v55 = vsel %vm747_vm6, %v619_v28, %v875_v45  ;;  %v1004_v56 = vsel %vm748_vm7, %v620_v29, %v876_v46  ;;  %v486_v57 = vmul.f32 %v2155_v47, %v2984_v0 }
  0x24   : > { %v2411_v58 = vpack.c.bf16 %v1004_v56, %v1003_v55  ;;  %v487_v59 = vmul.f32 %v2156_v49, %v2984_v0  ;;  %v488_v60 = vmul.f32 %v2159_v50, %v2984_v0  ;;  %v489_v61 = vmul.f32 %v2160_v51, %v2984_v0  ;;  %v2723_v55 = vld [vmem:[%s2979_s26 + $0x58] sm:$0xff]  }
  0x25   : > { %2777 = vst [vmem:[%s3016_s6 + $0x10] sm:$0xff] %v2406_v54   ;;  %v621_v62 = vadd.f32 %v2993_v9, %v486_v57  ;;  %v2163_v63 = vunpack.c.l.bf16 %v2718_v52  ;;  %v2164_v1 = vunpack.c.h.bf16 %v2718_v52  ;;  %v2167_v2 = vunpack.c.l.bf16 %v2719_v53 }
  0x26   : > { %2778 = vst [vmem:[%s3016_s6 + $0x18] sm:$0xff] %v2411_v58   ;;  %v622_v3 = vadd.f32 %v2993_v9, %v487_v59  ;;  %v623_v4 = vadd.f32 %v2993_v9, %v488_v60  ;;  %v624_v5 = vadd.f32 %v2993_v9, %v489_v61  ;;  %v2168_v6 = vunpack.c.h.bf16 %v2719_v53 }
  0x27   : > { %vm749_vm8 = vcmp.gt.f32.partialorder %v621_v62, 0.0  ;;  %v877_v7 = vmul.f32 0.2, %v621_v62  ;;  %v490_v8 = vmul.f32 %v2163_v63, %v2984_v0  ;;  %v491_v10 = vmul.f32 %v2164_v1, %v2984_v0  ;;  %v2724_v1 = vld [vmem:[%s2979_s26 + $0x60] sm:$0xff]  }
  0x28   : > { %vm750_vm9 = vcmp.gt.f32.partialorder %v622_v3, 0.0  ;;  %v878_v11 = vmul.f32 0.2, %v622_v3  ;;  %vm751_vm10 = vcmp.gt.f32.partialorder %v623_v4, 0.0  ;;  %vm752_vm11 = vcmp.gt.f32.partialorder %v624_v5, 0.0 }
  0x29   : > { %v1005_v12 = vsel %vm749_vm8, %v621_v62, %v877_v7  ;;  %v879_v13 = vmul.f32 0.2, %v623_v4  ;;  %v880_v14 = vmul.f32 0.2, %v624_v5  ;;  %v625_v15 = vadd.f32 %v2993_v9, %v490_v8 }
  0x2a   : > { %v1006_v16 = vsel %vm750_vm9, %v622_v3, %v878_v11  ;;  %v626_v17 = vadd.f32 %v2993_v9, %v491_v10  ;;  %v492_v18 = vmul.f32 %v2167_v2, %v2984_v0  ;;  %v493_v19 = vmul.f32 %v2168_v6, %v2984_v0  ;;  %v2725_v6 = vld [vmem:[%s2979_s26 + $0x68] sm:$0xff]  }
  0x2b   : > { %v2416_v21 = vpack.c.bf16 %v1006_v16, %v1005_v12  ;;  %v1007_v22 = vsel %vm751_vm10, %v623_v4, %v879_v13  ;;  %v1008_v23 = vsel %vm752_vm11, %v624_v5, %v880_v14  ;;  %vm753_vm12 = vcmp.gt.f32.partialorder %v625_v15, 0.0 }
  0x2c   : > { %v2421_v25 = vpack.c.bf16 %v1008_v23, %v1007_v22  ;;  %vm754_vm13 = vcmp.gt.f32.partialorder %v626_v17, 0.0  ;;  %v881_v26 = vmul.f32 0.2, %v625_v15  ;;  %v882_v27 = vmul.f32 0.2, %v626_v17  ;;  %v2726_v22 = vld [vmem:[%s2979_s26 + $0x70] sm:$0xff]  }
  0x2d   : > { %2779 = vst [vmem:[%s3016_s6 + $0x20] sm:$0xff] %v2416_v21   ;;  %v627_v28 = vadd.f32 %v2993_v9, %v492_v18  ;;  %v628_v29 = vadd.f32 %v2993_v9, %v493_v19  ;;  %v2171_v30 = vunpack.c.l.bf16 %v2720_v20  ;;  %v2172_v31 = vunpack.c.h.bf16 %v2720_v20 }
  0x2e   : > { %2780 = vst [vmem:[%s3016_s6 + $0x28] sm:$0xff] %v2421_v25   ;;  %v1009_v32 = vsel %vm753_vm12, %v625_v15, %v881_v26  ;;  %v1010_v33 = vsel %vm754_vm13, %v626_v17, %v882_v27  ;;  %v2175_v34 = vunpack.c.l.bf16 %v2721_v24  ;;  %v2176_v35 = vunpack.c.h.bf16 %v2721_v24 }
  0x2f   : > { %v2426_v37 = vpack.c.bf16 %v1010_v33, %v1009_v32  ;;  %vm755_vm14 = vcmp.gt.f32.partialorder %v627_v28, 0.0  ;;  %vm756_vm15 = vcmp.gt.f32.partialorder %v628_v29, 0.0  ;;  %v883_v38 = vmul.f32 0.2, %v627_v28 }
  0x30   : > { %v884_v39 = vmul.f32 0.2, %v628_v29  ;;  %v494_v40 = vmul.f32 %v2171_v30, %v2984_v0  ;;  %v495_v41 = vmul.f32 %v2172_v31, %v2984_v0  ;;  %v496_v42 = vmul.f32 %v2175_v34, %v2984_v0 }
  0x31   : > { %2781 = vst [vmem:[%s3016_s6 + $0x30] sm:$0xff] %v2426_v37   ;;  %v1011_v43 = vsel %vm755_vm14, %v627_v28, %v883_v38  ;;  %v497_v44 = vmul.f32 %v2176_v35, %v2984_v0  ;;  %v2179_v45 = vunpack.c.l.bf16 %v2722_v36  ;;  %v2180_v46 = vunpack.c.h.bf16 %v2722_v36 }
  0x32   : > { %v1012_v47 = vsel %vm756_vm15, %v628_v29, %v884_v39  ;;  %v629_v48 = vadd.f32 %v2993_v9, %v494_v40  ;;  %v630_v49 = vadd.f32 %v2993_v9, %v495_v41  ;;  %v631_v50 = vadd.f32 %v2993_v9, %v496_v42  ;;  %v2727_v41 = vld [vmem:[%s2979_s26 + $0x78] sm:$0xff]  }
  0x33   : > { %v2431_v51 = vpack.c.bf16 %v1012_v47, %v1011_v43  ;;  %v632_v52 = vadd.f32 %v2993_v9, %v497_v44  ;;  %v498_v53 = vmul.f32 %v2179_v45, %v2984_v0  ;;  %v499_v54 = vmul.f32 %v2180_v46, %v2984_v0  ;;  %v2728_v46 = vld [vmem:[%s2979_s26 + $0x80] sm:$0xff]   ;;  %v2729_v47 = vld [vmem:[%s2979_s26 + $0x88] sm:$0xff]  }
  0x34   : > { %vm757_vm0 = vcmp.gt.f32.partialorder %v629_v48, 0.0  ;;  %vm758_vm1 = vcmp.gt.f32.partialorder %v630_v49, 0.0  ;;  %v885_v56 = vmul.f32 0.2, %v629_v48  ;;  %v886_v57 = vmul.f32 0.2, %v630_v49 }
  0x35   : > { %2782 = vst [vmem:[%s3016_s6 + $0x38] sm:$0xff] %v2431_v51   ;;  %vm759_vm2 = vcmp.gt.f32.partialorder %v631_v50, 0.0  ;;  %vm760_vm3 = vcmp.gt.f32.partialorder %v632_v52, 0.0  ;;  %v887_v58 = vmul.f32 0.2, %v631_v50  ;;  %v633_v62 = vadd.f32 %v2993_v9, %v498_v53 }
  0x36   : > { %v888_v59 = vmul.f32 0.2, %v632_v52  ;;  %v1013_v60 = vsel %vm757_vm0, %v629_v48, %v885_v56  ;;  %v1014_v61 = vsel %vm758_vm1, %v630_v49, %v886_v57  ;;  %v634_v63 = vadd.f32 %v2993_v9, %v499_v54 }
  0x37   : > { %v2436_v2 = vpack.c.bf16 %v1014_v61, %v1013_v60  ;;  %v1015_v3 = vsel %vm759_vm2, %v631_v50, %v887_v58  ;;  %v2183_v5 = vunpack.c.l.bf16 %v2723_v55  ;;  %vm761_vm4 = vcmp.gt.f32.partialorder %v633_v62, 0.0 }
  0x38   : > { %v1016_v4 = vsel %vm760_vm3, %v632_v52, %v888_v59  ;;  %vm762_vm5 = vcmp.gt.f32.partialorder %v634_v63, 0.0  ;;  %v889_v8 = vmul.f32 0.2, %v633_v62  ;;  %v890_v10 = vmul.f32 0.2, %v634_v63 }
  0x39   : > { %v2441_v7 = vpack.c.bf16 %v1016_v4, %v1015_v3  ;;  %2783 = vst [vmem:[%s3016_s6 + $0x40] sm:$0xff] %v2436_v2   ;;  %v2184_v11 = vunpack.c.h.bf16 %v2723_v55  ;;  %v500_v12 = vmul.f32 %v2183_v5, %v2984_v0  ;;  %v2187_v13 = vunpack.c.l.bf16 %v2724_v1 }
  0x3a   : > { %v1017_v14 = vsel %vm761_vm4, %v633_v62, %v889_v8  ;;  %v2188_v15 = vunpack.c.h.bf16 %v2724_v1  ;;  %v2191_v16 = vunpack.c.l.bf16 %v2725_v6  ;;  %v2192_v17 = vunpack.c.h.bf16 %v2725_v6 }
  0x3b   : > { %2784 = vst [vmem:[%s3016_s6 + $0x48] sm:$0xff] %v2441_v7   ;;  %v1018_v18 = vsel %vm762_vm5, %v634_v63, %v890_v10  ;;  %v501_v19 = vmul.f32 %v2184_v11, %v2984_v0  ;;  %v635_v20 = vadd.f32 %v2993_v9, %v500_v12  ;;  %v502_v21 = vmul.f32 %v2187_v13, %v2984_v0 }
  0x3c   : > { %v2446_v23 = vpack.c.bf16 %v1018_v18, %v1017_v14  ;;  %v503_v24 = vmul.f32 %v2188_v15, %v2984_v0  ;;  %v504_v25 = vmul.f32 %v2191_v16, %v2984_v0  ;;  %v505_v26 = vmul.f32 %v2192_v17, %v2984_v0  ;;  %v2730_v14 = vld [vmem:[%s2979_s26 + $0x90] sm:$0xff]  }
  0x3d   : > { %v636_v27 = vadd.f32 %v2993_v9, %v501_v19  ;;  %vm763_vm6 = vcmp.gt.f32.partialorder %v635_v20, 0.0  ;;  %v891_v28 = vmul.f32 0.2, %v635_v20  ;;  %v637_v29 = vadd.f32 %v2993_v9, %v502_v21 }
  0x3e   : > { %2785 = vst [vmem:[%s3016_s6 + $0x50] sm:$0xff] %v2446_v23   ;;  %v638_v30 = vadd.f32 %v2993_v9, %v503_v24  ;;  %v639_v31 = vadd.f32 %v2993_v9, %v504_v25  ;;  %v640_v32 = vadd.f32 %v2993_v9, %v505_v26  ;;  %v2195_v33 = vunpack.c.l.bf16 %v2726_v22  ;;  %v2731_v25 = vld [vmem:[%s2979_s26 + $0x98] sm:$0xff]  }
  0x3f   : > { %vm764_vm7 = vcmp.gt.f32.partialorder %v636_v27, 0.0  ;;  %v892_v34 = vmul.f32 0.2, %v636_v27  ;;  %v1019_v35 = vsel %vm763_vm6, %v635_v20, %v891_v28  ;;  %vm765_vm8 = vcmp.gt.f32.partialorder %v637_v29, 0.0 }
  0x40   : > { %vm766_vm9 = vcmp.gt.f32.partialorder %v638_v30, 0.0  ;;  %v893_v36 = vmul.f32 0.2, %v637_v29  ;;  %v894_v37 = vmul.f32 0.2, %v638_v30  ;;  %vm767_vm10 = vcmp.gt.f32.partialorder %v639_v31, 0.0 }
  0x41   : > { %v1020_v38 = vsel %vm764_vm7, %v636_v27, %v892_v34  ;;  %vm768_vm11 = vcmp.gt.f32.partialorder %v640_v32, 0.0  ;;  %v895_v39 = vmul.f32 0.2, %v639_v31  ;;  %v896_v40 = vmul.f32 0.2, %v640_v32 }
  0x42   : > { %v2451_v42 = vpack.c.bf16 %v1020_v38, %v1019_v35  ;;  %v1021_v43 = vsel %vm765_vm8, %v637_v29, %v893_v36  ;;  %v1022_v44 = vsel %vm766_vm9, %v638_v30, %v894_v37  ;;  %v2196_v45 = vunpack.c.h.bf16 %v2726_v22  ;;  %v2732_v30 = vld [vmem:[%s2979_s26 + $0xa0] sm:$0xff]  }
  0x43   : > { %v2456_v48 = vpack.c.bf16 %v1022_v44, %v1021_v43  ;;  %v1023_v49 = vsel %vm767_vm10, %v639_v31, %v895_v39  ;;  %v1024_v50 = vsel %vm768_vm11, %v640_v32, %v896_v40  ;;  %v506_v51 = vmul.f32 %v2195_v33, %v2984_v0 }
  0x44   : > { %2786 = vst [vmem:[%s3016_s6 + $0x58] sm:$0xff] %v2451_v42   ;;  %v2461_v52 = vpack.c.bf16 %v1024_v50, %v1023_v49  ;;  %v507_v53 = vmul.f32 %v2196_v45, %v2984_v0  ;;  %v2199_v54 = vunpack.c.l.bf16 %v2727_v41  ;;  %v2200_v55 = vunpack.c.h.bf16 %v2727_v41  ;;  %v2733_v45 = vld [vmem:[%s2979_s26 + $0xa8] sm:$0xff]  }
  0x45   : > { %2787 = vst [vmem:[%s3016_s6 + $0x60] sm:$0xff] %v2456_v48   ;;  %v641_v56 = vadd.f32 %v2993_v9, %v506_v51  ;;  %v2203_v57 = vunpack.c.l.bf16 %v2728_v46  ;;  %v2204_v58 = vunpack.c.h.bf16 %v2728_v46  ;;  %v2207_v59 = vunpack.c.l.bf16 %v2729_v47 }
  0x46   : > { %2788 = vst [vmem:[%s3016_s6 + $0x68] sm:$0xff] %v2461_v52   ;;  %v642_v60 = vadd.f32 %v2993_v9, %v507_v53  ;;  %v508_v61 = vmul.f32 %v2199_v54, %v2984_v0  ;;  %v509_v62 = vmul.f32 %v2200_v55, %v2984_v0  ;;  %v2208_v63 = vunpack.c.h.bf16 %v2729_v47 }
  0x47   : > { %vm769_vm12 = vcmp.gt.f32.partialorder %v641_v56, 0.0  ;;  %v897_v1 = vmul.f32 0.2, %v641_v56  ;;  %v510_v2 = vmul.f32 %v2203_v57, %v2984_v0  ;;  %v511_v3 = vmul.f32 %v2204_v58, %v2984_v0 }
  0x48   : > { %vm770_vm13 = vcmp.gt.f32.partialorder %v642_v60, 0.0  ;;  %v898_v4 = vmul.f32 0.2, %v642_v60  ;;  %v643_v5 = vadd.f32 %v2993_v9, %v508_v61  ;;  %v644_v6 = vadd.f32 %v2993_v9, %v509_v62  ;;  %v2734_v62 = vld [vmem:[%s2979_s26 + $0xb0] sm:$0xff]  }
  0x49   : > { %v1025_v7 = vsel %vm769_vm12, %v641_v56, %v897_v1  ;;  %v645_v8 = vadd.f32 %v2993_v9, %v510_v2  ;;  %v646_v10 = vadd.f32 %v2993_v9, %v511_v3  ;;  %v512_v11 = vmul.f32 %v2207_v59, %v2984_v0  ;;  %v2735_v3 = vld [vmem:[%s2979_s26 + $0xb8] sm:$0xff]  }
  0x4a   : > { %v1026_v12 = vsel %vm770_vm13, %v642_v60, %v898_v4  ;;  %vm771_vm14 = vcmp.gt.f32.partialorder %v643_v5, 0.0  ;;  %vm772_vm15 = vcmp.gt.f32.partialorder %v644_v6, 0.0  ;;  %v899_v13 = vmul.f32 0.2, %v643_v5 }
  0x4b   : > { %v2466_v15 = vpack.c.bf16 %v1026_v12, %v1025_v7  ;;  %v900_v16 = vmul.f32 0.2, %v644_v6  ;;  %vm773_vm0 = vcmp.gt.f32.partialorder %v645_v8, 0.0  ;;  %vm774_vm1 = vcmp.gt.f32.partialorder %v646_v10, 0.0 }
  0x4c   : > { %v1027_v17 = vsel %vm771_vm14, %v643_v5, %v899_v13  ;;  %v901_v18 = vmul.f32 0.2, %v645_v8  ;;  %v902_v19 = vmul.f32 0.2, %v646_v10  ;;  %v513_v20 = vmul.f32 %v2208_v63, %v2984_v0 }
  0x4d   : > { %2789 = vst [vmem:[%s3016_s6 + $0x70] sm:$0xff] %v2466_v15   ;;  %v1028_v21 = vsel %vm772_vm15, %v644_v6, %v900_v16  ;;  %v647_v22 = vadd.f32 %v2993_v9, %v512_v11  ;;  %v2211_v23 = vunpack.c.l.bf16 %v2730_v14  ;;  %v2212_v24 = vunpack.c.h.bf16 %v2730_v14 }
  0x4e   : > { %v2471_v26 = vpack.c.bf16 %v1028_v21, %v1027_v17  ;;  %v1029_v27 = vsel %vm773_vm0, %v645_v8, %v901_v18  ;;  %v1030_v28 = vsel %vm774_vm1, %v646_v10, %v902_v19  ;;  %v648_v29 = vadd.f32 %v2993_v9, %v513_v20  ;;  %v2736_v20 = vld [vmem:[%s2979_s26 + $0xc0] sm:$0xff]  }
  0x4f   : > { %v2476_v31 = vpack.c.bf16 %v1030_v28, %v1029_v27  ;;  %vm775_vm2 = vcmp.gt.f32.partialorder %v647_v22, 0.0  ;;  %v903_v32 = vmul.f32 0.2, %v647_v22  ;;  %v514_v33 = vmul.f32 %v2211_v23, %v2984_v0 }
  0x50   : > { %2790 = vst [vmem:[%s3016_s6 + $0x78] sm:$0xff] %v2471_v26   ;;  %vm776_vm3 = vcmp.gt.f32.partialorder %v648_v29, 0.0  ;;  %v904_v34 = vmul.f32 0.2, %v648_v29  ;;  %v515_v35 = vmul.f32 %v2212_v24, %v2984_v0  ;;  %v2215_v36 = vunpack.c.l.bf16 %v2731_v25 }
  0x51   : > { %2791 = vst [vmem:[%s3016_s6 + $0x80] sm:$0xff] %v2476_v31   ;;  %v1031_v37 = vsel %vm775_vm2, %v647_v22, %v903_v32  ;;  %v649_v38 = vadd.f32 %v2993_v9, %v514_v33  ;;  %v2216_v39 = vunpack.c.h.bf16 %v2731_v25  ;;  %v2219_v40 = vunpack.c.l.bf16 %v2732_v30 }
  0x52   : > { %v1032_v41 = vsel %vm776_vm3, %v648_v29, %v904_v34  ;;  %v650_v42 = vadd.f32 %v2993_v9, %v515_v35  ;;  %v516_v43 = vmul.f32 %v2215_v36, %v2984_v0  ;;  %v2220_v44 = vunpack.c.h.bf16 %v2732_v30  ;;  %v2737_v34 = vld [vmem:[%s2979_s26 + $0xc8] sm:$0xff]  }
  0x53   : > { %v2481_v46 = vpack.c.bf16 %v1032_v41, %v1031_v37  ;;  %vm777_vm4 = vcmp.gt.f32.partialorder %v649_v38, 0.0  ;;  %v905_v47 = vmul.f32 0.2, %v649_v38  ;;  %v517_v48 = vmul.f32 %v2216_v39, %v2984_v0 }
  0x54   : > { %vm778_vm5 = vcmp.gt.f32.partialorder %v650_v42, 0.0  ;;  %v906_v49 = vmul.f32 0.2, %v650_v42  ;;  %v651_v50 = vadd.f32 %v2993_v9, %v516_v43  ;;  %v518_v51 = vmul.f32 %v2219_v40, %v2984_v0 }
  0x55   : > { %2792 = vst [vmem:[%s3016_s6 + $0x88] sm:$0xff] %v2481_v46   ;;  %v1033_v52 = vsel %vm777_vm4, %v649_v38, %v905_v47  ;;  %v652_v53 = vadd.f32 %v2993_v9, %v517_v48  ;;  %v519_v54 = vmul.f32 %v2220_v44, %v2984_v0  ;;  %v2223_v55 = vunpack.c.l.bf16 %v2733_v45  ;;  %v2738_v44 = vld [vmem:[%s2979_s26 + $0xd0] sm:$0xff]  }
  0x56   : > { %v1034_v56 = vsel %vm778_vm5, %v650_v42, %v906_v49  ;;  %vm779_vm6 = vcmp.gt.f32.partialorder %v651_v50, 0.0  ;;  %v907_v57 = vmul.f32 0.2, %v651_v50  ;;  %v653_v58 = vadd.f32 %v2993_v9, %v518_v51 }
  0x57   : > { %v2486_v59 = vpack.c.bf16 %v1034_v56, %v1033_v52  ;;  %vm780_vm7 = vcmp.gt.f32.partialorder %v652_v53, 0.0  ;;  %v908_v60 = vmul.f32 0.2, %v652_v53  ;;  %v654_v61 = vadd.f32 %v2993_v9, %v519_v54 }
  0x58   : > { %v1035_v63 = vsel %vm779_vm6, %v651_v50, %v907_v57  ;;  %vm781_vm8 = vcmp.gt.f32.partialorder %v653_v58, 0.0  ;;  %v909_v1 = vmul.f32 0.2, %v653_v58  ;;  %v2224_v2 = vunpack.c.h.bf16 %v2733_v45  ;;  %v2739_v45 = vld [vmem:[%s2979_s26 + $0xd8] sm:$0xff]  }
  0x59   : > { %2793 = vst [vmem:[%s3016_s6 + $0x90] sm:$0xff] %v2486_v59   ;;  %v1036_v4 = vsel %vm780_vm7, %v652_v53, %v908_v60  ;;  %vm782_vm9 = vcmp.gt.f32.partialorder %v654_v61, 0.0  ;;  %v910_v5 = vmul.f32 0.2, %v654_v61  ;;  %v520_v6 = vmul.f32 %v2223_v55, %v2984_v0 }
  0x5a   : > { %v2491_v7 = vpack.c.bf16 %v1036_v4, %v1035_v63  ;;  %v1037_v8 = vsel %vm781_vm8, %v653_v58, %v909_v1  ;;  %v521_v10 = vmul.f32 %v2224_v2, %v2984_v0  ;;  %v2227_v11 = vunpack.c.l.bf16 %v2734_v62 }
  0x5b   : > { %v1038_v12 = vsel %vm782_vm9, %v654_v61, %v910_v5  ;;  %v655_v13 = vadd.f32 %v2993_v9, %v520_v6  ;;  %v2228_v14 = vunpack.c.h.bf16 %v2734_v62  ;;  %v2231_v15 = vunpack.c.l.bf16 %v2735_v3 }
  0x5c   : > { %2794 = vst [vmem:[%s3016_s6 + $0x98] sm:$0xff] %v2491_v7   ;;  %v2496_v16 = vpack.c.bf16 %v1038_v12, %v1037_v8  ;;  %v656_v17 = vadd.f32 %v2993_v9, %v521_v10  ;;  %v522_v18 = vmul.f32 %v2227_v11, %v2984_v0  ;;  %v2232_v19 = vunpack.c.h.bf16 %v2735_v3  ;;  %v2740_v12 = vld [vmem:[%s2979_s26 + $0xe0] sm:$0xff]  }
  0x5d   : > { %vm783_vm10 = vcmp.gt.f32.partialorder %v655_v13, 0.0  ;;  %v911_v21 = vmul.f32 0.2, %v655_v13  ;;  %v523_v22 = vmul.f32 %v2228_v14, %v2984_v0  ;;  %v524_v23 = vmul.f32 %v2231_v15, %v2984_v0 }
  0x5e   : > { %2795 = vst [vmem:[%s3016_s6 + $0xa0] sm:$0xff] %v2496_v16   ;;  %vm784_vm11 = vcmp.gt.f32.partialorder %v656_v17, 0.0  ;;  %v912_v24 = vmul.f32 0.2, %v656_v17  ;;  %v657_v25 = vadd.f32 %v2993_v9, %v522_v18  ;;  %v525_v26 = vmul.f32 %v2232_v19, %v2984_v0  ;;  %v2741_v16 = vld [vmem:[%s2979_s26 + $0xe8] sm:$0xff]  }
  0x5f   : > { %v1039_v27 = vsel %vm783_vm10, %v655_v13, %v911_v21  ;;  %v658_v28 = vadd.f32 %v2993_v9, %v523_v22  ;;  %v659_v29 = vadd.f32 %v2993_v9, %v524_v23  ;;  %v2235_v30 = vunpack.c.l.bf16 %v2736_v20 }
  0x60   : > { %v1040_v31 = vsel %vm784_vm11, %v656_v17, %v912_v24  ;;  %vm785_vm12 = vcmp.gt.f32.partialorder %v657_v25, 0.0  ;;  %v913_v32 = vmul.f32 0.2, %v657_v25  ;;  %v660_v33 = vadd.f32 %v2993_v9, %v525_v26 }
  0x61   : > { %v2501_v35 = vpack.c.bf16 %v1040_v31, %v1039_v27  ;;  %vm786_vm13 = vcmp.gt.f32.partialorder %v658_v28, 0.0  ;;  %v914_v36 = vmul.f32 0.2, %v658_v28  ;;  %vm787_vm14 = vcmp.gt.f32.partialorder %v659_v29, 0.0 }
  0x62   : > { %v1041_v37 = vsel %vm785_vm12, %v657_v25, %v913_v32  ;;  %vm788_vm15 = vcmp.gt.f32.partialorder %v660_v33, 0.0  ;;  %v915_v38 = vmul.f32 0.2, %v659_v29  ;;  %v916_v39 = vmul.f32 0.2, %v660_v33 }
  0x63   : > { %2796 = vst [vmem:[%s3016_s6 + $0xa8] sm:$0xff] %v2501_v35   ;;  %v1042_v40 = vsel %vm786_vm13, %v658_v28, %v914_v36  ;;  %v2236_v41 = vunpack.c.h.bf16 %v2736_v20  ;;  %v526_v42 = vmul.f32 %v2235_v30, %v2984_v0  ;;  %v2239_v43 = vunpack.c.l.bf16 %v2737_v34  ;;  %v2742_v28 = vld [vmem:[%s2979_s26 + $0xf0] sm:$0xff]  }
  0x64   : > { %v2506_v46 = vpack.c.bf16 %v1042_v40, %v1041_v37  ;;  %v1043_v47 = vsel %vm787_vm14, %v659_v29, %v915_v38  ;;  %v1044_v48 = vsel %vm788_vm15, %v660_v33, %v916_v39  ;;  %v2240_v49 = vunpack.c.h.bf16 %v2737_v34 }
  0x65   : > { %v2511_v50 = vpack.c.bf16 %v1044_v48, %v1043_v47  ;;  %v527_v51 = vmul.f32 %v2236_v41, %v2984_v0  ;;  %v661_v52 = vadd.f32 %v2993_v9, %v526_v42  ;;  %v528_v53 = vmul.f32 %v2239_v43, %v2984_v0  ;;  %v2743_v47 = vld [vmem:[%s2979_s26 + $0xf8] sm:$0xff]  }
  0x66   : > { %2797 = vst [vmem:[%s3016_s6 + $0xb0] sm:$0xff] %v2506_v46   ;;  %v529_v54 = vmul.f32 %v2240_v49, %v2984_v0  ;;  %v2243_v55 = vunpack.c.l.bf16 %v2738_v44  ;;  %v2244_v56 = vunpack.c.h.bf16 %v2738_v44  ;;  %v2247_v57 = vunpack.c.l.bf16 %v2739_v45 }
  0x67   : > { %2798 = vst [vmem:[%s3016_s6 + $0xb8] sm:$0xff] %v2511_v50   ;;  %v662_v58 = vadd.f32 %v2993_v9, %v527_v51  ;;  %vm789_vm0 = vcmp.gt.f32.partialorder %v661_v52, 0.0  ;;  %v917_v59 = vmul.f32 0.2, %v661_v52  ;;  %v663_v60 = vadd.f32 %v2993_v9, %v528_v53 }
  0x68   : > { %v664_v61 = vadd.f32 %v2993_v9, %v529_v54  ;;  %v530_v62 = vmul.f32 %v2243_v55, %v2984_v0  ;;  %v531_v63 = vmul.f32 %v2244_v56, %v2984_v0  ;;  %v2248_v1 = vunpack.c.h.bf16 %v2739_v45  ;;  %v2744_v56 = vld [vmem:[%s2979_s26 + $0x100] sm:$0xff]  }
  0x69   : > { %vm790_vm1 = vcmp.gt.f32.partialorder %v662_v58, 0.0  ;;  %v918_v2 = vmul.f32 0.2, %v662_v58  ;;  %v1045_v3 = vsel %vm789_vm0, %v661_v52, %v917_v59  ;;  %vm791_vm2 = vcmp.gt.f32.partialorder %v663_v60, 0.0 }
  0x6a   : > { %vm792_vm3 = vcmp.gt.f32.partialorder %v664_v61, 0.0  ;;  %v919_v4 = vmul.f32 0.2, %v663_v60  ;;  %v920_v5 = vmul.f32 0.2, %v664_v61  ;;  %v665_v6 = vadd.f32 %v2993_v9, %v530_v62 }
  0x6b   : > { %v1046_v7 = vsel %vm790_vm1, %v662_v58, %v918_v2  ;;  %v666_v8 = vadd.f32 %v2993_v9, %v531_v63  ;;  %v532_v10 = vmul.f32 %v2247_v57, %v2984_v0  ;;  %v533_v11 = vmul.f32 %v2248_v1, %v2984_v0 }
  0x6c   : > { %v2516_v13 = vpack.c.bf16 %v1046_v7, %v1045_v3  ;;  %v1047_v14 = vsel %vm791_vm2, %v663_v60, %v919_v4  ;;  %v1048_v15 = vsel %vm792_vm3, %v664_v61, %v920_v5  ;;  %vm793_vm4 = vcmp.gt.f32.partialorder %v665_v6, 0.0  ;;  %v2745_v61 = vld [vmem:[%s2979_s26 + $0x108] sm:$0xff]  }
  0x6d   : > { %v2521_v17 = vpack.c.bf16 %v1048_v15, %v1047_v14  ;;  %vm794_vm5 = vcmp.gt.f32.partialorder %v666_v8, 0.0  ;;  %v921_v18 = vmul.f32 0.2, %v665_v6  ;;  %v922_v19 = vmul.f32 0.2, %v666_v8  ;;  %v2746_v14 = vld [vmem:[%s2979_s26 + $0x110] sm:$0xff]  }
  0x6e   : > { %2799 = vst [vmem:[%s3016_s6 + $0xc0] sm:$0xff] %v2516_v13   ;;  %v667_v20 = vadd.f32 %v2993_v9, %v532_v10  ;;  %v668_v21 = vadd.f32 %v2993_v9, %v533_v11  ;;  %v2251_v22 = vunpack.c.l.bf16 %v2740_v12  ;;  %v2252_v23 = vunpack.c.h.bf16 %v2740_v12 }
  0x6f   : > { %2800 = vst [vmem:[%s3016_s6 + $0xc8] sm:$0xff] %v2521_v17   ;;  %v1049_v24 = vsel %vm793_vm4, %v665_v6, %v921_v18  ;;  %v1050_v25 = vsel %vm794_vm5, %v666_v8, %v922_v19  ;;  %v2255_v26 = vunpack.c.l.bf16 %v2741_v16  ;;  %v2256_v27 = vunpack.c.h.bf16 %v2741_v16 }
  0x70   : > { %v2526_v29 = vpack.c.bf16 %v1050_v25, %v1049_v24  ;;  %vm795_vm6 = vcmp.gt.f32.partialorder %v667_v20, 0.0  ;;  %vm796_vm7 = vcmp.gt.f32.partialorder %v668_v21, 0.0  ;;  %v923_v30 = vmul.f32 0.2, %v667_v20 }
  0x71   : > { %v924_v31 = vmul.f32 0.2, %v668_v21  ;;  %v534_v32 = vmul.f32 %v2251_v22, %v2984_v0  ;;  %v535_v33 = vmul.f32 %v2252_v23, %v2984_v0  ;;  %v536_v34 = vmul.f32 %v2255_v26, %v2984_v0 }
  0x72   : > { %2801 = vst [vmem:[%s3016_s6 + $0xd0] sm:$0xff] %v2526_v29   ;;  %v1051_v35 = vsel %vm795_vm6, %v667_v20, %v923_v30  ;;  %v537_v36 = vmul.f32 %v2256_v27, %v2984_v0  ;;  %v2259_v37 = vunpack.c.l.bf16 %v2742_v28  ;;  %v2260_v38 = vunpack.c.h.bf16 %v2742_v28 }
  0x73   : > { %v1052_v39 = vsel %vm796_vm7, %v668_v21, %v924_v31  ;;  %v669_v40 = vadd.f32 %v2993_v9, %v534_v32  ;;  %v670_v41 = vadd.f32 %v2993_v9, %v535_v33  ;;  %v671_v42 = vadd.f32 %v2993_v9, %v536_v34  ;;  %v2747_v32 = vld [vmem:[%s2979_s26 + $0x118] sm:$0xff]  }
  0x74   : > { %v2531_v43 = vpack.c.bf16 %v1052_v39, %v1051_v35  ;;  %v672_v44 = vadd.f32 %v2993_v9, %v537_v36  ;;  %v538_v45 = vmul.f32 %v2259_v37, %v2984_v0  ;;  %v539_v46 = vmul.f32 %v2260_v38, %v2984_v0  ;;  %v2748_v36 = vld [vmem:[%s2979_s26 + $0x120] sm:$0xff]   ;;  %v2749_v37 = vld [vmem:[%s2979_s26 + $0x128] sm:$0xff]  }
  0x75   : > { %vm797_vm8 = vcmp.gt.f32.partialorder %v669_v40, 0.0  ;;  %vm798_vm9 = vcmp.gt.f32.partialorder %v670_v41, 0.0  ;;  %v925_v48 = vmul.f32 0.2, %v669_v40  ;;  %v926_v49 = vmul.f32 0.2, %v670_v41 }
  0x76   : > { %2802 = vst [vmem:[%s3016_s6 + $0xd8] sm:$0xff] %v2531_v43   ;;  %vm799_vm10 = vcmp.gt.f32.partialorder %v671_v42, 0.0  ;;  %vm800_vm11 = vcmp.gt.f32.partialorder %v672_v44, 0.0  ;;  %v927_v50 = vmul.f32 0.2, %v671_v42  ;;  %v673_v54 = vadd.f32 %v2993_v9, %v538_v45 }
  0x77   : > { %v928_v51 = vmul.f32 0.2, %v672_v44  ;;  %v1053_v52 = vsel %vm797_vm8, %v669_v40, %v925_v48  ;;  %v1054_v53 = vsel %vm798_vm9, %v670_v41, %v926_v49  ;;  %v674_v55 = vadd.f32 %v2993_v9, %v539_v46  ;;  %v3207_v41 = vld [vmem:[%s3409_s1] ss:$0 sm:$0xff] }
  0x78   : > { %v2536_v57 = vpack.c.bf16 %v1054_v53, %v1053_v52  ;;  %v1055_v58 = vsel %vm799_vm10, %v671_v42, %v927_v50  ;;  %v2263_v60 = vunpack.c.l.bf16 %v2743_v47  ;;  %vm801_vm12 = vcmp.gt.f32.partialorder %v673_v54, 0.0 }
  0x79   : > { %v1056_v59 = vsel %vm800_vm11, %v672_v44, %v928_v51  ;;  %vm802_vm13 = vcmp.gt.f32.partialorder %v674_v55, 0.0  ;;  %v929_v63 = vmul.f32 0.2, %v673_v54  ;;  %v930_v1 = vmul.f32 0.2, %v674_v55 }
  0x7a   : > { %v2541_v62 = vpack.c.bf16 %v1056_v59, %v1055_v58  ;;  %2803 = vst [vmem:[%s3016_s6 + $0xe0] sm:$0xff] %v2536_v57   ;;  %v2264_v2 = vunpack.c.h.bf16 %v2743_v47  ;;  %v540_v3 = vmul.f32 %v2263_v60, %v2984_v0  ;;  %v2267_v4 = vunpack.c.l.bf16 %v2744_v56  ;;  %v3216_v47 = vld [vmem:[%s3410_s2] ss:$0 sm:$0xff] }
  0x7b   : > { %v1057_v5 = vsel %vm801_vm12, %v673_v54, %v929_v63  ;;  %v2268_v6 = vunpack.c.h.bf16 %v2744_v56  ;;  %v2271_v7 = vunpack.c.l.bf16 %v2745_v61  ;;  %v2272_v8 = vunpack.c.h.bf16 %v2745_v61 }
  0x7c   : > { %2804 = vst [vmem:[%s3016_s6 + $0xe8] sm:$0xff] %v2541_v62   ;;  %v1058_v10 = vsel %vm802_vm13, %v674_v55, %v930_v1  ;;  %v541_v11 = vmul.f32 %v2264_v2, %v2984_v0  ;;  %v675_v12 = vadd.f32 %v2993_v9, %v540_v3  ;;  %v542_v13 = vmul.f32 %v2267_v4, %v2984_v0 }
  0x7d   : > { %v2546_v15 = vpack.c.bf16 %v1058_v10, %v1057_v5  ;;  %v543_v16 = vmul.f32 %v2268_v6, %v2984_v0  ;;  %v544_v17 = vmul.f32 %v2271_v7, %v2984_v0  ;;  %v545_v18 = vmul.f32 %v2272_v8, %v2984_v0  ;;  %v2750_v5 = vld [vmem:[%s2979_s26 + $0x130] sm:$0xff]  }
  0x7e   : > { %v676_v19 = vadd.f32 %v2993_v9, %v541_v11  ;;  %vm803_vm14 = vcmp.gt.f32.partialorder %v675_v12, 0.0  ;;  %v931_v20 = vmul.f32 0.2, %v675_v12  ;;  %v677_v21 = vadd.f32 %v2993_v9, %v542_v13 }
  0x7f   : > { %2805 = vst [vmem:[%s3016_s6 + $0xf0] sm:$0xff] %v2546_v15   ;;  %v678_v22 = vadd.f32 %v2993_v9, %v543_v16  ;;  %v679_v23 = vadd.f32 %v2993_v9, %v544_v17  ;;  %v680_v24 = vadd.f32 %v2993_v9, %v545_v18  ;;  %v2275_v25 = vunpack.c.l.bf16 %v2746_v14  ;;  %v2751_v17 = vld [vmem:[%s2979_s26 + $0x138] sm:$0xff]  }
  0x80   : > { %vm804_vm15 = vcmp.gt.f32.partialorder %v676_v19, 0.0  ;;  %v932_v26 = vmul.f32 0.2, %v676_v19  ;;  %v1059_v27 = vsel %vm803_vm14, %v675_v12, %v931_v20  ;;  %vm805_vm0 = vcmp.gt.f32.partialorder %v677_v21, 0.0 }
  0x81   : > { %vm806_vm1 = vcmp.gt.f32.partialorder %v678_v22, 0.0  ;;  %v933_v0 = vmul.f32 0.2, %v677_v21  ;;  %v934_v28 = vmul.f32 0.2, %v678_v22  ;;  %vm807_vm2 = vcmp.gt.f32.partialorder %v679_v23, 0.0 }
  0x82   : > { %v1060_v29 = vsel %vm804_vm15, %v676_v19, %v932_v26  ;;  %vm808_vm3 = vcmp.gt.f32.partialorder %v680_v24, 0.0  ;;  %v935_v30 = vmul.f32 0.2, %v679_v23  ;;  %v936_v31 = vmul.f32 0.2, %v680_v24 }
  0x83   : > { %v2551_v33 = vpack.c.bf16 %v1060_v29, %v1059_v27  ;;  %v1061_v9 = vsel %vm805_vm0, %v677_v21, %v933_v0  ;;  %v1062_v34 = vsel %vm806_vm1, %v678_v22, %v934_v28  ;;  %v2276_v35 = vunpack.c.h.bf16 %v2746_v14  ;;  %v2752_v22 = vld [vmem:[%s2979_s26 + $0x140] sm:$0xff]  }
  0x84   : > { %v2556_v38 = vpack.c.bf16 %v1062_v34, %v1061_v9  ;;  %v1063_v39 = vsel %vm807_vm2, %v679_v23, %v935_v30  ;;  %v1064_v40 = vsel %vm808_vm3, %v680_v24, %v936_v31  ;;  %v546_v42 = vmul.f32 %v3207_v41, %v2275_v25 }
  0x85   : > { %2806 = vst [vmem:[%s3016_s6 + $0xf8] sm:$0xff] %v2551_v33   ;;  %v2561_v43 = vpack.c.bf16 %v1064_v40, %v1063_v39  ;;  %v547_v44 = vmul.f32 %v3207_v41, %v2276_v35  ;;  %v2279_v45 = vunpack.c.l.bf16 %v2747_v32  ;;  %v2280_v46 = vunpack.c.h.bf16 %v2747_v32  ;;  %v2753_v35 = vld [vmem:[%s2979_s26 + $0x148] sm:$0xff]  }
  0x86   : > { %2807 = vst [vmem:[%s3016_s6 + $0x100] sm:$0xff] %v2556_v38   ;;  %v681_v48 = vadd.f32 %v3216_v47, %v546_v42  ;;  %v2283_v49 = vunpack.c.l.bf16 %v2748_v36  ;;  %v2284_v50 = vunpack.c.h.bf16 %v2748_v36  ;;  %v2287_v51 = vunpack.c.l.bf16 %v2749_v37 }
  0x87   : > { %2808 = vst [vmem:[%s3016_s6 + $0x108] sm:$0xff] %v2561_v43   ;;  %v682_v52 = vadd.f32 %v3216_v47, %v547_v44  ;;  %v548_v53 = vmul.f32 %v3207_v41, %v2279_v45  ;;  %v549_v54 = vmul.f32 %v3207_v41, %v2280_v46  ;;  %v2288_v55 = vunpack.c.h.bf16 %v2749_v37 }
  0x88   : > { %vm809_vm4 = vcmp.gt.f32.partialorder %v681_v48, 0.0  ;;  %v937_v56 = vmul.f32 0.2, %v681_v48  ;;  %v550_v57 = vmul.f32 %v3207_v41, %v2283_v49  ;;  %v551_v58 = vmul.f32 %v3207_v41, %v2284_v50 }
  0x89   : > { %vm810_vm5 = vcmp.gt.f32.partialorder %v682_v52, 0.0  ;;  %v938_v59 = vmul.f32 0.2, %v682_v52  ;;  %v683_v60 = vadd.f32 %v3216_v47, %v548_v53  ;;  %v684_v61 = vadd.f32 %v3216_v47, %v549_v54  ;;  %v2754_v54 = vld [vmem:[%s2979_s26 + $0x150] sm:$0xff]  }
  0x8a   : > { %v1065_v62 = vsel %vm809_vm4, %v681_v48, %v937_v56  ;;  %v685_v63 = vadd.f32 %v3216_v47, %v550_v57  ;;  %v686_v1 = vadd.f32 %v3216_v47, %v551_v58  ;;  %v552_v2 = vmul.f32 %v3207_v41, %v2287_v51  ;;  %v2755_v58 = vld [vmem:[%s2979_s26 + $0x158] sm:$0xff]  }
  0x8b   : > { %v1066_v3 = vsel %vm810_vm5, %v682_v52, %v938_v59  ;;  %vm811_vm6 = vcmp.gt.f32.partialorder %v683_v60, 0.0  ;;  %vm812_vm7 = vcmp.gt.f32.partialorder %v684_v61, 0.0  ;;  %v939_v4 = vmul.f32 0.2, %v683_v60 }
  0x8c   : > { %v2566_v6 = vpack.c.bf16 %v1066_v3, %v1065_v62  ;;  %v940_v7 = vmul.f32 0.2, %v684_v61  ;;  %vm813_vm8 = vcmp.gt.f32.partialorder %v685_v63, 0.0  ;;  %vm814_vm9 = vcmp.gt.f32.partialorder %v686_v1, 0.0 }
  0x8d   : > { %v1067_v8 = vsel %vm811_vm6, %v683_v60, %v939_v4  ;;  %v941_v10 = vmul.f32 0.2, %v685_v63  ;;  %v942_v11 = vmul.f32 0.2, %v686_v1  ;;  %v553_v12 = vmul.f32 %v3207_v41, %v2288_v55 }
  0x8e   : > { %2809 = vst [vmem:[%s3016_s6 + $0x110] sm:$0xff] %v2566_v6   ;;  %v1068_v13 = vsel %vm812_vm7, %v684_v61, %v940_v7  ;;  %v687_v14 = vadd.f32 %v3216_v47, %v552_v2  ;;  %v2291_v15 = vunpack.c.l.bf16 %v2750_v5  ;;  %v2292_v16 = vunpack.c.h.bf16 %v2750_v5 }
  0x8f   : > { %v2571_v18 = vpack.c.bf16 %v1068_v13, %v1067_v8  ;;  %v1069_v19 = vsel %vm813_vm8, %v685_v63, %v941_v10  ;;  %v1070_v20 = vsel %vm814_vm9, %v686_v1, %v942_v11  ;;  %v688_v21 = vadd.f32 %v3216_v47, %v553_v12  ;;  %v2756_v12 = vld [vmem:[%s2979_s26 + $0x160] sm:$0xff]  }
  0x90   : > { %v2576_v23 = vpack.c.bf16 %v1070_v20, %v1069_v19  ;;  %vm815_vm10 = vcmp.gt.f32.partialorder %v687_v14, 0.0  ;;  %v943_v24 = vmul.f32 0.2, %v687_v14  ;;  %v554_v25 = vmul.f32 %v3207_v41, %v2291_v15 }
  0x91   : > { %2810 = vst [vmem:[%s3016_s6 + $0x118] sm:$0xff] %v2571_v18   ;;  %vm816_vm11 = vcmp.gt.f32.partialorder %v688_v21, 0.0  ;;  %v944_v26 = vmul.f32 0.2, %v688_v21  ;;  %v555_v27 = vmul.f32 %v3207_v41, %v2292_v16  ;;  %v2295_v0 = vunpack.c.l.bf16 %v2751_v17 }
  0x92   : > { %2811 = vst [vmem:[%s3016_s6 + $0x120] sm:$0xff] %v2576_v23   ;;  %v1071_v28 = vsel %vm815_vm10, %v687_v14, %v943_v24  ;;  %v689_v29 = vadd.f32 %v3216_v47, %v554_v25  ;;  %v2296_v30 = vunpack.c.h.bf16 %v2751_v17  ;;  %v2299_v31 = vunpack.c.l.bf16 %v2752_v22 }
  0x93   : > { %v1072_v32 = vsel %vm816_vm11, %v688_v21, %v944_v26  ;;  %v690_v33 = vadd.f32 %v3216_v47, %v555_v27  ;;  %v556_v9 = vmul.f32 %v3207_v41, %v2295_v0  ;;  %v2300_v34 = vunpack.c.h.bf16 %v2752_v22  ;;  %v2757_v26 = vld [vmem:[%s2979_s26 + $0x168] sm:$0xff]  }
  0x94   : > { %v2581_v36 = vpack.c.bf16 %v1072_v32, %v1071_v28  ;;  %vm817_vm12 = vcmp.gt.f32.partialorder %v689_v29, 0.0  ;;  %v945_v37 = vmul.f32 0.2, %v689_v29  ;;  %v557_v38 = vmul.f32 %v3207_v41, %v2296_v30 }
  0x95   : > { %vm818_vm13 = vcmp.gt.f32.partialorder %v690_v33, 0.0  ;;  %v946_v39 = vmul.f32 0.2, %v690_v33  ;;  %v691_v40 = vadd.f32 %v3216_v47, %v556_v9  ;;  %v558_v42 = vmul.f32 %v3207_v41, %v2299_v31 }
  0x96   : > { %2812 = vst [vmem:[%s3016_s6 + $0x128] sm:$0xff] %v2581_v36   ;;  %v1073_v43 = vsel %vm817_vm12, %v689_v29, %v945_v37  ;;  %v692_v44 = vadd.f32 %v3216_v47, %v557_v38  ;;  %v559_v45 = vmul.f32 %v3207_v41, %v2300_v34  ;;  %v2303_v46 = vunpack.c.l.bf16 %v2753_v35  ;;  %v2758_v34 = vld [vmem:[%s2979_s26 + $0x170] sm:$0xff]  }
  0x97   : > { %v1074_v48 = vsel %vm818_vm13, %v690_v33, %v946_v39  ;;  %vm819_vm14 = vcmp.gt.f32.partialorder %v691_v40, 0.0  ;;  %v947_v49 = vmul.f32 0.2, %v691_v40  ;;  %v693_v50 = vadd.f32 %v3216_v47, %v558_v42 }
  0x98   : > { %v2586_v51 = vpack.c.bf16 %v1074_v48, %v1073_v43  ;;  %vm820_vm15 = vcmp.gt.f32.partialorder %v692_v44, 0.0  ;;  %v948_v52 = vmul.f32 0.2, %v692_v44  ;;  %v694_v53 = vadd.f32 %v3216_v47, %v559_v45 }
  0x99   : > { %v1075_v55 = vsel %vm819_vm14, %v691_v40, %v947_v49  ;;  %vm821_vm0 = vcmp.gt.f32.partialorder %v693_v50, 0.0  ;;  %v949_v56 = vmul.f32 0.2, %v693_v50  ;;  %v2304_v57 = vunpack.c.h.bf16 %v2753_v35  ;;  %v2759_v35 = vld [vmem:[%s2979_s26 + $0x178] sm:$0xff]  }
  0x9a   : > { %2813 = vst [vmem:[%s3016_s6 + $0x130] sm:$0xff] %v2586_v51   ;;  %v1076_v59 = vsel %vm820_vm15, %v692_v44, %v948_v52  ;;  %vm822_vm1 = vcmp.gt.f32.partialorder %v694_v53, 0.0  ;;  %v950_v60 = vmul.f32 0.2, %v694_v53  ;;  %v560_v61 = vmul.f32 %v3207_v41, %v2303_v46 }
  0x9b   : > { %v2591_v62 = vpack.c.bf16 %v1076_v59, %v1075_v55  ;;  %v1077_v63 = vsel %vm821_vm0, %v693_v50, %v949_v56  ;;  %v561_v1 = vmul.f32 %v3207_v41, %v2304_v57  ;;  %v2307_v2 = vunpack.c.l.bf16 %v2754_v54 }
  0x9c   : > { %v1078_v3 = vsel %vm822_vm1, %v694_v53, %v950_v60  ;;  %v695_v4 = vadd.f32 %v3216_v47, %v560_v61  ;;  %v2308_v5 = vunpack.c.h.bf16 %v2754_v54  ;;  %v2311_v6 = vunpack.c.l.bf16 %v2755_v58 }
  0x9d   : > { %2814 = vst [vmem:[%s3016_s6 + $0x138] sm:$0xff] %v2591_v62   ;;  %v2596_v7 = vpack.c.bf16 %v1078_v3, %v1077_v63  ;;  %v696_v8 = vadd.f32 %v3216_v47, %v561_v1  ;;  %v562_v10 = vmul.f32 %v3207_v41, %v2307_v2  ;;  %v2312_v11 = vunpack.c.h.bf16 %v2755_v58  ;;  %v2760_v3 = vld [vmem:[%s2979_s26 + $0x180] sm:$0xff]  }
  0x9e   : > { %vm823_vm2 = vcmp.gt.f32.partialorder %v695_v4, 0.0  ;;  %v951_v13 = vmul.f32 0.2, %v695_v4  ;;  %v563_v14 = vmul.f32 %v3207_v41, %v2308_v5  ;;  %v564_v15 = vmul.f32 %v3207_v41, %v2311_v6 }
  0x9f   : > { %2815 = vst [vmem:[%s3016_s6 + $0x140] sm:$0xff] %v2596_v7   ;;  %vm824_vm3 = vcmp.gt.f32.partialorder %v696_v8, 0.0  ;;  %v952_v16 = vmul.f32 0.2, %v696_v8  ;;  %v697_v17 = vadd.f32 %v3216_v47, %v562_v10  ;;  %v565_v18 = vmul.f32 %v3207_v41, %v2312_v11  ;;  %v2761_v7 = vld [vmem:[%s2979_s26 + $0x188] sm:$0xff]  }
  0xa0   : > { %v1079_v19 = vsel %vm823_vm2, %v695_v4, %v951_v13  ;;  %v698_v20 = vadd.f32 %v3216_v47, %v563_v14  ;;  %v699_v21 = vadd.f32 %v3216_v47, %v564_v15  ;;  %v2315_v22 = vunpack.c.l.bf16 %v2756_v12 }
  0xa1   : > { %v1080_v23 = vsel %vm824_vm3, %v696_v8, %v952_v16  ;;  %vm825_vm4 = vcmp.gt.f32.partialorder %v697_v17, 0.0  ;;  %v953_v24 = vmul.f32 0.2, %v697_v17  ;;  %v700_v25 = vadd.f32 %v3216_v47, %v565_v18 }
  0xa2   : > { %v2601_v27 = vpack.c.bf16 %v1080_v23, %v1079_v19  ;;  %vm826_vm5 = vcmp.gt.f32.partialorder %v698_v20, 0.0  ;;  %v954_v0 = vmul.f32 0.2, %v698_v20  ;;  %vm827_vm6 = vcmp.gt.f32.partialorder %v699_v21, 0.0 }
  0xa3   : > { %v1081_v28 = vsel %vm825_vm4, %v697_v17, %v953_v24  ;;  %vm828_vm7 = vcmp.gt.f32.partialorder %v700_v25, 0.0  ;;  %v955_v29 = vmul.f32 0.2, %v699_v21  ;;  %v956_v30 = vmul.f32 0.2, %v700_v25 }
  0xa4   : > { %2816 = vst [vmem:[%s3016_s6 + $0x148] sm:$0xff] %v2601_v27   ;;  %v1082_v31 = vsel %vm826_vm5, %v698_v20, %v954_v0  ;;  %v2316_v32 = vunpack.c.h.bf16 %v2756_v12  ;;  %v566_v33 = vmul.f32 %v3207_v41, %v2315_v22  ;;  %v2319_v9 = vunpack.c.l.bf16 %v2757_v26  ;;  %v2762_v20 = vld [vmem:[%s2979_s26 + $0x190] sm:$0xff]  }
  0xa5   : > { %v2606_v36 = vpack.c.bf16 %v1082_v31, %v1081_v28  ;;  %v1083_v37 = vsel %vm827_vm6, %v699_v21, %v955_v29  ;;  %v1084_v38 = vsel %vm828_vm7, %v700_v25, %v956_v30  ;;  %v2320_v39 = vunpack.c.h.bf16 %v2757_v26 }
  0xa6   : > { %v2611_v40 = vpack.c.bf16 %v1084_v38, %v1083_v37  ;;  %v567_v42 = vmul.f32 %v3207_v41, %v2316_v32  ;;  %v701_v43 = vadd.f32 %v3216_v47, %v566_v33  ;;  %v568_v44 = vmul.f32 %v3207_v41, %v2319_v9  ;;  %v2763_v37 = vld [vmem:[%s2979_s26 + $0x198] sm:$0xff]  }
  0xa7   : > { %2817 = vst [vmem:[%s3016_s6 + $0x150] sm:$0xff] %v2606_v36   ;;  %v569_v45 = vmul.f32 %v3207_v41, %v2320_v39  ;;  %v2323_v46 = vunpack.c.l.bf16 %v2758_v34  ;;  %v2324_v48 = vunpack.c.h.bf16 %v2758_v34  ;;  %v2327_v49 = vunpack.c.l.bf16 %v2759_v35 }
  0xa8   : > { %2818 = vst [vmem:[%s3016_s6 + $0x158] sm:$0xff] %v2611_v40   ;;  %v702_v50 = vadd.f32 %v3216_v47, %v567_v42  ;;  %vm829_vm8 = vcmp.gt.f32.partialorder %v701_v43, 0.0  ;;  %v957_v51 = vmul.f32 0.2, %v701_v43  ;;  %v703_v52 = vadd.f32 %v3216_v47, %v568_v44 }
  0xa9   : > { %v704_v53 = vadd.f32 %v3216_v47, %v569_v45  ;;  %v570_v54 = vmul.f32 %v3207_v41, %v2323_v46  ;;  %v571_v55 = vmul.f32 %v3207_v41, %v2324_v48  ;;  %v2328_v56 = vunpack.c.h.bf16 %v2759_v35  ;;  %v2764_v48 = vld [vmem:[%s2979_s26 + $0x1a0] sm:$0xff]  }
  0xaa   : > { %vm830_vm9 = vcmp.gt.f32.partialorder %v702_v50, 0.0  ;;  %v958_v57 = vmul.f32 0.2, %v702_v50  ;;  %v1085_v58 = vsel %vm829_vm8, %v701_v43, %v957_v51  ;;  %vm831_vm10 = vcmp.gt.f32.partialorder %v703_v52, 0.0 }
  0xab   : > { %vm832_vm11 = vcmp.gt.f32.partialorder %v704_v53, 0.0  ;;  %v959_v59 = vmul.f32 0.2, %v703_v52  ;;  %v960_v60 = vmul.f32 0.2, %v704_v53  ;;  %v705_v61 = vadd.f32 %v3216_v47, %v570_v54 }
  0xac   : > { %v1086_v62 = vsel %vm830_vm9, %v702_v50, %v958_v57  ;;  %v706_v63 = vadd.f32 %v3216_v47, %v571_v55  ;;  %v572_v1 = vmul.f32 %v3207_v41, %v2327_v49  ;;  %v573_v2 = vmul.f32 %v3207_v41, %v2328_v56 }
  0xad   : > { %v2616_v4 = vpack.c.bf16 %v1086_v62, %v1085_v58  ;;  %v1087_v5 = vsel %vm831_vm10, %v703_v52, %v959_v59  ;;  %v1088_v6 = vsel %vm832_vm11, %v704_v53, %v960_v60  ;;  %vm833_vm12 = vcmp.gt.f32.partialorder %v705_v61, 0.0  ;;  %v2765_v53 = vld [vmem:[%s2979_s26 + $0x1a8] sm:$0xff]  }
  0xae   : > { %v2621_v8 = vpack.c.bf16 %v1088_v6, %v1087_v5  ;;  %vm834_vm13 = vcmp.gt.f32.partialorder %v706_v63, 0.0  ;;  %v961_v10 = vmul.f32 0.2, %v705_v61  ;;  %v962_v11 = vmul.f32 0.2, %v706_v63  ;;  %v2766_v5 = vld [vmem:[%s2979_s26 + $0x1b0] sm:$0xff]  }
  0xaf   : > { %2819 = vst [vmem:[%s3016_s6 + $0x160] sm:$0xff] %v2616_v4   ;;  %v707_v12 = vadd.f32 %v3216_v47, %v572_v1  ;;  %v708_v13 = vadd.f32 %v3216_v47, %v573_v2  ;;  %v2331_v14 = vunpack.c.l.bf16 %v2760_v3  ;;  %v2332_v15 = vunpack.c.h.bf16 %v2760_v3 }
  0xb0   : > { %2820 = vst [vmem:[%s3016_s6 + $0x168] sm:$0xff] %v2621_v8   ;;  %v1089_v16 = vsel %vm833_vm12, %v705_v61, %v961_v10  ;;  %v1090_v17 = vsel %vm834_vm13, %v706_v63, %v962_v11  ;;  %v2335_v18 = vunpack.c.l.bf16 %v2761_v7  ;;  %v2336_v19 = vunpack.c.h.bf16 %v2761_v7 }
  0xb1   : > { %v2626_v21 = vpack.c.bf16 %v1090_v17, %v1089_v16  ;;  %vm835_vm14 = vcmp.gt.f32.partialorder %v707_v12, 0.0  ;;  %vm836_vm15 = vcmp.gt.f32.partialorder %v708_v13, 0.0  ;;  %v963_v22 = vmul.f32 0.2, %v707_v12 }
  0xb2   : > { %v964_v23 = vmul.f32 0.2, %v708_v13  ;;  %v574_v24 = vmul.f32 %v3207_v41, %v2331_v14  ;;  %v575_v25 = vmul.f32 %v3207_v41, %v2332_v15  ;;  %v576_v26 = vmul.f32 %v3207_v41, %v2335_v18 }
  0xb3   : > { %2821 = vst [vmem:[%s3016_s6 + $0x170] sm:$0xff] %v2626_v21   ;;  %v1091_v27 = vsel %vm835_vm14, %v707_v12, %v963_v22  ;;  %v577_v0 = vmul.f32 %v3207_v41, %v2336_v19  ;;  %v2339_v28 = vunpack.c.l.bf16 %v2762_v20  ;;  %v2340_v29 = vunpack.c.h.bf16 %v2762_v20 }
  0xb4   : > { %v1092_v30 = vsel %vm836_vm15, %v708_v13, %v964_v23  ;;  %v709_v31 = vadd.f32 %v3216_v47, %v574_v24  ;;  %v710_v32 = vadd.f32 %v3216_v47, %v575_v25  ;;  %v711_v33 = vadd.f32 %v3216_v47, %v576_v26  ;;  %v2767_v25 = vld [vmem:[%s2979_s26 + $0x1b8] sm:$0xff]  }
  0xb5   : > { %v2631_v9 = vpack.c.bf16 %v1092_v30, %v1091_v27  ;;  %v712_v34 = vadd.f32 %v3216_v47, %v577_v0  ;;  %v578_v35 = vmul.f32 %v3207_v41, %v2339_v28  ;;  %v579_v36 = vmul.f32 %v3207_v41, %v2340_v29  ;;  %v2768_v29 = vld [vmem:[%s2979_s26 + $0x1c0] sm:$0xff]   ;;  %v2769_v30 = vld [vmem:[%s2979_s26 + $0x1c8] sm:$0xff]  }
  0xb6   : > { %vm837_vm0 = vcmp.gt.f32.partialorder %v709_v31, 0.0  ;;  %vm838_vm1 = vcmp.gt.f32.partialorder %v710_v32, 0.0  ;;  %v965_v38 = vmul.f32 0.2, %v709_v31  ;;  %v966_v39 = vmul.f32 0.2, %v710_v32 }
  0xb7   : > { %2822 = vst [vmem:[%s3016_s6 + $0x178] sm:$0xff] %v2631_v9   ;;  %vm839_vm2 = vcmp.gt.f32.partialorder %v711_v33, 0.0  ;;  %vm840_vm3 = vcmp.gt.f32.partialorder %v712_v34, 0.0  ;;  %v967_v40 = vmul.f32 0.2, %v711_v33  ;;  %v713_v45 = vadd.f32 %v3216_v47, %v578_v35 }
  0xb8   : > { %v968_v42 = vmul.f32 0.2, %v712_v34  ;;  %v1093_v43 = vsel %vm837_vm0, %v709_v31, %v965_v38  ;;  %v1094_v44 = vsel %vm838_vm1, %v710_v32, %v966_v39  ;;  %v714_v46 = vadd.f32 %v3216_v47, %v579_v36 }
  0xb9   : > { %v2636_v49 = vpack.c.bf16 %v1094_v44, %v1093_v43  ;;  %v1095_v50 = vsel %vm839_vm2, %v711_v33, %v967_v40  ;;  %v2343_v52 = vunpack.c.l.bf16 %v2763_v37  ;;  %vm841_vm4 = vcmp.gt.f32.partialorder %v713_v45, 0.0 }
  0xba   : > { %v1096_v51 = vsel %vm840_vm3, %v712_v34, %v968_v42  ;;  %vm842_vm5 = vcmp.gt.f32.partialorder %v714_v46, 0.0  ;;  %v969_v55 = vmul.f32 0.2, %v713_v45  ;;  %v970_v56 = vmul.f32 0.2, %v714_v46 }
  0xbb   : > { %v2641_v54 = vpack.c.bf16 %v1096_v51, %v1095_v50  ;;  %2823 = vst [vmem:[%s3016_s6 + $0x180] sm:$0xff] %v2636_v49   ;;  %v2344_v57 = vunpack.c.h.bf16 %v2763_v37  ;;  %v580_v58 = vmul.f32 %v3207_v41, %v2343_v52  ;;  %v2347_v59 = vunpack.c.l.bf16 %v2764_v48 }
  0xbc   : > { %v1097_v60 = vsel %vm841_vm4, %v713_v45, %v969_v55  ;;  %v2348_v61 = vunpack.c.h.bf16 %v2764_v48  ;;  %v2351_v62 = vunpack.c.l.bf16 %v2765_v53  ;;  %v2352_v63 = vunpack.c.h.bf16 %v2765_v53 }
  0xbd   : > { %2824 = vst [vmem:[%s3016_s6 + $0x188] sm:$0xff] %v2641_v54   ;;  %v1098_v1 = vsel %vm842_vm5, %v714_v46, %v970_v56  ;;  %v581_v2 = vmul.f32 %v3207_v41, %v2344_v57  ;;  %v715_v3 = vadd.f32 %v3216_v47, %v580_v58  ;;  %v582_v4 = vmul.f32 %v3207_v41, %v2347_v59 }
  0xbe   : > { %v2646_v6 = vpack.c.bf16 %v1098_v1, %v1097_v60  ;;  %v583_v7 = vmul.f32 %v3207_v41, %v2348_v61  ;;  %v584_v8 = vmul.f32 %v3207_v41, %v2351_v62  ;;  %v585_v10 = vmul.f32 %v3207_v41, %v2352_v63  ;;  %v2770_v60 = vld [vmem:[%s2979_s26 + $0x1d0] sm:$0xff]  }
  0xbf   : > { %v716_v11 = vadd.f32 %v3216_v47, %v581_v2  ;;  %vm843_vm6 = vcmp.gt.f32.partialorder %v715_v3, 0.0  ;;  %v971_v12 = vmul.f32 0.2, %v715_v3  ;;  %v717_v13 = vadd.f32 %v3216_v47, %v582_v4 }
  0xc0   : > { %2825 = vst [vmem:[%s3016_s6 + $0x190] sm:$0xff] %v2646_v6   ;;  %v718_v14 = vadd.f32 %v3216_v47, %v583_v7  ;;  %v719_v15 = vadd.f32 %v3216_v47, %v584_v8  ;;  %v720_v16 = vadd.f32 %v3216_v47, %v585_v10  ;;  %v2355_v17 = vunpack.c.l.bf16 %v2766_v5  ;;  %v2771_v8 = vld [vmem:[%s2979_s26 + $0x1d8] sm:$0xff]  }
  0xc1   : > { %vm844_vm7 = vcmp.gt.f32.partialorder %v716_v11, 0.0  ;;  %v972_v18 = vmul.f32 0.2, %v716_v11  ;;  %v1099_v19 = vsel %vm843_vm6, %v715_v3, %v971_v12  ;;  %vm845_vm8 = vcmp.gt.f32.partialorder %v717_v13, 0.0 }
  0xc2   : > { %vm846_vm9 = vcmp.gt.f32.partialorder %v718_v14, 0.0  ;;  %v973_v20 = vmul.f32 0.2, %v717_v13  ;;  %v974_v21 = vmul.f32 0.2, %v718_v14  ;;  %vm847_vm10 = vcmp.gt.f32.partialorder %v719_v15, 0.0 }
  0xc3   : > { %v1100_v22 = vsel %vm844_vm7, %v716_v11, %v972_v18  ;;  %vm848_vm11 = vcmp.gt.f32.partialorder %v720_v16, 0.0  ;;  %v975_v23 = vmul.f32 0.2, %v719_v15  ;;  %v976_v24 = vmul.f32 0.2, %v720_v16 }
  0xc4   : > { %v2651_v26 = vpack.c.bf16 %v1100_v22, %v1099_v19  ;;  %v1101_v27 = vsel %vm845_vm8, %v717_v13, %v973_v20  ;;  %v1102_v0 = vsel %vm846_vm9, %v718_v14, %v974_v21  ;;  %v2356_v28 = vunpack.c.h.bf16 %v2766_v5  ;;  %v2772_v14 = vld [vmem:[%s2979_s26 + $0x1e0] sm:$0xff]  }
  0xc5   : > { %v2656_v31 = vpack.c.bf16 %v1102_v0, %v1101_v27  ;;  %v1103_v32 = vsel %vm847_vm10, %v719_v15, %v975_v23  ;;  %v1104_v33 = vsel %vm848_vm11, %v720_v16, %v976_v24  ;;  %v586_v9 = vmul.f32 %v3207_v41, %v2355_v17 }
  0xc6   : > { %2826 = vst [vmem:[%s3016_s6 + $0x198] sm:$0xff] %v2651_v26   ;;  %v2661_v34 = vpack.c.bf16 %v1104_v33, %v1103_v32  ;;  %v587_v35 = vmul.f32 %v3207_v41, %v2356_v28  ;;  %v2359_v36 = vunpack.c.l.bf16 %v2767_v25  ;;  %v2360_v37 = vunpack.c.h.bf16 %v2767_v25  ;;  %v2773_v28 = vld [vmem:[%s2979_s26 + $0x1e8] sm:$0xff]  }
  0xc7   : > { %2827 = vst [vmem:[%s3016_s6 + $0x1a0] sm:$0xff] %v2656_v31   ;;  %v721_v38 = vadd.f32 %v3216_v47, %v586_v9  ;;  %v2363_v39 = vunpack.c.l.bf16 %v2768_v29  ;;  %v2364_v40 = vunpack.c.h.bf16 %v2768_v29  ;;  %v2367_v42 = vunpack.c.l.bf16 %v2769_v30 }
  0xc8   : > { %2828 = vst [vmem:[%s3016_s6 + $0x1a8] sm:$0xff] %v2661_v34   ;;  %v722_v43 = vadd.f32 %v3216_v47, %v587_v35  ;;  %v588_v44 = vmul.f32 %v3207_v41, %v2359_v36  ;;  %v589_v45 = vmul.f32 %v3207_v41, %v2360_v37  ;;  %v2368_v46 = vunpack.c.h.bf16 %v2769_v30 }
  0xc9   : > { %vm849_vm12 = vcmp.gt.f32.partialorder %v721_v38, 0.0  ;;  %v977_v48 = vmul.f32 0.2, %v721_v38  ;;  %v590_v49 = vmul.f32 %v3207_v41, %v2363_v39  ;;  %v591_v50 = vmul.f32 %v3207_v41, %v2364_v40 }
  0xca   : > { %vm850_vm13 = vcmp.gt.f32.partialorder %v722_v43, 0.0  ;;  %v978_v51 = vmul.f32 0.2, %v722_v43  ;;  %v723_v52 = vadd.f32 %v3216_v47, %v588_v44  ;;  %v724_v53 = vadd.f32 %v3216_v47, %v589_v45  ;;  %v2774_v45 = vld [vmem:[%s2979_s26 + $0x1f0] sm:$0xff]  }
  0xcb   : > { %v1105_v54 = vsel %vm849_vm12, %v721_v38, %v977_v48  ;;  %v725_v55 = vadd.f32 %v3216_v47, %v590_v49  ;;  %v726_v56 = vadd.f32 %v3216_v47, %v591_v50  ;;  %v592_v57 = vmul.f32 %v3207_v41, %v2367_v42  ;;  %v2775_v50 = vld [vmem:[%s2979_s26 + $0x1f8] sm:$0xff]  }
  0xcc   : > { %v1106_v58 = vsel %vm850_vm13, %v722_v43, %v978_v51  ;;  %vm851_vm14 = vcmp.gt.f32.partialorder %v723_v52, 0.0  ;;  %vm852_vm15 = vcmp.gt.f32.partialorder %v724_v53, 0.0  ;;  %v979_v59 = vmul.f32 0.2, %v723_v52 }
  0xcd   : > { %v2666_v61 = vpack.c.bf16 %v1106_v58, %v1105_v54  ;;  %v980_v62 = vmul.f32 0.2, %v724_v53  ;;  %vm853_vm0 = vcmp.gt.f32.partialorder %v725_v55, 0.0  ;;  %vm854_vm1 = vcmp.gt.f32.partialorder %v726_v56, 0.0 }
  0xce   : > { %v1107_v63 = vsel %vm851_vm14, %v723_v52, %v979_v59  ;;  %v981_v1 = vmul.f32 0.2, %v725_v55  ;;  %v982_v2 = vmul.f32 0.2, %v726_v56  ;;  %v593_v3 = vmul.f32 %v3207_v41, %v2368_v46 }
  0xcf   : > { %2829 = vst [vmem:[%s3016_s6 + $0x1b0] sm:$0xff] %v2666_v61   ;;  %v1108_v4 = vsel %vm852_vm15, %v724_v53, %v980_v62  ;;  %v727_v5 = vadd.f32 %v3216_v47, %v592_v57  ;;  %v2371_v6 = vunpack.c.l.bf16 %v2770_v60  ;;  %v2372_v7 = vunpack.c.h.bf16 %v2770_v60 }
  0xd0   : > { %v2671_v10 = vpack.c.bf16 %v1108_v4, %v1107_v63  ;;  %v1109_v11 = vsel %vm853_vm0, %v725_v55, %v981_v1  ;;  %v1110_v12 = vsel %vm854_vm1, %v726_v56, %v982_v2  ;;  %v728_v13 = vadd.f32 %v3216_v47, %v593_v3 }
  0xd1   : > { %v2676_v15 = vpack.c.bf16 %v1110_v12, %v1109_v11  ;;  %vm855_vm2 = vcmp.gt.f32.partialorder %v727_v5, 0.0  ;;  %v983_v16 = vmul.f32 0.2, %v727_v5  ;;  %v594_v17 = vmul.f32 %v3207_v41, %v2371_v6 }
  0xd2   : > { %2830 = vst [vmem:[%s3016_s6 + $0x1b8] sm:$0xff] %v2671_v10   ;;  %vm856_vm3 = vcmp.gt.f32.partialorder %v728_v13, 0.0  ;;  %v984_v18 = vmul.f32 0.2, %v728_v13  ;;  %v595_v19 = vmul.f32 %v3207_v41, %v2372_v7  ;;  %v2375_v20 = vunpack.c.l.bf16 %v2771_v8 }
  0xd3   : > { %2831 = vst [vmem:[%s3016_s6 + $0x1c0] sm:$0xff] %v2676_v15   ;;  %v1111_v21 = vsel %vm855_vm2, %v727_v5, %v983_v16  ;;  %v729_v22 = vadd.f32 %v3216_v47, %v594_v17  ;;  %v2376_v23 = vunpack.c.h.bf16 %v2771_v8  ;;  %v2379_v24 = vunpack.c.l.bf16 %v2772_v14 }
  0xd4   : > { %v1112_v25 = vsel %vm856_vm3, %v728_v13, %v984_v18  ;;  %v730_v26 = vadd.f32 %v3216_v47, %v595_v19  ;;  %v596_v27 = vmul.f32 %v3207_v41, %v2375_v20  ;;  %v2380_v0 = vunpack.c.h.bf16 %v2772_v14 }
  0xd5   : > { %v2681_v29 = vpack.c.bf16 %v1112_v25, %v1111_v21  ;;  %vm857_vm4 = vcmp.gt.f32.partialorder %v729_v22, 0.0  ;;  %v985_v30 = vmul.f32 0.2, %v729_v22  ;;  %v597_v31 = vmul.f32 %v3207_v41, %v2376_v23 }
  0xd6   : > { %vm858_vm5 = vcmp.gt.f32.partialorder %v730_v26, 0.0  ;;  %v986_v32 = vmul.f32 0.2, %v730_v26  ;;  %v731_v33 = vadd.f32 %v3216_v47, %v596_v27  ;;  %v598_v9 = vmul.f32 %v3207_v41, %v2379_v24 }
  0xd7   : > { %2832 = vst [vmem:[%s3016_s6 + $0x1c8] sm:$0xff] %v2681_v29   ;;  %v1113_v34 = vsel %vm857_vm4, %v729_v22, %v985_v30  ;;  %v732_v35 = vadd.f32 %v3216_v47, %v597_v31  ;;  %v599_v36 = vmul.f32 %v3207_v41, %v2380_v0  ;;  %v2383_v37 = vunpack.c.l.bf16 %v2773_v28 }
  0xd8   : > { %v1114_v38 = vsel %vm858_vm5, %v730_v26, %v986_v32  ;;  %vm859_vm6 = vcmp.gt.f32.partialorder %v731_v33, 0.0  ;;  %v987_v39 = vmul.f32 0.2, %v731_v33  ;;  %v733_v40 = vadd.f32 %v3216_v47, %v598_v9 }
  0xd9   : > { %v2686_v42 = vpack.c.bf16 %v1114_v38, %v1113_v34  ;;  %vm860_vm7 = vcmp.gt.f32.partialorder %v732_v35, 0.0  ;;  %v988_v43 = vmul.f32 0.2, %v732_v35  ;;  %v734_v44 = vadd.f32 %v3216_v47, %v599_v36 }
  0xda   : > { %v1115_v46 = vsel %vm859_vm6, %v731_v33, %v987_v39  ;;  %vm861_vm8 = vcmp.gt.f32.partialorder %v733_v40, 0.0  ;;  %v989_v48 = vmul.f32 0.2, %v733_v40  ;;  %v2384_v49 = vunpack.c.h.bf16 %v2773_v28 }
  0xdb   : > { %2833 = vst [vmem:[%s3016_s6 + $0x1d0] sm:$0xff] %v2686_v42   ;;  %v1116_v51 = vsel %vm860_vm7, %v732_v35, %v988_v43  ;;  %vm862_vm9 = vcmp.gt.f32.partialorder %v734_v44, 0.0  ;;  %v990_v52 = vmul.f32 0.2, %v734_v44  ;;  %v600_v53 = vmul.f32 %v3207_v41, %v2383_v37 }
  0xdc   : > { %v2691_v54 = vpack.c.bf16 %v1116_v51, %v1115_v46  ;;  %v1117_v55 = vsel %vm861_vm8, %v733_v40, %v989_v48  ;;  %v601_v56 = vmul.f32 %v3207_v41, %v2384_v49  ;;  %v2387_v57 = vunpack.c.l.bf16 %v2774_v45 }
  0xdd   : > { %v1118_v58 = vsel %vm862_vm9, %v734_v44, %v990_v52  ;;  %v735_v59 = vadd.f32 %v3216_v47, %v600_v53  ;;  %v2388_v60 = vunpack.c.h.bf16 %v2774_v45  ;;  %v2391_v61 = vunpack.c.l.bf16 %v2775_v50 }
  0xde   : > { %2834 = vst [vmem:[%s3016_s6 + $0x1d8] sm:$0xff] %v2691_v54   ;;  %v2696_v62 = vpack.c.bf16 %v1118_v58, %v1117_v55  ;;  %v736_v63 = vadd.f32 %v3216_v47, %v601_v56  ;;  %v602_v1 = vmul.f32 %v3207_v41, %v2387_v57  ;;  %v2392_v2 = vunpack.c.h.bf16 %v2775_v50 }
  0xdf   : > { %vm863_vm10 = vcmp.gt.f32.partialorder %v735_v59, 0.0  ;;  %v991_v3 = vmul.f32 0.2, %v735_v59  ;;  %v603_v4 = vmul.f32 %v3207_v41, %v2388_v60  ;;  %v604_v5 = vmul.f32 %v3207_v41, %v2391_v61 }
  0xe0   : > { %2835 = vst [vmem:[%s3016_s6 + $0x1e0] sm:$0xff] %v2696_v62   ;;  %vm864_vm11 = vcmp.gt.f32.partialorder %v736_v63, 0.0  ;;  %v992_v6 = vmul.f32 0.2, %v736_v63  ;;  %v737_v7 = vadd.f32 %v3216_v47, %v602_v1  ;;  %v605_v8 = vmul.f32 %v3207_v41, %v2392_v2 }
  0xe1   : > { %v1119_v10 = vsel %vm863_vm10, %v735_v59, %v991_v3  ;;  %v738_v11 = vadd.f32 %v3216_v47, %v603_v4  ;;  %v739_v12 = vadd.f32 %v3216_v47, %v604_v5 }
  0xe2   : > { %v1120_v13 = vsel %vm864_vm11, %v736_v63, %v992_v6  ;;  %vm865_vm12 = vcmp.gt.f32.partialorder %v737_v7, 0.0  ;;  %v993_v14 = vmul.f32 0.2, %v737_v7  ;;  %v740_v15 = vadd.f32 %v3216_v47, %v605_v8 }
  0xe3   : > { %v2701_v16 = vpack.c.bf16 %v1120_v13, %v1119_v10  ;;  %vm866_vm13 = vcmp.gt.f32.partialorder %v738_v11, 0.0  ;;  %v994_v17 = vmul.f32 0.2, %v738_v11  ;;  %vm867_vm14 = vcmp.gt.f32.partialorder %v739_v12, 0.0 }
  0xe4   : > { %v1121_v18 = vsel %vm865_vm12, %v737_v7, %v993_v14  ;;  %vm868_vm15 = vcmp.gt.f32.partialorder %v740_v15, 0.0  ;;  %v995_v41 = vmul.f32 0.2, %v739_v12  ;;  %v996_v19 = vmul.f32 0.2, %v740_v15 }
  0xe5   : > { %2836 = vst [vmem:[%s3016_s6 + $0x1e8] sm:$0xff] %v2701_v16   ;;  %v1122_v20 = vsel %vm866_vm13, %v738_v11, %v994_v17 }
  0xe6   : > { %v2706_v21 = vpack.c.bf16 %v1122_v20, %v1121_v18  ;;  %v1123_v22 = vsel %vm867_vm14, %v739_v12, %v995_v41  ;;  %v1124_v23 = vsel %vm868_vm15, %v740_v15, %v996_v19 }
  0xe7   : > { %v2711_v24 = vpack.c.bf16 %v1124_v23, %v1123_v22 }
  0xe8   : > { %2837 = vst [vmem:[%s3016_s6 + $0x1f0] sm:$0xff] %v2706_v21  }
  0xe9   : > { %2838 = vst [vmem:[%s3016_s6 + $0x1f8] sm:$0xff] %v2711_v24  }
  0xea PF: > { %s13_s16 = sadd.s32 1, %s2919_s16   ;;  %s3412_s12 = smov %s2911_s14 }
  0xeb   : > { %p10_p7 = scmp.ge.s32.totalorder %s13_s16, 6   ;;  %s3413_s13 = smov %s2915_s15 }
  0xec   : > { %s3414_s14 = smov %s3417_s17  ;;  %s3415_s15 = smov %s3421_s18 }
  0xed   :  { %12 = sbr.rel (!%p10_p7) target bundleno = 3 (0x3), region = 62 }

// kernel: discriminator_forward.9
= control target key start
LH: loop header
LB: loop body
LE: loop exit
PB: predicated region body
PF: predicated region fallthrough
CT: control target
= control target key end

     0   :  { %s2029_s15 = smov 0   ;;  %s2031_s16 = smov 0   ;;  %s2197_s0 = inlined_call_operand.vmem [shape: bf16[2,17,32,128], index: 0, kind: input, shape index: {}]   ;;  %s2198_s1 = inlined_call_operand.vmem [shape: bf16[2,128,128], index: 1, kind: input, shape index: {}]   ;;  %s2199_s2 = inlined_call_operand.vmem [shape: bf16[2,16,32,128], index: 2, kind: output, shape index: {0}]   ;;  %s2200_s3 = inlined_call_operand.vmem [shape: f32[2,2,1,128], index: 3, kind: output, shape index: {1}]   ;;  %s2201_s4 = inlined_call_operand.vmem [shape: f32[2,2,1,128], index: 4, kind: output, shape index: {2}]  }
   0x1   :  { %s2033_s17 = smov 0   ;;  %s2035_s18 = smov 0  }
   0x2   :  { %s2037_s19 = smov 0  }
   0x3 LB: > { %s24_s20 = sadd.s32 1, %s1994_s17  ;;  %s27_s21 = sadd.s32 1, %s1998_s18  ;;  %s2002_s19 = sphi %s2037_s19, %s15_s19   ;;  %s1998_s18 = sphi %s2035_s18, %s2205_s18   ;;  %s1994_s17 = sphi %s2033_s17, %s2204_s17   ;;  %s1990_s16 = sphi %s2031_s16, %s2203_s16   ;;  %s1986_s15 = sphi %s2029_s15, %s2202_s15  }
   0x4   : > { %p25_p0 = scmp.ge.s32.totalorder %s24_s20, 2  ;;  %p1426_p1 = scmp.ge.s32.totalorder %s2002_s19, 1 }
   0x5   : > { %p185_p2 = scmp.lt.s32.totalorder %s2002_s19, 5 }
   0x6   : > { %s2207_s20 = smov (%p25_p0, %s24_s20), 0  ;;  %s2209_s21 = smov (!%p25_p0, %s27_s21), %s1998_s18 }
   0x7   : > { %p186_p3 = pnand %p1426_p1, %p185_p2  ;;  %p29_p4 = scmp.ge.s32.totalorder %s2209_s21, 2 }
   0x8   : > { %v1916_v0 = vld [vmem:[%s2198_s1 + $0x40] sm:$0xff] (!%p186_p3)   ;;  %p230_p5 = scmp.lt.s32.totalorder (!%p186_p3), %s1990_s16, 1  ;;  %v1918_v2 = vld [vmem:[%s2198_s1 + $0x48] sm:$0xff] (!%p186_p3)   ;;  %v1920_v4 = vld [vmem:[%s2198_s1 + $0x50] sm:$0xff] (!%p186_p3)   ;;  %s1570_s23 = sshll.u32 (!%p186_p3), %s1986_s15, 7 }
   0x9   : > { %s2211_s21 = smov (%p29_p4, %s2209_s21), 0  ;;  %189 = sbr.rel (%p186_p3) target bundleno = 337 (0x151), region = 28 }
   0xa   : > { %v1917_v1 = vld [vmem:[%s2198_s1] sm:$0xff] (!%p186_p3)   ;;  %1747 = vmatprep.subr.bf16.mxu1 (!%p186_p3), %v1916_v0  ;;  %v1919_v3 = vld [vmem:[%s2198_s1 + $0x8] sm:$0xff] (!%p186_p3)   ;;  %v1921_v5 = vld [vmem:[%s2198_s1 + $0x10] sm:$0xff] (!%p186_p3)   ;;  %p248_p7 = scmp.lt.s32.totalorder (!%p186_p3), %s1986_s15, 1 }
   0xb   : > { %1795 = vmatprep.subr.bf16.mxu0 (!%p186_p3), %v1917_v1  ;;  %1748 = vmatpush3.bf16.msra.mxu1 (!%p186_p3), %v1916_v0  ;;  %v1922_v6 = vld [vmem:[%s2198_s1 + $0x58] sm:$0xff] (!%p186_p3)   ;;  %v1924_v8 = vld [vmem:[%s2198_s1 + $0x60] sm:$0xff] (!%p186_p3)   ;;  %v1926_v10 = vld [vmem:[%s2198_s1 + $0x68] sm:$0xff] (!%p186_p3)  }
   0xc   : > { %1796 = vmatpush3.bf16.msra.mxu0 (!%p186_p3), %v1917_v1  ;;  %1749 = vmatprep.subr.bf16.mxu1 (!%p186_p3), %v1918_v2  ;;  %v1923_v7 = vld [vmem:[%s2198_s1 + $0x18] sm:$0xff] (!%p186_p3)   ;;  %v1925_v9 = vld [vmem:[%s2198_s1 + $0x20] sm:$0xff] (!%p186_p3)   ;;  %v1927_v11 = vld [vmem:[%s2198_s1 + $0x28] sm:$0xff] (!%p186_p3)  }
   0xd   : > { %1797 = vmatprep.subr.bf16.mxu0 (!%p186_p3), %v1919_v3  ;;  %v1928_v14 = vld [vmem:[%s2198_s1 + $0x70] sm:$0xff] (!%p186_p3)   ;;  %v1930_v16 = vld [vmem:[%s2198_s1 + $0x78] sm:$0xff] (!%p186_p3)  }
   0xe   : > { %v1929_v15 = vld [vmem:[%s2198_s1 + $0x30] sm:$0xff] (!%p186_p3)   ;;  %v1931_v17 = vld [vmem:[%s2198_s1 + $0x38] sm:$0xff] (!%p186_p3)  }
   0xf   : > { %1750 = vmatpush3.bf16.msra.mxu1 (!%p186_p3), %v1918_v2 }
  0x10   : > { %s2213_s16 = smov (!%p230_p5, %s1990_s16), 1  ;;  %1798 = vmatpush3.bf16.msra.mxu0 %v1919_v3  ;;  %1751 = vmatprep.subr.bf16.mxu1 %v1920_v4 }
  0x11   : > { %s1875_s8 = smul.u32 272, %s2213_s16  ;;  %1799 = vmatprep.subr.bf16.mxu0 %v1921_v5  ;;  %s1430_s24 = sshll.u32 %s2213_s16, 6 }
  0x12   : > { %s1432_s30 = sshll.u32 %s2213_s16, 1 }
  0x13   : > { %s234_s22 = scalar_lea.vmem %s2197_s0, %s1875_s8  ;;  %1752 = vmatpush3.bf16.msra.mxu1 %v1920_v4 }
  0x14   : > { %1800 = vmatpush3.bf16.msra.mxu0 %v1921_v5  ;;  %1753 = vmatprep.subr.bf16.mxu1 %v1922_v6  ;;  %s2098_s28 = scalar_lea.vmem %s234_s22, %s1570_s23  ;;  %s1428_s22 = sshll.u32 %s1986_s15, 3 }
  0x15   : > { %1801 = vmatprep.subr.bf16.mxu0 %v1923_v7  ;;  %v1932_v12 = vld [vmem:[%s2098_s28 + $0x10] sm:$0xff]   ;;  %v1933_v13 = vld [vmem:[%s2098_s28] sm:$0xff]   ;;  %v1934_v18 = vld [vmem:[%s2098_s28 + $0x18] sm:$0xff]   ;;  %p238_p6 = scmp.lt.s32.totalorder %s1428_s22, 15  ;;  %s2217_s15 = smov (!%p248_p7, %s1986_s15), 1 }
  0x16   : > { %1763 = vmatprep.mubr.bf16.mxu1 %v1932_v12  ;;  %1811 = vmatprep.mubr.bf16.mxu0 %v1933_v13  ;;  %v1935_v19 = vld [vmem:[%s2098_s28 + $0x8] sm:$0xff]   ;;  %v1936_v20 = vld [vmem:[%s2098_s28 + $0x20] sm:$0xff]   ;;  %v1937_v21 = vld [vmem:[%s2098_s28 + $0x10] sm:$0xff]   ;;  %s251_s5 = sadd.s32 %s1432_s30, %s2217_s15 }
  0x17   : > { %1754 = vmatpush3.bf16.msra.mxu1 %v1922_v6  ;;  %v1938_v22 = vld [vmem:[%s2098_s28 + $0x28] sm:$0xff]   ;;  %v1939_v23 = vld [vmem:[%s2098_s28 + $0x18] sm:$0xff]   ;;  %v1940_v24 = vld [vmem:[%s2098_s28 + $0x30] sm:$0xff]   ;;  %s2215_s22 = smov (!%p238_p6, %s1428_s22), 15  ;;  %s252_s8 = scalar_lea.vmem %s2200_s3, %s251_s5 }
  0x18   : > { %1802 = vmatpush3.bf16.msra.mxu0 %v1923_v7  ;;  %1755 = vmatprep.subr.bf16.mxu1 %v1924_v8  ;;  %v1941_v25 = vld [vmem:[%s2098_s28 + $0x20] sm:$0xff]   ;;  %v1942_v26 = vld [vmem:[%s2098_s28 + $0x38] sm:$0xff]   ;;  %v1943_v27 = vld [vmem:[%s2098_s28 + $0x28] sm:$0xff]   ;;  %s1429_s23 = sshll.u32 %s2215_s22, 2  ;;  %s259_s11 = scalar_lea.vmem %s2201_s4, %s251_s5 }
  0x19   : > { %1803 = vmatprep.subr.bf16.mxu0 %v1925_v9  ;;  %v1944_v28 = vld [vmem:[%s2098_s28 + $0x40] sm:$0xff]   ;;  %v1945_v29 = vld [vmem:[%s2098_s28 + $0x30] sm:$0xff]   ;;  %v1946_v30 = vld [vmem:[%s2098_s28 + $0x48] sm:$0xff]   ;;  %s242_s25 = sadd.s32 %s1430_s24, %s1429_s23 }
  0x1a   : > { %v1947_v31 = vld [vmem:[%s2098_s28 + $0x38] sm:$0xff]   ;;  %v1948_v32 = vld [vmem:[%s2098_s28 + $0x50] sm:$0xff]   ;;  %v1949_v33 = vld [vmem:[%s2098_s28 + $0x40] sm:$0xff]   ;;  %s1431_s26 = sshll.u32 %s242_s25, 2 }
  0x1b   : > { %1756 = vmatpush3.bf16.msra.mxu1 %v1924_v8  ;;  %v1950_v34 = vld [vmem:[%s2098_s28 + $0x58] sm:$0xff]   ;;  %v1951_v35 = vld [vmem:[%s2098_s28 + $0x48] sm:$0xff]   ;;  %v1952_v36 = vld [vmem:[%s2098_s28 + $0x60] sm:$0xff]   ;;  %s2155_s29 = scalar_lea.vmem %s2199_s2, %s1431_s26 }
  0x1c   : > { %1804 = vmatpush3.bf16.msra.mxu0 %v1925_v9  ;;  %1757 = vmatprep.subr.bf16.mxu1 %v1926_v10  ;;  %v1953_v37 = vld [vmem:[%s2098_s28 + $0x50] sm:$0xff]   ;;  %v1954_v38 = vld [vmem:[%s2098_s28 + $0x68] sm:$0xff]   ;;  %v1955_v39 = vld [vmem:[%s2098_s28 + $0x58] sm:$0xff]  }
  0x1d   : > { %1805 = vmatprep.subr.bf16.mxu0 %v1927_v11  ;;  %v1956_v40 = vld [vmem:[%s2098_s28 + $0x70] sm:$0xff]   ;;  %v1957_v41 = vld [vmem:[%s2098_s28 + $0x60] sm:$0xff]   ;;  %v1958_v42 = vld [vmem:[%s2098_s28 + $0x78] sm:$0xff]  }
  0x1e   : > { %v1959_v43 = vld [vmem:[%s2098_s28 + $0x68] sm:$0xff]   ;;  %v1960_v44 = vld [vmem:[%s2098_s28 + $0x80] sm:$0xff]   ;;  %v1961_v45 = vld [vmem:[%s2098_s28 + $0x70] sm:$0xff]  }
  0x1f   : > { %1758 = vmatpush3.bf16.msra.mxu1 %v1926_v10  ;;  %v1962_v46 = vld [vmem:[%s2098_s28 + $0x88] sm:$0xff]   ;;  %v1963_v47 = vld [vmem:[%s2098_s28 + $0x78] sm:$0xff]  }
  0x20   : > { %1806 = vmatpush3.bf16.msra.mxu0 %v1927_v11  ;;  %1759 = vmatprep.subr.bf16.mxu1 %v1928_v14 }
  0x21   : > { %1807 = vmatprep.subr.bf16.mxu0 %v1929_v15 }
  0x23   : > { %1760 = vmatpush3.bf16.msra.mxu1 %v1928_v14 }
  0x24   : > { %1808 = vmatpush3.bf16.msra.mxu0 %v1929_v15  ;;  %1761 = vmatprep.subr.bf16.mxu1 %v1930_v16 }
  0x25   : > { %1809 = vmatprep.subr.bf16.mxu0 %v1931_v17 }
  0x27   : > { %1762 = vmatpush3.bf16.msra.mxu1 %v1930_v16 }
  0x28   : > { %1810 = vmatpush3.bf16.msra.mxu0 %v1931_v17 }
  0x2a   : > { %1764 = vmatmul.mubr.bf16.vlgmr.msra.gmra.mrb[0].mxu1 %v1934_v18 }
  0x2b   : > { %1812 = vmatmul.mubr.bf16.vlgmr.msra.gmra.mrb[0].mxu0 %v1935_v19  ;;  %1767 = vmatprep.mubr.bf16.mxu1 %v1936_v20 }
  0x2c   : > { %1815 = vmatprep.mubr.bf16.mxu0 %v1937_v21 }
  0x32   : > { %1768 = vmatmul.mubr.bf16.gmra.mrb[4].mxu1 %v1938_v22 }
  0x33   : > { %1816 = vmatmul.mubr.bf16.gmra.mrb[4].mxu0 %v1939_v23  ;;  %1771 = vmatprep.mubr.bf16.mxu1 %v1940_v24 }
  0x34   : > { %1819 = vmatprep.mubr.bf16.mxu0 %v1941_v25 }
  0x3a   : > { %1772 = vmatmul.mubr.bf16.gmra.mrb[8].mxu1 %v1942_v26 }
  0x3b   : > { %1820 = vmatmul.mubr.bf16.gmra.mrb[8].mxu0 %v1943_v27  ;;  %1775 = vmatprep.mubr.bf16.mxu1 %v1944_v28 }
  0x3c   : > { %1823 = vmatprep.mubr.bf16.mxu0 %v1945_v29 }
  0x42   : > { %1776 = vmatmul.mubr.bf16.gmra.mrb[12].mxu1 %v1946_v30 }
  0x43   : > { %1824 = vmatmul.mubr.bf16.gmra.mrb[12].mxu0 %v1947_v31  ;;  %1779 = vmatprep.mubr.bf16.mxu1 %v1948_v32 }
  0x44   : > { %1827 = vmatprep.mubr.bf16.mxu0 %v1949_v33 }
  0x4a   : > { %1780 = vmatmul.mubr.bf16.gmra.mrb[16].mxu1 %v1950_v34 }
  0x4b   : > { %1828 = vmatmul.mubr.bf16.gmra.mrb[16].mxu0 %v1951_v35  ;;  %1783 = vmatprep.mubr.bf16.mxu1 %v1952_v36 }
  0x4c   : > { %1831 = vmatprep.mubr.bf16.mxu0 %v1953_v37 }
  0x52   : > { %1784 = vmatmul.mubr.bf16.gmra.mrb[20].mxu1 %v1954_v38 }
  0x53   : > { %1832 = vmatmul.mubr.bf16.gmra.mrb[20].mxu0 %v1955_v39  ;;  %1787 = vmatprep.mubr.bf16.mxu1 %v1956_v40 }
  0x54   : > { %1835 = vmatprep.mubr.bf16.mxu0 %v1957_v41 }
  0x5a   : > { %1788 = vmatmul.mubr.bf16.gmra.mrb[24].mxu1 %v1958_v42 }
  0x5b   : > { %1836 = vmatmul.mubr.bf16.gmra.mrb[24].mxu0 %v1959_v43  ;;  %1791 = vmatprep.mubr.bf16.mxu1 %v1960_v44 }
  0x5c   : > { %1839 = vmatprep.mubr.bf16.mxu0 %v1961_v45 }
  0x62   : > { %1792 = vmatmul.mubr.bf16.gmra.mrb[28].mxu1 %v1962_v46 }
  0x63   : > { %1840 = vmatmul.mubr.bf16.gmra.mrb[28].mxu0 %v1963_v47 }
  0xfd   : > { %v1765_v48 = vpop.f32.mrb[0].mxu1 }
  0xfe   : > { %v1813_v49 = vpop.f32.mrb[0].mxu0  ;;  %v544_v50 = vpop.f32.mrb[1].mxu1 }
  0xff   : > { %v858_v51 = vadd.f32 %v1813_v49, %v1765_v48  ;;  %v849_v52 = vpop.f32.mrb[1].mxu0  ;;  %v1766_v53 = vpop.f32.mrb[2].mxu1 }
 0x100   : > { %v850_v54 = vadd.f32 %v849_v52, %v544_v50  ;;  %v1814_v55 = vpop.f32.mrb[2].mxu0  ;;  %v547_v56 = vpop.f32.mrb[3].mxu1 }
 0x101   : > { %v861_v57 = vadd.f32 %v1814_v55, %v1766_v53  ;;  %v852_v58 = vpop.f32.mrb[3].mxu0  ;;  %v1176_v2 = vmul.f32 %v858_v51, %v858_v51 }
 0x102   : > { %v853_v59 = vadd.f32 %v852_v58, %v547_v56  ;;  %v1174_v61 = vmul.f32 %v850_v54, %v850_v54 }
 0x103   : > { %v1612_v60 = vpack.c.bf16 %v861_v57, %v858_v51  ;;  %v1177_v10 = vmul.f32 %v861_v57, %v861_v57 }
 0x104   : > { %v1607_v62 = vpack.c.bf16 %v853_v59, %v850_v54  ;;  %v1136_v63 = vadd.f32 %v853_v59, %v850_v54  ;;  %v1175_v0 = vmul.f32 %v853_v59, %v853_v59 }
 0x105   : > { %1684 = vst [vmem:[%s2155_s29 + $0x8] sm:$0xff] %v1612_v60   ;;  %v1769_v1 = vpop.f32.mrb[4].mxu1 }
 0x106   : > { %1608 = vst [vmem:[%s2155_s29] sm:$0xff] %v1607_v62   ;;  %v1137_v3 = vadd.f32 %v1136_v63, %v858_v51  ;;  %v1206_v4 = vadd.f32 %v1175_v0, %v1174_v61  ;;  %v1817_v5 = vpop.f32.mrb[4].mxu0  ;;  %v560_v6 = vpop.f32.mrb[5].mxu1 }
 0x107   : > { %v874_v7 = vadd.f32 %v1817_v5, %v1769_v1  ;;  %v865_v8 = vpop.f32.mrb[5].mxu0  ;;  %v1770_v9 = vpop.f32.mrb[6].mxu1 }
 0x108   : > { %v1207_v11 = vadd.f32 %v1206_v4, %v1176_v2  ;;  %v866_v12 = vadd.f32 %v865_v8, %v560_v6  ;;  %v1138_v13 = vadd.f32 %v1137_v3, %v861_v57  ;;  %v1818_v14 = vpop.f32.mrb[6].mxu0  ;;  %v563_v15 = vpop.f32.mrb[7].mxu1 }
 0x109   : > { %v877_v16 = vadd.f32 %v1818_v14, %v1770_v9  ;;  %v868_v17 = vpop.f32.mrb[7].mxu0  ;;  %v1180_v28 = vmul.f32 %v874_v7, %v874_v7 }
 0x10a   : > { %v1139_v18 = vadd.f32 %v1138_v13, %v866_v12  ;;  %v1178_v19 = vmul.f32 %v866_v12, %v866_v12  ;;  %v1208_v20 = vadd.f32 %v1207_v11, %v1177_v10  ;;  %v869_v21 = vadd.f32 %v868_v17, %v563_v15 }
 0x10b   : > { %v1622_v22 = vpack.c.bf16 %v877_v16, %v874_v7  ;;  %v1181_v36 = vmul.f32 %v877_v16, %v877_v16 }
 0x10c   : > { %v1209_v23 = vadd.f32 %v1208_v20, %v1178_v19  ;;  %v1617_v24 = vpack.c.bf16 %v869_v21, %v866_v12  ;;  %v1140_v25 = vadd.f32 %v1139_v18, %v869_v21  ;;  %v1179_v26 = vmul.f32 %v869_v21, %v869_v21 }
 0x10d   : > { %1686 = vst [vmem:[%s2155_s29 + $0x18] sm:$0xff] %v1622_v22   ;;  %v1773_v27 = vpop.f32.mrb[8].mxu1 }
 0x10e   : > { %1685 = vst [vmem:[%s2155_s29 + $0x10] sm:$0xff] %v1617_v24   ;;  %v1141_v29 = vadd.f32 %v1140_v25, %v874_v7  ;;  %v1210_v30 = vadd.f32 %v1209_v23, %v1179_v26  ;;  %v1821_v31 = vpop.f32.mrb[8].mxu0  ;;  %v576_v32 = vpop.f32.mrb[9].mxu1 }
 0x10f   : > { %v890_v33 = vadd.f32 %v1821_v31, %v1773_v27  ;;  %v881_v34 = vpop.f32.mrb[9].mxu0  ;;  %v1774_v35 = vpop.f32.mrb[10].mxu1 }
 0x110   : > { %v1211_v37 = vadd.f32 %v1210_v30, %v1180_v28  ;;  %v882_v38 = vadd.f32 %v881_v34, %v576_v32  ;;  %v1142_v39 = vadd.f32 %v1141_v29, %v877_v16  ;;  %v1822_v40 = vpop.f32.mrb[10].mxu0  ;;  %v579_v41 = vpop.f32.mrb[11].mxu1 }
 0x111   : > { %v893_v42 = vadd.f32 %v1822_v40, %v1774_v35  ;;  %v884_v43 = vpop.f32.mrb[11].mxu0  ;;  %v1184_v54 = vmul.f32 %v890_v33, %v890_v33 }
 0x112   : > { %v1143_v44 = vadd.f32 %v1142_v39, %v882_v38  ;;  %v1182_v45 = vmul.f32 %v882_v38, %v882_v38  ;;  %v1212_v46 = vadd.f32 %v1211_v37, %v1181_v36  ;;  %v885_v47 = vadd.f32 %v884_v43, %v579_v41 }
 0x113   : > { %v1632_v48 = vpack.c.bf16 %v893_v42, %v890_v33  ;;  %v1185_v62 = vmul.f32 %v893_v42, %v893_v42 }
 0x114   : > { %v1213_v49 = vadd.f32 %v1212_v46, %v1182_v45  ;;  %v1627_v50 = vpack.c.bf16 %v885_v47, %v882_v38  ;;  %v1144_v51 = vadd.f32 %v1143_v44, %v885_v47  ;;  %v1183_v52 = vmul.f32 %v885_v47, %v885_v47 }
 0x115   : > { %1688 = vst [vmem:[%s2155_s29 + $0x28] sm:$0xff] %v1632_v48   ;;  %v1777_v53 = vpop.f32.mrb[12].mxu1 }
 0x116   : > { %1687 = vst [vmem:[%s2155_s29 + $0x20] sm:$0xff] %v1627_v50   ;;  %v1145_v55 = vadd.f32 %v1144_v51, %v890_v33  ;;  %v1214_v56 = vadd.f32 %v1213_v49, %v1183_v52  ;;  %v1825_v57 = vpop.f32.mrb[12].mxu0  ;;  %v592_v58 = vpop.f32.mrb[13].mxu1 }
 0x117   : > { %v906_v59 = vadd.f32 %v1825_v57, %v1777_v53  ;;  %v897_v60 = vpop.f32.mrb[13].mxu0  ;;  %v1778_v61 = vpop.f32.mrb[14].mxu1 }
 0x118   : > { %v1215_v63 = vadd.f32 %v1214_v56, %v1184_v54  ;;  %v898_v0 = vadd.f32 %v897_v60, %v592_v58  ;;  %v1146_v1 = vadd.f32 %v1145_v55, %v893_v42  ;;  %v1826_v2 = vpop.f32.mrb[14].mxu0  ;;  %v595_v3 = vpop.f32.mrb[15].mxu1 }
 0x119   : > { %v909_v4 = vadd.f32 %v1826_v2, %v1778_v61  ;;  %v900_v5 = vpop.f32.mrb[15].mxu0  ;;  %v1188_v16 = vmul.f32 %v906_v59, %v906_v59 }
 0x11a   : > { %v1147_v6 = vadd.f32 %v1146_v1, %v898_v0  ;;  %v1186_v7 = vmul.f32 %v898_v0, %v898_v0  ;;  %v1216_v8 = vadd.f32 %v1215_v63, %v1185_v62  ;;  %v901_v9 = vadd.f32 %v900_v5, %v595_v3 }
 0x11b   : > { %v1642_v10 = vpack.c.bf16 %v909_v4, %v906_v59  ;;  %v1189_v24 = vmul.f32 %v909_v4, %v909_v4 }
 0x11c   : > { %v1217_v11 = vadd.f32 %v1216_v8, %v1186_v7  ;;  %v1637_v12 = vpack.c.bf16 %v901_v9, %v898_v0  ;;  %v1148_v13 = vadd.f32 %v1147_v6, %v901_v9  ;;  %v1187_v14 = vmul.f32 %v901_v9, %v901_v9 }
 0x11d   : > { %1690 = vst [vmem:[%s2155_s29 + $0x38] sm:$0xff] %v1642_v10   ;;  %v1781_v15 = vpop.f32.mrb[16].mxu1 }
 0x11e   : > { %1689 = vst [vmem:[%s2155_s29 + $0x30] sm:$0xff] %v1637_v12   ;;  %v1149_v17 = vadd.f32 %v1148_v13, %v906_v59  ;;  %v1218_v18 = vadd.f32 %v1217_v11, %v1187_v14  ;;  %v1829_v19 = vpop.f32.mrb[16].mxu0  ;;  %v608_v20 = vpop.f32.mrb[17].mxu1 }
 0x11f   : > { %v922_v21 = vadd.f32 %v1829_v19, %v1781_v15  ;;  %v913_v22 = vpop.f32.mrb[17].mxu0  ;;  %v1782_v23 = vpop.f32.mrb[18].mxu1 }
 0x120   : > { %v1219_v25 = vadd.f32 %v1218_v18, %v1188_v16  ;;  %v914_v26 = vadd.f32 %v913_v22, %v608_v20  ;;  %v1150_v27 = vadd.f32 %v1149_v17, %v909_v4  ;;  %v1830_v28 = vpop.f32.mrb[18].mxu0  ;;  %v611_v29 = vpop.f32.mrb[19].mxu1 }
 0x121   : > { %v925_v30 = vadd.f32 %v1830_v28, %v1782_v23  ;;  %v916_v31 = vpop.f32.mrb[19].mxu0  ;;  %v1192_v42 = vmul.f32 %v922_v21, %v922_v21 }
 0x122   : > { %v1151_v32 = vadd.f32 %v1150_v27, %v914_v26  ;;  %v1190_v33 = vmul.f32 %v914_v26, %v914_v26  ;;  %v1220_v34 = vadd.f32 %v1219_v25, %v1189_v24  ;;  %v917_v35 = vadd.f32 %v916_v31, %v611_v29 }
 0x123   : > { %v1652_v36 = vpack.c.bf16 %v925_v30, %v922_v21  ;;  %v1193_v50 = vmul.f32 %v925_v30, %v925_v30 }
 0x124   : > { %v1221_v37 = vadd.f32 %v1220_v34, %v1190_v33  ;;  %v1647_v38 = vpack.c.bf16 %v917_v35, %v914_v26  ;;  %v1152_v39 = vadd.f32 %v1151_v32, %v917_v35  ;;  %v1191_v40 = vmul.f32 %v917_v35, %v917_v35 }
 0x125   : > { %1692 = vst [vmem:[%s2155_s29 + $0x48] sm:$0xff] %v1652_v36   ;;  %v1785_v41 = vpop.f32.mrb[20].mxu1 }
 0x126   : > { %1691 = vst [vmem:[%s2155_s29 + $0x40] sm:$0xff] %v1647_v38   ;;  %v1153_v43 = vadd.f32 %v1152_v39, %v922_v21  ;;  %v1222_v44 = vadd.f32 %v1221_v37, %v1191_v40  ;;  %v1833_v45 = vpop.f32.mrb[20].mxu0  ;;  %v624_v46 = vpop.f32.mrb[21].mxu1 }
 0x127   : > { %v938_v47 = vadd.f32 %v1833_v45, %v1785_v41  ;;  %v929_v48 = vpop.f32.mrb[21].mxu0  ;;  %v1786_v49 = vpop.f32.mrb[22].mxu1 }
 0x128   : > { %v1223_v51 = vadd.f32 %v1222_v44, %v1192_v42  ;;  %v930_v52 = vadd.f32 %v929_v48, %v624_v46  ;;  %v1154_v53 = vadd.f32 %v1153_v43, %v925_v30  ;;  %v1834_v54 = vpop.f32.mrb[22].mxu0  ;;  %v627_v55 = vpop.f32.mrb[23].mxu1 }
 0x129   : > { %v941_v56 = vadd.f32 %v1834_v54, %v1786_v49  ;;  %v932_v57 = vpop.f32.mrb[23].mxu0  ;;  %v1196_v4 = vmul.f32 %v938_v47, %v938_v47 }
 0x12a   : > { %v1155_v58 = vadd.f32 %v1154_v53, %v930_v52  ;;  %v1194_v59 = vmul.f32 %v930_v52, %v930_v52  ;;  %v1224_v60 = vadd.f32 %v1223_v51, %v1193_v50  ;;  %v933_v61 = vadd.f32 %v932_v57, %v627_v55 }
 0x12b   : > { %v1662_v62 = vpack.c.bf16 %v941_v56, %v938_v47  ;;  %v1197_v12 = vmul.f32 %v941_v56, %v941_v56 }
 0x12c   : > { %v1225_v63 = vadd.f32 %v1224_v60, %v1194_v59  ;;  %v1657_v0 = vpack.c.bf16 %v933_v61, %v930_v52  ;;  %v1156_v1 = vadd.f32 %v1155_v58, %v933_v61  ;;  %v1195_v2 = vmul.f32 %v933_v61, %v933_v61 }
 0x12d   : > { %1694 = vst [vmem:[%s2155_s29 + $0x58] sm:$0xff] %v1662_v62   ;;  %v1789_v3 = vpop.f32.mrb[24].mxu1 }
 0x12e   : > { %1693 = vst [vmem:[%s2155_s29 + $0x50] sm:$0xff] %v1657_v0   ;;  %v1157_v5 = vadd.f32 %v1156_v1, %v938_v47  ;;  %v1226_v6 = vadd.f32 %v1225_v63, %v1195_v2  ;;  %v1837_v7 = vpop.f32.mrb[24].mxu0  ;;  %v640_v8 = vpop.f32.mrb[25].mxu1 }
 0x12f   : > { %v954_v9 = vadd.f32 %v1837_v7, %v1789_v3  ;;  %v945_v10 = vpop.f32.mrb[25].mxu0  ;;  %v1790_v11 = vpop.f32.mrb[26].mxu1 }
 0x130   : > { %v1227_v13 = vadd.f32 %v1226_v6, %v1196_v4  ;;  %v946_v14 = vadd.f32 %v945_v10, %v640_v8  ;;  %v1158_v15 = vadd.f32 %v1157_v5, %v941_v56  ;;  %v1838_v16 = vpop.f32.mrb[26].mxu0  ;;  %v643_v17 = vpop.f32.mrb[27].mxu1 }
 0x131   : > { %v957_v18 = vadd.f32 %v1838_v16, %v1790_v11  ;;  %v948_v19 = vpop.f32.mrb[27].mxu0  ;;  %v1200_v30 = vmul.f32 %v954_v9, %v954_v9 }
 0x132   : > { %v1159_v20 = vadd.f32 %v1158_v15, %v946_v14  ;;  %v1198_v21 = vmul.f32 %v946_v14, %v946_v14  ;;  %v1228_v22 = vadd.f32 %v1227_v13, %v1197_v12  ;;  %v949_v23 = vadd.f32 %v948_v19, %v643_v17 }
 0x133   : > { %v1672_v24 = vpack.c.bf16 %v957_v18, %v954_v9  ;;  %v1201_v38 = vmul.f32 %v957_v18, %v957_v18 }
 0x134   : > { %v1229_v25 = vadd.f32 %v1228_v22, %v1198_v21  ;;  %v1667_v26 = vpack.c.bf16 %v949_v23, %v946_v14  ;;  %v1160_v27 = vadd.f32 %v1159_v20, %v949_v23  ;;  %v1199_v28 = vmul.f32 %v949_v23, %v949_v23 }
 0x135   : > { %1696 = vst [vmem:[%s2155_s29 + $0x68] sm:$0xff] %v1672_v24   ;;  %v1793_v29 = vpop.f32.mrb[28].mxu1 }
 0x136   : > { %1695 = vst [vmem:[%s2155_s29 + $0x60] sm:$0xff] %v1667_v26   ;;  %v1161_v31 = vadd.f32 %v1160_v27, %v954_v9  ;;  %v1230_v32 = vadd.f32 %v1229_v25, %v1199_v28  ;;  %v1841_v33 = vpop.f32.mrb[28].mxu0  ;;  %v656_v34 = vpop.f32.mrb[29].mxu1 }
 0x137   : > { %v970_v35 = vadd.f32 %v1841_v33, %v1793_v29  ;;  %v961_v36 = vpop.f32.mrb[29].mxu0  ;;  %v1794_v37 = vpop.f32.mrb[30].mxu1 }
 0x138   : > { %v1231_v39 = vadd.f32 %v1230_v32, %v1200_v30  ;;  %v962_v40 = vadd.f32 %v961_v36, %v656_v34  ;;  %v1162_v41 = vadd.f32 %v1161_v31, %v957_v18  ;;  %v1842_v42 = vpop.f32.mrb[30].mxu0  ;;  %v659_v43 = vpop.f32.mrb[31].mxu1 }
 0x139   : > { %v973_v44 = vadd.f32 %v1842_v42, %v1794_v37  ;;  %v964_v45 = vpop.f32.mrb[31].mxu0  ;;  %v1204_v55 = vmul.f32 %v970_v35, %v970_v35 }
 0x13a   : > { %v1163_v46 = vadd.f32 %v1162_v41, %v962_v40  ;;  %v1202_v47 = vmul.f32 %v962_v40, %v962_v40  ;;  %v1232_v48 = vadd.f32 %v1231_v39, %v1201_v38  ;;  %v965_v49 = vadd.f32 %v964_v45, %v659_v43 }
 0x13b   : > { %v1682_v50 = vpack.c.bf16 %v973_v44, %v970_v35  ;;  %v1205_v58 = vmul.f32 %v973_v44, %v973_v44 }
 0x13c   : > { %v1233_v51 = vadd.f32 %v1232_v48, %v1202_v47  ;;  %v1677_v52 = vpack.c.bf16 %v965_v49, %v962_v40  ;;  %v1164_v53 = vadd.f32 %v1163_v46, %v965_v49  ;;  %v1203_v54 = vmul.f32 %v965_v49, %v965_v49 }
 0x13d   : > { %1698 = vst [vmem:[%s2155_s29 + $0x78] sm:$0xff] %v1682_v50  }
 0x13e   : > { %1697 = vst [vmem:[%s2155_s29 + $0x70] sm:$0xff] %v1677_v52   ;;  %v1165_v56 = vadd.f32 %v1164_v53, %v970_v35  ;;  %v1234_v57 = vadd.f32 %v1233_v51, %v1203_v54 }
 0x140   : > { %v1166_v59 = vadd.f32 %v1165_v56, %v973_v44  ;;  %v1235_v60 = vadd.f32 %v1234_v57, %v1204_v55 }
 0x142   : > { %v1167_v61 = vrot.slane %v1166_v59, 4  ;;  %v1236_v62 = vadd.f32 %v1235_v60, %v1205_v58 }
 0x144   : > { %v1168_v63 = vadd.f32 %v1167_v61, %v1166_v59  ;;  %v1237_v0 = vrot.slane %v1236_v62, 4 }
 0x146   : > { %v1169_v1 = vrot.slane %v1168_v63, 2  ;;  %v1238_v2 = vadd.f32 %v1237_v0, %v1236_v62 }
 0x148   : > { %v1170_v3 = vadd.f32 %v1169_v1, %v1168_v63  ;;  %v1239_v4 = vrot.slane %v1238_v2, 2 }
 0x14a   : > { %v1171_v5 = vrot.slane %v1170_v3, 1  ;;  %v1240_v6 = vadd.f32 %v1239_v4, %v1238_v2 }
 0x14c   : > { %v1172_v7 = vadd.f32 %v1171_v5, %v1170_v3  ;;  %v1241_v8 = vrot.slane %v1240_v6, 1 }
 0x14e   : > { %1173 = vst [vmem:[%s252_s8] sm:$0x1] %v1172_v7  ;;  %v1242_v9 = vadd.f32 %v1241_v8, %v1240_v6 }
 0x150   : > { %1243 = vst [vmem:[%s259_s11] sm:$0x1] %v1242_v9 }
 0x151 PF: > { %s15_s19 = sadd.s32 1, %s2002_s19   ;;  %s2202_s15 = smov %s1994_s17 }
 0x152   : > { %p12_p8 = scmp.ge.s32.totalorder %s15_s19, 6   ;;  %s2203_s16 = smov %s1998_s18 }
 0x153   : > { %s2204_s17 = smov %s2207_s20  ;;  %s2205_s18 = smov %s2211_s21 }
 0x154   :  { %14 = sbr.rel (!%p12_p8) target bundleno = 3 (0x3), region = 85 }

// kernel: discriminator_forward.10
= control target key start
LH: loop header
LB: loop body
LE: loop exit
PB: predicated region body
PF: predicated region fallthrough
CT: control target
= control target key end

     0   :  { %s1067_s12 = smov 0   ;;  %s1069_s13 = smov 0   ;;  %s1236_s0 = inlined_call_operand.vmem [shape: bf16[2,16,32,128], index: 0, kind: input, shape index: {}]   ;;  %s1237_s1 = inlined_call_operand.vmem [shape: f32[1,128], index: 1, kind: input, shape index: {}]   ;;  %s1238_s2 = inlined_call_operand.vmem [shape: f32[1,128], index: 2, kind: input, shape index: {}]   ;;  %s1239_s3 = inlined_call_operand.vmem [shape: bf16[2,16,32,128], index: 3, kind: output, shape index: {}]  }
   0x1   :  { %s1071_s14 = smov 0   ;;  %s1073_s15 = smov 0  }
   0x2   :  { %s1075_s16 = smov 0  }
   0x3 LB: > { %s22_s17 = sadd.s32 1, %s1037_s14  ;;  %s25_s18 = sadd.s32 1, %s1041_s15  ;;  %s1045_s16 = sphi %s1075_s16, %s13_s16   ;;  %s1041_s15 = sphi %s1073_s15, %s1243_s15   ;;  %s1037_s14 = sphi %s1071_s14, %s1242_s14   ;;  %s1033_s13 = sphi %s1069_s13, %s1241_s13   ;;  %s1029_s12 = sphi %s1067_s12, %s1240_s12  }
   0x4   : > { %p23_p0 = scmp.ge.s32.totalorder %s22_s17, 2  ;;  %p716_p1 = scmp.ge.s32.totalorder %s1045_s16, 1 }
   0x5   : > { %p159_p2 = scmp.lt.s32.totalorder %s1045_s16, 5 }
   0x6   : > { %s1245_s17 = smov (%p23_p0, %s22_s17), 0  ;;  %s1247_s18 = smov (!%p23_p0, %s25_s18), %s1041_s15 }
   0x7   : > { %p160_p3 = pnand %p716_p1, %p159_p2  ;;  %p27_p4 = scmp.ge.s32.totalorder %s1247_s18, 2 }
   0x8   : > { %s717_s19 = sshll.u32 (!%p160_p3), %s1029_s12, 3  ;;  %p194_p5 = scmp.lt.s32.totalorder (!%p160_p3), %s1033_s13, 1  ;;  %v1110_v0 = vld [vmem:[%s1237_s1] ss:$0 sm:$0xff] (!%p160_p3) }
   0x9   : > { %s1249_s18 = smov (%p27_p4, %s1247_s18), 0  ;;  %163 = sbr.rel (%p160_p3) target bundleno = 81 (0x51), region = 32 }
   0xa   : > { %p196_p6 = scmp.lt.s32.totalorder (!%p160_p3), %s717_s19, 15  ;;  %v1119_v9 = vld [vmem:[%s1238_s2] ss:$0 sm:$0xff] (!%p160_p3) }
  0x10   : > { %s1251_s13 = smov (!%p194_p5, %s1033_s13), 1  ;;  %s1253_s19 = smov (!%p196_p6, %s717_s19), 15 }
  0x11   : > { %s719_s20 = sshll.u32 %s1251_s13, 6  ;;  %s718_s21 = sshll.u32 %s1253_s19, 2 }
  0x12   : > { %s1097_s22 = sadd.s32 %s719_s20, %s718_s21 }
  0x13   : > { %s720_s23 = sshll.u32 %s1097_s22, 2 }
  0x14   : > { %s1105_s26 = scalar_lea.vmem %s1236_s0, %s720_s23  ;;  %s1142_s6 = scalar_lea.vmem %s1239_s3, %s720_s23 }
  0x15   : > { %v794_v1 = vld [vmem:[%s1105_s26] sm:$0xff]   ;;  %v937_v2 = vld [vmem:[%s1105_s26 + $0x8] sm:$0xff]   ;;  %v938_v3 = vld [vmem:[%s1105_s26 + $0x10] sm:$0xff]  }
  0x16   : > { %v795_v4 = vunpack.c.l.bf16 %v794_v1  ;;  %v796_v5 = vunpack.c.h.bf16 %v794_v1  ;;  %v799_v6 = vunpack.c.l.bf16 %v937_v2  ;;  %v800_v7 = vunpack.c.h.bf16 %v937_v2  ;;  %v939_v8 = vld [vmem:[%s1105_s26 + $0x18] sm:$0xff]   ;;  %v940_v36 = vld [vmem:[%s1105_s26 + $0x20] sm:$0xff]   ;;  %v941_v41 = vld [vmem:[%s1105_s26 + $0x28] sm:$0xff]  }
  0x17   : > { %v803_v10 = vunpack.c.l.bf16 %v938_v3  ;;  %v804_v11 = vunpack.c.h.bf16 %v938_v3  ;;  %v807_v12 = vunpack.c.l.bf16 %v939_v8  ;;  %v808_v13 = vunpack.c.h.bf16 %v939_v8  ;;  %v942_v52 = vld [vmem:[%s1105_s26 + $0x30] sm:$0xff]   ;;  %v943_v53 = vld [vmem:[%s1105_s26 + $0x38] sm:$0xff]  }
  0x18   : > { %v286_v14 = vmul.f32 %v795_v4, %v1110_v0  ;;  %v287_v15 = vmul.f32 %v796_v5, %v1110_v0  ;;  %v288_v16 = vmul.f32 %v799_v6, %v1110_v0  ;;  %v289_v17 = vmul.f32 %v800_v7, %v1110_v0 }
  0x19   : > { %v290_v18 = vmul.f32 %v803_v10, %v1110_v0  ;;  %v291_v19 = vmul.f32 %v804_v11, %v1110_v0  ;;  %v292_v20 = vmul.f32 %v807_v12, %v1110_v0  ;;  %v293_v21 = vmul.f32 %v808_v13, %v1110_v0 }
  0x1a   : > { %v325_v22 = vadd.f32 %v1119_v9, %v286_v14  ;;  %v326_v23 = vadd.f32 %v1119_v9, %v287_v15  ;;  %v327_v24 = vadd.f32 %v1119_v9, %v288_v16  ;;  %v328_v25 = vadd.f32 %v1119_v9, %v289_v17 }
  0x1b   : > { %v329_v26 = vadd.f32 %v1119_v9, %v290_v18  ;;  %v330_v27 = vadd.f32 %v1119_v9, %v291_v19  ;;  %v331_v28 = vadd.f32 %v1119_v9, %v292_v20  ;;  %v332_v29 = vadd.f32 %v1119_v9, %v293_v21  ;;  %v944_v20 = vld [vmem:[%s1105_s26 + $0x40] sm:$0xff]  }
  0x1c   : > { %vm357_vm0 = vcmp.gt.f32.partialorder %v325_v22, 0.0  ;;  %vm358_vm1 = vcmp.gt.f32.partialorder %v326_v23, 0.0  ;;  %v389_v30 = vmul.f32 0.2, %v325_v22  ;;  %v390_v31 = vmul.f32 0.2, %v326_v23 }
  0x1d   : > { %vm359_vm2 = vcmp.gt.f32.partialorder %v327_v24, 0.0  ;;  %vm360_vm3 = vcmp.gt.f32.partialorder %v328_v25, 0.0  ;;  %v391_v32 = vmul.f32 0.2, %v327_v24  ;;  %v392_v33 = vmul.f32 0.2, %v328_v25 }
  0x1e   : > { %v421_v34 = vsel %vm357_vm0, %v325_v22, %v389_v30  ;;  %v422_v35 = vsel %vm358_vm1, %v326_v23, %v390_v31  ;;  %vm361_vm4 = vcmp.gt.f32.partialorder %v329_v26, 0.0  ;;  %vm362_vm5 = vcmp.gt.f32.partialorder %v330_v27, 0.0 }
  0x1f   : > { %v860_v37 = vpack.c.bf16 %v422_v35, %v421_v34  ;;  %v423_v38 = vsel %vm359_vm2, %v327_v24, %v391_v32  ;;  %v424_v39 = vsel %vm360_vm3, %v328_v25, %v392_v33  ;;  %v393_v40 = vmul.f32 0.2, %v329_v26  ;;  %v945_v24 = vld [vmem:[%s1105_s26 + $0x48] sm:$0xff]  }
  0x20   : > { %v865_v42 = vpack.c.bf16 %v424_v39, %v423_v38  ;;  %v394_v43 = vmul.f32 0.2, %v330_v27  ;;  %vm363_vm6 = vcmp.gt.f32.partialorder %v331_v28, 0.0  ;;  %vm364_vm7 = vcmp.gt.f32.partialorder %v332_v29, 0.0 }
  0x21   : > { %861 = vst [vmem:[%s1142_s6] sm:$0xff] %v860_v37   ;;  %v425_v44 = vsel %vm361_vm4, %v329_v26, %v393_v40  ;;  %v395_v45 = vmul.f32 0.2, %v331_v28  ;;  %v396_v46 = vmul.f32 0.2, %v332_v29  ;;  %v811_v47 = vunpack.c.l.bf16 %v940_v36 }
  0x22   : > { %952 = vst [vmem:[%s1142_s6 + $0x8] sm:$0xff] %v865_v42   ;;  %v426_v48 = vsel %vm362_vm5, %v330_v27, %v394_v43  ;;  %v812_v49 = vunpack.c.h.bf16 %v940_v36  ;;  %v815_v50 = vunpack.c.l.bf16 %v941_v41  ;;  %v816_v51 = vunpack.c.h.bf16 %v941_v41  ;;  %v946_v36 = vld [vmem:[%s1105_s26 + $0x50] sm:$0xff]  }
  0x23   : > { %v870_v54 = vpack.c.bf16 %v426_v48, %v425_v44  ;;  %v427_v55 = vsel %vm363_vm6, %v331_v28, %v395_v45  ;;  %v428_v56 = vsel %vm364_vm7, %v332_v29, %v396_v46  ;;  %v294_v57 = vmul.f32 %v811_v47, %v1110_v0 }
  0x24   : > { %v875_v58 = vpack.c.bf16 %v428_v56, %v427_v55  ;;  %v295_v59 = vmul.f32 %v812_v49, %v1110_v0  ;;  %v296_v60 = vmul.f32 %v815_v50, %v1110_v0  ;;  %v297_v61 = vmul.f32 %v816_v51, %v1110_v0  ;;  %v947_v55 = vld [vmem:[%s1105_s26 + $0x58] sm:$0xff]  }
  0x25   : > { %953 = vst [vmem:[%s1142_s6 + $0x10] sm:$0xff] %v870_v54   ;;  %v333_v62 = vadd.f32 %v1119_v9, %v294_v57  ;;  %v819_v63 = vunpack.c.l.bf16 %v942_v52  ;;  %v820_v1 = vunpack.c.h.bf16 %v942_v52  ;;  %v823_v2 = vunpack.c.l.bf16 %v943_v53 }
  0x26   : > { %954 = vst [vmem:[%s1142_s6 + $0x18] sm:$0xff] %v875_v58   ;;  %v334_v3 = vadd.f32 %v1119_v9, %v295_v59  ;;  %v335_v4 = vadd.f32 %v1119_v9, %v296_v60  ;;  %v336_v5 = vadd.f32 %v1119_v9, %v297_v61  ;;  %v824_v6 = vunpack.c.h.bf16 %v943_v53 }
  0x27   : > { %vm365_vm8 = vcmp.gt.f32.partialorder %v333_v62, 0.0  ;;  %v397_v7 = vmul.f32 0.2, %v333_v62  ;;  %v298_v8 = vmul.f32 %v819_v63, %v1110_v0  ;;  %v299_v10 = vmul.f32 %v820_v1, %v1110_v0  ;;  %v948_v1 = vld [vmem:[%s1105_s26 + $0x60] sm:$0xff]  }
  0x28   : > { %vm366_vm9 = vcmp.gt.f32.partialorder %v334_v3, 0.0  ;;  %v398_v11 = vmul.f32 0.2, %v334_v3  ;;  %vm367_vm10 = vcmp.gt.f32.partialorder %v335_v4, 0.0  ;;  %vm368_vm11 = vcmp.gt.f32.partialorder %v336_v5, 0.0 }
  0x29   : > { %v429_v12 = vsel %vm365_vm8, %v333_v62, %v397_v7  ;;  %v399_v13 = vmul.f32 0.2, %v335_v4  ;;  %v400_v14 = vmul.f32 0.2, %v336_v5  ;;  %v337_v15 = vadd.f32 %v1119_v9, %v298_v8 }
  0x2a   : > { %v430_v16 = vsel %vm366_vm9, %v334_v3, %v398_v11  ;;  %v338_v17 = vadd.f32 %v1119_v9, %v299_v10  ;;  %v300_v18 = vmul.f32 %v823_v2, %v1110_v0  ;;  %v301_v19 = vmul.f32 %v824_v6, %v1110_v0  ;;  %v949_v6 = vld [vmem:[%s1105_s26 + $0x68] sm:$0xff]  }
  0x2b   : > { %v880_v21 = vpack.c.bf16 %v430_v16, %v429_v12  ;;  %v431_v22 = vsel %vm367_vm10, %v335_v4, %v399_v13  ;;  %v432_v23 = vsel %vm368_vm11, %v336_v5, %v400_v14  ;;  %vm369_vm12 = vcmp.gt.f32.partialorder %v337_v15, 0.0 }
  0x2c   : > { %v885_v25 = vpack.c.bf16 %v432_v23, %v431_v22  ;;  %vm370_vm13 = vcmp.gt.f32.partialorder %v338_v17, 0.0  ;;  %v401_v26 = vmul.f32 0.2, %v337_v15  ;;  %v402_v27 = vmul.f32 0.2, %v338_v17  ;;  %v950_v22 = vld [vmem:[%s1105_s26 + $0x70] sm:$0xff]  }
  0x2d   : > { %955 = vst [vmem:[%s1142_s6 + $0x20] sm:$0xff] %v880_v21   ;;  %v339_v28 = vadd.f32 %v1119_v9, %v300_v18  ;;  %v340_v29 = vadd.f32 %v1119_v9, %v301_v19  ;;  %v827_v30 = vunpack.c.l.bf16 %v944_v20  ;;  %v828_v31 = vunpack.c.h.bf16 %v944_v20 }
  0x2e   : > { %956 = vst [vmem:[%s1142_s6 + $0x28] sm:$0xff] %v885_v25   ;;  %v433_v32 = vsel %vm369_vm12, %v337_v15, %v401_v26  ;;  %v434_v33 = vsel %vm370_vm13, %v338_v17, %v402_v27  ;;  %v831_v34 = vunpack.c.l.bf16 %v945_v24  ;;  %v832_v35 = vunpack.c.h.bf16 %v945_v24 }
  0x2f   : > { %v890_v37 = vpack.c.bf16 %v434_v33, %v433_v32  ;;  %vm371_vm14 = vcmp.gt.f32.partialorder %v339_v28, 0.0  ;;  %vm372_vm15 = vcmp.gt.f32.partialorder %v340_v29, 0.0  ;;  %v403_v38 = vmul.f32 0.2, %v339_v28 }
  0x30   : > { %v404_v39 = vmul.f32 0.2, %v340_v29  ;;  %v302_v40 = vmul.f32 %v827_v30, %v1110_v0  ;;  %v303_v41 = vmul.f32 %v828_v31, %v1110_v0  ;;  %v304_v42 = vmul.f32 %v831_v34, %v1110_v0 }
  0x31   : > { %957 = vst [vmem:[%s1142_s6 + $0x30] sm:$0xff] %v890_v37   ;;  %v435_v43 = vsel %vm371_vm14, %v339_v28, %v403_v38  ;;  %v305_v44 = vmul.f32 %v832_v35, %v1110_v0  ;;  %v835_v45 = vunpack.c.l.bf16 %v946_v36  ;;  %v836_v46 = vunpack.c.h.bf16 %v946_v36 }
  0x32   : > { %v436_v47 = vsel %vm372_vm15, %v340_v29, %v404_v39  ;;  %v341_v48 = vadd.f32 %v1119_v9, %v302_v40  ;;  %v342_v49 = vadd.f32 %v1119_v9, %v303_v41  ;;  %v343_v50 = vadd.f32 %v1119_v9, %v304_v42  ;;  %v951_v41 = vld [vmem:[%s1105_s26 + $0x78] sm:$0xff]  }
  0x33   : > { %v895_v51 = vpack.c.bf16 %v436_v47, %v435_v43  ;;  %v344_v52 = vadd.f32 %v1119_v9, %v305_v44  ;;  %v306_v53 = vmul.f32 %v835_v45, %v1110_v0  ;;  %v307_v54 = vmul.f32 %v836_v46, %v1110_v0 }
  0x34   : > { %vm373_vm0 = vcmp.gt.f32.partialorder %v341_v48, 0.0  ;;  %vm374_vm1 = vcmp.gt.f32.partialorder %v342_v49, 0.0  ;;  %v405_v56 = vmul.f32 0.2, %v341_v48  ;;  %v406_v57 = vmul.f32 0.2, %v342_v49 }
  0x35   : > { %958 = vst [vmem:[%s1142_s6 + $0x38] sm:$0xff] %v895_v51   ;;  %vm375_vm2 = vcmp.gt.f32.partialorder %v343_v50, 0.0  ;;  %vm376_vm3 = vcmp.gt.f32.partialorder %v344_v52, 0.0  ;;  %v407_v58 = vmul.f32 0.2, %v343_v50  ;;  %v345_v62 = vadd.f32 %v1119_v9, %v306_v53 }
  0x36   : > { %v408_v59 = vmul.f32 0.2, %v344_v52  ;;  %v437_v60 = vsel %vm373_vm0, %v341_v48, %v405_v56  ;;  %v438_v61 = vsel %vm374_vm1, %v342_v49, %v406_v57  ;;  %v346_v63 = vadd.f32 %v1119_v9, %v307_v54 }
  0x37   : > { %v900_v2 = vpack.c.bf16 %v438_v61, %v437_v60  ;;  %v439_v3 = vsel %vm375_vm2, %v343_v50, %v407_v58  ;;  %v839_v5 = vunpack.c.l.bf16 %v947_v55  ;;  %vm377_vm4 = vcmp.gt.f32.partialorder %v345_v62, 0.0 }
  0x38   : > { %v440_v4 = vsel %vm376_vm3, %v344_v52, %v408_v59  ;;  %vm378_vm5 = vcmp.gt.f32.partialorder %v346_v63, 0.0  ;;  %v409_v8 = vmul.f32 0.2, %v345_v62  ;;  %v410_v10 = vmul.f32 0.2, %v346_v63 }
  0x39   : > { %v905_v7 = vpack.c.bf16 %v440_v4, %v439_v3  ;;  %959 = vst [vmem:[%s1142_s6 + $0x40] sm:$0xff] %v900_v2   ;;  %v840_v11 = vunpack.c.h.bf16 %v947_v55  ;;  %v308_v12 = vmul.f32 %v839_v5, %v1110_v0  ;;  %v843_v13 = vunpack.c.l.bf16 %v948_v1 }
  0x3a   : > { %v441_v14 = vsel %vm377_vm4, %v345_v62, %v409_v8  ;;  %v844_v15 = vunpack.c.h.bf16 %v948_v1  ;;  %v847_v16 = vunpack.c.l.bf16 %v949_v6  ;;  %v848_v17 = vunpack.c.h.bf16 %v949_v6 }
  0x3b   : > { %960 = vst [vmem:[%s1142_s6 + $0x48] sm:$0xff] %v905_v7   ;;  %v442_v18 = vsel %vm378_vm5, %v346_v63, %v410_v10  ;;  %v309_v19 = vmul.f32 %v840_v11, %v1110_v0  ;;  %v347_v20 = vadd.f32 %v1119_v9, %v308_v12  ;;  %v310_v21 = vmul.f32 %v843_v13, %v1110_v0 }
  0x3c   : > { %v910_v23 = vpack.c.bf16 %v442_v18, %v441_v14  ;;  %v311_v24 = vmul.f32 %v844_v15, %v1110_v0  ;;  %v312_v25 = vmul.f32 %v847_v16, %v1110_v0  ;;  %v313_v26 = vmul.f32 %v848_v17, %v1110_v0 }
  0x3d   : > { %v348_v27 = vadd.f32 %v1119_v9, %v309_v19  ;;  %vm379_vm6 = vcmp.gt.f32.partialorder %v347_v20, 0.0  ;;  %v411_v28 = vmul.f32 0.2, %v347_v20  ;;  %v349_v29 = vadd.f32 %v1119_v9, %v310_v21 }
  0x3e   : > { %961 = vst [vmem:[%s1142_s6 + $0x50] sm:$0xff] %v910_v23   ;;  %v350_v30 = vadd.f32 %v1119_v9, %v311_v24  ;;  %v351_v31 = vadd.f32 %v1119_v9, %v312_v25  ;;  %v352_v32 = vadd.f32 %v1119_v9, %v313_v26  ;;  %v851_v33 = vunpack.c.l.bf16 %v950_v22 }
  0x3f   : > { %vm380_vm7 = vcmp.gt.f32.partialorder %v348_v27, 0.0  ;;  %v412_v34 = vmul.f32 0.2, %v348_v27  ;;  %v443_v35 = vsel %vm379_vm6, %v347_v20, %v411_v28  ;;  %vm381_vm8 = vcmp.gt.f32.partialorder %v349_v29, 0.0 }
  0x40   : > { %vm382_vm9 = vcmp.gt.f32.partialorder %v350_v30, 0.0  ;;  %v413_v36 = vmul.f32 0.2, %v349_v29  ;;  %v414_v37 = vmul.f32 0.2, %v350_v30  ;;  %vm383_vm10 = vcmp.gt.f32.partialorder %v351_v31, 0.0 }
  0x41   : > { %v444_v38 = vsel %vm380_vm7, %v348_v27, %v412_v34  ;;  %vm384_vm11 = vcmp.gt.f32.partialorder %v352_v32, 0.0  ;;  %v415_v39 = vmul.f32 0.2, %v351_v31  ;;  %v416_v40 = vmul.f32 0.2, %v352_v32 }
  0x42   : > { %v915_v42 = vpack.c.bf16 %v444_v38, %v443_v35  ;;  %v445_v43 = vsel %vm381_vm8, %v349_v29, %v413_v36  ;;  %v446_v44 = vsel %vm382_vm9, %v350_v30, %v414_v37  ;;  %v852_v45 = vunpack.c.h.bf16 %v950_v22 }
  0x43   : > { %v920_v46 = vpack.c.bf16 %v446_v44, %v445_v43  ;;  %v447_v47 = vsel %vm383_vm10, %v351_v31, %v415_v39  ;;  %v448_v48 = vsel %vm384_vm11, %v352_v32, %v416_v40  ;;  %v314_v49 = vmul.f32 %v851_v33, %v1110_v0 }
  0x44   : > { %962 = vst [vmem:[%s1142_s6 + $0x58] sm:$0xff] %v915_v42   ;;  %v925_v50 = vpack.c.bf16 %v448_v48, %v447_v47  ;;  %v315_v51 = vmul.f32 %v852_v45, %v1110_v0  ;;  %v855_v52 = vunpack.c.l.bf16 %v951_v41  ;;  %v856_v53 = vunpack.c.h.bf16 %v951_v41 }
  0x45   : > { %963 = vst [vmem:[%s1142_s6 + $0x60] sm:$0xff] %v920_v46   ;;  %v353_v54 = vadd.f32 %v1119_v9, %v314_v49 }
  0x46   : > { %964 = vst [vmem:[%s1142_s6 + $0x68] sm:$0xff] %v925_v50   ;;  %v354_v55 = vadd.f32 %v1119_v9, %v315_v51  ;;  %v316_v56 = vmul.f32 %v855_v52, %v1110_v0  ;;  %v317_v57 = vmul.f32 %v856_v53, %v1110_v0 }
  0x47   : > { %vm385_vm12 = vcmp.gt.f32.partialorder %v353_v54, 0.0  ;;  %v417_v58 = vmul.f32 0.2, %v353_v54 }
  0x48   : > { %vm386_vm13 = vcmp.gt.f32.partialorder %v354_v55, 0.0  ;;  %v418_v59 = vmul.f32 0.2, %v354_v55  ;;  %v355_v60 = vadd.f32 %v1119_v9, %v316_v56  ;;  %v356_v61 = vadd.f32 %v1119_v9, %v317_v57 }
  0x49   : > { %v449_v62 = vsel %vm385_vm12, %v353_v54, %v417_v58 }
  0x4a   : > { %v450_v63 = vsel %vm386_vm13, %v354_v55, %v418_v59  ;;  %vm387_vm14 = vcmp.gt.f32.partialorder %v355_v60, 0.0  ;;  %vm388_vm15 = vcmp.gt.f32.partialorder %v356_v61, 0.0  ;;  %v419_v1 = vmul.f32 0.2, %v355_v60 }
  0x4b   : > { %v930_v2 = vpack.c.bf16 %v450_v63, %v449_v62  ;;  %v420_v3 = vmul.f32 0.2, %v356_v61 }
  0x4c   : > { %v451_v4 = vsel %vm387_vm14, %v355_v60, %v419_v1 }
  0x4d   : > { %965 = vst [vmem:[%s1142_s6 + $0x70] sm:$0xff] %v930_v2   ;;  %v452_v5 = vsel %vm388_vm15, %v356_v61, %v420_v3 }
  0x4e   : > { %v935_v0 = vpack.c.bf16 %v452_v5, %v451_v4 }
  0x50   : > { %966 = vst [vmem:[%s1142_s6 + $0x78] sm:$0xff] %v935_v0  }
  0x51 PF: > { %s13_s16 = sadd.s32 1, %s1045_s16   ;;  %s1240_s12 = smov %s1037_s14 }
  0x52   : > { %p10_p7 = scmp.ge.s32.totalorder %s13_s16, 6   ;;  %s1241_s13 = smov %s1041_s15 }
  0x53   : > { %s1242_s14 = smov %s1245_s17  ;;  %s1243_s15 = smov %s1249_s18 }
  0x54   :  { %12 = sbr.rel (!%p10_p7) target bundleno = 3 (0x3), region = 62 }

// kernel: discriminator_forward.11
= control target key start
LH: loop header
LB: loop body
LE: loop exit
PB: predicated region body
PF: predicated region fallthrough
CT: control target
= control target key end

     0   :  { %s1165_s15 = smov 0   ;;  %s1167_s16 = smov 0   ;;  %s1297_s0 = inlined_call_operand.vmem [shape: bf16[2,9,16,128], index: 0, kind: input, shape index: {}]   ;;  %s1298_s1 = inlined_call_operand.vmem [shape: bf16[2,128,128], index: 1, kind: input, shape index: {}]   ;;  %s1299_s2 = inlined_call_operand.vmem [shape: bf16[2,8,16,128], index: 2, kind: output, shape index: {0}]   ;;  %s1300_s3 = inlined_call_operand.vmem [shape: f32[2,2,1,128], index: 3, kind: output, shape index: {1}]   ;;  %s1301_s4 = inlined_call_operand.vmem [shape: f32[2,2,1,128], index: 4, kind: output, shape index: {2}]  }
   0x1   :  { %s1169_s17 = smov 0   ;;  %s1171_s18 = smov 0  }
   0x2   :  { %s1173_s19 = smov 0  }
   0x3 LB: > { %s24_s20 = sadd.s32 1, %s1130_s17  ;;  %s27_s21 = sadd.s32 1, %s1134_s18  ;;  %s1138_s19 = sphi %s1173_s19, %s15_s19   ;;  %s1134_s18 = sphi %s1171_s18, %s1305_s18   ;;  %s1130_s17 = sphi %s1169_s17, %s1304_s17   ;;  %s1126_s16 = sphi %s1167_s16, %s1303_s16   ;;  %s1122_s15 = sphi %s1165_s15, %s1302_s15  }
   0x4   : > { %p25_p0 = scmp.ge.s32.totalorder %s24_s20, 2  ;;  %p850_p1 = scmp.ge.s32.totalorder %s1138_s19, 1 }
   0x5   : > { %p185_p2 = scmp.lt.s32.totalorder %s1138_s19, 5 }
   0x6   : > { %s1307_s20 = smov (%p25_p0, %s24_s20), 0  ;;  %s1309_s21 = smov (!%p25_p0, %s27_s21), %s1134_s18 }
   0x7   : > { %p186_p3 = pnand %p850_p1, %p185_p2  ;;  %p29_p4 = scmp.ge.s32.totalorder %s1309_s21, 2 }
   0x8   : > { %v1076_v0 = vld [vmem:[%s1298_s1 + $0x40] sm:$0xff] (!%p186_p3)   ;;  %p230_p5 = scmp.lt.s32.totalorder (!%p186_p3), %s1126_s16, 1  ;;  %v1078_v2 = vld [vmem:[%s1298_s1 + $0x48] sm:$0xff] (!%p186_p3)   ;;  %v1080_v4 = vld [vmem:[%s1298_s1 + $0x50] sm:$0xff] (!%p186_p3)   ;;  %s922_s23 = sshll.u32 (!%p186_p3), %s1122_s15, 5 }
   0x9   : > { %s1311_s21 = smov (%p29_p4, %s1309_s21), 0  ;;  %189 = sbr.rel (%p186_p3) target bundleno = 289 (0x121), region = 28 }
   0xa   : > { %v1077_v1 = vld [vmem:[%s1298_s1] sm:$0xff] (!%p186_p3)   ;;  %979 = vmatprep.subr.bf16.mxu1 (!%p186_p3), %v1076_v0  ;;  %v1079_v3 = vld [vmem:[%s1298_s1 + $0x8] sm:$0xff] (!%p186_p3)   ;;  %v1081_v5 = vld [vmem:[%s1298_s1 + $0x10] sm:$0xff] (!%p186_p3)   ;;  %p248_p7 = scmp.lt.s32.totalorder (!%p186_p3), %s1122_s15, 1 }
   0xb   : > { %1003 = vmatprep.subr.bf16.mxu0 (!%p186_p3), %v1077_v1  ;;  %980 = vmatpush3.bf16.msra.mxu1 (!%p186_p3), %v1076_v0  ;;  %v1082_v6 = vld [vmem:[%s1298_s1 + $0x58] sm:$0xff] (!%p186_p3)   ;;  %v1084_v8 = vld [vmem:[%s1298_s1 + $0x60] sm:$0xff] (!%p186_p3)   ;;  %v1086_v10 = vld [vmem:[%s1298_s1 + $0x68] sm:$0xff] (!%p186_p3)  }
   0xc   : > { %1004 = vmatpush3.bf16.msra.mxu0 (!%p186_p3), %v1077_v1  ;;  %981 = vmatprep.subr.bf16.mxu1 (!%p186_p3), %v1078_v2  ;;  %v1083_v7 = vld [vmem:[%s1298_s1 + $0x18] sm:$0xff] (!%p186_p3)   ;;  %v1085_v9 = vld [vmem:[%s1298_s1 + $0x20] sm:$0xff] (!%p186_p3)   ;;  %v1087_v11 = vld [vmem:[%s1298_s1 + $0x28] sm:$0xff] (!%p186_p3)  }
   0xd   : > { %1005 = vmatprep.subr.bf16.mxu0 (!%p186_p3), %v1079_v3  ;;  %v1088_v14 = vld [vmem:[%s1298_s1 + $0x70] sm:$0xff] (!%p186_p3)   ;;  %v1090_v16 = vld [vmem:[%s1298_s1 + $0x78] sm:$0xff] (!%p186_p3)  }
   0xe   : > { %v1089_v15 = vld [vmem:[%s1298_s1 + $0x30] sm:$0xff] (!%p186_p3)   ;;  %v1091_v17 = vld [vmem:[%s1298_s1 + $0x38] sm:$0xff] (!%p186_p3)  }
   0xf   : > { %982 = vmatpush3.bf16.msra.mxu1 (!%p186_p3), %v1078_v2 }
  0x10   : > { %s1313_s16 = smov (!%p230_p5, %s1126_s16), 1  ;;  %1006 = vmatpush3.bf16.msra.mxu0 %v1079_v3  ;;  %983 = vmatprep.subr.bf16.mxu1 %v1080_v4 }
  0x11   : > { %s1035_s8 = smul.u32 72, %s1313_s16  ;;  %1007 = vmatprep.subr.bf16.mxu0 %v1081_v5  ;;  %s854_s24 = sshll.u32 %s1313_s16, 4 }
  0x12   : > { %s856_s30 = sshll.u32 %s1313_s16, 1 }
  0x13   : > { %s234_s22 = scalar_lea.vmem %s1297_s0, %s1035_s8  ;;  %984 = vmatpush3.bf16.msra.mxu1 %v1080_v4 }
  0x14   : > { %1008 = vmatpush3.bf16.msra.mxu0 %v1081_v5  ;;  %985 = vmatprep.subr.bf16.mxu1 %v1082_v6  ;;  %s1234_s28 = scalar_lea.vmem %s234_s22, %s922_s23  ;;  %s852_s22 = sshll.u32 %s1122_s15, 2 }
  0x15   : > { %1009 = vmatprep.subr.bf16.mxu0 %v1083_v7  ;;  %v1092_v12 = vld [vmem:[%s1234_s28 + $0x8] sm:$0xff]   ;;  %v1093_v13 = vld [vmem:[%s1234_s28] sm:$0xff]   ;;  %v1094_v18 = vld [vmem:[%s1234_s28 + $0x10] sm:$0xff]   ;;  %p238_p6 = scmp.lt.s32.totalorder %s852_s22, 7  ;;  %s1317_s15 = smov (!%p248_p7, %s1122_s15), 1 }
  0x16   : > { %995 = vmatprep.mubr.bf16.mxu1 %v1092_v12  ;;  %1019 = vmatprep.mubr.bf16.mxu0 %v1093_v13  ;;  %v1095_v19 = vld [vmem:[%s1234_s28 + $0x8] sm:$0xff]   ;;  %v1096_v20 = vld [vmem:[%s1234_s28 + $0x18] sm:$0xff]   ;;  %v1097_v21 = vld [vmem:[%s1234_s28 + $0x10] sm:$0xff]   ;;  %s251_s5 = sadd.s32 %s856_s30, %s1317_s15 }
  0x17   : > { %986 = vmatpush3.bf16.msra.mxu1 %v1082_v6  ;;  %v1098_v22 = vld [vmem:[%s1234_s28 + $0x20] sm:$0xff]   ;;  %v1099_v23 = vld [vmem:[%s1234_s28 + $0x18] sm:$0xff]   ;;  %s1315_s22 = smov (!%p238_p6, %s852_s22), 7  ;;  %s252_s8 = scalar_lea.vmem %s1300_s3, %s251_s5 }
  0x18   : > { %1010 = vmatpush3.bf16.msra.mxu0 %v1083_v7  ;;  %987 = vmatprep.subr.bf16.mxu1 %v1084_v8  ;;  %s853_s23 = sshll.u32 %s1315_s22, 1  ;;  %s259_s11 = scalar_lea.vmem %s1301_s4, %s251_s5 }
  0x19   : > { %1011 = vmatprep.subr.bf16.mxu0 %v1085_v9  ;;  %s242_s25 = sadd.s32 %s854_s24, %s853_s23 }
  0x1a   : > { %s855_s26 = sshll.u32 %s242_s25, 2 }
  0x1b   : > { %988 = vmatpush3.bf16.msra.mxu1 %v1084_v8  ;;  %s1267_s29 = scalar_lea.vmem %s1299_s2, %s855_s26 }
  0x1c   : > { %1012 = vmatpush3.bf16.msra.mxu0 %v1085_v9  ;;  %989 = vmatprep.subr.bf16.mxu1 %v1086_v10 }
  0x1d   : > { %1013 = vmatprep.subr.bf16.mxu0 %v1087_v11 }
  0x1f   : > { %990 = vmatpush3.bf16.msra.mxu1 %v1086_v10 }
  0x20   : > { %1014 = vmatpush3.bf16.msra.mxu0 %v1087_v11  ;;  %991 = vmatprep.subr.bf16.mxu1 %v1088_v14 }
  0x21   : > { %1015 = vmatprep.subr.bf16.mxu0 %v1089_v15 }
  0x23   : > { %992 = vmatpush3.bf16.msra.mxu1 %v1088_v14 }
  0x24   : > { %1016 = vmatpush3.bf16.msra.mxu0 %v1089_v15  ;;  %993 = vmatprep.subr.bf16.mxu1 %v1090_v16 }
  0x25   : > { %1017 = vmatprep.subr.bf16.mxu0 %v1091_v17 }
  0x27   : > { %994 = vmatpush3.bf16.msra.mxu1 %v1090_v16 }
  0x28   : > { %1018 = vmatpush3.bf16.msra.mxu0 %v1091_v17 }
  0x2a   : > { %996 = vmatmul.mubr.bf16.vlgmr.msra.gmra.mrb[0].mxu1 %v1094_v18 }
  0x2b   : > { %1020 = vmatmul.mubr.bf16.vlgmr.msra.gmra.mrb[0].mxu0 %v1095_v19  ;;  %999 = vmatprep.mubr.bf16.mxu1 %v1096_v20 }
  0x2c   : > { %1023 = vmatprep.mubr.bf16.mxu0 %v1097_v21 }
  0x32   : > { %1000 = vmatmul.mubr.bf16.gmra.mrb[4].mxu1 %v1098_v22 }
  0x33   : > { %1024 = vmatmul.mubr.bf16.gmra.mrb[4].mxu0 %v1099_v23 }
  0xfd   : > { %v997_v24 = vpop.f32.mrb[0].mxu1 }
  0xfe   : > { %v1021_v25 = vpop.f32.mrb[0].mxu0  ;;  %v424_v26 = vpop.f32.mrb[1].mxu1 }
  0xff   : > { %v570_v27 = vadd.f32 %v1021_v25, %v997_v24  ;;  %v561_v28 = vpop.f32.mrb[1].mxu0  ;;  %v998_v29 = vpop.f32.mrb[2].mxu1 }
 0x100   : > { %v562_v30 = vadd.f32 %v561_v28, %v424_v26  ;;  %v1022_v31 = vpop.f32.mrb[2].mxu0  ;;  %v427_v32 = vpop.f32.mrb[3].mxu1 }
 0x101   : > { %v573_v33 = vadd.f32 %v1022_v31, %v998_v29  ;;  %v564_v34 = vpop.f32.mrb[3].mxu0  ;;  %v648_v42 = vmul.f32 %v570_v27, %v570_v27 }
 0x102   : > { %v565_v35 = vadd.f32 %v564_v34, %v427_v32  ;;  %v646_v37 = vmul.f32 %v562_v30, %v562_v30 }
 0x103   : > { %v940_v36 = vpack.c.bf16 %v573_v33, %v570_v27  ;;  %v649_v50 = vmul.f32 %v573_v33, %v573_v33 }
 0x104   : > { %v935_v38 = vpack.c.bf16 %v565_v35, %v562_v30  ;;  %v632_v39 = vadd.f32 %v565_v35, %v562_v30  ;;  %v647_v40 = vmul.f32 %v565_v35, %v565_v35 }
 0x105   : > { %952 = vst [vmem:[%s1267_s29 + $0x8] sm:$0xff] %v940_v36   ;;  %v1001_v41 = vpop.f32.mrb[4].mxu1 }
 0x106   : > { %936 = vst [vmem:[%s1267_s29] sm:$0xff] %v935_v38   ;;  %v633_v43 = vadd.f32 %v632_v39, %v570_v27  ;;  %v654_v44 = vadd.f32 %v647_v40, %v646_v37  ;;  %v1025_v45 = vpop.f32.mrb[4].mxu0  ;;  %v440_v46 = vpop.f32.mrb[5].mxu1 }
 0x107   : > { %v586_v47 = vadd.f32 %v1025_v45, %v1001_v41  ;;  %v577_v48 = vpop.f32.mrb[5].mxu0  ;;  %v1002_v49 = vpop.f32.mrb[6].mxu1 }
 0x108   : > { %v655_v51 = vadd.f32 %v654_v44, %v648_v42  ;;  %v578_v52 = vadd.f32 %v577_v48, %v440_v46  ;;  %v634_v53 = vadd.f32 %v633_v43, %v573_v33  ;;  %v1026_v54 = vpop.f32.mrb[6].mxu0  ;;  %v443_v55 = vpop.f32.mrb[7].mxu1 }
 0x109   : > { %v589_v56 = vadd.f32 %v1026_v54, %v1002_v49  ;;  %v580_v57 = vpop.f32.mrb[7].mxu0  ;;  %v652_v3 = vmul.f32 %v586_v47, %v586_v47 }
 0x10a   : > { %v635_v58 = vadd.f32 %v634_v53, %v578_v52  ;;  %v650_v59 = vmul.f32 %v578_v52, %v578_v52  ;;  %v656_v60 = vadd.f32 %v655_v51, %v649_v50  ;;  %v581_v61 = vadd.f32 %v580_v57, %v443_v55 }
 0x10b   : > { %v950_v62 = vpack.c.bf16 %v589_v56, %v586_v47  ;;  %v653_v6 = vmul.f32 %v589_v56, %v589_v56 }
 0x10c   : > { %v657_v63 = vadd.f32 %v656_v60, %v650_v59  ;;  %v945_v0 = vpack.c.bf16 %v581_v61, %v578_v52  ;;  %v636_v1 = vadd.f32 %v635_v58, %v581_v61  ;;  %v651_v2 = vmul.f32 %v581_v61, %v581_v61 }
 0x10d   : > { %954 = vst [vmem:[%s1267_s29 + $0x18] sm:$0xff] %v950_v62  }
 0x10e   : > { %953 = vst [vmem:[%s1267_s29 + $0x10] sm:$0xff] %v945_v0   ;;  %v637_v4 = vadd.f32 %v636_v1, %v586_v47  ;;  %v658_v5 = vadd.f32 %v657_v63, %v651_v2 }
 0x110   : > { %v638_v7 = vadd.f32 %v637_v4, %v589_v56  ;;  %v659_v8 = vadd.f32 %v658_v5, %v652_v3 }
 0x112   : > { %v639_v9 = vrot.slane %v638_v7, 4  ;;  %v660_v10 = vadd.f32 %v659_v8, %v653_v6 }
 0x114   : > { %v640_v11 = vadd.f32 %v639_v9, %v638_v7  ;;  %v661_v12 = vrot.slane %v660_v10, 4 }
 0x116   : > { %v641_v13 = vrot.slane %v640_v11, 2  ;;  %v662_v14 = vadd.f32 %v661_v12, %v660_v10 }
 0x118   : > { %v642_v15 = vadd.f32 %v641_v13, %v640_v11  ;;  %v663_v16 = vrot.slane %v662_v14, 2 }
 0x11a   : > { %v643_v17 = vrot.slane %v642_v15, 1  ;;  %v664_v18 = vadd.f32 %v663_v16, %v662_v14 }
 0x11c   : > { %v644_v19 = vadd.f32 %v643_v17, %v642_v15  ;;  %v665_v20 = vrot.slane %v664_v18, 1 }
 0x11e   : > { %645 = vst [vmem:[%s252_s8] sm:$0x1] %v644_v19  ;;  %v666_v21 = vadd.f32 %v665_v20, %v664_v18 }
 0x120   : > { %667 = vst [vmem:[%s259_s11] sm:$0x1] %v666_v21 }
 0x121 PF: > { %s15_s19 = sadd.s32 1, %s1138_s19   ;;  %s1302_s15 = smov %s1130_s17 }
 0x122   : > { %p12_p8 = scmp.ge.s32.totalorder %s15_s19, 6   ;;  %s1303_s16 = smov %s1134_s18 }
 0x123   : > { %s1304_s17 = smov %s1307_s20  ;;  %s1305_s18 = smov %s1311_s21 }
 0x124   :  { %14 = sbr.rel (!%p12_p8) target bundleno = 3 (0x3), region = 85 }

// kernel: discriminator_forward.12
= control target key start
LH: loop header
LB: loop body
LE: loop exit
PB: predicated region body
PF: predicated region fallthrough
CT: control target
= control target key end

     0   :  { %s599_s12 = smov 0   ;;  %s601_s13 = smov 0   ;;  %s663_s0 = inlined_call_operand.vmem [shape: bf16[2,8,16,128], index: 0, kind: input, shape index: {}]   ;;  %s664_s1 = inlined_call_operand.vmem [shape: f32[1,128], index: 1, kind: input, shape index: {}]   ;;  %s665_s2 = inlined_call_operand.vmem [shape: f32[1,128], index: 2, kind: input, shape index: {}]   ;;  %s666_s3 = inlined_call_operand.vmem [shape: bf16[2,8,16,128], index: 3, kind: output, shape index: {}]  }
   0x1   :  { %s603_s14 = smov 0   ;;  %s605_s15 = smov 0  }
   0x2   :  { %s607_s16 = smov 0  }
   0x3 LB: > { %s22_s17 = sadd.s32 1, %s569_s14  ;;  %s25_s18 = sadd.s32 1, %s573_s15  ;;  %s577_s16 = sphi %s607_s16, %s13_s16   ;;  %s573_s15 = sphi %s605_s15, %s670_s15   ;;  %s569_s14 = sphi %s603_s14, %s669_s14   ;;  %s565_s13 = sphi %s601_s13, %s668_s13   ;;  %s561_s12 = sphi %s599_s12, %s667_s12  }
   0x4   : > { %p23_p0 = scmp.ge.s32.totalorder %s22_s17, 2  ;;  %p428_p1 = scmp.ge.s32.totalorder %s577_s16, 1 }
   0x5   : > { %p159_p2 = scmp.lt.s32.totalorder %s577_s16, 5 }
   0x6   : > { %s672_s17 = smov (%p23_p0, %s22_s17), 0  ;;  %s674_s18 = smov (!%p23_p0, %s25_s18), %s573_s15 }
   0x7   : > { %p160_p3 = pnand %p428_p1, %p159_p2  ;;  %p27_p4 = scmp.ge.s32.totalorder %s674_s18, 2 }
   0x8   : > { %s429_s19 = sshll.u32 (!%p160_p3), %s561_s12, 2  ;;  %p194_p5 = scmp.lt.s32.totalorder (!%p160_p3), %s565_s13, 1  ;;  %v437_v0 = vld [vmem:[%s664_s1] ss:$0 sm:$0xff] (!%p160_p3) }
   0x9   : > { %s676_s18 = smov (%p27_p4, %s674_s18), 0  ;;  %163 = sbr.rel (%p160_p3) target bundleno = 39 (0x27), region = 32 }
   0xa   : > { %p196_p6 = scmp.lt.s32.totalorder (!%p160_p3), %s429_s19, 7  ;;  %v438_v13 = vld [vmem:[%s665_s2] ss:$0 sm:$0xff] (!%p160_p3) }
  0x10   : > { %s678_s13 = smov (!%p194_p5, %s565_s13), 1  ;;  %s680_s19 = smov (!%p196_p6, %s429_s19), 7 }
  0x11   : > { %s431_s20 = sshll.u32 %s678_s13, 4  ;;  %s430_s21 = sshll.u32 %s680_s19, 1 }
  0x12   : > { %s629_s22 = sadd.s32 %s431_s20, %s430_s21 }
  0x13   : > { %s432_s23 = sshll.u32 %s629_s22, 2 }
  0x14   : > { %s202_s26 = scalar_lea.vmem %s663_s0, %s432_s23  ;;  %s213_s6 = scalar_lea.vmem %s666_s3, %s432_s23 }
  0x15   : > { %v458_v1 = vld [vmem:[%s202_s26] sm:$0xff]   ;;  %v493_v2 = vld [vmem:[%s202_s26 + $0x8] sm:$0xff]   ;;  %v494_v3 = vld [vmem:[%s202_s26 + $0x10] sm:$0xff]  }
  0x16   : > { %v459_v4 = vunpack.c.l.bf16 %v458_v1  ;;  %v460_v5 = vunpack.c.h.bf16 %v458_v1  ;;  %v463_v6 = vunpack.c.l.bf16 %v493_v2  ;;  %v464_v7 = vunpack.c.h.bf16 %v493_v2  ;;  %v495_v8 = vld [vmem:[%s202_s26 + $0x18] sm:$0xff]  }
  0x17   : > { %v467_v9 = vunpack.c.l.bf16 %v494_v3  ;;  %v468_v10 = vunpack.c.h.bf16 %v494_v3  ;;  %v471_v11 = vunpack.c.l.bf16 %v495_v8  ;;  %v472_v12 = vunpack.c.h.bf16 %v495_v8 }
  0x18   : > { %v238_v14 = vmul.f32 %v459_v4, %v437_v0  ;;  %v239_v15 = vmul.f32 %v460_v5, %v437_v0  ;;  %v240_v16 = vmul.f32 %v463_v6, %v437_v0  ;;  %v241_v17 = vmul.f32 %v464_v7, %v437_v0 }
  0x19   : > { %v242_v18 = vmul.f32 %v467_v9, %v437_v0  ;;  %v243_v19 = vmul.f32 %v468_v10, %v437_v0  ;;  %v244_v20 = vmul.f32 %v471_v11, %v437_v0  ;;  %v245_v21 = vmul.f32 %v472_v12, %v437_v0 }
  0x1a   : > { %v253_v22 = vadd.f32 %v438_v13, %v238_v14  ;;  %v254_v23 = vadd.f32 %v438_v13, %v239_v15  ;;  %v255_v24 = vadd.f32 %v438_v13, %v240_v16  ;;  %v256_v25 = vadd.f32 %v438_v13, %v241_v17 }
  0x1b   : > { %v257_v26 = vadd.f32 %v438_v13, %v242_v18  ;;  %v258_v27 = vadd.f32 %v438_v13, %v243_v19  ;;  %v259_v28 = vadd.f32 %v438_v13, %v244_v20  ;;  %v260_v29 = vadd.f32 %v438_v13, %v245_v21 }
  0x1c   : > { %vm261_vm0 = vcmp.gt.f32.partialorder %v253_v22, 0.0  ;;  %vm262_vm1 = vcmp.gt.f32.partialorder %v254_v23, 0.0  ;;  %v269_v30 = vmul.f32 0.2, %v253_v22  ;;  %v270_v31 = vmul.f32 0.2, %v254_v23 }
  0x1d   : > { %vm263_vm2 = vcmp.gt.f32.partialorder %v255_v24, 0.0  ;;  %vm264_vm3 = vcmp.gt.f32.partialorder %v256_v25, 0.0  ;;  %v271_v32 = vmul.f32 0.2, %v255_v24  ;;  %v272_v33 = vmul.f32 0.2, %v256_v25 }
  0x1e   : > { %v277_v34 = vsel %vm261_vm0, %v253_v22, %v269_v30  ;;  %v278_v35 = vsel %vm262_vm1, %v254_v23, %v270_v31  ;;  %vm265_vm4 = vcmp.gt.f32.partialorder %v257_v26, 0.0  ;;  %vm266_vm5 = vcmp.gt.f32.partialorder %v258_v27, 0.0 }
  0x1f   : > { %v476_v36 = vpack.c.bf16 %v278_v35, %v277_v34  ;;  %v279_v37 = vsel %vm263_vm2, %v255_v24, %v271_v32  ;;  %v280_v38 = vsel %vm264_vm3, %v256_v25, %v272_v33  ;;  %v273_v39 = vmul.f32 0.2, %v257_v26 }
  0x20   : > { %v481_v40 = vpack.c.bf16 %v280_v38, %v279_v37  ;;  %v274_v41 = vmul.f32 0.2, %v258_v27  ;;  %vm267_vm6 = vcmp.gt.f32.partialorder %v259_v28, 0.0  ;;  %vm268_vm7 = vcmp.gt.f32.partialorder %v260_v29, 0.0 }
  0x21   : > { %477 = vst [vmem:[%s213_s6] sm:$0xff] %v476_v36   ;;  %v281_v42 = vsel %vm265_vm4, %v257_v26, %v273_v39  ;;  %v275_v43 = vmul.f32 0.2, %v259_v28  ;;  %v276_v44 = vmul.f32 0.2, %v260_v29 }
  0x22   : > { %496 = vst [vmem:[%s213_s6 + $0x8] sm:$0xff] %v481_v40   ;;  %v282_v45 = vsel %vm266_vm5, %v258_v27, %v274_v41 }
  0x23   : > { %v486_v46 = vpack.c.bf16 %v282_v45, %v281_v42  ;;  %v283_v47 = vsel %vm267_vm6, %v259_v28, %v275_v43  ;;  %v284_v48 = vsel %vm268_vm7, %v260_v29, %v276_v44 }
  0x24   : > { %v491_v49 = vpack.c.bf16 %v284_v48, %v283_v47 }
  0x25   : > { %497 = vst [vmem:[%s213_s6 + $0x10] sm:$0xff] %v486_v46  }
  0x26   : > { %498 = vst [vmem:[%s213_s6 + $0x18] sm:$0xff] %v491_v49  }
  0x27 PF: > { %s13_s16 = sadd.s32 1, %s577_s16   ;;  %s667_s12 = smov %s569_s14 }
  0x28   : > { %p10_p7 = scmp.ge.s32.totalorder %s13_s16, 6   ;;  %s668_s13 = smov %s573_s15 }
  0x29   : > { %s669_s14 = smov %s672_s17  ;;  %s670_s15 = smov %s676_s18 }
  0x2a   :  { %12 = sbr.rel (!%p10_p7) target bundleno = 3 (0x3), region = 62 }

// kernel: discriminator_forward.13
= control target key start
LH: loop header
LB: loop body
LE: loop exit
PB: predicated region body
PF: predicated region fallthrough
CT: control target
= control target key end

     0   :  { %s2158_s9 = smov 0   ;;  %s2344_s0 = inlined_call_operand.vmem [shape: bf16[2,4096], index: 0, kind: input, shape index: {}]   ;;  %s2345_s1 = inlined_call_operand.vmem [shape: bf16[4096,128], index: 1, kind: input, shape index: {}]   ;;  %s2346_s2 = inlined_call_operand.vmem [shape: f32[2,128], index: 2, kind: output, shape index: {}]  }
   0x1 LB: > { %s2164_s10 = sadd.s32 4294967295, %s2139_s9   ;;  %p1677_p0 = scmp.ge.s32.totalorder %s2139_s9, 1  ;;  %s2139_s9 = sphi %s2158_s9, %s12_s9  }
   0x2   : > { %p118_p1 = scmp.lt.s32.totalorder %s2139_s9, 3 }
   0x4   : > { %p119_p2 = pnand %p1677_p0, %p118_p1 }
   0x5   : > { %s1678_s11 = sshll.u32 (!%p119_p2), %s2164_s10, 4  ;;  %s1679_s12 = sshll.u32 (!%p119_p2), %s2164_s10, 8 }
   0x6   : > { %122 = sbr.rel (%p119_p2) target bundleno = 411 (0x19b), region = 28  ;;  %p140_p3 = scmp.lt.s32.totalorder (!%p119_p2), %s1678_s11, 31 }
   0x7   : > { %p145_p4 = scmp.lt.s32.totalorder (!%p119_p2), %s1679_s12, 511  ;;  %p1681_p5 = scmp.ne.s32.totalorder (!%p119_p2), %s2164_s10, 0 }
   0xd   : > { %s2348_s11 = smov (!%p140_p3, %s1678_s11), 31  ;;  %s2350_s12 = smov (!%p145_p4, %s1679_s12), 511 }
   0xe   : > { %s2173_s15 = scalar_lea.vmem %s2344_s0, %s2348_s11  ;;  %s1680_s16 = sshll.u32 %s2350_s12, 2  ;;  %v2141_v0 = vmov (!%p1681_p5), 0.0  }
   0xf   : > { %s2178_s19 = scalar_lea.vmem %s2345_s1, %s1680_s16  ;;  %154 = sbr.rel (%p1681_p5) target bundleno = 22 (0x16), region = 32  ;;  %155 = vst [vmem:[#allocation2] sm:$0x3] (!%p1681_p5), %v2141_v0 }
  0x16 PF: > { %v1999_v1 = vld [vmem:[%s2178_s19 + $0x40] sm:$0xff]   ;;  %v2003_v5 = vld [vmem:[%s2178_s19 + $0x48] sm:$0xff]   ;;  %v2007_v9 = vld [vmem:[%s2178_s19 + $0x50] sm:$0xff]   ;;  %v421_v29 = vlaneseq  ;;  %v2142_v37 = vmov 1966171168   ;;  %p1810_p6 = scmp.ne.s32.totalorder %s2164_s10, 1 }
  0x17   : > { %v2000_v2 = vld [vmem:[%s2178_s19 + $0xc0] sm:$0xff]   ;;  %1813 = vmatprep.subr.bf16.mxu0 %v1999_v1  ;;  %v2004_v6 = vld [vmem:[%s2178_s19 + $0xc8] sm:$0xff]   ;;  %v2008_v10 = vld [vmem:[%s2178_s19 + $0xd0] sm:$0xff]   ;;  %v419_v38 = vunpack.c.l.s4 %v2142_v37 }
  0x18   : > { %v2001_v3 = vld [vmem:[%s2178_s19] sm:$0xff]   ;;  %1835 = vmatprep.subr.bf16.mxu1 %v2000_v2  ;;  %v2005_v7 = vld [vmem:[%s2178_s19 + $0x8] sm:$0xff]   ;;  %v2009_v11 = vld [vmem:[%s2178_s19 + $0x10] sm:$0xff]   ;;  %v422_v34 = vshrl.u32 %v421_v29, 7 }
  0x19   : > { %v2002_v4 = vld [vmem:[%s2178_s19 + $0x80] sm:$0xff]   ;;  %1814 = vmatpush3.bf16.msra.mxu0 %v2001_v3  ;;  %v2006_v8 = vld [vmem:[%s2178_s19 + $0x88] sm:$0xff]   ;;  %v2010_v12 = vld [vmem:[%s2178_s19 + $0x90] sm:$0xff]   ;;  %v420_v41 = vunpack.c.0.s8 %v419_v38 }
  0x1a   : > { %1836 = vmatpush3.bf16.msra.mxu1 %v2002_v4  ;;  %1815 = vmatprep.subr.bf16.mxu0 %v2003_v5  ;;  %v2011_v13 = vld [vmem:[%s2178_s19 + $0x58] sm:$0xff]   ;;  %v2015_v17 = vld [vmem:[%s2178_s19 + $0x60] sm:$0xff]   ;;  %v2019_v21 = vld [vmem:[%s2178_s19 + $0x68] sm:$0xff]  }
  0x1b   : > { %1837 = vmatprep.subr.bf16.mxu1 %v2004_v6  ;;  %v2012_v14 = vld [vmem:[%s2178_s19 + $0xd8] sm:$0xff]   ;;  %v2016_v18 = vld [vmem:[%s2178_s19 + $0xe0] sm:$0xff]   ;;  %v2020_v22 = vld [vmem:[%s2178_s19 + $0xe8] sm:$0xff]   ;;  %v2217_v42 = vsub.s32 %v420_v41, %v422_v34 }
  0x1c   : > { %v2013_v15 = vld [vmem:[%s2178_s19 + $0x18] sm:$0xff]   ;;  %v2017_v19 = vld [vmem:[%s2178_s19 + $0x20] sm:$0xff]   ;;  %v2021_v23 = vld [vmem:[%s2178_s19 + $0x28] sm:$0xff]  }
  0x1d   : > { %1816 = vmatpush3.bf16.msra.mxu0 %v2005_v7  ;;  %v2014_v16 = vld [vmem:[%s2178_s19 + $0x98] sm:$0xff]   ;;  %v2018_v20 = vld [vmem:[%s2178_s19 + $0xa0] sm:$0xff]   ;;  %v2022_v24 = vld [vmem:[%s2178_s19 + $0xa8] sm:$0xff]  }
  0x1e   : > { %1838 = vmatpush3.bf16.msra.mxu1 %v2006_v8  ;;  %1817 = vmatprep.subr.bf16.mxu0 %v2007_v9  ;;  %v2023_v25 = vld [vmem:[%s2178_s19 + $0x70] sm:$0xff]   ;;  %v2027_v30 = vld [vmem:[%s2178_s19 + $0x78] sm:$0xff]   ;;  %v157_v35 = vld [vmem:[%s2173_s15] sm:$0xff] }
  0x1f   : > { %1839 = vmatprep.subr.bf16.mxu1 %v2008_v10  ;;  %v2024_v26 = vld [vmem:[%s2178_s19 + $0xf0] sm:$0xff]   ;;  %v2028_v31 = vld [vmem:[%s2178_s19 + $0xf8] sm:$0xff]   ;;  %v2032_v36 = vld [vmem:[%s2178_s19 + $0x140] sm:$0xff]   ;;  %v417_v40 = vcombine.high %v157_v35, %v157_v35  ;;  %v424_v43 = vrot.slane %v157_v35, %v2217_v42 }
  0x20   : > { %v2025_v27 = vld [vmem:[%s2178_s19 + $0x30] sm:$0xff]   ;;  %v2029_v32 = vld [vmem:[%s2178_s19 + $0x38] sm:$0xff]   ;;  %v2033_v39 = vld [vmem:[%s2178_s19 + $0x1c0] sm:$0xff]  }
  0x21   : > { %1818 = vmatpush3.bf16.msra.mxu0 %v2009_v11  ;;  %v2026_v28 = vld [vmem:[%s2178_s19 + $0xb0] sm:$0xff]   ;;  %v2030_v33 = vld [vmem:[%s2178_s19 + $0xb8] sm:$0xff]   ;;  %v2221_v44 = vrot.slane %v417_v40, %v2217_v42  ;;  %v432_v45 = vcombine.high %v424_v43, %v424_v43  ;;  %v440_v46 = vrot.slane %v424_v43, %v2217_v42  ;;  %v2034_v49 = vld [vmem:[%s2178_s19 + $0x100] sm:$0xff]  }
  0x22   : > { %1840 = vmatpush3.bf16.msra.mxu1 %v2010_v12  ;;  %1819 = vmatprep.subr.bf16.mxu0 %v2011_v13  ;;  %v2036_v52 = vld [vmem:[%s2178_s19 + $0x148] sm:$0xff]   ;;  %v2035_v54 = vld [vmem:[%s2178_s19 + $0x180] sm:$0xff]   ;;  %v2040_v58 = vld [vmem:[%s2178_s19 + $0x150] sm:$0xff]  }
  0x23   : > { %1841 = vmatprep.subr.bf16.mxu1 %v2012_v14  ;;  %v433_v47 = vcombine.high %v2221_v44, %v2221_v44  ;;  %v454_v48 = vrot.slane %v432_v45, %v2217_v42  ;;  %v462_v51 = vcombine.high %v440_v46, %v440_v46  ;;  %v2037_v55 = vld [vmem:[%s2178_s19 + $0x1c8] sm:$0xff]   ;;  %v2041_v60 = vld [vmem:[%s2178_s19 + $0x1d0] sm:$0xff]   ;;  %v2044_v62 = vld [vmem:[%s2178_s19 + $0x158] sm:$0xff]  }
  0x24   : > { %v2038_v57 = vld [vmem:[%s2178_s19 + $0x108] sm:$0xff]   ;;  %v2042_v61 = vld [vmem:[%s2178_s19 + $0x110] sm:$0xff]   ;;  %v2045_v0 = vld [vmem:[%s2178_s19 + $0x1d8] sm:$0xff]  }
  0x25   : > { %1820 = vmatpush3.bf16.msra.mxu0 %v2013_v15  ;;  %v461_v50 = vrot.slane %v433_v47, %v2217_v42  ;;  %1331 = vmatprep.mubr.bf16.mxu0 %v454_v48  ;;  %v464_v53 = vcombine.high %v454_v48, %v454_v48  ;;  %v2039_v59 = vld [vmem:[%s2178_s19 + $0x188] sm:$0xff]   ;;  %v2043_v63 = vld [vmem:[%s2178_s19 + $0x190] sm:$0xff]   ;;  %v2046_v1 = vld [vmem:[%s2178_s19 + $0x118] sm:$0xff]  }
  0x26   : > { %1842 = vmatpush3.bf16.msra.mxu1 %v2014_v16  ;;  %1821 = vmatprep.subr.bf16.mxu0 %v2015_v17  ;;  %v2048_v2 = vld [vmem:[%s2178_s19 + $0x160] sm:$0xff]   ;;  %v2047_v3 = vld [vmem:[%s2178_s19 + $0x198] sm:$0xff]   ;;  %v2052_v6 = vld [vmem:[%s2178_s19 + $0x168] sm:$0xff]  }
  0x27   : > { %1843 = vmatprep.subr.bf16.mxu1 %v2016_v18  ;;  %v465_v56 = vcombine.high %v461_v50, %v461_v50  ;;  %1371 = vmatprep.mubr.bf16.mxu1 %v464_v53  ;;  %v2049_v4 = vld [vmem:[%s2178_s19 + $0x1e0] sm:$0xff]   ;;  %v2053_v8 = vld [vmem:[%s2178_s19 + $0x1e8] sm:$0xff]   ;;  %v2056_v10 = vld [vmem:[%s2178_s19 + $0x170] sm:$0xff]   ;;  %v447_v18 = vrot.slane %v2221_v44, %v2217_v42 }
  0x28   : > { %v2050_v5 = vld [vmem:[%s2178_s19 + $0x120] sm:$0xff]   ;;  %v2054_v9 = vld [vmem:[%s2178_s19 + $0x128] sm:$0xff]   ;;  %v2057_v12 = vld [vmem:[%s2178_s19 + $0x1f0] sm:$0xff]  }
  0x29   : > { %1822 = vmatpush3.bf16.msra.mxu0 %v2017_v19  ;;  %v2051_v7 = vld [vmem:[%s2178_s19 + $0x1a0] sm:$0xff]   ;;  %v2055_v11 = vld [vmem:[%s2178_s19 + $0x1a8] sm:$0xff]   ;;  %v2058_v13 = vld [vmem:[%s2178_s19 + $0x130] sm:$0xff]  }
  0x2a   : > { %1844 = vmatpush3.bf16.msra.mxu1 %v2018_v20  ;;  %1823 = vmatprep.subr.bf16.mxu0 %v2019_v21  ;;  %v2060_v14 = vld [vmem:[%s2178_s19 + $0x178] sm:$0xff]   ;;  %v2059_v15 = vld [vmem:[%s2178_s19 + $0x1b0] sm:$0xff]   ;;  %v2064_v19 = vld [vmem:[%s2178_s19 + $0x240] sm:$0xff]  }
  0x2b   : > { %1845 = vmatprep.subr.bf16.mxu1 %v2020_v22  ;;  %v2061_v16 = vld [vmem:[%s2178_s19 + $0x1f8] sm:$0xff]   ;;  %v2065_v21 = vld [vmem:[%s2178_s19 + $0x2c0] sm:$0xff]   ;;  %v2075_v34 = vld [vmem:[%s2178_s19 + $0x290] sm:$0xff]  }
  0x2c   : > { %v2062_v17 = vld [vmem:[%s2178_s19 + $0x138] sm:$0xff]   ;;  %v2066_v22 = vld [vmem:[%s2178_s19 + $0x200] sm:$0xff]   ;;  %v2084_v41 = vld [vmem:[%s2178_s19 + $0x268] sm:$0xff]  }
  0x2d   : > { %1824 = vmatpush3.bf16.msra.mxu0 %v2021_v23  ;;  %v2063_v20 = vld [vmem:[%s2178_s19 + $0x1b8] sm:$0xff]   ;;  %v463_v23 = vcombine.high %v447_v18, %v447_v18  ;;  %v2080_v37 = vld [vmem:[%s2178_s19 + $0x260] sm:$0xff]   ;;  %v2085_v44 = vld [vmem:[%s2178_s19 + $0x2e8] sm:$0xff]  }
  0x2e   : > { %1846 = vmatpush3.bf16.msra.mxu1 %v2022_v24  ;;  %1825 = vmatprep.subr.bf16.mxu0 %v2023_v25  ;;  %v2068_v24 = vld [vmem:[%s2178_s19 + $0x248] sm:$0xff]   ;;  %v2067_v25 = vld [vmem:[%s2178_s19 + $0x280] sm:$0xff]   ;;  %v2077_v35 = vld [vmem:[%s2178_s19 + $0x2d8] sm:$0xff]  }
  0x2f   : > { %1847 = vmatprep.subr.bf16.mxu1 %v2024_v26  ;;  %v2069_v26 = vld [vmem:[%s2178_s19 + $0x2c8] sm:$0xff]   ;;  %v2079_v38 = vld [vmem:[%s2178_s19 + $0x298] sm:$0xff]   ;;  %v2082_v40 = vld [vmem:[%s2178_s19 + $0x220] sm:$0xff]  }
  0x30   : > { %v2083_v43 = vld [vmem:[%s2178_s19 + $0x2a0] sm:$0xff]   ;;  %v2086_v45 = vld [vmem:[%s2178_s19 + $0x228] sm:$0xff]  }
  0x31   : > { %1826 = vmatpush3.bf16.msra.mxu0 %v2025_v27  ;;  %v2070_v27 = vld [vmem:[%s2178_s19 + $0x208] sm:$0xff]  }
  0x32   : > { %1848 = vmatpush3.bf16.msra.mxu1 %v2026_v28  ;;  %1827 = vmatprep.subr.bf16.mxu0 %v2027_v30  ;;  %v2072_v28 = vld [vmem:[%s2178_s19 + $0x250] sm:$0xff]   ;;  %v2071_v30 = vld [vmem:[%s2178_s19 + $0x288] sm:$0xff]  }
  0x33   : > { %1849 = vmatprep.subr.bf16.mxu1 %v2028_v31  ;;  %v2073_v31 = vld [vmem:[%s2178_s19 + $0x2d0] sm:$0xff]   ;;  %v158_v47 = vld [vmem:[%s2173_s15 + $0x8] sm:$0xff] }
  0x34   : > { %v2087_v48 = vld [vmem:[%s2178_s19 + $0x2a8] sm:$0xff]  }
  0x35   : > { %1828 = vmatpush3.bf16.msra.mxu0 %v2029_v32  ;;  %v2074_v32 = vld [vmem:[%s2178_s19 + $0x210] sm:$0xff]  }
  0x36   : > { %1850 = vmatpush3.bf16.msra.mxu1 %v2030_v33  ;;  %1857 = vmatprep.subr.bf16.mxu0 %v2032_v36  ;;  %v2076_v33 = vld [vmem:[%s2178_s19 + $0x258] sm:$0xff]  }
  0x37   : > { %1879 = vmatprep.subr.bf16.mxu1 %v2033_v39  ;;  %v2078_v36 = vld [vmem:[%s2178_s19 + $0x218] sm:$0xff]   ;;  %v2081_v39 = vld [vmem:[%s2178_s19 + $0x2e0] sm:$0xff]  }
  0x38   : > { %1332 = vmatmul.mubr.bf16.vlgmr.msra.gmra.mrb[0].mxu0 %v440_v46  ;;  %v2088_v46 = vld [vmem:[%s2178_s19 + $0x270] sm:$0xff]  }
  0x39   : > { %1858 = vmatpush3.bf16.msra.mxu0 %v2034_v49  ;;  %1372 = vmatmul.mubr.bf16.vlgmr.msra.gmra.mrb[0].mxu1 %v462_v51  ;;  %v473_v49 = vrot.slane %v158_v47, %v2217_v42  ;;  %v2089_v51 = vld [vmem:[%s2178_s19 + $0x2f0] sm:$0xff]  }
  0x3a   : > { %1859 = vmatprep.subr.bf16.mxu0 %v2036_v52  ;;  %1880 = vmatpush3.bf16.msra.mxu1 %v2035_v54  ;;  %v2090_v52 = vld [vmem:[%s2178_s19 + $0x230] sm:$0xff]  }
  0x3b   : > { %1411 = vmatprep.mubr.bf16.mxu0 %v461_v50  ;;  %1881 = vmatprep.subr.bf16.mxu1 %v2037_v55  ;;  %v466_v50 = vcombine.high %v158_v47, %v158_v47  ;;  %v481_v53 = vcombine.high %v473_v49, %v473_v49  ;;  %v2092_v55 = vld [vmem:[%s2178_s19 + $0x278] sm:$0xff]  }
  0x3c   : > { %1451 = vmatprep.mubr.bf16.mxu1 %v465_v56  ;;  %v2091_v56 = vld [vmem:[%s2178_s19 + $0x2b0] sm:$0xff]  }
  0x3d   : > { %1860 = vmatpush3.bf16.msra.mxu0 %v2038_v57  ;;  %v2290_v54 = vrot.slane %v466_v50, %v2217_v42  ;;  %v503_v57 = vrot.slane %v481_v53, %v2217_v42 }
  0x3e   : > { %1861 = vmatprep.subr.bf16.mxu0 %v2040_v58  ;;  %1882 = vmatpush3.bf16.msra.mxu1 %v2039_v59  ;;  %v2093_v59 = vld [vmem:[%s2178_s19 + $0x2f8] sm:$0xff]  }
  0x3f   : > { %1883 = vmatprep.subr.bf16.mxu1 %v2041_v60  ;;  %v482_v58 = vcombine.high %v2290_v54, %v2290_v54  ;;  %v2094_v60 = vld [vmem:[%s2178_s19 + $0x238] sm:$0xff]  }
  0x41   : > { %1862 = vmatpush3.bf16.msra.mxu0 %v2042_v61  ;;  %v513_v61 = vcombine.high %v503_v57, %v503_v57 }
  0x42   : > { %1863 = vmatprep.subr.bf16.mxu0 %v2044_v62  ;;  %1884 = vmatpush3.bf16.msra.mxu1 %v2043_v63  ;;  %v489_v62 = vrot.slane %v473_v49, %v2217_v42  ;;  %v2096_v63 = vld [vmem:[%s2178_s19 + $0x340] sm:$0xff]  }
  0x43   : > { %1885 = vmatprep.subr.bf16.mxu1 %v2045_v0  ;;  %v2095_v0 = vld [vmem:[%s2178_s19 + $0x2b8] sm:$0xff]  }
  0x45   : > { %1864 = vmatpush3.bf16.msra.mxu0 %v2046_v1  ;;  %v510_v1 = vrot.slane %v482_v58, %v2217_v42 }
  0x46   : > { %1865 = vmatprep.subr.bf16.mxu0 %v2048_v2  ;;  %1886 = vmatpush3.bf16.msra.mxu1 %v2047_v3  ;;  %v2097_v2 = vld [vmem:[%s2178_s19 + $0x3c0] sm:$0xff]  }
  0x47   : > { %1887 = vmatprep.subr.bf16.mxu1 %v2049_v4  ;;  %v2098_v3 = vld [vmem:[%s2178_s19 + $0x300] sm:$0xff]   ;;  %v511_v4 = vcombine.high %v489_v62, %v489_v62 }
  0x49   : > { %1866 = vmatpush3.bf16.msra.mxu0 %v2050_v5  ;;  %v2100_v5 = vld [vmem:[%s2178_s19 + $0x348] sm:$0xff]  }
  0x4a   : > { %1867 = vmatprep.subr.bf16.mxu0 %v2052_v6  ;;  %1888 = vmatpush3.bf16.msra.mxu1 %v2051_v7  ;;  %v2099_v6 = vld [vmem:[%s2178_s19 + $0x380] sm:$0xff]   ;;  %v514_v7 = vcombine.high %v510_v1, %v510_v1 }
  0x4b   : > { %1889 = vmatprep.subr.bf16.mxu1 %v2053_v8  ;;  %v2101_v8 = vld [vmem:[%s2178_s19 + $0x3c8] sm:$0xff]  }
  0x4d   : > { %1868 = vmatpush3.bf16.msra.mxu0 %v2054_v9  ;;  %v2102_v9 = vld [vmem:[%s2178_s19 + $0x308] sm:$0xff]  }
  0x4e   : > { %1869 = vmatprep.subr.bf16.mxu0 %v2056_v10  ;;  %1890 = vmatpush3.bf16.msra.mxu1 %v2055_v11  ;;  %v2104_v10 = vld [vmem:[%s2178_s19 + $0x350] sm:$0xff]   ;;  %v2103_v11 = vld [vmem:[%s2178_s19 + $0x388] sm:$0xff]  }
  0x4f   : > { %1891 = vmatprep.subr.bf16.mxu1 %v2057_v12  ;;  %v2105_v12 = vld [vmem:[%s2178_s19 + $0x3d0] sm:$0xff]  }
  0x51   : > { %1870 = vmatpush3.bf16.msra.mxu0 %v2058_v13  ;;  %v2106_v13 = vld [vmem:[%s2178_s19 + $0x310] sm:$0xff]  }
  0x52   : > { %1871 = vmatprep.subr.bf16.mxu0 %v2060_v14  ;;  %1892 = vmatpush3.bf16.msra.mxu1 %v2059_v15  ;;  %v2108_v14 = vld [vmem:[%s2178_s19 + $0x358] sm:$0xff]   ;;  %v2107_v15 = vld [vmem:[%s2178_s19 + $0x390] sm:$0xff]  }
  0x53   : > { %1893 = vmatprep.subr.bf16.mxu1 %v2061_v16  ;;  %v2109_v16 = vld [vmem:[%s2178_s19 + $0x3d8] sm:$0xff]  }
  0x55   : > { %1872 = vmatpush3.bf16.msra.mxu0 %v2062_v17  ;;  %v2110_v17 = vld [vmem:[%s2178_s19 + $0x318] sm:$0xff]  }
  0x56   : > { %1901 = vmatprep.subr.bf16.mxu0 %v2064_v19  ;;  %1894 = vmatpush3.bf16.msra.mxu1 %v2063_v20  ;;  %v2111_v19 = vld [vmem:[%s2178_s19 + $0x398] sm:$0xff]   ;;  %v2113_v20 = vld [vmem:[%s2178_s19 + $0x3e0] sm:$0xff]  }
  0x57   : > { %1923 = vmatprep.subr.bf16.mxu1 %v2065_v21  ;;  %v2114_v21 = vld [vmem:[%s2178_s19 + $0x320] sm:$0xff]  }
  0x58   : > { %1412 = vmatmul.mubr.bf16.vlgmr.msra.gmra.mrb[4].mxu0 %v447_v18  ;;  %v2112_v18 = vld [vmem:[%s2178_s19 + $0x360] sm:$0xff]  }
  0x59   : > { %1902 = vmatpush3.bf16.msra.mxu0 %v2066_v22  ;;  %1452 = vmatmul.mubr.bf16.vlgmr.msra.gmra.mrb[4].mxu1 %v463_v23  ;;  %v2116_v22 = vld [vmem:[%s2178_s19 + $0x368] sm:$0xff]   ;;  %v2115_v23 = vld [vmem:[%s2178_s19 + $0x3a0] sm:$0xff]  }
  0x5a   : > { %1903 = vmatprep.subr.bf16.mxu0 %v2068_v24  ;;  %1924 = vmatpush3.bf16.msra.mxu1 %v2067_v25  ;;  %v2117_v24 = vld [vmem:[%s2178_s19 + $0x3e8] sm:$0xff]  }
  0x5b   : > { %1925 = vmatprep.subr.bf16.mxu1 %v2069_v26  ;;  %1491 = vmatprep.mubr.bf16.mxu0 %v503_v57  ;;  %v2118_v25 = vld [vmem:[%s2178_s19 + $0x328] sm:$0xff]   ;;  %v2120_v26 = vld [vmem:[%s2178_s19 + $0x370] sm:$0xff]  }
  0x5c   : > { %1531 = vmatprep.mubr.bf16.mxu1 %v513_v61 }
  0x5d   : > { %1904 = vmatpush3.bf16.msra.mxu0 %v2070_v27  ;;  %v2119_v27 = vld [vmem:[%s2178_s19 + $0x3a8] sm:$0xff]  }
  0x5e   : > { %1905 = vmatprep.subr.bf16.mxu0 %v2072_v28  ;;  %1926 = vmatpush3.bf16.msra.mxu1 %v2071_v30  ;;  %v2121_v28 = vld [vmem:[%s2178_s19 + $0x3f0] sm:$0xff]  }
  0x5f   : > { %1927 = vmatprep.subr.bf16.mxu1 %v2073_v31  ;;  %v2122_v30 = vld [vmem:[%s2178_s19 + $0x330] sm:$0xff]   ;;  %v2124_v31 = vld [vmem:[%s2178_s19 + $0x378] sm:$0xff]  }
  0x61   : > { %1906 = vmatpush3.bf16.msra.mxu0 %v2074_v32  ;;  %v2123_v32 = vld [vmem:[%s2178_s19 + $0x3b0] sm:$0xff]  }
  0x62   : > { %1907 = vmatprep.subr.bf16.mxu0 %v2076_v33  ;;  %1928 = vmatpush3.bf16.msra.mxu1 %v2075_v34  ;;  %v2125_v33 = vld [vmem:[%s2178_s19 + $0x3f8] sm:$0xff]  }
  0x63   : > { %1929 = vmatprep.subr.bf16.mxu1 %v2077_v35  ;;  %v2126_v34 = vld [vmem:[%s2178_s19 + $0x338] sm:$0xff]   ;;  %v496_v35 = vrot.slane %v2290_v54, %v2217_v42 }
  0x65   : > { %1908 = vmatpush3.bf16.msra.mxu0 %v2078_v36  ;;  %v2127_v36 = vld [vmem:[%s2178_s19 + $0x3b8] sm:$0xff]  }
  0x66   : > { %1909 = vmatprep.subr.bf16.mxu0 %v2080_v37  ;;  %1930 = vmatpush3.bf16.msra.mxu1 %v2079_v38  ;;  %v512_v37 = vcombine.high %v496_v35, %v496_v35 }
  0x67   : > { %1931 = vmatprep.subr.bf16.mxu1 %v2081_v39 }
  0x69   : > { %1910 = vmatpush3.bf16.msra.mxu0 %v2082_v40 }
  0x6a   : > { %1911 = vmatprep.subr.bf16.mxu0 %v2084_v41  ;;  %1932 = vmatpush3.bf16.msra.mxu1 %v2083_v43 }
  0x6b   : > { %1933 = vmatprep.subr.bf16.mxu1 %v2085_v44 }
  0x6d   : > { %1912 = vmatpush3.bf16.msra.mxu0 %v2086_v45 }
  0x6e   : > { %1913 = vmatprep.subr.bf16.mxu0 %v2088_v46  ;;  %1934 = vmatpush3.bf16.msra.mxu1 %v2087_v48 }
  0x6f   : > { %1935 = vmatprep.subr.bf16.mxu1 %v2089_v51 }
  0x71   : > { %1914 = vmatpush3.bf16.msra.mxu0 %v2090_v52 }
  0x72   : > { %1915 = vmatprep.subr.bf16.mxu0 %v2092_v55  ;;  %1936 = vmatpush3.bf16.msra.mxu1 %v2091_v56 }
  0x73   : > { %1937 = vmatprep.subr.bf16.mxu1 %v2093_v59 }
  0x75   : > { %1916 = vmatpush3.bf16.msra.mxu0 %v2094_v60 }
  0x76   : > { %1945 = vmatprep.subr.bf16.mxu0 %v2096_v63  ;;  %1938 = vmatpush3.bf16.msra.mxu1 %v2095_v0 }
  0x77   : > { %1967 = vmatprep.subr.bf16.mxu1 %v2097_v2 }
  0x78   : > { %1492 = vmatmul.mubr.bf16.vlgmr.msra.gmra.mrb[8].mxu0 %v489_v62 }
  0x79   : > { %1946 = vmatpush3.bf16.msra.mxu0 %v2098_v3  ;;  %1571 = vmatprep.mubr.bf16.mxu0 %v510_v1 }
  0x7a   : > { %1532 = vmatmul.mubr.bf16.vlgmr.msra.gmra.mrb[8].mxu1 %v511_v4  ;;  %1947 = vmatprep.subr.bf16.mxu0 %v2100_v5 }
  0x7b   : > { %1968 = vmatpush3.bf16.msra.mxu1 %v2099_v6  ;;  %1611 = vmatprep.mubr.bf16.mxu1 %v514_v7 }
  0x7c   : > { %1969 = vmatprep.subr.bf16.mxu1 %v2101_v8 }
  0x7d   : > { %1948 = vmatpush3.bf16.msra.mxu0 %v2102_v9 }
  0x7e   : > { %1949 = vmatprep.subr.bf16.mxu0 %v2104_v10 }
  0x7f   : > { %1970 = vmatpush3.bf16.msra.mxu1 %v2103_v11 }
  0x80   : > { %1971 = vmatprep.subr.bf16.mxu1 %v2105_v12 }
  0x81   : > { %1950 = vmatpush3.bf16.msra.mxu0 %v2106_v13 }
  0x82   : > { %1951 = vmatprep.subr.bf16.mxu0 %v2108_v14 }
  0x83   : > { %1972 = vmatpush3.bf16.msra.mxu1 %v2107_v15 }
  0x84   : > { %1973 = vmatprep.subr.bf16.mxu1 %v2109_v16 }
  0x85   : > { %1952 = vmatpush3.bf16.msra.mxu0 %v2110_v17 }
  0x86   : > { %1953 = vmatprep.subr.bf16.mxu0 %v2112_v18 }
  0x87   : > { %1974 = vmatpush3.bf16.msra.mxu1 %v2111_v19  ;;  %v156_v19 = vld [vmem:[#allocation2] sm:$0x3] }
  0x88   : > { %1975 = vmatprep.subr.bf16.mxu1 %v2113_v20 }
  0x89   : > { %1954 = vmatpush3.bf16.msra.mxu0 %v2114_v21 }
  0x8a   : > { %1955 = vmatprep.subr.bf16.mxu0 %v2116_v22 }
  0x8b   : > { %1976 = vmatpush3.bf16.msra.mxu1 %v2115_v23 }
  0x8c   : > { %1977 = vmatprep.subr.bf16.mxu1 %v2117_v24 }
  0x8d   : > { %1956 = vmatpush3.bf16.msra.mxu0 %v2118_v25 }
  0x8e   : > { %1957 = vmatprep.subr.bf16.mxu0 %v2120_v26 }
  0x8f   : > { %1978 = vmatpush3.bf16.msra.mxu1 %v2119_v27 }
  0x90   : > { %1979 = vmatprep.subr.bf16.mxu1 %v2121_v28  ;;  %v1633_v28 = vand.u32 (!%p1810_p6), 127, %v421_v29 }
  0x91   : > { %1958 = vmatpush3.bf16.msra.mxu0 %v2122_v30 }
  0x92   : > { %1959 = vmatprep.subr.bf16.mxu0 %v2124_v31  ;;  %vm1634_vm0 = vcmp.eq.s32.totalorder (!%p1810_p6), %v1633_v28, 0 }
  0x93   : > { %1980 = vmatpush3.bf16.msra.mxu1 %v2123_v32 }
  0x94   : > { %1981 = vmatprep.subr.bf16.mxu1 %v2125_v33 }
  0x95   : > { %1960 = vmatpush3.bf16.msra.mxu0 %v2126_v34 }
  0x97   : > { %1982 = vmatpush3.bf16.msra.mxu1 %v2127_v36 }
  0x98   : > { %1572 = vmatmul.mubr.bf16.vlgmr.msra.gmra.mrb[12].mxu0 %v496_v35 }
  0x9a   : > { %1612 = vmatmul.mubr.bf16.vlgmr.msra.gmra.mrb[12].mxu1 %v512_v37 }
 0x10b   : > { %v1829_v38 = vpop.f32.mrb[0].mxu0 }
 0x10c   : > { %v1830_v39 = vpop.f32.mrb[1].mxu0  ;;  %v1851_v40 = vpop.f32.mrb[0].mxu1 }
 0x10d   : > { %v1831_v41 = vadd.f32 %v1830_v39, %v1829_v38  ;;  %v1832_v43 = vpop.f32.mrb[2].mxu0  ;;  %v1852_v44 = vpop.f32.mrb[1].mxu1 }
 0x10e   : > { %v1833_v45 = vpop.f32.mrb[3].mxu0  ;;  %v1853_v46 = vadd.f32 %v1852_v44, %v1851_v40  ;;  %v1854_v47 = vpop.f32.mrb[2].mxu1 }
 0x10f   : > { %v1855_v48 = vpop.f32.mrb[3].mxu1 }
 0x110   : > { %v1374_v49 = vadd.f32 %v1853_v46, %v1831_v41 }
 0x12b   : > { %v1873_v42 = vpop.f32.mrb[4].mxu0 }
 0x12c   : > { %v1874_v50 = vpop.f32.mrb[5].mxu0  ;;  %v1895_v51 = vpop.f32.mrb[4].mxu1 }
 0x12d   : > { %v1875_v52 = vadd.f32 %v1874_v50, %v1873_v42  ;;  %v1876_v53 = vpop.f32.mrb[6].mxu0  ;;  %v1896_v54 = vpop.f32.mrb[5].mxu1 }
 0x12e   : > { %v1877_v55 = vpop.f32.mrb[7].mxu0  ;;  %v1897_v57 = vadd.f32 %v1896_v54, %v1895_v51  ;;  %v1898_v58 = vpop.f32.mrb[6].mxu1 }
 0x12f   : > { %v1414_v56 = vadd.f32 %v1875_v52, %v1374_v49  ;;  %v1899_v59 = vpop.f32.mrb[7].mxu1 }
 0x131   : > { %v1454_v60 = vadd.f32 %v1897_v57, %v1414_v56 }
 0x14b   : > { %v1917_v61 = vpop.f32.mrb[8].mxu0 }
 0x14c   : > { %v1918_v62 = vpop.f32.mrb[9].mxu0 }
 0x14d   : > { %v1939_v63 = vpop.f32.mrb[8].mxu1  ;;  %v1919_v0 = vadd.f32 %v1918_v62, %v1917_v61  ;;  %v1920_v1 = vpop.f32.mrb[10].mxu0 }
 0x14e   : > { %v1940_v2 = vpop.f32.mrb[9].mxu1  ;;  %v1921_v3 = vpop.f32.mrb[11].mxu0 }
 0x14f   : > { %v1494_v4 = vadd.f32 %v1919_v0, %v1454_v60  ;;  %v1941_v5 = vadd.f32 %v1940_v2, %v1939_v63  ;;  %v1942_v6 = vpop.f32.mrb[10].mxu1 }
 0x150   : > { %v1943_v7 = vpop.f32.mrb[11].mxu1 }
 0x151   : > { %v1534_v8 = vadd.f32 %v1941_v5, %v1494_v4 }
 0x16b   : > { %v1961_v9 = vpop.f32.mrb[12].mxu0 }
 0x16c   : > { %v1962_v10 = vpop.f32.mrb[13].mxu0 }
 0x16d   : > { %v1983_v11 = vpop.f32.mrb[12].mxu1  ;;  %v1963_v12 = vadd.f32 %v1962_v10, %v1961_v9  ;;  %v1964_v13 = vpop.f32.mrb[14].mxu0 }
 0x16e   : > { %v1984_v14 = vpop.f32.mrb[13].mxu1  ;;  %v1965_v15 = vpop.f32.mrb[15].mxu0 }
 0x16f   : > { %v1574_v16 = vadd.f32 %v1963_v12, %v1534_v8  ;;  %v1985_v17 = vadd.f32 %v1984_v14, %v1983_v11  ;;  %v1986_v18 = vpop.f32.mrb[14].mxu1  ;;  %1624 = sbr.rel (%p1810_p6) target bundleno = 411 (0x19b), region = 36 }
 0x170   : > { %v1987_v20 = vpop.f32.mrb[15].mxu1 }
 0x171   : > { %v1614_v21 = vadd.f32 %v1985_v17, %v1574_v16 }
 0x173   : > { %v1619_v22 = vadd.f32 %v1614_v21, %v156_v19 }
 0x175   : > { %1620 = vst [vmem:[#allocation2] sm:$0x3] %v1619_v22 }
 0x17c   : > { %v1625_v23 = vld [vmem:[#allocation2] sm:$0x3] }
 0x17d   : > { %v1626_v24 = vsub.f32 0.0, %v1625_v23 }
 0x17f   : > { %v1627_v25 = vmul.f32 1.442695, %v1626_v24 }
 0x181   : > { %2129 = vpow2.f32 %v1627_v25 }
 0x18b   : > { %v2130_v26 = vpop.eup %2129 }
 0x18c   : > { %v1629_v27 = vadd.f32 1.0, %v2130_v26 }
 0x18e   : > { %2131 = vrcp.f32 %v1629_v27 }
 0x198   : > { %v2132_v30 = vpop.eup %2131 }
 0x199   : > { %v1635_v31 = vsel %vm1634_vm0, %v2132_v30, %v1625_v23 }
 0x19a   : > { %1636 = vst [vmem:[%s2346_s2] sm:$0x3] %v1635_v31 }
 0x19b PF: > { %s12_s9 = sadd.s32 1, %s2139_s9  }
 0x19c   : > { %p9_p7 = scmp.ge.s32.totalorder %s12_s9, 4  }
 0x19e   :  { %11 = sbr.rel (!%p9_p7) target bundleno = 1 (0x1), region = 65 }

</bundles_post_ra>
